<compile_context>
chip_gen: v5e
topology: v5e:2x2
jax: 0.10.0
libtpu: 0.0.40
codegen_flags: <defaults>
</compile_context>

<pallas_src>
import math
import functools

import jax
import jax.numpy as jnp
from jax.experimental import pallas as pl
from jax.experimental.pallas import tpu as pltpu


# ---------------------------------------------------------------------------
# Pallas kernel: one (row block, kk block) step of the attention core
# ---------------------------------------------------------------------------
def _tri_att_kernel(q_ref, k_ref, v_ref, bias_ref, g_ref, o_ref,
                    m_sc, l_sc, acc_sc, *, H, c):
    # q_ref    : (TB, L2, H*c)   bf16   q[b, l, h*c+cc]          (sq_c folded into weights)
    # k_ref    : (TB, TK, H*c)   bf16   klin(z)[kk, b] stored as [b, kk, h*c+cc]
    # v_ref    : (L2, TK, H*c)   bf16   vlin(z)[kk, l] stored as [l, kk, h*c+cc]
    # bias_ref : (H, L2, TK)     bf16   blin(z)[kk, l, h] stored as [h, l, kk]
    # g_ref    : (L2, TB, H*c)   bf16   gate pre-activation, l-major
    # o_ref    : (L2, TB, H*c)   bf16   gated output, l-major (olinear + transpose in XLA)
    # m_sc     : (H, L2, TB)     f32    running row max
    # l_sc     : (H, L2, TB)     f32    running softmax denominator
    # acc_sc   : (H, L2, TB, c)  f32    running softmax numerator (att @ v)
    j = pl.program_id(1)

    @pl.when(j == 0)
    def _init():
        m_sc[...] = jnp.full(m_sc.shape, -jnp.inf, dtype=m_sc.dtype)
        l_sc[...] = jnp.zeros(l_sc.shape, dtype=l_sc.dtype)
        acc_sc[...] = jnp.zeros(acc_sc.shape, dtype=acc_sc.dtype)

    for h in range(H):                                  # static unroll over heads
        sl = slice(h * c, (h + 1) * c)
        qh = q_ref[:, :, sl]                            # (TB, L2, c) bf16
        kh = k_ref[:, :, sl]                            # (TB, TK, c) bf16
        vh = v_ref[:, :, sl]                            # (L2, TK, c) bf16

        # q k^T on the MXU (bf16 in, f32 accumulate), batched over the TB query rows.
        s = jnp.einsum('blc,bkc->blk', qh, kh,
                       preferred_element_type=jnp.float32)        # (TB, L2, TK)
        # Relayout to l-major (the batch dim of the att@V matmul) and add the pair bias.
        s = pltpu.einshape('blk->lbk', s)                         # (L2, TB, TK)
        s = s + bias_ref[h][:, None, :].astype(jnp.float32)

        # Online (flash) softmax over the kk axis.
        m_prev = m_sc[h]                                          # (L2, TB)
        m_new = jnp.maximum(m_prev, jnp.max(s, axis=-1))
        alpha = jnp.exp(m_prev - m_new)                           # (L2, TB)
        p = jnp.exp(s - m_new[:, :, None])                        # (L2, TB, TK)
        l_sc[h] = alpha * l_sc[h] + jnp.sum(p, axis=-1)
        m_sc[h] = m_new

        # att @ V on the MXU (bf16 in, f32 accumulate), batched over l.
        pv = jnp.einsum('lbk,lkc->lbc', p.astype(jnp.bfloat16), vh,
                        preferred_element_type=jnp.float32)       # (L2, TB, c)
        acc_sc[h] = alpha[:, :, None] * acc_sc[h] + pv

    @pl.when(j == pl.num_programs(1) - 1)
    def _finalize():
        gate = jax.nn.sigmoid(g_ref[...].astype(jnp.float32))     # (L2, TB, H*c)
        outs = [acc_sc[h] * pl.reciprocal(l_sc[h], approx=True)[:, :, None]
                for h in range(H)]
        # Single full-width, lane-dense store per row block.
        o_ref[...] = (gate * jnp.concatenate(outs, axis=-1)).astype(o_ref.dtype)


# ---------------------------------------------------------------------------
# Tiling helpers
# ---------------------------------------------------------------------------
def _pick_tb(L1, max_tb):
    """Row (b) block: divides L1 and is a multiple of 8 (second-minor of g/o blocks)."""
    if L1 <= max_tb:
        return L1
    tb = (min(max_tb, L1) // 8) * 8
    while tb >= 8:
        if L1 % tb == 0:
            return tb
        tb -= 8
    return L1


def _pick_tk(L1, max_tk):
    """kk block: divides L1 and is a multiple of 128 (last dim of the bias block)."""
    if L1 <= max_tk:
        return L1
    tk = (max_tk // 128) * 128
    while tk >= 128:
        if L1 % tk == 0:
            return tk
        tk -= 128
    # TODO(synk): mask/pad the ragged tail instead of keeping the kk axis resident.
    return L1


def _vmem_limit_bytes(fraction=0.8, fallback=48 * 1024 * 1024):
    # Leave headroom for compiler scratch instead of requesting all of physical VMEM
    # (v7x has 64 MiB per TensorCore; v5e/v6e have 128 MiB).
    try:
        cap = pltpu.get_tpu_info().vmem_capacity_bytes
        return int(cap * fraction)
    except Exception:
        return fallback


def tri_att_core(qT, kT, vT, biasT, gT, *, N_head, c, block_b=16, block_k=256):
    """qT: (L1, L2, H*c) bf16 [b, l], kT: (L1, L1, H*c) bf16 [b, kk],
    vT: (L2, L1, H*c) bf16 [l, kk], biasT: (H, L2, L1) bf16 [h, l, kk],
    gT: (L2, L1, H*c) bf16 [l, b].  Returns (L2, L1, H*c) bf16, l-major."""
    L1, L2, HC = qT.shape
    H = N_head
    TB = _pick_tb(L1, block_b)
    TK = _pick_tk(L1, block_k)
    assert L1 % TB == 0 and L1 % TK == 0
    kernel = functools.partial(_tri_att_kernel, H=H, c=c)
    return pl.pallas_call(
        kernel,
        out_shape=jax.ShapeDtypeStruct((L2, L1, HC), jnp.bfloat16),
        grid=(L1 // TB, L1 // TK),
        in_specs=[
            pl.BlockSpec((TB, L2, HC), lambda i, j: (i, 0, 0)),    # q    (row block)
            pl.BlockSpec((TB, TK, HC), lambda i, j: (i, j, 0)),    # k    (row x kk block)
            pl.BlockSpec((L2, TK, HC), lambda i, j: (0, j, 0)),    # v    (kk block)
            pl.BlockSpec((H, L2, TK), lambda i, j: (0, 0, j)),     # bias (kk block)
            pl.BlockSpec((L2, TB, HC), lambda i, j: (0, i, 0)),    # g    (row block, l-major)
        ],
        out_specs=pl.BlockSpec((L2, TB, HC), lambda i, j: (0, i, 0)),
        scratch_shapes=[
            pltpu.VMEM((H, L2, TB), jnp.float32),       # running max
            pltpu.VMEM((H, L2, TB), jnp.float32),       # running denominator
            pltpu.VMEM((H, L2, TB, c), jnp.float32),    # running numerator
        ],
        compiler_params=pltpu.CompilerParams(
            dimension_semantics=("parallel", "arbitrary"),
            vmem_limit_bytes=_vmem_limit_bytes()),
    )(qT, kT, vT, biasT, gT)


# ---------------------------------------------------------------------------
# Full module forward (glue in plain JAX, the O(L^3) hot path in Pallas)
# ---------------------------------------------------------------------------
def layer_norm(x, gamma, beta, eps=1e-5):
    mu = jnp.mean(x, axis=-1, keepdims=True)
    var = jnp.mean((x - mu) ** 2, axis=-1, keepdims=True)
    return (x - mu) * jax.lax.rsqrt(var + eps) * gamma + beta


def init_params(key, z_dim, N_head, c):
    ks = jax.random.split(key, 12)
    def lin(kw, kb, din, dout):
        w = jax.random.normal(kw, (din, dout), jnp.float32) * (1.0 / math.sqrt(din))
        b = jax.random.normal(kb, (dout,), jnp.float32) * 0.02
        return w, b
    p = {}
    p['ln_g'] = jnp.ones((z_dim,), jnp.float32)
    p['ln_b'] = jnp.zeros((z_dim,), jnp.float32)
    p['q_w'], p['q_b'] = lin(ks[0], ks[1], z_dim, c * N_head)
    p['k_w'], p['k_b'] = lin(ks[2], ks[3], z_dim, c * N_head)
    p['v_w'], p['v_b'] = lin(ks[4], ks[5], z_dim, c * N_head)
    p['b_w'], p['b_b'] = lin(ks[6], ks[7], z_dim, N_head)
    p['g_w'], p['g_b'] = lin(ks[8], ks[9], z_dim, c * N_head)
    p['o_w'], p['o_b'] = lin(ks[10], ks[11], c * N_head, z_dim)
    return p


def tri_att_end_forward(z_, params, *, N_head, c, block_b=16, block_k=256):
    L1, L2, D = z_.shape
    assert L1 == L2, "einsum 'blhc,kbhc->blkh' requires L1 == L2"
    sq_c = 1.0 / math.sqrt(c)
    H = N_head

    z = layer_norm(z_, params['ln_g'], params['ln_b'])
    zt = jnp.transpose(z, (1, 0, 2))                    # zt[a, b] = z[b, a]

    # Projections, produced directly in kernel-friendly layouts.
    # sq_c is folded into the q projection (one D x H*c scale, outside the O(L^3) path).
    q = z @ (params['q_w'] * sq_c) + params['q_b'] * sq_c   # (L1, L2, HC)  q[b, l]
    v = z @ params['v_w'] + params['v_b']                   # (L1, L2, HC)  v[kk, l]
    k = zt @ params['k_w'] + params['k_b']                  # (L1, L1, HC)  k[b, kk]  = klin(z[kk, b])
    g = zt @ params['g_w'] + params['g_b']                  # (L2, L1, HC)  g[l, b]   = glin(z[b, l])
    bp = zt @ params['b_w'] + params['b_b']                 # (L2, L1, H)   bp[l, kk] = blin(z[kk, l])

    qb = q.astype(jnp.bfloat16)
    kb = k.astype(jnp.bfloat16)
    gb = g.astype(jnp.bfloat16)
    vT = jnp.transpose(v, (1, 0, 2)).astype(jnp.bfloat16)   # (L2, L1, HC): vT[l, kk] = v[kk, l]
    biasT = jnp.transpose(bp, (2, 0, 1)).astype(jnp.bfloat16)  # (H, L2, L1): biasT[h, l, kk]

    o_lb = tri_att_core(qb, kb, vT, biasT, gb, N_head=H, c=c,
                        block_b=block_b, block_k=block_k)   # (L2, L1, HC) bf16, l-major
    out_lb = o_lb.astype(jnp.float32) @ params['o_w'] + params['o_b']   # (L2, L1, D)
    return jnp.transpose(out_lb, (1, 0, 2))                 # (L1, L2, D)


# ---------------------------------------------------------------------------
# Pure-JAX reference (mirrors the PyTorch training-path math exactly, all f32)
# ---------------------------------------------------------------------------
def tri_att_end_reference(z_, params, *, N_head, c):
    L1, L2, D = z_.shape
    sq_c = 1.0 / math.sqrt(c)
    z = layer_norm(z_, params['ln_g'], params['ln_b'])
    q = (z @ params['q_w'] + params['q_b']).reshape(L1, L2, N_head, c)
    k = (z @ params['k_w'] + params['k_b']).reshape(L1, L2, N_head, c)
    v = (z @ params['v_w'] + params['v_b']).reshape(L1, L2, N_head, c)
    b = (z @ params['b_w'] + params['b_b'])
    g = (z @ params['g_w'] + params['g_b']).reshape(L1, L2, N_head, c)

    att = jnp.einsum('blhc,kbhc->blkh', q, k) * sq_c \
        + jnp.transpose(b, (1, 0, 2))[None]          # b[None].permute(0, 2, 1, 3)
    att = jax.nn.softmax(att, axis=2)
    o = jnp.einsum('blkh,klhc->blhc', att, v)
    o = (jax.nn.sigmoid(g) * o).reshape(L1, L2, -1)
    return o @ params['o_w'] + params['o_b']


if __name__ == "__main__":
    key = jax.random.PRNGKey(0)
    k_z1, k_p1, k_z2, k_p2 = jax.random.split(key, 4)

    # --- small primary test: L1 = L2 = 16, z_dim = 32, N_head = 4, c = 16 -----------
    L, D, H, C = 16, 32, 4, 16
    z_in = jax.random.normal(k_z1, (L, L, D), jnp.float32)
    params = init_params(k_p1, D, H, C)

    fwd = jax.jit(functools.partial(tri_att_end_forward, N_head=H, c=C,
                                    block_b=8, block_k=256))
    out = jax.block_until_ready(fwd(z_in, params))
    assert out.shape == (L, L, D)
    ref = tri_att_end_reference(z_in, params, N_head=H, c=C)
    err = jnp.max(jnp.abs(out - ref))
    # bf16 q/k/v/g/bias/output + approx reciprocal => small extra rounding vs f32 ref
    assert jnp.allclose(out, ref, atol=3e-2, rtol=3e-2), f"max abs err {err}"

    # --- second check: exercises the kk-tiled online-softmax path (2 key blocks) ----
    Lb, Db, Hb, Cb = 256, 32, 4, 16
    z_in2 = jax.random.normal(k_z2, (Lb, Lb, Db), jnp.float32)
    params2 = init_params(k_p2, Db, Hb, Cb)
    fwd2 = jax.jit(functools.partial(tri_att_end_forward, N_head=Hb, c=Cb,
                                     block_b=16, block_k=128))
    out2 = jax.block_until_ready(fwd2(z_in2, params2))
    ref2 = tri_att_end_reference(z_in2, params2, N_head=Hb, c=Cb)
    err2 = jnp.max(jnp.abs(out2 - ref2))
    assert jnp.allclose(out2, ref2, atol=3e-2, rtol=3e-2), f"max abs err {err2}"

    print("KERNEL_OK")
</pallas_src>

<mosaic_0001>
module attributes {stable_mosaic.version = 11 : i64} {
  func.func @_tri_att_kernel(%arg0: i32, %arg1: i32, %arg2: memref<8x16x64xbf16, #tpu.memory_space<vmem>>, %arg3: memref<8x16x64xbf16, #tpu.memory_space<vmem>>, %arg4: memref<16x16x64xbf16, #tpu.memory_space<vmem>>, %arg5: memref<4x16x16xbf16, #tpu.memory_space<vmem>>, %arg6: memref<16x8x64xbf16, #tpu.memory_space<vmem>>, %arg7: memref<16x8x64xbf16, #tpu.memory_space<vmem>>, %arg8: memref<4x16x8xf32, #tpu.memory_space<vmem>>, %arg9: memref<4x16x8xf32, #tpu.memory_space<vmem>>, %arg10: memref<4x16x8x16xf32, #tpu.memory_space<vmem>>) attributes {dimension_semantics = [#tpu.dimension_semantics<parallel>, #tpu.dimension_semantics<arbitrary>], iteration_bounds = array<i64: 2, 1>, scalar_prefetch = 0 : i64, scratch_operands = 3 : i64, tpu.core_type = #tpu.core_type<tc>, window_params = [{transform_indices = @transform_0, window_bounds = array<i64: 8, 16, 64>}, {transform_indices = @transform_1, window_bounds = array<i64: 8, 16, 64>}, {transform_indices = @transform_2, window_bounds = array<i64: 16, 16, 64>}, {transform_indices = @transform_3, window_bounds = array<i64: 4, 16, 16>}, {transform_indices = @transform_4, window_bounds = array<i64: 16, 8, 64>}, {transform_indices = @transform_5, window_bounds = array<i64: 16, 8, 64>}]} {
    %c0_i32 = arith.constant 0 : i32
    %0 = arith.cmpi eq, %arg1, %c0_i32 : i32
    %1 = arith.extui %0 : i1 to i32
    %c0_i32_0 = arith.constant 0 : i32
    %2 = arith.cmpi ne, %1, %c0_i32_0 : i32
    scf.if %2 {
      %cst_139 = arith.constant 0xFF800000 : f32
      %178 = vector.broadcast %cst_139 : f32 to vector<4x16x8xf32>
      %c0_140 = arith.constant 0 : index
      %c0_141 = arith.constant 0 : index
      %c0_142 = arith.constant 0 : index
      %179 = vector.load %arg8[%c0_140, %c0_141, %c0_142] : memref<4x16x8xf32, #tpu.memory_space<vmem>>, vector<4x16x8xf32>
      tpu.vector_store %arg8[%c0_140, %c0_141, %c0_142], %178 {strides = array<i32>} : memref<4x16x8xf32, #tpu.memory_space<vmem>>, vector<4x16x8xf32>,
      %cst_143 = arith.constant 0.000000e+00 : f32
      %180 = vector.broadcast %cst_143 : f32 to vector<4x16x8xf32>
      %c0_144 = arith.constant 0 : index
      %c0_145 = arith.constant 0 : index
      %c0_146 = arith.constant 0 : index
      %181 = vector.load %arg9[%c0_144, %c0_145, %c0_146] : memref<4x16x8xf32, #tpu.memory_space<vmem>>, vector<4x16x8xf32>
      tpu.vector_store %arg9[%c0_144, %c0_145, %c0_146], %180 {strides = array<i32>} : memref<4x16x8xf32, #tpu.memory_space<vmem>>, vector<4x16x8xf32>,
      %cst_147 = arith.constant 0.000000e+00 : f32
      %182 = vector.broadcast %cst_147 : f32 to vector<4x16x8x16xf32>
      %c0_148 = arith.constant 0 : index
      %c0_149 = arith.constant 0 : index
      %c0_150 = arith.constant 0 : index
      %c0_151 = arith.constant 0 : index
      %183 = vector.load %arg10[%c0_148, %c0_149, %c0_150, %c0_151] : memref<4x16x8x16xf32, #tpu.memory_space<vmem>>, vector<4x16x8x16xf32>
      tpu.vector_store %arg10[%c0_148, %c0_149, %c0_150, %c0_151], %182 {strides = array<i32>} : memref<4x16x8x16xf32, #tpu.memory_space<vmem>>, vector<4x16x8x16xf32>,
    } else {
    }
    %c0 = arith.constant 0 : index
    %c0_1 = arith.constant 0 : index
    %c0_2 = arith.constant 0 : index
    %3 = vector.load %arg2[%c0, %c0_1, %c0_2] : memref<8x16x64xbf16, #tpu.memory_space<vmem>>, vector<8x16x16xbf16>
    %c0_3 = arith.constant 0 : index
    %c0_4 = arith.constant 0 : index
    %c0_5 = arith.constant 0 : index
    %4 = vector.load %arg3[%c0_3, %c0_4, %c0_5] : memref<8x16x64xbf16, #tpu.memory_space<vmem>>, vector<8x16x16xbf16>
    %c0_6 = arith.constant 0 : index
    %c0_7 = arith.constant 0 : index
    %c0_8 = arith.constant 0 : index
    %5 = vector.load %arg4[%c0_6, %c0_7, %c0_8] : memref<16x16x64xbf16, #tpu.memory_space<vmem>>, vector<16x16x16xbf16>
    "tpu.trace_start"() <{level = 10 : i32, message = "blc,bkc->blk"}> : () -> ()
    %cst = arith.constant dense<0.000000e+00> : vector<8x16x16xf32>
    %6 = tpu.matmul %3, %4, %cst {dimension_numbers = #tpu.dot_dimension_numbers<[2], [2], [1], [1], [0, 0, 0, 1, 1, 1], [0], [0]>} : vector<8x16x16xbf16>, vector<8x16x16xbf16>, vector<8x16x16xf32> -> vector<8x16x16xf32>
    "tpu.trace_stop"() : () -> ()
    %7 = tpu.transpose %6, [1, 0, 2] : vector<8x16x16xf32> -> vector<16x8x16xf32>
    %c0_9 = arith.constant 0 : index
    %c0_10 = arith.constant 0 : index
    %c0_11 = arith.constant 0 : index
    %8 = vector.load %arg5[%c0_9, %c0_10, %c0_11] : memref<4x16x16xbf16, #tpu.memory_space<vmem>>, vector<1x16x16xbf16>
    %9 = vector.shape_cast %8 : vector<1x16x16xbf16> to vector<16x16xbf16>
    %10 = vector.shape_cast %9 : vector<16x16xbf16> to vector<16x1x16xbf16>
    %11 = arith.extf %10 : vector<16x1x16xbf16> to vector<16x1x16xf32>
    %12 = vector.broadcast %11 : vector<16x1x16xf32> to vector<16x8x16xf32>
    %13 = arith.addf %7, %12 : vector<16x8x16xf32>
    %c0_12 = arith.constant 0 : index
    %c0_13 = arith.constant 0 : index
    %c0_14 = arith.constant 0 : index
    %14 = vector.load %arg8[%c0_12, %c0_13, %c0_14] : memref<4x16x8xf32, #tpu.memory_space<vmem>>, vector<1x16x8xf32>
    %15 = vector.shape_cast %14 : vector<1x16x8xf32> to vector<16x8xf32>
    %cst_15 = arith.constant dense<0xFF800000> : vector<16x8xf32>
    %16 = vector.multi_reduction <maximumf>, %13, %cst_15 [2] : vector<16x8x16xf32> to vector<16x8xf32>
    %17 = arith.maximumf %15, %16 : vector<16x8xf32>
    %18 = arith.subf %15, %17 : vector<16x8xf32>
    %19 = math.exp %18 : vector<16x8xf32>
    %20 = vector.shape_cast %17 : vector<16x8xf32> to vector<16x8x1xf32>
    %21 = vector.broadcast %20 : vector<16x8x1xf32> to vector<16x8x16xf32>
    %22 = arith.subf %13, %21 : vector<16x8x16xf32>
    %23 = math.exp %22 : vector<16x8x16xf32>
    %c0_16 = arith.constant 0 : index
    %c0_17 = arith.constant 0 : index
    %c0_18 = arith.constant 0 : index
    %24 = vector.load %arg9[%c0_16, %c0_17, %c0_18] : memref<4x16x8xf32, #tpu.memory_space<vmem>>, vector<1x16x8xf32>
    %25 = vector.shape_cast %24 : vector<1x16x8xf32> to vector<16x8xf32>
    %26 = arith.mulf %19, %25 : vector<16x8xf32>
    %cst_19 = arith.constant dense<0.000000e+00> : vector<16x8xf32>
    %27 = vector.multi_reduction <add>, %23, %cst_19 [2] : vector<16x8x16xf32> to vector<16x8xf32>
    %28 = arith.addf %26, %27 : vector<16x8xf32>
    %c0_20 = arith.constant 0 : index
    %c0_21 = arith.constant 0 : index
    %c0_22 = arith.constant 0 : index
    %29 = vector.load %arg9[%c0_20, %c0_21, %c0_22] : memref<4x16x8xf32, #tpu.memory_space<vmem>>, vector<1x16x8xf32>
    %30 = vector.shape_cast %29 : vector<1x16x8xf32> to vector<16x8xf32>
    %31 = vector.shape_cast %28 : vector<16x8xf32> to vector<1x16x8xf32>
    tpu.vector_store %arg9[%c0_20, %c0_21, %c0_22], %31 {strides = array<i32>} : memref<4x16x8xf32, #tpu.memory_space<vmem>>, vector<1x16x8xf32>,
    %c0_23 = arith.constant 0 : index
    %c0_24 = arith.constant 0 : index
    %c0_25 = arith.constant 0 : index
    %32 = vector.load %arg8[%c0_23, %c0_24, %c0_25] : memref<4x16x8xf32, #tpu.memory_space<vmem>>, vector<1x16x8xf32>
    %33 = vector.shape_cast %32 : vector<1x16x8xf32> to vector<16x8xf32>
    %34 = vector.shape_cast %17 : vector<16x8xf32> to vector<1x16x8xf32>
    tpu.vector_store %arg8[%c0_23, %c0_24, %c0_25], %34 {strides = array<i32>} : memref<4x16x8xf32, #tpu.memory_space<vmem>>, vector<1x16x8xf32>,
    %35 = arith.truncf %23 : vector<16x8x16xf32> to vector<16x8x16xbf16>
    "tpu.trace_start"() <{level = 10 : i32, message = "lbk,lkc->lbc"}> : () -> ()
    %cst_26 = arith.constant dense<0.000000e+00> : vector<16x8x16xf32>
    %36 = tpu.matmul %35, %5, %cst_26 {dimension_numbers = #tpu.dot_dimension_numbers<[2], [1], [1], [2], [0, 0, 0, 1, 1, 2], [0], [0]>} : vector<16x8x16xbf16>, vector<16x16x16xbf16>, vector<16x8x16xf32> -> vector<16x8x16xf32>
    "tpu.trace_stop"() : () -> ()
    %37 = vector.shape_cast %19 : vector<16x8xf32> to vector<16x8x1xf32>
    %c0_27 = arith.constant 0 : index
    %c0_28 = arith.constant 0 : index
    %c0_29 = arith.constant 0 : index
    %c0_30 = arith.constant 0 : index
    %38 = vector.load %arg10[%c0_27, %c0_28, %c0_29, %c0_30] : memref<4x16x8x16xf32, #tpu.memory_space<vmem>>, vector<1x16x8x16xf32>
    %39 = vector.shape_cast %38 : vector<1x16x8x16xf32> to vector<16x8x16xf32>
    %40 = vector.broadcast %37 : vector<16x8x1xf32> to vector<16x8x16xf32>
    %41 = arith.mulf %40, %39 : vector<16x8x16xf32>
    %42 = arith.addf %41, %36 : vector<16x8x16xf32>
    %c0_31 = arith.constant 0 : index
    %c0_32 = arith.constant 0 : index
    %c0_33 = arith.constant 0 : index
    %c0_34 = arith.constant 0 : index
    %43 = vector.load %arg10[%c0_31, %c0_32, %c0_33, %c0_34] : memref<4x16x8x16xf32, #tpu.memory_space<vmem>>, vector<1x16x8x16xf32>
    %44 = vector.shape_cast %43 : vector<1x16x8x16xf32> to vector<16x8x16xf32>
    %45 = vector.shape_cast %42 : vector<16x8x16xf32> to vector<1x16x8x16xf32>
    tpu.vector_store %arg10[%c0_31, %c0_32, %c0_33, %c0_34], %45 {strides = array<i32>} : memref<4x16x8x16xf32, #tpu.memory_space<vmem>>, vector<1x16x8x16xf32>,
    %c0_35 = arith.constant 0 : index
    %c0_36 = arith.constant 0 : index
    %c16 = arith.constant 16 : index
    %46 = vector.load %arg2[%c0_35, %c0_36, %c16] : memref<8x16x64xbf16, #tpu.memory_space<vmem>>, vector<8x16x16xbf16>
    %c0_37 = arith.constant 0 : index
    %c0_38 = arith.constant 0 : index
    %c16_39 = arith.constant 16 : index
    %47 = vector.load %arg3[%c0_37, %c0_38, %c16_39] : memref<8x16x64xbf16, #tpu.memory_space<vmem>>, vector<8x16x16xbf16>
    %c0_40 = arith.constant 0 : index
    %c0_41 = arith.constant 0 : index
    %c16_42 = arith.constant 16 : index
    %48 = vector.load %arg4[%c0_40, %c0_41, %c16_42] : memref<16x16x64xbf16, #tpu.memory_space<vmem>>, vector<16x16x16xbf16>
    "tpu.trace_start"() <{level = 10 : i32, message = "blc,bkc->blk"}> : () -> ()
    %cst_43 = arith.constant dense<0.000000e+00> : vector<8x16x16xf32>
    %49 = tpu.matmul %46, %47, %cst_43 {dimension_numbers = #tpu.dot_dimension_numbers<[2], [2], [1], [1], [0, 0, 0, 1, 1, 1], [0], [0]>} : vector<8x16x16xbf16>, vector<8x16x16xbf16>, vector<8x16x16xf32> -> vector<8x16x16xf32>
    "tpu.trace_stop"() : () -> ()
    %50 = tpu.transpose %49, [1, 0, 2] : vector<8x16x16xf32> -> vector<16x8x16xf32>
    %c1 = arith.constant 1 : index
    %c0_44 = arith.constant 0 : index
    %c0_45 = arith.constant 0 : index
    %51 = vector.load %arg5[%c1, %c0_44, %c0_45] : memref<4x16x16xbf16, #tpu.memory_space<vmem>>, vector<1x16x16xbf16>
    %52 = vector.shape_cast %51 : vector<1x16x16xbf16> to vector<16x16xbf16>
    %53 = vector.shape_cast %52 : vector<16x16xbf16> to vector<16x1x16xbf16>
    %54 = arith.extf %53 : vector<16x1x16xbf16> to vector<16x1x16xf32>
    %55 = vector.broadcast %54 : vector<16x1x16xf32> to vector<16x8x16xf32>
    %56 = arith.addf %50, %55 : vector<16x8x16xf32>
    %c1_46 = arith.constant 1 : index
    %c0_47 = arith.constant 0 : index
    %c0_48 = arith.constant 0 : index
    %57 = vector.load %arg8[%c1_46, %c0_47, %c0_48] : memref<4x16x8xf32, #tpu.memory_space<vmem>>, vector<1x16x8xf32>
    %58 = vector.shape_cast %57 : vector<1x16x8xf32> to vector<16x8xf32>
    %cst_49 = arith.constant dense<0xFF800000> : vector<16x8xf32>
    %59 = vector.multi_reduction <maximumf>, %56, %cst_49 [2] : vector<16x8x16xf32> to vector<16x8xf32>
    %60 = arith.maximumf %58, %59 : vector<16x8xf32>
    %61 = arith.subf %58, %60 : vector<16x8xf32>
    %62 = math.exp %61 : vector<16x8xf32>
    %63 = vector.shape_cast %60 : vector<16x8xf32> to vector<16x8x1xf32>
    %64 = vector.broadcast %63 : vector<16x8x1xf32> to vector<16x8x16xf32>
    %65 = arith.subf %56, %64 : vector<16x8x16xf32>
    %66 = math.exp %65 : vector<16x8x16xf32>
    %c1_50 = arith.constant 1 : index
    %c0_51 = arith.constant 0 : index
    %c0_52 = arith.constant 0 : index
    %67 = vector.load %arg9[%c1_50, %c0_51, %c0_52] : memref<4x16x8xf32, #tpu.memory_space<vmem>>, vector<1x16x8xf32>
    %68 = vector.shape_cast %67 : vector<1x16x8xf32> to vector<16x8xf32>
    %69 = arith.mulf %62, %68 : vector<16x8xf32>
    %cst_53 = arith.constant dense<0.000000e+00> : vector<16x8xf32>
    %70 = vector.multi_reduction <add>, %66, %cst_53 [2] : vector<16x8x16xf32> to vector<16x8xf32>
    %71 = arith.addf %69, %70 : vector<16x8xf32>
    %c1_54 = arith.constant 1 : index
    %c0_55 = arith.constant 0 : index
    %c0_56 = arith.constant 0 : index
    %72 = vector.load %arg9[%c1_54, %c0_55, %c0_56] : memref<4x16x8xf32, #tpu.memory_space<vmem>>, vector<1x16x8xf32>
    %73 = vector.shape_cast %72 : vector<1x16x8xf32> to vector<16x8xf32>
    %74 = vector.shape_cast %71 : vector<16x8xf32> to vector<1x16x8xf32>
    tpu.vector_store %arg9[%c1_54, %c0_55, %c0_56], %74 {strides = array<i32>} : memref<4x16x8xf32, #tpu.memory_space<vmem>>, vector<1x16x8xf32>,
    %c1_57 = arith.constant 1 : index
    %c0_58 = arith.constant 0 : index
    %c0_59 = arith.constant 0 : index
    %75 = vector.load %arg8[%c1_57, %c0_58, %c0_59] : memref<4x16x8xf32, #tpu.memory_space<vmem>>, vector<1x16x8xf32>
    %76 = vector.shape_cast %75 : vector<1x16x8xf32> to vector<16x8xf32>
    %77 = vector.shape_cast %60 : vector<16x8xf32> to vector<1x16x8xf32>
    tpu.vector_store %arg8[%c1_57, %c0_58, %c0_59], %77 {strides = array<i32>} : memref<4x16x8xf32, #tpu.memory_space<vmem>>, vector<1x16x8xf32>,
    %78 = arith.truncf %66 : vector<16x8x16xf32> to vector<16x8x16xbf16>
    "tpu.trace_start"() <{level = 10 : i32, message = "lbk,lkc->lbc"}> : () -> ()
    %cst_60 = arith.constant dense<0.000000e+00> : vector<16x8x16xf32>
    %79 = tpu.matmul %78, %48, %cst_60 {dimension_numbers = #tpu.dot_dimension_numbers<[2], [1], [1], [2], [0, 0, 0, 1, 1, 2], [0], [0]>} : vector<16x8x16xbf16>, vector<16x16x16xbf16>, vector<16x8x16xf32> -> vector<16x8x16xf32>
    "tpu.trace_stop"() : () -> ()
    %80 = vector.shape_cast %62 : vector<16x8xf32> to vector<16x8x1xf32>
    %c1_61 = arith.constant 1 : index
    %c0_62 = arith.constant 0 : index
    %c0_63 = arith.constant 0 : index
    %c0_64 = arith.constant 0 : index
    %81 = vector.load %arg10[%c1_61, %c0_62, %c0_63, %c0_64] : memref<4x16x8x16xf32, #tpu.memory_space<vmem>>, vector<1x16x8x16xf32>
    %82 = vector.shape_cast %81 : vector<1x16x8x16xf32> to vector<16x8x16xf32>
    %83 = vector.broadcast %80 : vector<16x8x1xf32> to vector<16x8x16xf32>
    %84 = arith.mulf %83, %82 : vector<16x8x16xf32>
    %85 = arith.addf %84, %79 : vector<16x8x16xf32>
    %c1_65 = arith.constant 1 : index
    %c0_66 = arith.constant 0 : index
    %c0_67 = arith.constant 0 : index
    %c0_68 = arith.constant 0 : index
    %86 = vector.load %arg10[%c1_65, %c0_66, %c0_67, %c0_68] : memref<4x16x8x16xf32, #tpu.memory_space<vmem>>, vector<1x16x8x16xf32>
    %87 = vector.shape_cast %86 : vector<1x16x8x16xf32> to vector<16x8x16xf32>
    %88 = vector.shape_cast %85 : vector<16x8x16xf32> to vector<1x16x8x16xf32>
    tpu.vector_store %arg10[%c1_65, %c0_66, %c0_67, %c0_68], %88 {strides = array<i32>} : memref<4x16x8x16xf32, #tpu.memory_space<vmem>>, vector<1x16x8x16xf32>,
    %c0_69 = arith.constant 0 : index
    %c0_70 = arith.constant 0 : index
    %c32 = arith.constant 32 : index
    %89 = vector.load %arg2[%c0_69, %c0_70, %c32] : memref<8x16x64xbf16, #tpu.memory_space<vmem>>, vector<8x16x16xbf16>
    %c0_71 = arith.constant 0 : index
    %c0_72 = arith.constant 0 : index
    %c32_73 = arith.constant 32 : index
    %90 = vector.load %arg3[%c0_71, %c0_72, %c32_73] : memref<8x16x64xbf16, #tpu.memory_space<vmem>>, vector<8x16x16xbf16>
    %c0_74 = arith.constant 0 : index
    %c0_75 = arith.constant 0 : index
    %c32_76 = arith.constant 32 : index
    %91 = vector.load %arg4[%c0_74, %c0_75, %c32_76] : memref<16x16x64xbf16, #tpu.memory_space<vmem>>, vector<16x16x16xbf16>
    "tpu.trace_start"() <{level = 10 : i32, message = "blc,bkc->blk"}> : () -> ()
    %cst_77 = arith.constant dense<0.000000e+00> : vector<8x16x16xf32>
    %92 = tpu.matmul %89, %90, %cst_77 {dimension_numbers = #tpu.dot_dimension_numbers<[2], [2], [1], [1], [0, 0, 0, 1, 1, 1], [0], [0]>} : vector<8x16x16xbf16>, vector<8x16x16xbf16>, vector<8x16x16xf32> -> vector<8x16x16xf32>
    "tpu.trace_stop"() : () -> ()
    %93 = tpu.transpose %92, [1, 0, 2] : vector<8x16x16xf32> -> vector<16x8x16xf32>
    %c2 = arith.constant 2 : index
    %c0_78 = arith.constant 0 : index
    %c0_79 = arith.constant 0 : index
    %94 = vector.load %arg5[%c2, %c0_78, %c0_79] : memref<4x16x16xbf16, #tpu.memory_space<vmem>>, vector<1x16x16xbf16>
    %95 = vector.shape_cast %94 : vector<1x16x16xbf16> to vector<16x16xbf16>
    %96 = vector.shape_cast %95 : vector<16x16xbf16> to vector<16x1x16xbf16>
    %97 = arith.extf %96 : vector<16x1x16xbf16> to vector<16x1x16xf32>
    %98 = vector.broadcast %97 : vector<16x1x16xf32> to vector<16x8x16xf32>
    %99 = arith.addf %93, %98 : vector<16x8x16xf32>
    %c2_80 = arith.constant 2 : index
    %c0_81 = arith.constant 0 : index
    %c0_82 = arith.constant 0 : index
    %100 = vector.load %arg8[%c2_80, %c0_81, %c0_82] : memref<4x16x8xf32, #tpu.memory_space<vmem>>, vector<1x16x8xf32>
    %101 = vector.shape_cast %100 : vector<1x16x8xf32> to vector<16x8xf32>
    %cst_83 = arith.constant dense<0xFF800000> : vector<16x8xf32>
    %102 = vector.multi_reduction <maximumf>, %99, %cst_83 [2] : vector<16x8x16xf32> to vector<16x8xf32>
    %103 = arith.maximumf %101, %102 : vector<16x8xf32>
    %104 = arith.subf %101, %103 : vector<16x8xf32>
    %105 = math.exp %104 : vector<16x8xf32>
    %106 = vector.shape_cast %103 : vector<16x8xf32> to vector<16x8x1xf32>
    %107 = vector.broadcast %106 : vector<16x8x1xf32> to vector<16x8x16xf32>
    %108 = arith.subf %99, %107 : vector<16x8x16xf32>
    %109 = math.exp %108 : vector<16x8x16xf32>
    %c2_84 = arith.constant 2 : index
    %c0_85 = arith.constant 0 : index
    %c0_86 = arith.constant 0 : index
    %110 = vector.load %arg9[%c2_84, %c0_85, %c0_86] : memref<4x16x8xf32, #tpu.memory_space<vmem>>, vector<1x16x8xf32>
    %111 = vector.shape_cast %110 : vector<1x16x8xf32> to vector<16x8xf32>
    %112 = arith.mulf %105, %111 : vector<16x8xf32>
    %cst_87 = arith.constant dense<0.000000e+00> : vector<16x8xf32>
    %113 = vector.multi_reduction <add>, %109, %cst_87 [2] : vector<16x8x16xf32> to vector<16x8xf32>
    %114 = arith.addf %112, %113 : vector<16x8xf32>
    %c2_88 = arith.constant 2 : index
    %c0_89 = arith.constant 0 : index
    %c0_90 = arith.constant 0 : index
    %115 = vector.load %arg9[%c2_88, %c0_89, %c0_90] : memref<4x16x8xf32, #tpu.memory_space<vmem>>, vector<1x16x8xf32>
    %116 = vector.shape_cast %115 : vector<1x16x8xf32> to vector<16x8xf32>
    %117 = vector.shape_cast %114 : vector<16x8xf32> to vector<1x16x8xf32>
    tpu.vector_store %arg9[%c2_88, %c0_89, %c0_90], %117 {strides = array<i32>} : memref<4x16x8xf32, #tpu.memory_space<vmem>>, vector<1x16x8xf32>,
    %c2_91 = arith.constant 2 : index
    %c0_92 = arith.constant 0 : index
    %c0_93 = arith.constant 0 : index
    %118 = vector.load %arg8[%c2_91, %c0_92, %c0_93] : memref<4x16x8xf32, #tpu.memory_space<vmem>>, vector<1x16x8xf32>
    %119 = vector.shape_cast %118 : vector<1x16x8xf32> to vector<16x8xf32>
    %120 = vector.shape_cast %103 : vector<16x8xf32> to vector<1x16x8xf32>
    tpu.vector_store %arg8[%c2_91, %c0_92, %c0_93], %120 {strides = array<i32>} : memref<4x16x8xf32, #tpu.memory_space<vmem>>, vector<1x16x8xf32>,
    %121 = arith.truncf %109 : vector<16x8x16xf32> to vector<16x8x16xbf16>
    "tpu.trace_start"() <{level = 10 : i32, message = "lbk,lkc->lbc"}> : () -> ()
    %cst_94 = arith.constant dense<0.000000e+00> : vector<16x8x16xf32>
    %122 = tpu.matmul %121, %91, %cst_94 {dimension_numbers = #tpu.dot_dimension_numbers<[2], [1], [1], [2], [0, 0, 0, 1, 1, 2], [0], [0]>} : vector<16x8x16xbf16>, vector<16x16x16xbf16>, vector<16x8x16xf32> -> vector<16x8x16xf32>
    "tpu.trace_stop"() : () -> ()
    %123 = vector.shape_cast %105 : vector<16x8xf32> to vector<16x8x1xf32>
    %c2_95 = arith.constant 2 : index
    %c0_96 = arith.constant 0 : index
    %c0_97 = arith.constant 0 : index
    %c0_98 = arith.constant 0 : index
    %124 = vector.load %arg10[%c2_95, %c0_96, %c0_97, %c0_98] : memref<4x16x8x16xf32, #tpu.memory_space<vmem>>, vector<1x16x8x16xf32>
    %125 = vector.shape_cast %124 : vector<1x16x8x16xf32> to vector<16x8x16xf32>
    %126 = vector.broadcast %123 : vector<16x8x1xf32> to vector<16x8x16xf32>
    %127 = arith.mulf %126, %125 : vector<16x8x16xf32>
    %128 = arith.addf %127, %122 : vector<16x8x16xf32>
    %c2_99 = arith.constant 2 : index
    %c0_100 = arith.constant 0 : index
    %c0_101 = arith.constant 0 : index
    %c0_102 = arith.constant 0 : index
    %129 = vector.load %arg10[%c2_99, %c0_100, %c0_101, %c0_102] : memref<4x16x8x16xf32, #tpu.memory_space<vmem>>, vector<1x16x8x16xf32>
    %130 = vector.shape_cast %129 : vector<1x16x8x16xf32> to vector<16x8x16xf32>
    %131 = vector.shape_cast %128 : vector<16x8x16xf32> to vector<1x16x8x16xf32>
    tpu.vector_store %arg10[%c2_99, %c0_100, %c0_101, %c0_102], %131 {strides = array<i32>} : memref<4x16x8x16xf32, #tpu.memory_space<vmem>>, vector<1x16x8x16xf32>,
    %c0_103 = arith.constant 0 : index
    %c0_104 = arith.constant 0 : index
    %c48 = arith.constant 48 : index
    %132 = vector.load %arg2[%c0_103, %c0_104, %c48] : memref<8x16x64xbf16, #tpu.memory_space<vmem>>, vector<8x16x16xbf16>
    %c0_105 = arith.constant 0 : index
    %c0_106 = arith.constant 0 : index
    %c48_107 = arith.constant 48 : index
    %133 = vector.load %arg3[%c0_105, %c0_106, %c48_107] : memref<8x16x64xbf16, #tpu.memory_space<vmem>>, vector<8x16x16xbf16>
    %c0_108 = arith.constant 0 : index
    %c0_109 = arith.constant 0 : index
    %c48_110 = arith.constant 48 : index
    %134 = vector.load %arg4[%c0_108, %c0_109, %c48_110] : memref<16x16x64xbf16, #tpu.memory_space<vmem>>, vector<16x16x16xbf16>
    "tpu.trace_start"() <{level = 10 : i32, message = "blc,bkc->blk"}> : () -> ()
    %cst_111 = arith.constant dense<0.000000e+00> : vector<8x16x16xf32>
    %135 = tpu.matmul %132, %133, %cst_111 {dimension_numbers = #tpu.dot_dimension_numbers<[2], [2], [1], [1], [0, 0, 0, 1, 1, 1], [0], [0]>} : vector<8x16x16xbf16>, vector<8x16x16xbf16>, vector<8x16x16xf32> -> vector<8x16x16xf32>
    "tpu.trace_stop"() : () -> ()
    %136 = tpu.transpose %135, [1, 0, 2] : vector<8x16x16xf32> -> vector<16x8x16xf32>
    %c3 = arith.constant 3 : index
    %c0_112 = arith.constant 0 : index
    %c0_113 = arith.constant 0 : index
    %137 = vector.load %arg5[%c3, %c0_112, %c0_113] : memref<4x16x16xbf16, #tpu.memory_space<vmem>>, vector<1x16x16xbf16>
    %138 = vector.shape_cast %137 : vector<1x16x16xbf16> to vector<16x16xbf16>
    %139 = vector.shape_cast %138 : vector<16x16xbf16> to vector<16x1x16xbf16>
    %140 = arith.extf %139 : vector<16x1x16xbf16> to vector<16x1x16xf32>
    %141 = vector.broadcast %140 : vector<16x1x16xf32> to vector<16x8x16xf32>
    %142 = arith.addf %136, %141 : vector<16x8x16xf32>
    %c3_114 = arith.constant 3 : index
    %c0_115 = arith.constant 0 : index
    %c0_116 = arith.constant 0 : index
    %143 = vector.load %arg8[%c3_114, %c0_115, %c0_116] : memref<4x16x8xf32, #tpu.memory_space<vmem>>, vector<1x16x8xf32>
    %144 = vector.shape_cast %143 : vector<1x16x8xf32> to vector<16x8xf32>
    %cst_117 = arith.constant dense<0xFF800000> : vector<16x8xf32>
    %145 = vector.multi_reduction <maximumf>, %142, %cst_117 [2] : vector<16x8x16xf32> to vector<16x8xf32>
    %146 = arith.maximumf %144, %145 : vector<16x8xf32>
    %147 = arith.subf %144, %146 : vector<16x8xf32>
    %148 = math.exp %147 : vector<16x8xf32>
    %149 = vector.shape_cast %146 : vector<16x8xf32> to vector<16x8x1xf32>
    %150 = vector.broadcast %149 : vector<16x8x1xf32> to vector<16x8x16xf32>
    %151 = arith.subf %142, %150 : vector<16x8x16xf32>
    %152 = math.exp %151 : vector<16x8x16xf32>
    %c3_118 = arith.constant 3 : index
    %c0_119 = arith.constant 0 : index
    %c0_120 = arith.constant 0 : index
    %153 = vector.load %arg9[%c3_118, %c0_119, %c0_120] : memref<4x16x8xf32, #tpu.memory_space<vmem>>, vector<1x16x8xf32>
    %154 = vector.shape_cast %153 : vector<1x16x8xf32> to vector<16x8xf32>
    %155 = arith.mulf %148, %154 : vector<16x8xf32>
    %cst_121 = arith.constant dense<0.000000e+00> : vector<16x8xf32>
    %156 = vector.multi_reduction <add>, %152, %cst_121 [2] : vector<16x8x16xf32> to vector<16x8xf32>
    %157 = arith.addf %155, %156 : vector<16x8xf32>
    %c3_122 = arith.constant 3 : index
    %c0_123 = arith.constant 0 : index
    %c0_124 = arith.constant 0 : index
    %158 = vector.load %arg9[%c3_122, %c0_123, %c0_124] : memref<4x16x8xf32, #tpu.memory_space<vmem>>, vector<1x16x8xf32>
    %159 = vector.shape_cast %158 : vector<1x16x8xf32> to vector<16x8xf32>
    %160 = vector.shape_cast %157 : vector<16x8xf32> to vector<1x16x8xf32>
    tpu.vector_store %arg9[%c3_122, %c0_123, %c0_124], %160 {strides = array<i32>} : memref<4x16x8xf32, #tpu.memory_space<vmem>>, vector<1x16x8xf32>,
    %c3_125 = arith.constant 3 : index
    %c0_126 = arith.constant 0 : index
    %c0_127 = arith.constant 0 : index
    %161 = vector.load %arg8[%c3_125, %c0_126, %c0_127] : memref<4x16x8xf32, #tpu.memory_space<vmem>>, vector<1x16x8xf32>
    %162 = vector.shape_cast %161 : vector<1x16x8xf32> to vector<16x8xf32>
    %163 = vector.shape_cast %146 : vector<16x8xf32> to vector<1x16x8xf32>
    tpu.vector_store %arg8[%c3_125, %c0_126, %c0_127], %163 {strides = array<i32>} : memref<4x16x8xf32, #tpu.memory_space<vmem>>, vector<1x16x8xf32>,
    %164 = arith.truncf %152 : vector<16x8x16xf32> to vector<16x8x16xbf16>
    "tpu.trace_start"() <{level = 10 : i32, message = "lbk,lkc->lbc"}> : () -> ()
    %cst_128 = arith.constant dense<0.000000e+00> : vector<16x8x16xf32>
    %165 = tpu.matmul %164, %134, %cst_128 {dimension_numbers = #tpu.dot_dimension_numbers<[2], [1], [1], [2], [0, 0, 0, 1, 1, 2], [0], [0]>} : vector<16x8x16xbf16>, vector<16x16x16xbf16>, vector<16x8x16xf32> -> vector<16x8x16xf32>
    "tpu.trace_stop"() : () -> ()
    %166 = vector.shape_cast %148 : vector<16x8xf32> to vector<16x8x1xf32>
    %c3_129 = arith.constant 3 : index
    %c0_130 = arith.constant 0 : index
    %c0_131 = arith.constant 0 : index
    %c0_132 = arith.constant 0 : index
    %167 = vector.load %arg10[%c3_129, %c0_130, %c0_131, %c0_132] : memref<4x16x8x16xf32, #tpu.memory_space<vmem>>, vector<1x16x8x16xf32>
    %168 = vector.shape_cast %167 : vector<1x16x8x16xf32> to vector<16x8x16xf32>
    %169 = vector.broadcast %166 : vector<16x8x1xf32> to vector<16x8x16xf32>
    %170 = arith.mulf %169, %168 : vector<16x8x16xf32>
    %171 = arith.addf %170, %165 : vector<16x8x16xf32>
    %c3_133 = arith.constant 3 : index
    %c0_134 = arith.constant 0 : index
    %c0_135 = arith.constant 0 : index
    %c0_136 = arith.constant 0 : index
    %172 = vector.load %arg10[%c3_133, %c0_134, %c0_135, %c0_136] : memref<4x16x8x16xf32, #tpu.memory_space<vmem>>, vector<1x16x8x16xf32>
    %173 = vector.shape_cast %172 : vector<1x16x8x16xf32> to vector<16x8x16xf32>
    %174 = vector.shape_cast %171 : vector<16x8x16xf32> to vector<1x16x8x16xf32>
    tpu.vector_store %arg10[%c3_133, %c0_134, %c0_135, %c0_136], %174 {strides = array<i32>} : memref<4x16x8x16xf32, #tpu.memory_space<vmem>>, vector<1x16x8x16xf32>,
    %c0_i32_137 = arith.constant 0 : i32
    %175 = arith.cmpi eq, %arg1, %c0_i32_137 : i32
    %176 = arith.extui %175 : i1 to i32
    %c0_i32_138 = arith.constant 0 : i32
    %177 = arith.cmpi ne, %176, %c0_i32_138 : i32
    scf.if %177 {
      %c0_139 = arith.constant 0 : index
      %c0_140 = arith.constant 0 : index
      %c0_141 = arith.constant 0 : index
      %178 = vector.load %arg6[%c0_139, %c0_140, %c0_141] : memref<16x8x64xbf16, #tpu.memory_space<vmem>>, vector<16x8x64xbf16>
      %179 = arith.extf %178 : vector<16x8x64xbf16> to vector<16x8x64xf32>
      %180 = arith.negf %179 : vector<16x8x64xf32>
      %181 = math.exp %180 : vector<16x8x64xf32>
      %cst_142 = arith.constant 1.000000e+00 : f32
      %182 = vector.broadcast %cst_142 : f32 to vector<16x8x64xf32>
      %183 = arith.addf %182, %181 : vector<16x8x64xf32>
      %184 = arith.divf %182, %183 : vector<16x8x64xf32>
      %c0_143 = arith.constant 0 : index
      %c0_144 = arith.constant 0 : index
      %c0_145 = arith.constant 0 : index
      %c0_146 = arith.constant 0 : index
      %185 = vector.load %arg10[%c0_143, %c0_144, %c0_145, %c0_146] : memref<4x16x8x16xf32, #tpu.memory_space<vmem>>, vector<1x16x8x16xf32>
      %186 = vector.shape_cast %185 : vector<1x16x8x16xf32> to vector<16x8x16xf32>
      %c0_147 = arith.constant 0 : index
      %c0_148 = arith.constant 0 : index
      %c0_149 = arith.constant 0 : index
      %187 = vector.load %arg9[%c0_147, %c0_148, %c0_149] : memref<4x16x8xf32, #tpu.memory_space<vmem>>, vector<1x16x8xf32>
      %188 = vector.shape_cast %187 : vector<1x16x8xf32> to vector<16x8xf32>
      %189 = tpu.reciprocal %188 {approx = true} : vector<16x8xf32> -> vector<16x8xf32>
      %190 = vector.shape_cast %189 : vector<16x8xf32> to vector<16x8x1xf32>
      %191 = vector.broadcast %190 : vector<16x8x1xf32> to vector<16x8x16xf32>
      %192 = arith.mulf %186, %191 : vector<16x8x16xf32>
      %c1_150 = arith.constant 1 : index
      %c0_151 = arith.constant 0 : index
      %c0_152 = arith.constant 0 : index
      %c0_153 = arith.constant 0 : index
      %193 = vector.load %arg10[%c1_150, %c0_151, %c0_152, %c0_153] : memref<4x16x8x16xf32, #tpu.memory_space<vmem>>, vector<1x16x8x16xf32>
      %194 = vector.shape_cast %193 : vector<1x16x8x16xf32> to vector<16x8x16xf32>
      %c1_154 = arith.constant 1 : index
      %c0_155 = arith.constant 0 : index
      %c0_156 = arith.constant 0 : index
      %195 = vector.load %arg9[%c1_154, %c0_155, %c0_156] : memref<4x16x8xf32, #tpu.memory_space<vmem>>, vector<1x16x8xf32>
      %196 = vector.shape_cast %195 : vector<1x16x8xf32> to vector<16x8xf32>
      %197 = tpu.reciprocal %196 {approx = true} : vector<16x8xf32> -> vector<16x8xf32>
      %198 = vector.shape_cast %197 : vector<16x8xf32> to vector<16x8x1xf32>
      %199 = vector.broadcast %198 : vector<16x8x1xf32> to vector<16x8x16xf32>
      %200 = arith.mulf %194, %199 : vector<16x8x16xf32>
      %c2_157 = arith.constant 2 : index
      %c0_158 = arith.constant 0 : index
      %c0_159 = arith.constant 0 : index
      %c0_160 = arith.constant 0 : index
      %201 = vector.load %arg10[%c2_157, %c0_158, %c0_159, %c0_160] : memref<4x16x8x16xf32, #tpu.memory_space<vmem>>, vector<1x16x8x16xf32>
      %202 = vector.shape_cast %201 : vector<1x16x8x16xf32> to vector<16x8x16xf32>
      %c2_161 = arith.constant 2 : index
      %c0_162 = arith.constant 0 : index
      %c0_163 = arith.constant 0 : index
      %203 = vector.load %arg9[%c2_161, %c0_162, %c0_163] : memref<4x16x8xf32, #tpu.memory_space<vmem>>, vector<1x16x8xf32>
      %204 = vector.shape_cast %203 : vector<1x16x8xf32> to vector<16x8xf32>
      %205 = tpu.reciprocal %204 {approx = true} : vector<16x8xf32> -> vector<16x8xf32>
      %206 = vector.shape_cast %205 : vector<16x8xf32> to vector<16x8x1xf32>
      %207 = vector.broadcast %206 : vector<16x8x1xf32> to vector<16x8x16xf32>
      %208 = arith.mulf %202, %207 : vector<16x8x16xf32>
      %c3_164 = arith.constant 3 : index
      %c0_165 = arith.constant 0 : index
      %c0_166 = arith.constant 0 : index
      %c0_167 = arith.constant 0 : index
      %209 = vector.load %arg10[%c3_164, %c0_165, %c0_166, %c0_167] : memref<4x16x8x16xf32, #tpu.memory_space<vmem>>, vector<1x16x8x16xf32>
      %210 = vector.shape_cast %209 : vector<1x16x8x16xf32> to vector<16x8x16xf32>
      %c3_168 = arith.constant 3 : index
      %c0_169 = arith.constant 0 : index
      %c0_170 = arith.constant 0 : index
      %211 = vector.load %arg9[%c3_168, %c0_169, %c0_170] : memref<4x16x8xf32, #tpu.memory_space<vmem>>, vector<1x16x8xf32>
      %212 = vector.shape_cast %211 : vector<1x16x8xf32> to vector<16x8xf32>
      %213 = tpu.reciprocal %212 {approx = true} : vector<16x8xf32> -> vector<16x8xf32>
      %214 = vector.shape_cast %213 : vector<16x8xf32> to vector<16x8x1xf32>
      %215 = vector.broadcast %214 : vector<16x8x1xf32> to vector<16x8x16xf32>
      %216 = arith.mulf %210, %215 : vector<16x8x16xf32>
      %217 = tpu.concatenate %192, %200, %208, %216 in 2 : vector<16x8x16xf32>, vector<16x8x16xf32>, vector<16x8x16xf32>, vector<16x8x16xf32> -> vector<16x8x64xf32>
      %218 = arith.mulf %184, %217 : vector<16x8x64xf32>
      %219 = arith.truncf %218 : vector<16x8x64xf32> to vector<16x8x64xbf16>
      %c0_171 = arith.constant 0 : index
      %c0_172 = arith.constant 0 : index
      %c0_173 = arith.constant 0 : index
      %220 = vector.load %arg7[%c0_171, %c0_172, %c0_173] : memref<16x8x64xbf16, #tpu.memory_space<vmem>>, vector<16x8x64xbf16>
      tpu.vector_store %arg7[%c0_171, %c0_172, %c0_173], %219 {strides = array<i32>} : memref<16x8x64xbf16, #tpu.memory_space<vmem>>, vector<16x8x64xbf16>,
    } else {
    }
    return
  }
  func.func @transform_0(%arg0: i32, %arg1: i32) -> (i32, i32, i32) {
    %c0_i32 = arith.constant 0 : i32
    %c0_i32_0 = arith.constant 0 : i32
    %c0_i32_1 = arith.constant 0 : i32
    return %arg0, %c0_i32, %c0_i32_0 : i32, i32, i32
  }
  func.func @transform_1(%arg0: i32, %arg1: i32) -> (i32, i32, i32) {
    %c0_i32 = arith.constant 0 : i32
    %c0_i32_0 = arith.constant 0 : i32
    return %arg0, %arg1, %c0_i32 : i32, i32, i32
  }
  func.func @transform_2(%arg0: i32, %arg1: i32) -> (i32, i32, i32) {
    %c0_i32 = arith.constant 0 : i32
    %c0_i32_0 = arith.constant 0 : i32
    %c0_i32_1 = arith.constant 0 : i32
    return %c0_i32, %arg1, %c0_i32_0 : i32, i32, i32
  }
  func.func @transform_3(%arg0: i32, %arg1: i32) -> (i32, i32, i32) {
    %c0_i32 = arith.constant 0 : i32
    %c0_i32_0 = arith.constant 0 : i32
    %c0_i32_1 = arith.constant 0 : i32
    return %c0_i32, %c0_i32_0, %arg1 : i32, i32, i32
  }
  func.func @transform_4(%arg0: i32, %arg1: i32) -> (i32, i32, i32) {
    %c0_i32 = arith.constant 0 : i32
    %c0_i32_0 = arith.constant 0 : i32
    %c0_i32_1 = arith.constant 0 : i32
    return %c0_i32, %arg0, %c0_i32_0 : i32, i32, i32
  }
  func.func @transform_5(%arg0: i32, %arg1: i32) -> (i32, i32, i32) {
    %c0_i32 = arith.constant 0 : i32
    %c0_i32_0 = arith.constant 0 : i32
    %c0_i32_1 = arith.constant 0 : i32
    return %c0_i32, %arg0, %c0_i32_0 : i32, i32, i32
  }
}

</mosaic_0001>

<bundles_post_ra>
// kernel: tri_att_end_forward.1
= control target key start
LH: loop header
LB: loop body
LE: loop exit
PB: predicated region body
PF: predicated region fallthrough
CT: control target
= control target key end

     0   :  { %s9955_s18 = smov 0   ;;  %s9957_s19 = smov 0   ;;  %s13694_s0 = inlined_call_operand.vmem [shape: bf16[16,16,64], index: 0, kind: input, shape index: {}]   ;;  %s13695_s1 = inlined_call_operand.vmem [shape: bf16[16,16,64], index: 1, kind: input, shape index: {}]   ;;  %s13696_s2 = inlined_call_operand.vmem [shape: bf16[16,16,64], index: 2, kind: input, shape index: {}]   ;;  %s13697_s3 = inlined_call_operand.vmem [shape: bf16[4,16,16], index: 3, kind: input, shape index: {}]   ;;  %s13698_s4 = inlined_call_operand.vmem [shape: bf16[16,16,64], index: 4, kind: input, shape index: {}]   ;;  %s13699_s5 = inlined_call_operand.vmem [shape: bf16[16,16,64], index: 5, kind: output, shape index: {}]  }
   0x1   :  { %s9959_s20 = smov 0   ;;  %s9961_s21 = smov 0  }
   0x2   :  { %s9963_s22 = smov 0  }
   0x3 LB: > { %s27_s23 = sadd.s32 1, %s9908_s21  ;;  %s8744_s24 = sadd.s32 4294967295, %s9912_s22   ;;  %s9912_s22 = sphi %s9963_s22, %s15_s22   ;;  %s9908_s21 = sphi %s9961_s21, %s13904_s21   ;;  %s9904_s20 = sphi %s9959_s20, %s13903_s20   ;;  %s9900_s19 = sphi %s9957_s19, %s13902_s19   ;;  %s9896_s18 = sphi %s9955_s18, %s13901_s18  }
   0x4   : > { %p29_p0 = scmp.ge.s32.totalorder %s27_s23, 2  ;;  %p147_p1 = scmp.ne.s32.totalorder %s9900_s19, %s9896_s18 }
   0x5   : > { %p148_p2 = scmp.eq.s32.totalorder %s9912_s22, 0  ;;  %p177_p4 = scmp.eq.s32.totalorder %s8744_s24, 1 }
   0x6   : > { %s13906_s23 = smov (%p29_p0, %s27_s23), 0  ;;  %s140_s26 = sadd.s32 1, %s9900_s19 }
   0x7   : > { %p149_p3 = por %p148_p2, %p147_p1  ;;  %s137_s25 = ssub.s32 %s9908_s21, %s13906_s23 }
   0x8   : > { %p138_p5 = scmp.eq.s32.totalorder %s137_s25, 0  ;;  %p9990_p6 = por %p177_p4, %p147_p1 }
   0x9   : > { %p8749_p7 = scmp.ge.s32.totalorder %s9912_s22, 2 }
   0xa   : > { %s9995_s28 = scalar_select %p138_p5, %s9900_s19, %s140_s26  }
   0xb   : > { %215 = sbr.rel (%p8749_p7) target bundleno = 36 (0x24), region = 24 }
  0x10   : > { %243 = sbr.rel (!%p149_p3) target bundleno = 36 (0x24), region = 36  ;;  %s245_s29 = sand.u32 (%p149_p3), 1, %s9900_s19  }
  0x11   : > { %s8751_s30 = sshll.u32 (%p149_p3), %s9908_s21, 2  ;;  %s8750_s6 = sshll.u32 (%p149_p3), %s245_s29, 6 }
  0x12   : > { %s10003_s9 = scalar_lea.vmem (%p149_p3), %s13698_s4, %s8751_s30  ;;  %s247_s10 = scalar_lea.vmem (%p149_p3), [#allocation5], %s8750_s6 }
  0x13   : > { %v266_v0 = vld [vmem:[%s10003_s9] sm:$0xf] (%p149_p3)  ;;  %v268_v1 = vld [vmem:[%s10003_s9 + $0x8] sm:$0xf] (%p149_p3)  ;;  %v270_v2 = vld [vmem:[%s10003_s9 + $0x10] sm:$0xf] (%p149_p3) }
  0x14   : > { %267 = vst [vmem:[%s247_s10] sm:$0xf] (%p149_p3), %v266_v0  ;;  %v272_v3 = vld [vmem:[%s10003_s9 + $0x18] sm:$0xf] (%p149_p3)  ;;  %v274_v4 = vld [vmem:[%s10003_s9 + $0x20] sm:$0xf] (%p149_p3) }
  0x15   : > { %269 = vst [vmem:[%s247_s10 + $0x4] sm:$0xf] %v268_v1  ;;  %v276_v5 = vld [vmem:[%s10003_s9 + $0x28] sm:$0xf]  ;;  %v278_v6 = vld [vmem:[%s10003_s9 + $0x30] sm:$0xf] }
  0x16   : > { %271 = vst [vmem:[%s247_s10 + $0x8] sm:$0xf] %v270_v2  ;;  %v280_v7 = vld [vmem:[%s10003_s9 + $0x38] sm:$0xf]  ;;  %v282_v8 = vld [vmem:[%s10003_s9 + $0x40] sm:$0xf] }
  0x17   : > { %273 = vst [vmem:[%s247_s10 + $0xc] sm:$0xf] %v272_v3  ;;  %v284_v9 = vld [vmem:[%s10003_s9 + $0x48] sm:$0xf]  ;;  %v286_v10 = vld [vmem:[%s10003_s9 + $0x50] sm:$0xf] }
  0x18   : > { %275 = vst [vmem:[%s247_s10 + $0x10] sm:$0xf] %v274_v4  ;;  %v288_v11 = vld [vmem:[%s10003_s9 + $0x58] sm:$0xf]  ;;  %v290_v12 = vld [vmem:[%s10003_s9 + $0x60] sm:$0xf] }
  0x19   : > { %277 = vst [vmem:[%s247_s10 + $0x14] sm:$0xf] %v276_v5  ;;  %v292_v13 = vld [vmem:[%s10003_s9 + $0x68] sm:$0xf]  ;;  %v294_v14 = vld [vmem:[%s10003_s9 + $0x70] sm:$0xf] }
  0x1a   : > { %279 = vst [vmem:[%s247_s10 + $0x18] sm:$0xf] %v278_v6  ;;  %v296_v15 = vld [vmem:[%s10003_s9 + $0x78] sm:$0xf] }
  0x1b   : > { %281 = vst [vmem:[%s247_s10 + $0x1c] sm:$0xf] %v280_v7 }
  0x1c   : > { %283 = vst [vmem:[%s247_s10 + $0x20] sm:$0xf] %v282_v8 }
  0x1d   : > { %285 = vst [vmem:[%s247_s10 + $0x24] sm:$0xf] %v284_v9 }
  0x1e   : > { %287 = vst [vmem:[%s247_s10 + $0x28] sm:$0xf] %v286_v10 }
  0x1f   : > { %289 = vst [vmem:[%s247_s10 + $0x2c] sm:$0xf] %v288_v11 }
  0x20   : > { %291 = vst [vmem:[%s247_s10 + $0x30] sm:$0xf] %v290_v12 }
  0x21   : > { %293 = vst [vmem:[%s247_s10 + $0x34] sm:$0xf] %v292_v13 }
  0x22   : > { %295 = vst [vmem:[%s247_s10 + $0x38] sm:$0xf] %v294_v14 }
  0x23   : > { %297 = vst [vmem:[%s247_s10 + $0x3c] sm:$0xf] %v296_v15 }
  0x24 PF: > { %p8752_p8 = scmp.ge.s32.totalorder %s9912_s22, 1  ;;  %p352_p9 = scmp.lt.s32.totalorder %s9912_s22, 3 }
  0x26   : > { %p353_p10 = pnand %p8752_p8, %p352_p9 }
  0x28   : > { %356 = sbr.rel (%p353_p10) target bundleno = 2519 (0x9d7), region = 77 }
  0x2d   : > { %s8755_s11 = sshll.u32 %s9904_s20, 3  ;;  %vm461_vm0 = vcmask 130048   ;;  %s9914_s25 = smov 112   ;;  %v9479_v56 = vld [vmem:[%s13696_s2 + $0x10] sm:$0xff]  ;;  %v9477_v57 = vld [vmem:[%s13696_s2] sm:$0xff]  ;;  %v9478_v58 = vld [vmem:[%s13696_s2 + $0x8] sm:$0xff] }
  0x2e   : > { %p411_p11 = scmp.lt.s32.totalorder %s8755_s11, 15  ;;  %v9483_v59 = vld [vmem:[%s13696_s2 + $0x30] sm:$0xff]  ;;  %v9481_v60 = vld [vmem:[%s13696_s2 + $0x20] sm:$0xff]  ;;  %v9480_v61 = vld [vmem:[%s13696_s2 + $0x18] sm:$0xff]  ;;  %s9915_s7 = smov 96   ;;  %vm1075_vm1 = vcmask 1043459  }
  0x2f   : > { %v9486_v62 = vld [vmem:[%s13696_s2 + $0x48] sm:$0xff]  ;;  %v9484_v63 = vld [vmem:[%s13696_s2 + $0x38] sm:$0xff]  ;;  %v9489_v1 = vld [vmem:[%s13696_s2 + $0x60] sm:$0xff]  ;;  %vm1071_vm2 = vcmask 1042434   ;;  %vm1062_vm3 = vcmask 1040384   ;;  %vm1067_vm4 = vcmask 1041409  }
  0x30   : > { %s13908_s11 = smov (!%p411_p11, %s8755_s11), 15  ;;  %v9482_v0 = vld [vmem:[%s13696_s2 + $0x28] sm:$0xff]  ;;  %v9487_v2 = vld [vmem:[%s13696_s2 + $0x50] sm:$0xff]  ;;  %v9485_v3 = vld [vmem:[%s13696_s2 + $0x40] sm:$0xff]  ;;  %vm832_vm5 = vcmask 1047556   ;;  %vm444_vm6 = vcmask 64512  }
  0x31   : > { %s9427_s12 = sshll.u32 %s13908_s11, 3  ;;  %v9492_v4 = vld [vmem:[%s13696_s2 + $0x78] sm:$0xff]  ;;  %v9490_v5 = vld [vmem:[%s13696_s2 + $0x68] sm:$0xff]  ;;  %v9491_v9 = vld [vmem:[%s13696_s2 + $0x70] sm:$0xff]  ;;  %vm1339_vm7 = vcmask 1044484   ;;  %vm1341_vm8 = vcmask 1045509  }
  0x32   : > { %s10027_s15 = scalar_lea.vmem %s13694_s0, %s9427_s12  ;;  %s10032_s24 = scalar_lea.vmem %s13695_s1, %s9427_s12  ;;  %v9488_v6 = vld [vmem:[%s13696_s2 + $0x58] sm:$0xff]  ;;  %vm1343_vm9 = vcmask 1046534   ;;  %vm1345_vm10 = vcmask 1047559   ;;  %vm8426_vm15 = vcmask 261120  }
  0x33   : > { %v9461_v16 = vld [vmem:[%s10027_s15] sm:$0xff]  ;;  %v9438_v18 = vld [vmem:[%s10032_s24 + $0x8] sm:$0xff]  ;;  %v9439_v19 = vld [vmem:[%s10032_s24 + $0x10] sm:$0xff]  ;;  %s9921_s30 = smov 80   ;;  %s9922_s10 = smov 16  }
  0x34   : > { %v9437_v17 = vld [vmem:[%s10032_s24] sm:$0xff]  ;;  %v9440_v20 = vld [vmem:[%s10032_s24 + $0x18] sm:$0xff]  ;;  %2244 = vrot.lane.b32.xlu0 %v9461_v16, %s9914_s25  ;;  %v635_v23 = vsel %vm461_vm0, %v9438_v18, 0  ;;  %v665_v24 = vsel %vm461_vm0, %v9439_v19, 0  ;;  %v9443_v27 = vld [vmem:[%s10032_s24 + $0x30] sm:$0xff]  ;;  %s9923_s16 = smov 32  }
  0x35   : > { %v9444_v21 = vld [vmem:[%s10032_s24 + $0x38] sm:$0xff]  ;;  %v605_v22 = vsel %vm461_vm0, %v9437_v17, 0  ;;  %644 = vmatpush.bf16.xpose.msra.mxu1 %v635_v23  ;;  %v695_v25 = vsel %vm461_vm0, %v9440_v20, 0  ;;  %674 = vmatpush.bf16.xpose.msra.mxu2 %v665_v24  ;;  %v9462_v28 = vld [vmem:[%s10027_s15 + $0x8] sm:$0xff]  ;;  %v9469_v29 = vld [vmem:[%s10032_s24] sm:$0xff]  ;;  %v785_v31 = vsel %vm461_vm0, %v9443_v27, 0 }
  0x36   : > { %614 = vmatpush.bf16.xpose.msra.mxu0 %v605_v22  ;;  %v815_v26 = vsel %vm461_vm0, %v9444_v21, 0  ;;  %704 = vmatpush.bf16.xpose.msra.mxu3 %v695_v25  ;;  %v9441_v30 = vld [vmem:[%s10032_s24 + $0x20] sm:$0xff]  ;;  %v9442_v32 = vld [vmem:[%s10032_s24 + $0x28] sm:$0xff]  ;;  %v9431_v37 = vld [vmem:[%s10027_s15 + $0x10] sm:$0xff]  ;;  %s9924_s17 = smov 48   ;;  %s359_s26 = sand.u32 1, %s9896_s18  }
  0x37   : > { %v9470_v33 = vld [vmem:[%s10032_s24 + $0x8] sm:$0xff]  ;;  %v9429_v34 = vld [vmem:[%s10027_s15] sm:$0xff]  ;;  %2278 = vrot.lane.b32.xlu1 %v9462_v28, %s9914_s25  ;;  %v725_v35 = vsel %vm461_vm0, %v9441_v30, 0  ;;  %2251 = vrot.lane.b32.xlu2 %v9469_v29, %s9914_s25  ;;  %v755_v38 = vsel %vm461_vm0, %v9442_v32, 0  ;;  %v9916_v30 = vmov 286326784   ;;  %s13173_s29 = sshll.u32 %s359_s26, 6 }
  0x38   : > { %v9430_v36 = vld [vmem:[%s10027_s15 + $0x8] sm:$0xff]  ;;  %v9432_v39 = vld [vmem:[%s10027_s15 + $0x18] sm:$0xff]  ;;  %v9471_v40 = vld [vmem:[%s10032_s24 + $0x10] sm:$0xff]  ;;  %s13222_s18 = scalar_lea.vmem [#allocation6], %s13173_s29 }
  0x39   : > { %v9463_v41 = vld [vmem:[%s10027_s15 + $0x10] sm:$0xff]  ;;  %v9464_v42 = vld [vmem:[%s10027_s15 + $0x18] sm:$0xff]  ;;  %v9465_v43 = vld [vmem:[%s10027_s15 + $0x20] sm:$0xff] }
  0x3a   : > { %v9472_v44 = vld [vmem:[%s10032_s24 + $0x18] sm:$0xff]  ;;  %v9473_v45 = vld [vmem:[%s10032_s24 + $0x20] sm:$0xff]  ;;  %v9434_v47 = vld [vmem:[%s10027_s15 + $0x28] sm:$0xff] }
  0x3b   : > { %v9433_v46 = vld [vmem:[%s10027_s15 + $0x20] sm:$0xff]  ;;  %v9435_v48 = vld [vmem:[%s10027_s15 + $0x30] sm:$0xff]  ;;  %v9436_v49 = vld [vmem:[%s10027_s15 + $0x38] sm:$0xff] }
  0x3c   : > { %2285 = vrot.lane.b32.xlu0 %v9470_v33, %s9914_s25  ;;  %8778 = vmatmul.msk.bf16.vlgmr.msra.gmra.mxu1 %vm461_vm0, %v9430_v36  ;;  %v9474_v50 = vld [vmem:[%s10032_s24 + $0x28] sm:$0xff]  ;;  %v9467_v52 = vld [vmem:[%s10027_s15 + $0x30] sm:$0xff]  ;;  %v9468_v53 = vld [vmem:[%s10027_s15 + $0x38] sm:$0xff] }
  0x3d   : > { %794 = vmatpush.bf16.xpose.msrb.mxu2 %v785_v31  ;;  %764 = vmatpush.bf16.xpose.msrb.mxu1 %v755_v38  ;;  %v9466_v51 = vld [vmem:[%s10027_s15 + $0x28] sm:$0xff]  ;;  %v9475_v54 = vld [vmem:[%s10032_s24 + $0x30] sm:$0xff]  ;;  %v9476_v55 = vld [vmem:[%s10032_s24 + $0x38] sm:$0xff]  ;;  %v1125_v31 = vunpack.c.l.s4 %v9916_v30 }
  0x3e   : > { %824 = vmatpush.bf16.xpose.msrb.mxu3 %v815_v26  ;;  %734 = vmatpush.bf16.xpose.msrb.mxu0 %v725_v35  ;;  %v9501_v7 = vld [vmem:[%s10032_s24] sm:$0xff]  ;;  %v9494_v8 = vld [vmem:[%s10027_s15 + $0x8] sm:$0xff]  ;;  %v9495_v10 = vld [vmem:[%s10027_s15 + $0x10] sm:$0xff] }
  0x3f   : > { %8769 = vmatmul.msk.bf16.vlgmr.msra.gmra.mxu0 %vm461_vm0, %v9429_v34  ;;  %8787 = vmatmul.msk.bf16.vlgmr.msra.gmra.mxu2 %vm461_vm0, %v9431_v37  ;;  %v9503_v11 = vld [vmem:[%s10032_s24 + $0x10] sm:$0xff]  ;;  %v9493_v12 = vld [vmem:[%s10027_s15] sm:$0xff]  ;;  %v9504_v13 = vld [vmem:[%s10032_s24 + $0x18] sm:$0xff]  ;;  %v10205_v38 = vunpack.c.0.s8 %v1125_v31 }
  0x40   : > { %8796 = vmatmul.msk.bf16.vlgmr.msra.gmra.mxu3 %vm461_vm0, %v9432_v39  ;;  %2319 = vrot.lane.b32.xlu1 %v9471_v40, %s9914_s25  ;;  %v9497_v14 = vld [vmem:[%s10027_s15 + $0x20] sm:$0xff]  ;;  %v9502_v15 = vld [vmem:[%s10032_s24 + $0x8] sm:$0xff]  ;;  %v9496_v18 = vld [vmem:[%s10027_s15 + $0x18] sm:$0xff] }
  0x41   : > { %2312 = vrot.lane.b32.xlu2 %v9463_v41, %s9914_s25  ;;  %v9498_v16 = vld [vmem:[%s10027_s15 + $0x28] sm:$0xff]  ;;  %v9507_v19 = vld [vmem:[%s10032_s24 + $0x30] sm:$0xff]  ;;  %v9500_v20 = vld [vmem:[%s10027_s15 + $0x38] sm:$0xff] }
  0x42   : > { %v9506_v17 = vld [vmem:[%s10032_s24 + $0x28] sm:$0xff]  ;;  %v9505_v21 = vld [vmem:[%s10032_s24 + $0x20] sm:$0xff]  ;;  %v9499_v27 = vld [vmem:[%s10027_s15 + $0x30] sm:$0xff] }
  0x43   : > { %v1056_v22 = vld [vmem:[%s13697_s3] sm:$0xf] }
  0x44   : > { %2346 = vrot.lane.b32.xlu0 %v9464_v42, %s9914_s25  ;;  %v1060_v24 = vrot.slane %v1056_v22, 3 }
  0x46   : > { %v1076_v25 = vsel %vm1075_vm1, %v1056_v22, %v1060_v24  ;;  %v1072_v28 = vsel %vm1071_vm2, %v1056_v22, %v1060_v24  ;;  %v10200_v33 = vsel %vm1062_vm3, %v1056_v22, %v1060_v24  ;;  %v1068_v34 = vsel %vm1067_vm4, %v1056_v22, %v1060_v24 }
  0x47   : > { %v1078_v26 = vrot.slane %v1076_v25, 3  ;;  %v1074_v32 = vrot.slane %v1072_v28, 2  ;;  %v1070_v36 = vrot.slane %v1068_v34, 1  ;;  %v1093_v40 = vunpack.i.h.s16 %v10200_v33 }
  0x48   : > { %2380 = vrot.lane.b32.xlu1 %v9465_v43, %s9914_s25  ;;  %v10211_v43 = vld [vmem:[%s13697_s3 + $0x4] sm:$0xf] }
  0x49   : > { %2353 = vrot.lane.b32.xlu2 %v9472_v44, %s9914_s25  ;;  %v1099_v29 = vunpack.i.h.s16 %v1078_v26  ;;  %v1097_v39 = vunpack.i.h.s16 %v1074_v32  ;;  %v1095_v42 = vunpack.i.h.s16 %v1070_v36 }
  0x4b   : > { %v1115_v37 = vpack.i.b16 %v1099_v29, %v1099_v29 }
  0x4c   : > { %2387 = vrot.lane.b32.xlu0 %v9473_v45, %s9914_s25  ;;  %8814 = vmatmul.msk.bf16.vlgmr.msrb.gmra.mxu1 %vm461_vm0, %v9434_v47  ;;  %v9917_v45 = vmov 1983009808  }
  0x4d   : > { %v1155_v47 = vperm.slane %v1115_v37, %v10205_v38 }
  0x4f   : > { %8805 = vmatmul.msk.bf16.vlgmr.msrb.gmra.mxu0 %vm461_vm0, %v9433_v46  ;;  %8823 = vmatmul.msk.bf16.vlgmr.msrb.gmra.mxu2 %vm461_vm0, %v9435_v48  ;;  %v837_v46 = vunpack.c.l.s4 %v9917_v45  ;;  %v1113_v48 = vpack.i.b16 %v1097_v39, %v1097_v39 }
  0x50   : > { %8832 = vmatmul.msk.bf16.vlgmr.msrb.gmra.mxu3 %vm461_vm0, %v9436_v49  ;;  %2421 = vrot.lane.b32.xlu1 %v9474_v50, %s9914_s25  ;;  %v1109_v49 = vpack.i.b16 %v1093_v40, %v1093_v40 }
  0x51   : > { %2414 = vrot.lane.b32.xlu2 %v9466_v51, %s9914_s25  ;;  %v8835_v51 = vpack.i.b16 %v1074_v32, %v1074_v32 }
  0x54   : > { %2448 = vrot.lane.b32.xlu0 %v9467_v52, %s9914_s25  ;;  %v10217_v52 = vrot.slane %v10211_v43, 3 }
  0x58   : > { %2482 = vrot.lane.b32.xlu1 %v9468_v53, %s9914_s25 }
  0x59   : > { %2455 = vrot.lane.b32.xlu2 %v9475_v54, %s9914_s25  ;;  %v1111_v54 = vpack.i.b16 %v1095_v42, %v1095_v42 }
  0x5c   : > { %2489 = vrot.lane.b32.xlu0 %v9476_v55, %s9914_s25  ;;  %v8836_v55 = vpack.i.b16 %v1078_v26, %v1078_v26 }
  0x60   : > { %3371 = vrot.lane.b32.xlu1 %v9479_v56, %s9914_s25 }
  0x61   : > { %3323 = vrot.lane.b32.xlu2 %v9477_v57, %s9914_s25  ;;  %v10219_v57 = vunpack.c.0.s8 %v837_v46 }
  0x64   : > { %3347 = vrot.lane.b32.xlu0 %v9478_v58, %s9914_s25 }
  0x68   : > { %3467 = vrot.lane.b32.xlu1 %v9483_v59, %s9914_s25  ;;  %v9918_v59 = vmov 1934713408  }
  0x69   : > { %3419 = vrot.lane.b32.xlu2 %v9481_v60, %s9914_s25  ;;  %v885_v60 = vunpack.c.l.s4 %v9918_v59 }
  0x6b   : > { %v10261_v31 = vunpack.c.0.s8 %v885_v60 }
  0x6c   : > { %3395 = vrot.lane.b32.xlu0 %v9480_v61, %s9914_s25  ;;  %v10223_v61 = vunpack.c.l.bf16 %v1155_v47 }
  0x70   : > { %3539 = vrot.lane.b32.xlu1 %v9486_v62, %s9914_s25  ;;  %v1147_v62 = vperm.slane %v1113_v48, %v10205_v38 }
  0x71   : > { %3491 = vrot.lane.b32.xlu2 %v9484_v63, %s9914_s25  ;;  %v1131_v63 = vperm.slane %v1109_v49, %v10205_v38 }
  0x73   : > { %v10253_v22 = vunpack.c.l.bf16 %v1131_v63 }
  0x74   : > { %3443 = vrot.lane.b32.xlu0 %v9482_v0, %s9914_s25 }
  0x78   : > { %3611 = vrot.lane.b32.xlu1 %v9489_v1, %s9914_s25 }
  0x79   : > { %3563 = vrot.lane.b32.xlu2 %v9487_v2, %s9914_s25  ;;  %v1143_v2 = vperm.slane %v8835_v51, %v10205_v38 }
  0x7b   : > { %v1208_v24 = vunpack.c.l.bf16 %v1143_v2 }
  0x7c   : > { %3515 = vrot.lane.b32.xlu0 %v9485_v3, %s9914_s25  ;;  %v8834_v3 = vpack.i.b16 %v1070_v36, %v1070_v36  ;;  %v1227_v36 = vperm.slane %v10223_v61, 0 }
  0x7d   : > { %v10274_v49 = vperm.slane %v1208_v24, 0 }
  0x7e   : > { %v1135_v25 = vperm.slane %v8834_v3, %v10205_v38 }
  0x80   : > { %3683 = vrot.lane.b32.xlu1 %v9492_v4, %s9914_s25  ;;  %v1083_v4 = vsel %vm1067_vm4, %v10211_v43, %v10217_v52  ;;  %v1206_v45 = vunpack.c.l.bf16 %v1135_v25 }
  0x81   : > { %3635 = vrot.lane.b32.xlu2 %v9490_v5, %s9914_s25  ;;  %v1086_v5 = vsel %vm1071_vm2, %v10211_v43, %v10217_v52 }
  0x84   : > { %3587 = vrot.lane.b32.xlu0 %v9488_v6, %s9914_s25 }
  0x88   : > { %3955 = vrot.lane.b32.xlu1 %v9501_v7, %s9915_s7 }
  0x89   : > { %3982 = vrot.lane.b32.xlu2 %v9494_v8, %s9915_s7 }
  0x8c   : > { %3659 = vrot.lane.b32.xlu0 %v9491_v9, %s9914_s25 }
  0x90   : > { %4016 = vrot.lane.b32.xlu1 %v9495_v10, %s9915_s7  ;;  %v1139_v10 = vperm.slane %v1111_v54, %v10205_v38 }
  0x91   : > { %4023 = vrot.lane.b32.xlu2 %v9503_v11, %s9915_s7  ;;  %v10221_v58 = vpop.permute.xlu2 %2251  ;;  %v1151_v11 = vperm.slane %v8836_v55, %v10205_v38 }
  0x92   : > { %v10257_v28 = vunpack.c.l.bf16 %v1139_v10 }
  0x93   : > { %v1210_v29 = vunpack.c.l.bf16 %v1151_v11 }
  0x94   : > { %3948 = vrot.lane.b32.xlu0 %v9493_v12, %s9915_s7 }
  0x98   : > { %4057 = vrot.lane.b32.xlu1 %v9504_v13, %s9915_s7 }
  0x99   : > { %4084 = vrot.lane.b32.xlu2 %v9497_v14, %s9915_s7 }
  0x9b   : > { %v10271_v46 = vpop.permute.xlu2 %2312 }
  0x9c   : > { %3989 = vrot.lane.b32.xlu0 %v9502_v15, %s9915_s7 }
  0xa0   : > { %4118 = vrot.lane.b32.xlu1 %v9498_v16, %s9915_s7  ;;  %v8833_v16 = vpack.i.b16 %v10200_v33, %v10200_v33 }
  0xa1   : > { %4125 = vrot.lane.b32.xlu2 %v9506_v17, %s9915_s7 }
  0xa2   : > { %v1127_v33 = vperm.slane %v8833_v16, %v10205_v38 }
  0xa4   : > { %4050 = vrot.lane.b32.xlu0 %v9496_v18, %s9915_s7  ;;  %v10246_v18 = vunpack.c.l.bf16 %v1147_v62  ;;  %v1204_v62 = vunpack.c.l.bf16 %v1127_v33 }
  0xa6   : > { %v10192_v23 = vpop.permute.xlu0 %2244 }
  0xa8   : > { %4159 = vrot.lane.b32.xlu1 %v9507_v19, %s9915_s7  ;;  %v10248_v19 = vrot.slane %v1083_v4, 1 }
  0xa9   : > { %4186 = vrot.lane.b32.xlu2 %v9500_v20, %s9915_s7  ;;  %v10214_v50 = vpop.permute.xlu1 %2278  ;;  %v10250_v20 = vrot.slane %v1086_v5, 2 }
  0xaa   : > { %v1103_v37 = vunpack.i.h.s16 %v10248_v19 }
  0xab   : > { %v1105_v39 = vunpack.i.h.s16 %v10250_v20 }
  0xac   : > { %4091 = vrot.lane.b32.xlu0 %v9505_v21, %s9915_s7  ;;  %v1119_v3 = vpack.i.b16 %v1103_v37, %v1103_v37 }
  0xad   : > { %v10283_v4 = vpack.i.b16 %v1105_v39, %v1105_v39 }
  0xae   : > { %v10203_v35 = vpop.permute.xlu0 %2285 }
  0xb2   : > { %v10259_v30 = vpop.permute.xlu1 %2319 }
  0xb4   : > { %4152 = vrot.lane.b32.xlu0 %v9499_v27, %s9915_s7 }
  0xb6   : > { %v10227_v0 = vpop.permute.xlu0 %2346 }
  0xb9   : > { %v646_v44 = vpop.f32.mrf.mxu1 }
  0xba   : > { %v846_v56 = vrot.slane %v646_v44, 4 }
  0xbc   : > { %v616_v41 = vpop.f32.mrf.mxu0 }
  0xbd   : > { %v834_v53 = vrot.slane %v616_v41, 4 }
  0xbe   : > { %v10279_v54 = vpop.permute.xlu0 %2387 }
  0xc1   : > { %v10241_v15 = vpop.f32.mrf.mxu1 }
  0xc2   : > { %v676_v1 = vpop.f32.mrf.mxu2 }
  0xc3   : > { %v831_v6 = vrot.slane %v676_v1, 4  ;;  %v835_v7 = vsel %vm832_vm5, %v676_v1, %v834_v53  ;;  %v706_v8 = vpop.f32.mrf.mxu3  ;;  %v10277_v53 = vperm.slane %v1210_v29, 0  ;;  %v958_v1 = vrot.slane %v10241_v15, 4  ;;  %v10308_v29 = vpop.permute.xlu1 %2380 }
  0xc4   : > { %v618_v9 = vpop.f32.mrf.mxu0  ;;  %v843_v12 = vperm.slane %v835_v7, %v10219_v57  ;;  %v844_v13 = vrot.slane %v706_v8, 4  ;;  %v847_v14 = vsel %vm832_vm5, %v706_v8, %v846_v56  ;;  %v10289_v8 = vperm.slane %v1206_v45, 0 }
  0xc5   : > { %v855_v17 = vperm.slane %v847_v14, %v10219_v57  ;;  %v833_v21 = vsel %vm832_vm5, %v831_v6, %v616_v41  ;;  %v946_v56 = vrot.slane %v618_v9, 4 }
  0xc6   : > { %v894_v26 = vrot.slane %v843_v12, 4  ;;  %v845_v27 = vsel %vm832_vm5, %v844_v13, %v646_v44  ;;  %v839_v34 = vperm.slane %v833_v21, %v10219_v57  ;;  %v1089_v13 = vsel %vm1075_vm1, %v10211_v43, %v10217_v52 }
  0xc7   : > { %v892_v32 = vrot.slane %v855_v17, 4  ;;  %v851_v40 = vperm.slane %v845_v27, %v10219_v57  ;;  %v10299_v21 = vperm.slane %v1204_v62, 0  ;;  %v10315_v39 = vrot.slane %v1089_v13, 3 }
  0xc8   : > { %v895_v47 = vsel %vm832_vm5, %v855_v17, %v894_v26  ;;  %v882_v63 = vrot.slane %v839_v34, 4  ;;  %v1171_v26 = vperm.slane %v1119_v3, %v10205_v38 }
  0xc9   : > { %v893_v55 = vsel %vm832_vm5, %v892_v32, %v843_v12  ;;  %v766_v2 = vpop.f32.mrf.mxu1  ;;  %v880_v5 = vrot.slane %v851_v40, 4  ;;  %v10286_v6 = vperm.slane %v895_v47, %v10261_v31 }
  0xca   : > { %v678_v41 = vpop.f32.mrf.mxu2  ;;  %v10293_v12 = vperm.slane %v893_v55, %v10261_v31  ;;  %v870_v17 = vrot.slane %v766_v2, 4  ;;  %v883_v25 = vsel %vm832_vm5, %v851_v40, %v882_v63 }
  0xcb   : > { %v708_v48 = vpop.f32.mrf.mxu3  ;;  %v944_v59 = vrot.slane %v678_v41, 4  ;;  %v947_v7 = vsel %vm832_vm5, %v678_v41, %v946_v56  ;;  %v942_v33 = vrot.slane %v10286_v6, 4  ;;  %v881_v37 = vsel %vm832_vm5, %v880_v5, %v839_v34  ;;  %v10326_v34 = vpop.permute.xlu2 %2353 }
  0xcc   : > { %v736_v60 = vpop.f32.mrf.mxu0  ;;  %v959_v10 = vsel %vm832_vm5, %v708_v48, %v958_v1  ;;  %v956_v16 = vrot.slane %v708_v48, 4  ;;  %v10302_v24 = vperm.slane %v947_v7, %v10219_v57  ;;  %v938_v48 = vrot.slane %v10293_v12, 4  ;;  %v10334_v7 = vpop.permute.xlu0 %2448 }
  0xcd   : > { %v858_v11 = vrot.slane %v736_v60, 4  ;;  %v945_v14 = vsel %vm832_vm5, %v944_v59, %v618_v9  ;;  %v10311_v32 = vperm.slane %v959_v10, %v10219_v57  ;;  %v10332_v5 = vperm.slane %v881_v37, %v10261_v31  ;;  %13701 = vst [vmem:[#allocation7_spill] sm:$0xff] %v10334_v7  ;;  %v10358_v42 = vpop.permute.xlu1 %2421 }
  0xce   : > { %v10318_v41 = vperm.slane %v945_v14, %v10219_v57  ;;  %v957_v55 = vsel %vm832_vm5, %v956_v16, %v10241_v15  ;;  %v10339_v14 = vperm.slane %v883_v25, %v10261_v31 }
  0xcf   : > { %v10342_v16 = vperm.slane %v957_v55, %v10219_v57 }
  0xd1   : > { %v768_v37 = vpop.f32.mrf.mxu1 }
  0xd2   : > { %v796_v9 = vpop.f32.mrf.mxu2 }
  0xd3   : > { %v856_v40 = vrot.slane %v796_v9, 4  ;;  %v859_v45 = vsel %vm832_vm5, %v796_v9, %v858_v11  ;;  %v826_v47 = vpop.f32.mrf.mxu3 }
  0xd4   : > { %v867_v56 = vperm.slane %v859_v45, %v10219_v57  ;;  %v868_v59 = vrot.slane %v826_v47, 4  ;;  %v871_v62 = vsel %vm832_vm5, %v826_v47, %v870_v17  ;;  %v738_v13 = vpop.f32.mrf.mxu0 }
  0xd5   : > { %v857_v1 = vsel %vm832_vm5, %v856_v40, %v736_v60  ;;  %v879_v3 = vperm.slane %v871_v62, %v10219_v57  ;;  %v994_v40 = vrot.slane %v10318_v41, 4  ;;  %v10348_v62 = vunpack.c.l.bf16 %v1171_v26 }
  0xd6   : > { %v863_v15 = vperm.slane %v857_v1, %v10219_v57  ;;  %v918_v10 = vrot.slane %v867_v56, 4  ;;  %v869_v11 = vsel %vm832_vm5, %v868_v59, %v766_v2  ;;  %v970_v59 = vrot.slane %v738_v13, 4 }
  0xd7   : > { %v875_v17 = vperm.slane %v869_v11, %v10219_v57  ;;  %v916_v9 = vrot.slane %v879_v3, 4  ;;  %v982_v1 = vrot.slane %v768_v37, 4  ;;  %v930_v11 = vrot.slane %v10332_v5, 4 }
  0xd8   : > { %v906_v45 = vrot.slane %v863_v15, 4  ;;  %v919_v47 = vsel %vm832_vm5, %v879_v3, %v918_v10  ;;  %v934_v60 = vrot.slane %v10339_v14, 4 }
  0xd9   : > { %v904_v2 = vrot.slane %v875_v17, 4  ;;  %v927_v25 = vperm.slane %v919_v47, %v10261_v31  ;;  %v917_v55 = vsel %vm832_vm5, %v916_v9, %v867_v56 }
  0xda   : > { %v798_v63 = vpop.f32.mrf.mxu2  ;;  %v923_v27 = vperm.slane %v917_v55, %v10261_v31  ;;  %v907_v55 = vsel %vm832_vm5, %v875_v17, %v906_v45  ;;  %v10387_v17 = vpop.permute.xlu0 %2489 }
  0xdb   : > { %v968_v51 = vrot.slane %v798_v63, 4  ;;  %v971_v44 = vsel %vm832_vm5, %v798_v63, %v970_v59  ;;  %v828_v3 = vpop.f32.mrf.mxu3  ;;  %v943_v26 = vsel %vm832_vm5, %v927_v25, %v942_v33  ;;  %v905_v10 = vsel %vm832_vm5, %v904_v2, %v863_v15 }
  0xdc   : > { %v980_v47 = vrot.slane %v828_v3, 4  ;;  %v983_v56 = vsel %vm832_vm5, %v828_v3, %v982_v1  ;;  %v10363_v9 = vadd.f32 %v1227_v36, %v943_v26  ;;  %v979_v63 = vperm.slane %v971_v44, %v10219_v57  ;;  %v10377_v36 = vpop.permute.xlu2 %2414 }
  0xdd   : > { %v969_v7 = vsel %vm832_vm5, %v968_v51, %v738_v13  ;;  %v939_v59 = vsel %vm832_vm5, %v923_v27, %v938_v48  ;;  %v911_v33 = vperm.slane %v905_v10, %v10261_v31  ;;  %v991_v1 = vperm.slane %v983_v56, %v10219_v57 }
  0xde   : > { %v10371_v15 = vperm.slane %v969_v7, %v10219_v57  ;;  %v981_v2 = vsel %vm832_vm5, %v980_v47, %v768_v37  ;;  %v1275_v61 = vsel %vm461_vm0, %v10363_v9, -inf  ;;  %v13702_v51 = vperm.slane %v10246_v18, 0 }
  0xdf   : > { %1276 = vmax.xlane.f32.xlu1 %v1275_v61  ;;  %v931_v48 = vsel %vm832_vm5, %v911_v33, %v930_v11  ;;  %v995_v7 = vsel %vm832_vm5, %v10342_v16, %v994_v40  ;;  %v1107_v13 = vunpack.i.h.s16 %v10315_v39  ;;  %v10391_v45 = vperm.slane %v981_v2, %v10219_v57 }
  0xe0   : > { %v10381_v44 = vadd.f32 %v13702_v51, %v939_v59  ;;  %v1018_v37 = vrot.slane %v10371_v15, 4  ;;  %v13703_v3 = vperm.slane %v10253_v22, 0  ;;  %v936_v18 = vrot.slane %v923_v27, 4 }
  0xe1   : > { %v1030_v10 = vrot.slane %v979_v63, 4  ;;  %v915_v40 = vperm.slane %v907_v55, %v10261_v31  ;;  %v940_v47 = vrot.slane %v927_v25, 4  ;;  %v1028_v56 = vrot.slane %v991_v1, 4 }
  0xe2   : > { %v10395_v26 = vadd.f32 %v13703_v3, %v931_v48  ;;  %v1269_v11 = vsel %vm461_vm0, %v10381_v44, -inf  ;;  %v937_v2 = vsel %vm832_vm5, %v936_v18, %v10293_v12  ;;  %v1019_v22 = vsel %vm832_vm5, %v10391_v45, %v1018_v37 }
  0xe3   : > { %1270 = vmax.xlane.f32.xlu2 %v1269_v11  ;;  %v935_v27 = vsel %vm832_vm5, %v915_v40, %v934_v60  ;;  %v941_v61 = vsel %vm832_vm5, %v940_v47, %v10286_v6  ;;  %v932_v51 = vrot.slane %v915_v40, 4  ;;  %v10410_v25 = vperm.slane %v995_v7, %v10261_v31 }
  0xe4   : > { %v1257_v59 = vsel %vm461_vm0, %v10395_v26, -inf  ;;  %v13704_v55 = vperm.slane %v10257_v28, 0  ;;  %v928_v3 = vrot.slane %v911_v33, 4  ;;  %v13705_v12 = vrot.slane %v10311_v32, 4  ;;  %v10431_v33 = vpop.permute.xlu1 %2482 }
  0xe5   : > { %1258 = vmax.xlane.f32.xlu0 %v1257_v59  ;;  %v8840_v60 = vpack.i.b16 %v10315_v39, %v10315_v39  ;;  %v10423_v18 = vadd.f32 %v10274_v49, %v937_v2  ;;  %v10426_v6 = vperm.slane %v1019_v22, %v10261_v31  ;;  %v13706_v28 = vperm.slane %v10283_v4, %v10205_v38 }
  0xe6   : > { %v10414_v48 = vadd.f32 %v13704_v55, %v935_v27  ;;  %v1005_v37 = vsel %vm832_vm5, %v13705_v12, %v10302_v24  ;;  %v1123_v11 = vpack.i.b16 %v1107_v13, %v1107_v13  ;;  %v1031_v40 = vsel %vm832_vm5, %v991_v1, %v1030_v10  ;;  %v10466_v27 = vpop.permute.xlu0 %3347 }
  0xe7   : > { %v1217_v7 = vunpack.c.l.bf16 %v13706_v28  ;;  %v10437_v39 = vadd.f32 %v10277_v53, %v941_v61  ;;  %v1029_v49 = vsel %vm832_vm5, %v1028_v56, %v979_v63  ;;  %v933_v59 = vsel %vm832_vm5, %v932_v51, %v10339_v14  ;;  %v10456_v56 = vpop.permute.xlu2 %2455 }
  0xe8   : > { %v1263_v47 = vsel %vm461_vm0, %v10414_v48, -inf  ;;  %v1046_v4 = vrot.slane %v10410_v25, 4  ;;  %v10444_v13 = vperm.slane %v1005_v37, %v10261_v31  ;;  %v13707_v2 = vrot.slane %v10302_v24, 4 }
  0xe9   : > { %1264 = vmax.xlane.f32.xlu1 %v1263_v47  ;;  %v1231_v10 = vperm.slane %v10348_v62, 0  ;;  %v929_v53 = vsel %vm832_vm5, %v928_v3, %v10332_v5  ;;  %v1183_v63 = vperm.slane %v8840_v60, %v10205_v38  ;;  %v8838_v14 = vpack.i.b16 %v10248_v19, %v10248_v19 }
  0xea   : > { %v1007_v1 = vsel %vm832_vm5, %v10311_v32, %v13707_v2  ;;  %v1266_v22 = vsel %vm461_vm0, %v10423_v18, -inf  ;;  %v1047_v24 = vsel %vm832_vm5, %v10426_v6, %v1046_v4  ;;  %v10463_v32 = vperm.slane %v1029_v49, %v10261_v31 }
  0xeb   : > { %v1039_v62 = vperm.slane %v1031_v40, %v10261_v31  ;;  %1267 = vmax.xlane.f32.xlu2 %v1266_v22  ;;  %v1272_v5 = vsel %vm461_vm0, %v10437_v39, -inf  ;;  %v10471_v19 = vadd.f32 %v10289_v8, %v933_v59  ;;  %v1233_v61 = vperm.slane %v1217_v7, 0 }
  0xec   : > { %v1187_v51 = vperm.slane %v1123_v11, %v10205_v38  ;;  %v1016_v55 = vrot.slane %v10391_v45, 4  ;;  %v1050_v3 = vrot.slane %v10444_v13, 4  ;;  %v1015_v12 = vperm.slane %v1007_v1, %v10261_v31  ;;  %v10493_v2 = vpop.permute.xlu1 %3371 }
  0xed   : > { %1273 = vmax.xlane.f32.xlu0 %v1272_v5  ;;  %v1081_v37 = vsel %vm1062_vm3, %v10211_v43, %v10217_v52  ;;  %v10480_v60 = vadd.f32 %v1231_v10, %v1047_v24  ;;  %v10483_v28 = vadd.f32 %v10299_v21, %v929_v53  ;;  %v1218_v8 = vunpack.c.l.bf16 %v1183_v63 }
  0xee   : > { %v1167_v7 = vperm.slane %v8838_v14, %v10205_v38  ;;  %v1051_v45 = vsel %vm832_vm5, %v10463_v32, %v1050_v3  ;;  %v1052_v11 = vrot.slane %v1039_v62, 4  ;;  %v8837_v40 = vpack.i.b16 %v1081_v37, %v1081_v37  ;;  %v10511_v3 = vpop.permute.xlu0 %3395 }
  0xef   : > { %v1101_v47 = vunpack.i.h.s16 %v1081_v37  ;;  %v992_v49 = vrot.slane %v10342_v16, 4  ;;  %v1260_v59 = vsel %vm461_vm0, %v10471_v19, -inf  ;;  %v1219_v43 = vunpack.c.l.bf16 %v1187_v51 }
  0xf0   : > { %v1054_v52 = vrot.slane %v1015_v12, 4  ;;  %v1017_v21 = vsel %vm832_vm5, %v1016_v55, %v10371_v15  ;;  %v1254_v1 = vsel %vm461_vm0, %v10483_v28, -inf  ;;  %v10497_v10 = vadd.f32 %v1233_v61, %v1051_v45  ;;  %v10508_v55 = vpop.permute.xlu2 %3323 }
  0xf1   : > { %1261 = vmax.xlane.f32.xlu1 %v1260_v59  ;;  %v1117_v4 = vpack.i.b16 %v1101_v47, %v1101_v47  ;;  %v1234_v53 = vperm.slane %v1218_v8, 0  ;;  %v1044_v16 = vrot.slane %v10426_v6, 4  ;;  %v1287_v63 = vsel %vm461_vm0, %v10480_v60, -inf }
  0xf2   : > { %v1053_v14 = vsel %vm832_vm5, %v1052_v11, %v1015_v12  ;;  %v1214_v22 = vunpack.c.l.bf16 %v1167_v7  ;;  %v1159_v24 = vperm.slane %v8837_v40, %v10205_v38  ;;  %v1235_v15 = vperm.slane %v1219_v43, 0 }
  0xf3   : > { %1288 = vmax.xlane.f32.xlu2 %v1287_v63  ;;  %v993_v5 = vsel %vm832_vm5, %v992_v49, %v10318_v41  ;;  %v1023_v51 = vperm.slane %v1017_v21, %v10261_v31  ;;  %v1163_v61 = vperm.slane %v1117_v4, %v10205_v38  ;;  %v1055_v6 = vsel %vm832_vm5, %v1039_v62, %v1054_v52 }
  0xf4   : > { %v1293_v12 = vsel %vm461_vm0, %v10497_v10, -inf  ;;  %v1045_v37 = vsel %vm832_vm5, %v1044_v16, %v10410_v25  ;;  %v10517_v8 = vadd.f32 %v1234_v53, %v1053_v14  ;;  %v1230_v41 = vperm.slane %v1214_v22, 0  ;;  %v10528_v52 = vpop.permute.xlu1 %3467 }
  0xf5   : > { %1255 = vmax.xlane.f32.xlu0 %v1254_v1  ;;  %v999_v7 = vperm.slane %v993_v5, %v10261_v31  ;;  %v1212_v45 = vunpack.c.l.bf16 %v1159_v24  ;;  %v10520_v11 = vadd.f32 %v1235_v15, %v1055_v6  ;;  %v1040_v40 = vrot.slane %v1023_v51, 4 }
  0xf6   : > { %v1213_v47 = vunpack.c.l.bf16 %v1163_v61  ;;  %v8839_v62 = vpack.i.b16 %v10250_v20, %v10250_v20  ;;  %v1296_v49 = vsel %vm461_vm0, %v10517_v8, -inf  ;;  %v10526_v59 = vadd.f32 %v1230_v41, %v1045_v37  ;;  %v10539_v14 = vpop.permute.xlu0 %3443 }
  0xf7   : > { %v1228_v25 = vperm.slane %v1212_v45, 0  ;;  %v1042_v43 = vrot.slane %v999_v7, 4  ;;  %v1299_v21 = vsel %vm461_vm0, %v10520_v11, -inf  ;;  %v1041_v4 = vsel %vm832_vm5, %v1040_v40, %v999_v7 }
  0xf8   : > { %v1229_v1 = vperm.slane %v1213_v47, 0  ;;  %v1175_v53 = vperm.slane %v8839_v62, %v10205_v38  ;;  %v10535_v16 = vpop.permute.xlu2 %3419  ;;  %v1284_v22 = vsel %vm461_vm0, %v10526_v59, -inf  ;;  %v1048_v5 = vrot.slane %v10463_v32, 4 }
  0xf9   : > { %1294 = vmax.xlane.f32.xlu1 %v1293_v12  ;;  %v1043_v20 = vsel %vm832_vm5, %v1023_v51, %v1042_v43  ;;  %v10537_v63 = vadd.f32 %v1228_v25, %v1041_v4 }
  0xfa   : > { %v10543_v24 = vadd.f32 %v1229_v1, %v1043_v20  ;;  %v1216_v15 = vunpack.c.l.bf16 %v1175_v53  ;;  %v1049_v12 = vsel %vm832_vm5, %v1048_v5, %v10444_v13 }
  0xfb   : > { %1297 = vmax.xlane.f32.xlu2 %v1296_v49  ;;  %v1278_v61 = vsel %vm461_vm0, %v10537_v63, -inf }
  0xfc   : > { %v1281_v51 = vsel %vm461_vm0, %v10543_v24, -inf  ;;  %v1232_v6 = vperm.slane %v1216_v15, 0  ;;  %v10552_v37 = vpop.permute.xlu1 %3539 }
  0xfd   : > { %1300 = vmax.xlane.f32.xlu0 %v1299_v21 }
  0xfe   : > { %v10554_v41 = vadd.f32 %v1232_v6, %v1049_v12  ;;  %v10558_v45 = vpop.permute.xlu0 %3515  ;;  %v9919_v12 = vmov -inf  }
  0xff   : > { %445 = vst.msk [vmem:[#allocation2] sm:$0xff] %vm444_vm6, %v9919_v12 }
 0x100   : > { %v10556_v7 = vpop.permute.xlu2 %3491  ;;  %v1290_v32 = vsel %vm461_vm0, %v10554_v41, -inf  ;;  %446 = vst.msk [vmem:[#allocation2 + $0x8] sm:$0xff] %vm444_vm6, %v9919_v12 }
 0x101   : > { %1285 = vmax.xlane.f32.xlu1 %v1284_v22  ;;  %447 = vst.msk [vmem:[#allocation2 + $0x10] sm:$0xff] %vm444_vm6, %v9919_v12 }
 0x102   : > { %448 = vst.msk [vmem:[#allocation2 + $0x18] sm:$0xff] %vm444_vm6, %v9919_v12 }
 0x103   : > { %1279 = vmax.xlane.f32.xlu2 %v1278_v61  ;;  %449 = vst.msk [vmem:[#allocation2 + $0x20] sm:$0xff] %vm444_vm6, %v9919_v12 }
 0x104   : > { %v10562_v40 = vpop.permute.xlu1 %3611  ;;  %450 = vst.msk [vmem:[#allocation2 + $0x28] sm:$0xff] %vm444_vm6, %v9919_v12 }
 0x105   : > { %1282 = vmax.xlane.f32.xlu0 %v1281_v51  ;;  %13708 = vst [vmem:[#allocation8_spill] sm:$0xff] %v10562_v40 }
 0x106   : > { %v10566_v62 = vpop.permute.xlu0 %3587  ;;  %451 = vst.msk [vmem:[#allocation2 + $0x30] sm:$0xff] %vm444_vm6, %v9919_v12 }
 0x107   : > { %13709 = vst [vmem:[#allocation9_spill] sm:$0xff] %v10566_v62 }
 0x108   : > { %v10564_v47 = vpop.permute.xlu2 %3563  ;;  %452 = vst.msk [vmem:[#allocation2 + $0x38] sm:$0xff] %vm444_vm6, %v9919_v12 }
 0x10c   : > { %v10568_v49 = vpop.permute.xlu1 %3683 }
 0x10d   : > { %1291 = vmax.xlane.f32.xlu0 %v1290_v32  ;;  %13710 = vst [vmem:[#allocation10_spill] sm:$0xff] %v10568_v49 }
 0x10e   : > { %v10572_v25 = vpop.permute.xlu0 %3659 }
 0x10f   : > { %13712 = vst [vmem:[#allocation12_spill] sm:$0xff] %v10572_v25 }
 0x110   : > { %v10570_v13 = vpop.permute.xlu2 %3635 }
 0x111   : > { %13711 = vst [vmem:[#allocation11_spill] sm:$0xff] %v10570_v13 }
 0x114   : > { %v10574_v43 = vpop.permute.xlu1 %3955 }
 0x115   : > { %13713 = vst [vmem:[#allocation13_spill] sm:$0xff] %v10574_v43 }
 0x116   : > { %v10578_v4 = vpop.permute.xlu0 %3948 }
 0x117   : > { %13715 = vst [vmem:[#allocation15_spill] sm:$0xff] %v10578_v4 }
 0x118   : > { %v10576_v21 = vpop.permute.xlu2 %3982 }
 0x119   : > { %13714 = vst [vmem:[#allocation14_spill] sm:$0xff] %v10576_v21 }
 0x11c   : > { %v10580_v1 = vpop.permute.xlu1 %4016 }
 0x11d   : > { %13716 = vst [vmem:[#allocation16_spill] sm:$0xff] %v10580_v1  ;;  %v1318_v1 = vlaneseq }
 0x11e   : > { %v10584_v20 = vpop.permute.xlu0 %3989 }
 0x11f   : > { %13718 = vst [vmem:[#allocation18_spill] sm:$0xff] %v10584_v20 }
 0x120   : > { %v10582_v53 = vpop.permute.xlu2 %4023 }
 0x121   : > { %13717 = vst [vmem:[#allocation17_spill] sm:$0xff] %v10582_v53  ;;  %v10622_v53 = vand.u32 127, %v1318_v1 }
 0x124   : > { %v10586_v22 = vpop.permute.xlu1 %4057 }
 0x125   : > { %13719 = vst [vmem:[#allocation19_spill] sm:$0xff] %v10586_v22 }
 0x126   : > { %v10590_v5 = vpop.permute.xlu0 %4050 }
 0x127   : > { %13721 = vst [vmem:[#allocation21_spill] sm:$0xff] %v10590_v5 }
 0x128   : > { %v10588_v15 = vpop.permute.xlu2 %4084 }
 0x129   : > { %13720 = vst [vmem:[#allocation20_spill] sm:$0xff] %v10588_v15 }
 0x12c   : > { %v10592_v61 = vpop.permute.xlu1 %4118 }
 0x12d   : > { %13722 = vst [vmem:[#allocation22_spill] sm:$0xff] %v10592_v61 }
 0x12e   : > { %v10596_v6 = vpop.permute.xlu0 %4091 }
 0x12f   : > { %13724 = vst [vmem:[#allocation24_spill] sm:$0xff] %v10596_v6  ;;  %v1366_v6 = vshrl.u32 %v1318_v1, 7 }
 0x130   : > { %v10594_v51 = vpop.permute.xlu2 %4125 }
 0x131   : > { %13723 = vst [vmem:[#allocation23_spill] sm:$0xff] %v10594_v51  ;;  %v9508_v51 = vld [vmem:[%s10032_s24 + $0x38] sm:$0xff]  ;;  %9649 = vset.pattern.permute.xlu0 %v1366_v6  ;;  %9648 = vset.pattern.permute.xlu2 %v1366_v6 }
 0x132   : > { %9647 = vset.pattern.permute.xlu1 %v1366_v6  ;;  %4193 = vrot.lane.b32.xlu0 %v9508_v51, %s9915_s7 }
 0x134   : > { %v10601_v32 = vpop.permute.xlu1 %4159 }
 0x135   : > { %13725 = vst [vmem:[#allocation25_spill] sm:$0xff] %v10601_v32  ;;  %v9510_v32 = vld [vmem:[%s13696_s2 + $0x8] sm:$0xff] }
 0x136   : > { %v10609_v61 = vpop.permute.xlu0 %4152  ;;  %5051 = vrot.lane.b32.xlu1 %v9510_v32, %s9915_s7 }
 0x137   : > { %13727 = vst [vmem:[#allocation27_spill] sm:$0xff] %v10609_v61 }
 0x138   : > { %v10606_v15 = vpop.permute.xlu2 %4186 }
 0x139   : > { %13726 = vst [vmem:[#allocation26_spill] sm:$0xff] %v10606_v15  ;;  %v9509_v15 = vld [vmem:[%s13696_s2] sm:$0xff] }
 0x13a   : > { %5027 = vrot.lane.b32.xlu2 %v9509_v15, %s9915_s7 }
 0x152   : > { %v1277_v5 = vpop.xlane.xlu1 %1276 }
 0x156   : > { %v1271_v4 = vpop.xlane.xlu2 %1270 }
 0x157   : > { %v1325_v40 = vperm.slane %v1271_v4, %v10622_v53 }
 0x158   : > { %v1259_v21 = vpop.xlane.xlu0 %1258 }
 0x159   : > { %v1321_v25 = vperm.slane %v1259_v21, %v10622_v53 }
 0x15c   : > { %v1265_v12 = vpop.xlane.xlu1 %1264 }
 0x15d   : > { %v1323_v51 = vperm.slane %v1265_v12, %v10622_v53  ;;  %v10638_v12 = vld [vmem:[#allocation2] sm:$0xff] }
 0x15e   : > { %v1268_v61 = vpop.xlane.xlu2 %1267 }
 0x15f   : > { %v1324_v15 = vperm.slane %v1268_v61, %v10622_v53  ;;  %v9920_v61 = vmov 0.0  }
 0x160   : > { %v1274_v22 = vpop.xlane.xlu0 %1273  ;;  %463 = vst.msk [vmem:[#allocation4 + $0x8] sm:$0xff] %vm461_vm0, %v9920_v61 }
 0x161   : > { %v1326_v21 = vperm.slane %v1274_v22, %v10622_v53  ;;  %453 = vst.msk [vmem:[#allocation3] sm:$0xff] %vm444_vm6, %v9920_v61 }
 0x162   : > { %454 = vst.msk [vmem:[#allocation3 + $0x8] sm:$0xff] %vm444_vm6, %v9920_v61 }
 0x163   : > { %455 = vst.msk [vmem:[#allocation3 + $0x10] sm:$0xff] %vm444_vm6, %v9920_v61 }
 0x164   : > { %v1262_v20 = vpop.xlane.xlu1 %1261  ;;  %456 = vst.msk [vmem:[#allocation3 + $0x18] sm:$0xff] %vm444_vm6, %v9920_v61 }
 0x165   : > { %v1322_v6 = vperm.slane %v1262_v20, %v10622_v53  ;;  %v1327_v20 = vperm.slane %v1277_v5, %v10622_v53  ;;  %457 = vst.msk [vmem:[#allocation3 + $0x20] sm:$0xff] %vm444_vm6, %v9920_v61 }
 0x166   : > { %v10624_v43 = vpop.xlane.xlu2 %1288  ;;  %458 = vst.msk [vmem:[#allocation3 + $0x28] sm:$0xff] %vm444_vm6, %v9920_v61 }
 0x167   : > { %459 = vst.msk [vmem:[#allocation3 + $0x30] sm:$0xff] %vm444_vm6, %v9920_v61 }
 0x168   : > { %v1256_v49 = vpop.xlane.xlu0 %1255  ;;  %460 = vst.msk [vmem:[#allocation3 + $0x38] sm:$0xff] %vm444_vm6, %v9920_v61 }
 0x169   : > { %v1320_v13 = vperm.slane %v1256_v49, %v10622_v53  ;;  %462 = vst.msk [vmem:[#allocation4] sm:$0xff] %vm461_vm0, %v9920_v61 }
 0x16a   : > { %464 = vst.msk [vmem:[#allocation4 + $0x10] sm:$0xff] %vm461_vm0, %v9920_v61 }
 0x16b   : > { %v1336_v32 = vsel %vm1067_vm4, %v1321_v25, %v1320_v13  ;;  %465 = vst.msk [vmem:[#allocation4 + $0x18] sm:$0xff] %vm461_vm0, %v9920_v61 }
 0x16c   : > { %v1337_v1 = vsel %vm1071_vm2, %v1322_v6, %v1336_v32  ;;  %v1295_v6 = vpop.xlane.xlu1 %1294  ;;  %466 = vst.msk [vmem:[#allocation4 + $0x20] sm:$0xff] %vm461_vm0, %v9920_v61 }
 0x16d   : > { %v1338_v62 = vsel %vm1075_vm1, %v1323_v51, %v1337_v1  ;;  %467 = vst.msk [vmem:[#allocation4 + $0x28] sm:$0xff] %vm461_vm0, %v9920_v61 }
 0x16e   : > { %v1340_v49 = vsel %vm1339_vm7, %v1324_v15, %v1338_v62  ;;  %v1298_v25 = vpop.xlane.xlu2 %1297  ;;  %468 = vst.msk [vmem:[#allocation4 + $0x30] sm:$0xff] %vm461_vm0, %v9920_v61 }
 0x16f   : > { %v1342_v13 = vsel %vm1341_vm8, %v1325_v40, %v1340_v49  ;;  %469 = vst.msk [vmem:[#allocation4 + $0x38] sm:$0xff] %vm461_vm0, %v9920_v61 }
 0x170   : > { %v1344_v4 = vsel %vm1343_vm9, %v1326_v21, %v1342_v13  ;;  %v1301_v51 = vpop.xlane.xlu0 %1300  ;;  %470 = vst.msk [vmem:[#allocation4 + $0x40] sm:$0xff] %vm461_vm0, %v9920_v61 }
 0x171   : > { %v1346_v62 = vsel %vm1345_vm10, %v1327_v20, %v1344_v4  ;;  %471 = vst.msk [vmem:[#allocation4 + $0x48] sm:$0xff] %vm461_vm0, %v9920_v61 }
 0x172   : > { %v10650_v22 = vmax.f32 %v10638_v12, %v1346_v62  ;;  %472 = vst.msk [vmem:[#allocation4 + $0x50] sm:$0xff] %vm461_vm0, %v9920_v61 }
 0x173   : > { %473 = vst.msk [vmem:[#allocation4 + $0x58] sm:$0xff] %vm461_vm0, %v9920_v61 }
 0x174   : > { %1629 = vst.msk [vmem:[#allocation2] sm:$0xff] %vm444_vm6, %v10650_v22  ;;  %v1364_v40 = vperm.slane %v10650_v22, 0  ;;  %v1378_v5 = vperm.slane %v10650_v22, 2  ;;  %v1371_v32 = vperm.slane %v10650_v22, 1  ;;  %v1286_v49 = vpop.xlane.xlu1 %1285  ;;  %v1392_v4 = vperm.slane %v10650_v22, 4 }
 0x175   : > { %v1330_v62 = vperm.slane %v1286_v49, %v10622_v53  ;;  %474 = vst.msk [vmem:[#allocation4 + $0x60] sm:$0xff] %vm461_vm0, %v9920_v61 }
 0x176   : > { %1369 = vperm.xlu1 %9647, %v1364_v40   ;;  %1383 = vperm.xlu0 %9649, %v1378_v5   ;;  %v1280_v15 = vpop.xlane.xlu2 %1279  ;;  %v1385_v40 = vperm.slane %v10650_v22, 3  ;;  %475 = vst.msk [vmem:[#allocation4 + $0x68] sm:$0xff] %vm461_vm0, %v9920_v61 }
 0x177   : > { %1376 = vperm.xlu2 %9648, %v1371_v32   ;;  %v1328_v20 = vperm.slane %v1280_v15, %v10622_v53  ;;  %v1331_v32 = vperm.slane %v10624_v43, %v10622_v53  ;;  %476 = vst.msk [vmem:[#allocation4 + $0x70] sm:$0xff] %vm461_vm0, %v9920_v61 }
 0x178   : > { %v1283_v1 = vpop.xlane.xlu0 %1282  ;;  %477 = vst.msk [vmem:[#allocation4 + $0x78] sm:$0xff] %vm461_vm0, %v9920_v61 }
 0x179   : > { %v1329_v21 = vperm.slane %v1283_v1, %v10622_v53  ;;  %478 = vst.msk [vmem:[#allocation4 + $0x80] sm:$0xff] %vm461_vm0, %v9920_v61 }
 0x17a   : > { %479 = vst.msk [vmem:[#allocation4 + $0x88] sm:$0xff] %vm461_vm0, %v9920_v61 }
 0x17b   : > { %v1347_v13 = vsel %vm1067_vm4, %v1329_v21, %v1328_v20  ;;  %v1333_v21 = vperm.slane %v1295_v6, %v10622_v53  ;;  %v1334_v20 = vperm.slane %v1298_v25, %v10622_v53  ;;  %v1406_v6 = vperm.slane %v10650_v22, 6  ;;  %480 = vst.msk [vmem:[#allocation4 + $0x90] sm:$0xff] %vm461_vm0, %v9920_v61 }
 0x17c   : > { %v1348_v5 = vsel %vm1071_vm2, %v1330_v62, %v1347_v13  ;;  %v1335_v13 = vperm.slane %v1301_v51, %v10622_v53  ;;  %v1399_v25 = vperm.slane %v10650_v22, 5  ;;  %481 = vst.msk [vmem:[#allocation4 + $0x98] sm:$0xff] %vm461_vm0, %v9920_v61 }
 0x17d   : > { %v1349_v49 = vsel %vm1075_vm1, %v1331_v32, %v1348_v5  ;;  %482 = vst.msk [vmem:[#allocation4 + $0xa0] sm:$0xff] %vm461_vm0, %v9920_v61 }
 0x17e   : > { %1397 = vperm.xlu1 %9647, %v1392_v4   ;;  %v10706_v4 = vld [vmem:[#allocation2 + $0x8] sm:$0xff]  ;;  %483 = vst.msk [vmem:[#allocation4 + $0xa8] sm:$0xff] %vm461_vm0, %v9920_v61 }
 0x17f   : > { %1390 = vperm.xlu2 %9648, %v1385_v40   ;;  %484 = vst.msk [vmem:[#allocation4 + $0xb0] sm:$0xff] %vm461_vm0, %v9920_v61 }
 0x180   : > { %v1292_v15 = vpop.xlane.xlu0 %1291  ;;  %485 = vst.msk [vmem:[#allocation4 + $0xb8] sm:$0xff] %vm461_vm0, %v9920_v61 }
 0x181   : > { %v1332_v1 = vperm.slane %v1292_v15, %v10622_v53  ;;  %486 = vst.msk [vmem:[#allocation4 + $0xc0] sm:$0xff] %vm461_vm0, %v9920_v61 }
 0x182   : > { %487 = vst.msk [vmem:[#allocation4 + $0xc8] sm:$0xff] %vm461_vm0, %v9920_v61 }
 0x183   : > { %v1350_v43 = vsel %vm1339_vm7, %v1332_v1, %v1349_v49  ;;  %v1413_v1 = vperm.slane %v10650_v22, 7  ;;  %488 = vst.msk [vmem:[#allocation4 + $0xd0] sm:$0xff] %vm461_vm0, %v9920_v61 }
 0x184   : > { %v1351_v62 = vsel %vm1341_vm8, %v1333_v21, %v1350_v43  ;;  %v1358_v21 = vsub.f32 %v10638_v12, %v10650_v22  ;;  %489 = vst.msk [vmem:[#allocation4 + $0xd8] sm:$0xff] %vm461_vm0, %v9920_v61 }
 0x185   : > { %v1352_v40 = vsel %vm1343_vm9, %v1334_v20, %v1351_v62  ;;  %490 = vst.msk [vmem:[#allocation4 + $0xe0] sm:$0xff] %vm461_vm0, %v9920_v61 }
 0x186   : > { %v1353_v5 = vsel %vm1345_vm10, %v1335_v13, %v1352_v40  ;;  %1411 = vperm.xlu1 %9647, %v1406_v6   ;;  %v1360_v20 = vmul.f32 1.442695, %v1358_v21  ;;  %491 = vst.msk [vmem:[#allocation4 + $0xe8] sm:$0xff] %vm461_vm0, %v9920_v61 }
 0x187   : > { %v10720_v51 = vmax.f32 %v10706_v4, %v1353_v5  ;;  %1404 = vperm.xlu2 %9648, %v1399_v25   ;;  %492 = vst.msk [vmem:[#allocation4 + $0xf0] sm:$0xff] %vm461_vm0, %v9920_v61 }
 0x188   : > { %9650 = vpow2.f32 %v1360_v20  ;;  %493 = vst.msk [vmem:[#allocation4 + $0xf8] sm:$0xff] %vm461_vm0, %v9920_v61 }
 0x189   : > { %1630 = vst.msk [vmem:[#allocation2 + $0x8] sm:$0xff] %vm444_vm6, %v10720_v51  ;;  %v1427_v32 = vperm.slane %v10720_v51, 1  ;;  %v1420_v15 = vperm.slane %v10720_v51, 0  ;;  %v1448_v49 = vperm.slane %v10720_v51, 4  ;;  %v1441_v43 = vperm.slane %v10720_v51, 3 }
 0x18a   : > { %v1434_v12 = vperm.slane %v10720_v51, 2  ;;  %v1469_v22 = vperm.slane %v10720_v51, 7  ;;  %494 = vst.msk [vmem:[#allocation4 + $0x100] sm:$0xff] %vm461_vm0, %v9920_v61  ;;  %v1462_v13 = vperm.slane %v10720_v51, 6  ;;  %v1455_v62 = vperm.slane %v10720_v51, 5 }
 0x18b   : > { %1432 = vperm.xlu0 %9649, %v1427_v32   ;;  %495 = vst.msk [vmem:[#allocation4 + $0x108] sm:$0xff] %vm461_vm0, %v9920_v61  ;;  %v1359_v25 = vsub.f32 %v10706_v4, %v10720_v51 }
 0x18c   : > { %496 = vst.msk [vmem:[#allocation4 + $0x110] sm:$0xff] %vm461_vm0, %v9920_v61 }
 0x18d   : > { %497 = vst.msk [vmem:[#allocation4 + $0x118] sm:$0xff] %vm461_vm0, %v9920_v61 }
 0x18e   : > { %1425 = vperm.xlu1 %9647, %v1420_v15   ;;  %498 = vst.msk [vmem:[#allocation4 + $0x120] sm:$0xff] %vm461_vm0, %v9920_v61  ;;  %v10779_v6 = vpop.eup %9650  ;;  %v1362_v15 = vmul.f32 1.442695, %v1359_v25 }
 0x18f   : > { %1418 = vperm.xlu2 %9648, %v1413_v1   ;;  %499 = vst.msk [vmem:[#allocation4 + $0x128] sm:$0xff] %vm461_vm0, %v9920_v61  ;;  %v2013_v40 = vperm.slane %v10779_v6, 2  ;;  %v1999_v5 = vperm.slane %v10779_v6, 0  ;;  %v2006_v32 = vperm.slane %v10779_v6, 1  ;;  %v2027_v4 = vperm.slane %v10779_v6, 4 }
 0x190   : > { %500 = vst.msk [vmem:[#allocation4 + $0x130] sm:$0xff] %vm461_vm0, %v9920_v61  ;;  %9652 = vpow2.f32 %v1362_v15  ;;  %v2020_v51 = vperm.slane %v10779_v6, 3  ;;  %v2034_v1 = vperm.slane %v10779_v6, 5  ;;  %v2048_v21 = vperm.slane %v10779_v6, 7 }
 0x191   : > { %501 = vst.msk [vmem:[#allocation4 + $0x138] sm:$0xff] %vm461_vm0, %v9920_v61  ;;  %v2041_v20 = vperm.slane %v10779_v6, 6 }
 0x192   : > { %502 = vst.msk [vmem:[#allocation4 + $0x140] sm:$0xff] %vm461_vm0, %v9920_v61 }
 0x193   : > { %1453 = vperm.xlu0 %9649, %v1448_v49   ;;  %503 = vst.msk [vmem:[#allocation4 + $0x148] sm:$0xff] %vm461_vm0, %v9920_v61 }
 0x194   : > { %504 = vst.msk [vmem:[#allocation4 + $0x150] sm:$0xff] %vm461_vm0, %v9920_v61 }
 0x195   : > { %505 = vst.msk [vmem:[#allocation4 + $0x158] sm:$0xff] %vm461_vm0, %v9920_v61 }
 0x196   : > { %1446 = vperm.xlu1 %9647, %v1441_v43   ;;  %506 = vst.msk [vmem:[#allocation4 + $0x160] sm:$0xff] %vm461_vm0, %v9920_v61  ;;  %v10830_v49 = vpop.eup %9652 }
 0x197   : > { %1439 = vperm.xlu2 %9648, %v1434_v12   ;;  %507 = vst.msk [vmem:[#allocation4 + $0x168] sm:$0xff] %vm461_vm0, %v9920_v61  ;;  %v2055_v43 = vperm.slane %v10830_v49, 0  ;;  %v2069_v12 = vperm.slane %v10830_v49, 2  ;;  %v2083_v25 = vperm.slane %v10830_v49, 4  ;;  %v2104_v15 = vperm.slane %v10830_v49, 7 }
 0x198   : > { %508 = vst.msk [vmem:[#allocation4 + $0x170] sm:$0xff] %vm461_vm0, %v9920_v61 }
 0x199   : > { %509 = vst.msk [vmem:[#allocation4 + $0x178] sm:$0xff] %vm461_vm0, %v9920_v61 }
 0x19a   : > { %510 = vst.msk [vmem:[#allocation4 + $0x180] sm:$0xff] %vm461_vm0, %v9920_v61 }
 0x19b   : > { %1474 = vperm.xlu0 %9649, %v1469_v22   ;;  %511 = vst.msk [vmem:[#allocation4 + $0x188] sm:$0xff] %vm461_vm0, %v9920_v61  ;;  %v2062_v22 = vperm.slane %v10830_v49, 1 }
 0x19c   : > { %512 = vst.msk [vmem:[#allocation4 + $0x190] sm:$0xff] %vm461_vm0, %v9920_v61 }
 0x19d   : > { %513 = vst.msk [vmem:[#allocation4 + $0x198] sm:$0xff] %vm461_vm0, %v9920_v61 }
 0x19e   : > { %1467 = vperm.xlu1 %9647, %v1462_v13   ;;  %514 = vst.msk [vmem:[#allocation4 + $0x1a0] sm:$0xff] %vm461_vm0, %v9920_v61  ;;  %v2076_v13 = vperm.slane %v10830_v49, 3 }
 0x19f   : > { %1460 = vperm.xlu2 %9648, %v1455_v62   ;;  %515 = vst.msk [vmem:[#allocation4 + $0x1a8] sm:$0xff] %vm461_vm0, %v9920_v61  ;;  %v2090_v62 = vperm.slane %v10830_v49, 5 }
 0x1a0   : > { %516 = vst.msk [vmem:[#allocation4 + $0x1b0] sm:$0xff] %vm461_vm0, %v9920_v61 }
 0x1a1   : > { %517 = vst.msk [vmem:[#allocation4 + $0x1b8] sm:$0xff] %vm461_vm0, %v9920_v61 }
 0x1a2   : > { %518 = vst.msk [vmem:[#allocation4 + $0x1c0] sm:$0xff] %vm461_vm0, %v9920_v61 }
 0x1a3   : > { %2018 = vperm.xlu0 %9649, %v2013_v40   ;;  %519 = vst.msk [vmem:[#allocation4 + $0x1c8] sm:$0xff] %vm461_vm0, %v9920_v61  ;;  %v9512_v40 = vld [vmem:[%s13696_s2 + $0x18] sm:$0xff] }
 0x1a4   : > { %520 = vst.msk [vmem:[#allocation4 + $0x1d0] sm:$0xff] %vm461_vm0, %v9920_v61 }
 0x1a5   : > { %521 = vst.msk [vmem:[#allocation4 + $0x1d8] sm:$0xff] %vm461_vm0, %v9920_v61 }
 0x1a6   : > { %2004 = vperm.xlu1 %9647, %v1999_v5   ;;  %522 = vst.msk [vmem:[#allocation4 + $0x1e0] sm:$0xff] %vm461_vm0, %v9920_v61  ;;  %v10860_v5 = vpop.permute.xlu2 %5027 }
 0x1a7   : > { %2011 = vperm.xlu2 %9648, %v2006_v32   ;;  %523 = vst.msk [vmem:[#allocation4 + $0x1e8] sm:$0xff] %vm461_vm0, %v9920_v61  ;;  %v9511_v32 = vld [vmem:[%s13696_s2 + $0x10] sm:$0xff] }
 0x1a8   : > { %524 = vst.msk [vmem:[#allocation4 + $0x1f0] sm:$0xff] %vm461_vm0, %v9920_v61 }
 0x1a9   : > { %525 = vst.msk [vmem:[#allocation4 + $0x1f8] sm:$0xff] %vm461_vm0, %v9920_v61  ;;  %v9446_v61 = vld [vmem:[%s13696_s2 + $0x8] sm:$0xff] }
 0x1aa   : > { %1685 = vmatpush.bf16.msra.mxu1 %v9446_v61  ;;  %v9518_v61 = vld [vmem:[%s13696_s2 + $0x48] sm:$0xff] }
 0x1ab   : > { %2032 = vperm.xlu0 %9649, %v2027_v4   ;;  %v2097_v4 = vperm.slane %v10830_v49, 6 }
 0x1ae   : > { %2025 = vperm.xlu1 %9647, %v2020_v51   ;;  %v9448_v51 = vld [vmem:[%s13696_s2 + $0x18] sm:$0xff] }
 0x1af   : > { %2039 = vperm.xlu2 %9648, %v2034_v1   ;;  %v9513_v1 = vld [vmem:[%s13696_s2 + $0x20] sm:$0xff]  ;;  %1729 = vmatpush.bf16.msra.mxu3 %v9448_v51  ;;  %v9447_v51 = vld [vmem:[%s13696_s2 + $0x10] sm:$0xff] }
 0x1b0   : > { %1707 = vmatpush.bf16.msra.mxu2 %v9447_v51 }
 0x1b3   : > { %2053 = vperm.xlu0 %9649, %v2048_v21  }
 0x1b6   : > { %2046 = vperm.xlu1 %9647, %v2041_v20  }
 0x1b7   : > { %2060 = vperm.xlu2 %9648, %v2055_v43   ;;  %v9514_v43 = vld [vmem:[%s13696_s2 + $0x28] sm:$0xff] }
 0x1bb   : > { %2074 = vperm.xlu0 %9649, %v2069_v12   ;;  %v9515_v12 = vld [vmem:[%s13696_s2 + $0x30] sm:$0xff] }
 0x1be   : > { %2067 = vperm.xlu1 %9647, %v2062_v22  }
 0x1bf   : > { %2081 = vperm.xlu2 %9648, %v2076_v13   ;;  %v9450_v13 = vld [vmem:[%s13696_s2 + $0x28] sm:$0xff] }
 0x1c0   : > { %1773 = vmatpush.bf16.msrb.mxu1 %v9450_v13  ;;  %v9520_v13 = vld [vmem:[%s13696_s2 + $0x58] sm:$0xff] }
 0x1c3   : > { %2095 = vperm.xlu0 %9649, %v2090_v62  }
 0x1c6   : > { %2088 = vperm.xlu1 %9647, %v2083_v25   ;;  %v9517_v25 = vld [vmem:[%s13696_s2 + $0x40] sm:$0xff] }
 0x1c7   : > { %5099 = vrot.lane.b32.xlu2 %v9512_v40, %s9915_s7 }
 0x1cb   : > { %5075 = vrot.lane.b32.xlu0 %v9511_v32, %s9915_s7 }
 0x1ce   : > { %2109 = vperm.xlu1 %9647, %v2104_v15  }
 0x1cf   : > { %2102 = vperm.xlu2 %9648, %v2097_v4  }
 0x1d1   : > { %v1377_v21 = vpop.permute.xlu2 %1376 }
 0x1d2   : > { %v1477_v20 = vsub.f32 %v10395_v26, %v1377_v21  ;;  %v9516_v26 = vld [vmem:[%s13696_s2 + $0x38] sm:$0xff]  ;;  %v10912_v21 = vpop.permute.xlu1 %5051 }
 0x1d3   : > { %5123 = vrot.lane.b32.xlu0 %v9513_v1, %s9915_s7  ;;  %v9452_v1 = vld [vmem:[%s13696_s2 + $0x38] sm:$0xff] }
 0x1d4   : > { %v1494_v22 = vmul.f32 1.442695, %v1477_v20  ;;  %v10914_v20 = vpop.permute.xlu0 %4193  ;;  %1817 = vmatpush.bf16.msrb.mxu3 %v9452_v1 }
 0x1d6   : > { %9654 = vpow2.f32 %v1494_v22  ;;  %5147 = vrot.lane.b32.xlu1 %v9514_v43, %s9915_s7  ;;  %v9519_v43 = vld [vmem:[%s13696_s2 + $0x50] sm:$0xff] }
 0x1d7   : > { %5171 = vrot.lane.b32.xlu2 %v9515_v12, %s9915_s7 }
 0x1d9   : > { %v1391_v62 = vpop.permute.xlu2 %1390 }
 0x1da   : > { %v1479_v40 = vsub.f32 %v10414_v48, %v1391_v62  ;;  %v9445_v48 = vld [vmem:[%s13696_s2] sm:$0xff] }
 0x1db   : > { %5195 = vrot.lane.b32.xlu0 %v9516_v26, %s9915_s7  ;;  %1663 = vmatpush.bf16.msra.mxu0 %v9445_v48  ;;  %v9521_v26 = vld [vmem:[%s13696_s2 + $0x60] sm:$0xff] }
 0x1dc   : > { %v10898_v32 = vpop.eup %9654  ;;  %v1498_v15 = vmul.f32 1.442695, %v1479_v40 }
 0x1dd   : > { %v1632_v4 = vpack.c.bf16 %v10898_v32, %v10898_v32 }
 0x1de   : > { %9656 = vpow2.f32 %v1498_v15  ;;  %5219 = vrot.lane.b32.xlu1 %v9517_v25, %s9915_s7 }
 0x1df   : > { %5243 = vrot.lane.b32.xlu2 %v9518_v61, %s9915_s7  ;;  %8850 = vmatmul.msk.bf16.vlgmr.msra.gmra.mxu1 %vm461_vm0, %v1632_v4 }
 0x1e1   : > { %v1405_v12 = vpop.permute.xlu2 %1404 }
 0x1e2   : > { %v1481_v22 = vsub.f32 %v10381_v44, %v1405_v12  ;;  %v9522_v44 = vld [vmem:[%s13696_s2 + $0x68] sm:$0xff] }
 0x1e3   : > { %5267 = vrot.lane.b32.xlu0 %v9519_v43, %s9915_s7  ;;  %v9523_v43 = vld [vmem:[%s13696_s2 + $0x70] sm:$0xff] }
 0x1e4   : > { %v10929_v62 = vpop.eup %9656  ;;  %v1502_v40 = vmul.f32 1.442695, %v1481_v22 }
 0x1e5   : > { %v1634_v25 = vpack.c.bf16 %v10929_v62, %v10929_v62 }
 0x1e6   : > { %9658 = vpow2.f32 %v1502_v40  ;;  %5291 = vrot.lane.b32.xlu1 %v9520_v13, %s9915_s7  ;;  %v9524_v13 = vld [vmem:[%s13696_s2 + $0x78] sm:$0xff] }
 0x1e7   : > { %5315 = vrot.lane.b32.xlu2 %v9521_v26, %s9915_s7  ;;  %8860 = vmatmul.msk.bf16.vlgmr.msra.gmra.mxu3 %vm461_vm0, %v1634_v25  ;;  %v9526_v25 = vld [vmem:[%s10027_s15 + $0x8] sm:$0xff] }
 0x1e8   : > { %v1370_v61 = vpop.permute.xlu1 %1369  ;;  %v1384_v15 = vpop.permute.xlu0 %1383 }
 0x1e9   : > { %v1476_v4 = vsub.f32 %v10483_v28, %v1370_v61  ;;  %v1478_v48 = vsub.f32 %v10471_v19, %v1384_v15  ;;  %v1419_v51 = vpop.permute.xlu2 %1418  ;;  %v9451_v28 = vld [vmem:[%s13696_s2 + $0x30] sm:$0xff]  ;;  %v9454_v61 = vld [vmem:[%s13696_s2 + $0x48] sm:$0xff]  ;;  %v9525_v15 = vld [vmem:[%s10027_s15] sm:$0xff] }
 0x1ea   : > { %v1483_v1 = vsub.f32 %v10363_v9, %v1419_v51  ;;  %v9449_v9 = vld [vmem:[%s13696_s2 + $0x20] sm:$0xff]  ;;  %1795 = vmatpush.bf16.msrb.mxu2 %v9451_v28  ;;  %1861 = vmatpush.bf16.msra.mxu1 %v9454_v61 }
 0x1eb   : > { %v1492_v12 = vmul.f32 1.442695, %v1476_v4  ;;  %v1496_v22 = vmul.f32 1.442695, %v1478_v48  ;;  %5339 = vrot.lane.b32.xlu0 %v9522_v44, %s9915_s7  ;;  %1751 = vmatpush.bf16.msrb.mxu0 %v9449_v9  ;;  %v9533_v51 = vld [vmem:[%s10032_s24] sm:$0xff] }
 0x1ec   : > { %v10949_v26 = vpop.eup %9658  ;;  %v1506_v19 = vmul.f32 1.442695, %v1483_v1  ;;  %v9453_v61 = vld [vmem:[%s13696_s2 + $0x40] sm:$0xff] }
 0x1ed   : > { %v1636_v40 = vpack.c.bf16 %v10949_v26, %v10949_v26  ;;  %9660 = vpow2.f32 %v1492_v12  ;;  %v9458_v12 = vld [vmem:[%s13696_s2 + $0x68] sm:$0xff] }
 0x1ee   : > { %9662 = vpow2.f32 %v1496_v22  ;;  %5363 = vrot.lane.b32.xlu1 %v9523_v43, %s9915_s7 }
 0x1ef   : > { %9664 = vpow2.f32 %v1506_v19  ;;  %5387 = vrot.lane.b32.xlu2 %v9524_v13, %s9915_s7  ;;  %8870 = vmatmul.msk.bf16.vlgmr.msrb.gmra.mxu1 %vm461_vm0, %v1636_v40  ;;  %v9534_v40 = vld [vmem:[%s10032_s24 + $0x8] sm:$0xff]  ;;  %s9424_s7 = sshll.u32 (%p9990_p6), %s9904_s20, 2 }
 0x1f0   : > { %v1398_v44 = vpop.permute.xlu1 %1397  ;;  %1949 = vmatpush.bf16.msrb.mxu1 %v9458_v12 }
 0x1f1   : > { %v1480_v48 = vsub.f32 %v10423_v18, %v1398_v44 }
 0x1f3   : > { %v10967_v4 = vpop.eup %9660  ;;  %5686 = vrot.lane.b32.xlu0 %v9526_v25, %s9921_s30  ;;  %v1500_v19 = vmul.f32 1.442695, %v1480_v48  ;;  %v1440_v25 = vpop.permute.xlu2 %1439 }
 0x1f4   : > { %v10972_v1 = vpop.eup %9662  ;;  %v1631_v43 = vpack.c.bf16 %v10967_v4, %v10967_v4 }
 0x1f5   : > { %v10979_v22 = vpop.eup %9664  ;;  %v1633_v18 = vpack.c.bf16 %v10972_v1, %v10972_v1  ;;  %9666 = vpow2.f32 %v1500_v19 }
 0x1f6   : > { %v1638_v13 = vpack.c.bf16 %v10979_v22, %v10979_v22  ;;  %8845 = vmatmul.msk.bf16.vlgmr.msra.gmra.mxu0 %vm461_vm0, %v1631_v43  ;;  %5652 = vrot.lane.b32.xlu1 %v9525_v15, %s9921_s30  ;;  %v9455_v15 = vld [vmem:[%s13696_s2 + $0x50] sm:$0xff]  ;;  %v9460_v43 = vld [vmem:[%s13696_s2 + $0x78] sm:$0xff] }
 0x1f7   : > { %8855 = vmatmul.msk.bf16.vlgmr.msra.gmra.mxu2 %vm461_vm0, %v1633_v18  ;;  %5659 = vrot.lane.b32.xlu2 %v9533_v51, %s9921_s30  ;;  %v9456_v51 = vld [vmem:[%s13696_s2 + $0x58] sm:$0xff] }
 0x1f8   : > { %8880 = vmatmul.msk.bf16.vlgmr.msrb.gmra.mxu3 %vm461_vm0, %v1638_v13  ;;  %v1412_v9 = vpop.permute.xlu1 %1411  ;;  %1839 = vmatpush.bf16.msra.mxu0 %v9453_v61  ;;  %v9459_v61 = vld [vmem:[%s13696_s2 + $0x70] sm:$0xff] }
 0x1f9   : > { %v1482_v28 = vsub.f32 %v10437_v39, %v1412_v9  ;;  %1883 = vmatpush.bf16.msra.mxu2 %v9455_v15  ;;  %1905 = vmatpush.bf16.msra.mxu3 %v9456_v51 }
 0x1fb   : > { %v1504_v44 = vmul.f32 1.442695, %v1482_v28  ;;  %v11006_v13 = vpop.eup %9666  ;;  %v1461_v15 = vpop.permute.xlu2 %1460 }
 0x1fc   : > { %v1635_v28 = vpack.c.bf16 %v11006_v13, %v11006_v13 }
 0x1fd   : > { %9668 = vpow2.f32 %v1504_v44  ;;  %v1433_v48 = vpop.permute.xlu0 %1432  ;;  %1993 = vmatpush.bf16.msrb.mxu3 %v9460_v43 }
 0x1fe   : > { %v1485_v39 = vsub.f32 %v10543_v24, %v1433_v48  ;;  %5693 = vrot.lane.b32.xlu1 %v9534_v40, %s9921_s30  ;;  %v9457_v24 = vld [vmem:[%s13696_s2 + $0x60] sm:$0xff]  ;;  %v1486_v40 = vsub.f32 %v10526_v59, %v1440_v25  ;;  %v1489_v59 = vsub.f32 %v10497_v10, %v1461_v15 }
 0x200   : > { %v1510_v12 = vmul.f32 1.442695, %v1485_v39  ;;  %v1426_v18 = vpop.permute.xlu1 %1425  ;;  %v1512_v39 = vmul.f32 1.442695, %v1486_v40 }
 0x201   : > { %v1484_v9 = vsub.f32 %v10537_v63, %v1426_v18  ;;  %v2291_v18 = vsel %vm461_vm0, %v10203_v35, 0 }
 0x202   : > { %9670 = vpow2.f32 %v1510_v12 }
 0x203   : > { %v11008_v19 = vpop.eup %9668  ;;  %v1508_v63 = vmul.f32 1.442695, %v1484_v9 }
 0x204   : > { %v1637_v44 = vpack.c.bf16 %v11008_v19, %v11008_v19 }
 0x205   : > { %v1454_v48 = vpop.permute.xlu0 %1453  ;;  %9672 = vpow2.f32 %v1508_v63 }
 0x206   : > { %8865 = vmatmul.msk.bf16.vlgmr.msrb.gmra.mxu0 %vm461_vm0, %v1635_v28  ;;  %9674 = vpow2.f32 %v1512_v39 }
 0x207   : > { %8875 = vmatmul.msk.bf16.vlgmr.msrb.gmra.mxu2 %vm461_vm0, %v1637_v44  ;;  %1927 = vmatpush.bf16.msrb.mxu0 %v9457_v24  ;;  %v1518_v24 = vmul.f32 1.442695, %v1489_v59 }
 0x208   : > { %v11024_v51 = vpop.eup %9670  ;;  %v1447_v25 = vpop.permute.xlu1 %1446  ;;  %1971 = vmatpush.bf16.msrb.mxu2 %v9459_v61 }
 0x209   : > { %v1640_v43 = vpack.c.bf16 %v11024_v51, %v11024_v51  ;;  %v1487_v12 = vsub.f32 %v10480_v60, %v1447_v25  ;;  %v1488_v60 = vsub.f32 %v10554_v41, %v1454_v48  ;;  %v2257_v41 = vsel %vm461_vm0, %v10221_v58, 0 }
 0x20b   : > { %v1514_v9 = vmul.f32 1.442695, %v1487_v12  ;;  %8890 = vmatmul.msk.bf16.vlgmr.msra.gmra.mxu1 %vm461_vm0, %v1640_v43  ;;  %v11033_v28 = vpop.eup %9672  ;;  %v1516_v48 = vmul.f32 1.442695, %v1488_v60  ;;  %v2325_v43 = vsel %vm461_vm0, %v10259_v30, 0  ;;  %v1534_v30 = vsel %vm461_vm0, %v10972_v1, 0.0 }
 0x20c   : > { %2300 = vmatpush.bf16.xpose.msra.mxu1 %v2291_v18  ;;  %v11035_v44 = vpop.eup %9674  ;;  %v1639_v15 = vpack.c.bf16 %v11033_v28, %v11033_v28  ;;  %v2427_v18 = vsel %vm461_vm0, %v10358_v42, 0  ;;  %v1546_v42 = vsel %vm461_vm0, %v11008_v19, 0.0  ;;  %v2393_v1 = vsel %vm461_vm0, %v10279_v54, 0 }
 0x20d   : > { %9676 = vpow2.f32 %v1514_v9  ;;  %v1475_v10 = vpop.permute.xlu0 %1474  ;;  %v1641_v59 = vpack.c.bf16 %v11035_v44, %v11035_v44  ;;  %v1537_v54 = vsel %vm461_vm0, %v10929_v62, 0.0  ;;  %v1531_v19 = vsel %vm461_vm0, %v10898_v32, 0.0 }
 0x20e   : > { %9678 = vpow2.f32 %v1518_v24  ;;  %v1491_v35 = vsub.f32 %v10520_v11, %v1475_v10  ;;  %v2359_v11 = vsel %vm461_vm0, %v10326_v34, 0  ;;  %v1528_v34 = vsel %vm461_vm0, %v10967_v4, 0.0 }
 0x20f   : > { %9680 = vpow2.f32 %v1516_v48  ;;  %v2461_v4 = vsel %vm461_vm0, %v10456_v56, 0  ;;  %v1543_v62 = vsel %vm461_vm0, %v10949_v26, 0.0  ;;  %v1540_v32 = vsel %vm461_vm0, %v11006_v13, 0.0 }
 0x210   : > { %v1468_v40 = vpop.permute.xlu1 %1467  ;;  %v1549_v26 = vsel %vm461_vm0, %v10979_v22, 0.0 }
 0x211   : > { %v1490_v39 = vsub.f32 %v10517_v8, %v1468_v40  ;;  %v1522_v8 = vmul.f32 1.442695, %v1491_v35 }
 0x213   : > { %v11038_v61 = vpop.eup %9676  ;;  %v1520_v12 = vmul.f32 1.442695, %v1490_v39  ;;  %9682 = vpow2.f32 %v1522_v8  ;;  %v2012_v39 = vpop.permute.xlu2 %2011 }
 0x214   : > { %v1642_v63 = vpack.c.bf16 %v11038_v61, %v11038_v61  ;;  %v11048_v25 = vpop.eup %9678 }
 0x215   : > { %v1644_v58 = vpack.c.bf16 %v11048_v25, %v11048_v25  ;;  %9684 = vpow2.f32 %v1520_v12  ;;  %v9681_v9 = vpop.eup %9680  ;;  %v9529_v12 = vld [vmem:[%s10027_s15 + $0x20] sm:$0xff] }
 0x216   : > { %8885 = vmatmul.msk.bf16.vlgmr.msra.gmra.mxu0 %vm461_vm0, %v1639_v15  ;;  %8900 = vmatmul.msk.bf16.vlgmr.msra.gmra.mxu3 %vm461_vm0, %v1642_v63  ;;  %v1643_v40 = vpack.c.bf16 %v9681_v9, %v9681_v9  ;;  %v2495_v63 = vsel %vm461_vm0, %v10387_v17, 0  ;;  %v1555_v17 = vsel %vm461_vm0, %v11024_v51, 0.0 }
 0x217   : > { %8895 = vmatmul.msk.bf16.vlgmr.msra.gmra.mxu2 %vm461_vm0, %v1641_v59  ;;  %2266 = vmatpush.bf16.xpose.msra.mxu0 %v2257_v41  ;;  %v11089_v59 = vpop.permute.xlu0 %2018 }
 0x218   : > { %2334 = vmatpush.bf16.xpose.msra.mxu2 %v2325_v43  ;;  %2368 = vmatpush.bf16.xpose.msra.mxu3 %v2359_v11  ;;  %v11076_v15 = vpop.permute.xlu1 %2004 }
 0x219   : > { %v9683_v24 = vpop.eup %9682 }
 0x21a   : > { %v1646_v60 = vpack.c.bf16 %v9683_v24, %v9683_v24 }
 0x21b   : > { %8910 = vmatmul.msk.bf16.vlgmr.msrb.gmra.mxu1 %vm461_vm0, %v1644_v58  ;;  %v11068_v10 = vpop.eup %9684  ;;  %v11102_v41 = vpop.permute.xlu2 %2039  ;;  %v9527_v58 = vld [vmem:[%s10027_s15 + $0x10] sm:$0xff] }
 0x21c   : > { %2436 = vmatpush.bf16.xpose.msrb.mxu1 %v2427_v18  ;;  %v1645_v35 = vpack.c.bf16 %v11068_v10, %v11068_v10  ;;  %v1570_v51 = vsel %vm461_vm0, %v11068_v10, 0.0  ;;  %v9528_v18 = vld [vmem:[%s10027_s15 + $0x18] sm:$0xff]  ;;  %v9538_v10 = vld [vmem:[%s10032_s24 + $0x28] sm:$0xff] }
 0x21d   : > { %1535 = vadd.xlane.f32.xlu0 %v1534_v30 }
 0x21f   : > { %v11104_v48 = vpop.permute.xlu0 %2032 }
 0x220   : > { %1529 = vadd.xlane.f32.xlu2 %v1528_v34  ;;  %v11096_v56 = vpop.permute.xlu1 %2025 }
 0x225   : > { %1547 = vadd.xlane.f32.xlu0 %v1546_v42  ;;  %v9537_v42 = vld [vmem:[%s10032_s24 + $0x20] sm:$0xff] }
 0x226   : > { %8905 = vmatmul.msk.bf16.vlgmr.msrb.gmra.mxu0 %vm461_vm0, %v1643_v40  ;;  %8920 = vmatmul.msk.bf16.vlgmr.msrb.gmra.mxu3 %vm461_vm0, %v1646_v60  ;;  %v9536_v40 = vld [vmem:[%s10032_s24 + $0x18] sm:$0xff] }
 0x227   : > { %8915 = vmatmul.msk.bf16.vlgmr.msrb.gmra.mxu2 %vm461_vm0, %v1645_v35  ;;  %2402 = vmatpush.bf16.xpose.msrb.mxu0 %v2393_v1  ;;  %v2114_v60 = vld [vmem:[#allocation4 + $0x18] sm:$0xff]  ;;  %v2116_v35 = vld [vmem:[#allocation4 + $0x28] sm:$0xff] }
 0x228   : > { %2470 = vmatpush.bf16.xpose.msrb.mxu2 %v2461_v4  ;;  %2504 = vmatpush.bf16.xpose.msrb.mxu3 %v2495_v63  ;;  %v2130_v1 = vmul.f32 %v2114_v60, %v11096_v56  ;;  %v2132_v63 = vmul.f32 %v2116_v35, %v11102_v41  ;;  %v2115_v35 = vld [vmem:[#allocation4 + $0x20] sm:$0xff] }
 0x229   : > { %1538 = vadd.xlane.f32.xlu2 %v1537_v54  ;;  %1532 = vadd.xlane.f32.xlu1 %v1531_v19 }
 0x22b   : > { %8938 = vmatmul.msk.bf16.vlgmr.msra.gmra.mxu1 %vm461_vm0, %v10214_v50  ;;  %v1564_v50 = vsel %vm461_vm0, %v9681_v9, 0.0 }
 0x22c   : > { %3360 = vmatpush.bf16.msra.mxu1 %v10466_v27  ;;  %v1552_v27 = vsel %vm461_vm0, %v11033_v28, 0.0 }
 0x22d   : > { %1556 = vadd.xlane.f32.xlu0 %v1555_v17 }
 0x231   : > { %1544 = vadd.xlane.f32.xlu2 %v1543_v62  ;;  %1541 = vadd.xlane.f32.xlu1 %v1540_v32  ;;  %v9532_v32 = vld [vmem:[%s10027_s15 + $0x38] sm:$0xff] }
 0x235   : > { %1565 = vadd.xlane.f32.xlu0 %v1564_v50  ;;  %v9530_v50 = vld [vmem:[%s10027_s15 + $0x28] sm:$0xff] }
 0x236   : > { %8929 = vmatmul.msk.bf16.vlgmr.msra.gmra.mxu0 %vm461_vm0, %v10192_v23  ;;  %8956 = vmatmul.msk.bf16.vlgmr.msra.gmra.mxu3 %vm461_vm0, %v10227_v0  ;;  %v11120_v23 = vpop.permute.xlu1 %2046  ;;  %v1573_v0 = vsel %vm461_vm0, %v9683_v24, 0.0 }
 0x237   : > { %8947 = vmatmul.msk.bf16.vlgmr.msra.gmra.mxu2 %vm461_vm0, %v10271_v46  ;;  %3336 = vmatpush.bf16.msra.mxu0 %v10508_v55  ;;  %v11126_v46 = vpop.permute.xlu2 %2060  ;;  %v1561_v55 = vsel %vm461_vm0, %v11038_v61, 0.0 }
 0x238   : > { %3384 = vmatpush.bf16.msra.mxu2 %v10493_v2  ;;  %3408 = vmatpush.bf16.msra.mxu3 %v10511_v3  ;;  %v11128_v2 = vpop.permute.xlu0 %2053  ;;  %v1558_v3 = vsel %vm461_vm0, %v11035_v44, 0.0 }
 0x239   : > { %1553 = vadd.xlane.f32.xlu2 %v1552_v27  ;;  %1550 = vadd.xlane.f32.xlu1 %v1549_v26  ;;  %v9531_v27 = vld [vmem:[%s10027_s15 + $0x30] sm:$0xff]  ;;  %v2111_v26 = vld [vmem:[#allocation4] sm:$0xff] }
 0x23a   : > { %v2127_v41 = vmul.f32 %v2111_v26, %v11076_v15  ;;  %v9546_v26 = vld [vmem:[%s13696_s2 + $0x28] sm:$0xff] }
 0x23b   : > { %8974 = vmatmul.msk.bf16.vlgmr.msrb.gmra.mxu1 %vm461_vm0, %v10377_v36 }
 0x23c   : > { %3456 = vmatpush.bf16.msrb.mxu1 %v10539_v14  ;;  %v13728_v14 = vld [vmem:[#allocation7_spill] sm:$0xff] }
 0x23d   : > { %1574 = vadd.xlane.f32.xlu0 %v1573_v0 }
 0x23e   : > { %v11134_v22 = vpop.permute.xlu1 %2067 }
 0x23f   : > { %v11140_v36 = vpop.permute.xlu2 %2081 }
 0x240   : > { %v11145_v13 = vpop.permute.xlu0 %2074 }
 0x241   : > { %1562 = vadd.xlane.f32.xlu2 %v1561_v55  ;;  %1559 = vadd.xlane.f32.xlu1 %v1558_v3 }
 0x246   : > { %8965 = vmatmul.msk.bf16.vlgmr.msrb.gmra.mxu0 %vm461_vm0, %v10308_v29  ;;  %8992 = vmatmul.msk.bf16.vlgmr.msrb.gmra.mxu3 %vm461_vm0, %v10431_v33  ;;  %v1567_v29 = vsel %vm461_vm0, %v11048_v25, 0.0  ;;  %v11153_v33 = vpop.permute.xlu1 %2088 }
 0x247   : > { %8983 = vmatmul.msk.bf16.vlgmr.msrb.gmra.mxu2 %vm461_vm0, %v13728_v14  ;;  %3432 = vmatpush.bf16.msrb.mxu0 %v10535_v16  ;;  %v11155_v16 = vpop.permute.xlu2 %5099 }
 0x248   : > { %3480 = vmatpush.bf16.msrb.mxu2 %v10528_v52  ;;  %3504 = vmatpush.bf16.msrb.mxu3 %v10556_v7  ;;  %v11157_v28 = vpop.permute.xlu0 %2095  ;;  %v9535_v52 = vld [vmem:[%s10032_s24 + $0x10] sm:$0xff]  ;;  %v2112_v7 = vld [vmem:[#allocation4 + $0x8] sm:$0xff] }
 0x249   : > { %1571 = vadd.xlane.f32.xlu2 %v1570_v51  ;;  %1568 = vadd.xlane.f32.xlu1 %v1567_v29  ;;  %v2128_v25 = vmul.f32 %v2112_v7, %v2012_v39  ;;  %v9541_v51 = vld [vmem:[%s13696_s2] sm:$0xff]  ;;  %v9539_v29 = vld [vmem:[%s10032_s24 + $0x30] sm:$0xff] }
 0x24e   : > { %v11161_v44 = vpop.permute.xlu1 %2109 }
 0x24f   : > { %v11165_v11 = vpop.permute.xlu2 %2102 }
 0x250   : > { %v11163_v61 = vpop.permute.xlu0 %5075 }
 0x251   : > { %5727 = vrot.lane.b32.xlu0 %v9535_v52, %s9921_s30  ;;  %v2113_v52 = vld [vmem:[#allocation4 + $0x10] sm:$0xff] }
 0x256   : > { %v11173_v30 = vpop.permute.xlu1 %5147 }
 0x257   : > { %v11176_v34 = vpop.permute.xlu2 %5171 }
 0x258   : > { %v11178_v9 = vpop.permute.xlu0 %5123 }
 0x259   : > { %5788 = vrot.lane.b32.xlu0 %v9529_v12, %s9921_s30  ;;  %v2129_v12 = vmul.f32 %v2113_v52, %v11089_v59  ;;  %v9542_v59 = vld [vmem:[%s13696_s2 + $0x8] sm:$0xff] }
 0x25c   : > { %v1687_v43 = vpop.f32.mrf.mxu1 }
 0x25d   : > { %v2144_v8 = vadd.f32 %v2128_v25, %v1687_v43  ;;  %v9540_v25 = vld [vmem:[%s10032_s24 + $0x38] sm:$0xff]  ;;  %s8517_s24 = scalar_lea.vmem (%p9990_p6), %s13699_s5, %s9424_s7 }
 0x25e   : > { %v11188_v19 = vpop.permute.xlu1 %5219  ;;  %v2118_v43 = vld [vmem:[#allocation4 + $0x38] sm:$0xff] }
 0x25f   : > { %2160 = vst.msk [vmem:[#allocation4 + $0x8] sm:$0xff] %vm461_vm0, %v2144_v8  ;;  %v11190_v17 = vpop.permute.xlu2 %5243 }
 0x260   : > { %13729 = vst [vmem:[#allocation7_spill] sm:$0xff] %v11190_v17  ;;  %v11195_v56 = vpop.permute.xlu0 %5195 }
 0x261   : > { %5720 = vrot.lane.b32.xlu2 %v9527_v58, %s9921_s30  ;;  %5829 = vrot.lane.b32.xlu0 %v9538_v10, %s9921_s30  ;;  %v2134_v58 = vmul.f32 %v2118_v43, %v11128_v2  ;;  %v9543_v2 = vld [vmem:[%s13696_s2 + $0x10] sm:$0xff] }
 0x262   : > { %5754 = vrot.lane.b32.xlu1 %v9528_v18, %s9921_s30 }
 0x264   : > { %v1689_v24 = vpop.f32.mrf.mxu1 }
 0x266   : > { %v11207_v7 = vpop.permute.xlu1 %5291 }
 0x267   : > { %13730 = vst [vmem:[#allocation28_spill] sm:$0xff] %v11207_v7  ;;  %v11211_v8 = vpop.permute.xlu2 %5315 }
 0x268   : > { %13731 = vst [vmem:[#allocation29_spill] sm:$0xff] %v11211_v8  ;;  %v11213_v15 = vpop.permute.xlu0 %5267 }
 0x269   : > { %5761 = vrot.lane.b32.xlu2 %v9536_v40, %s9921_s30  ;;  %5890 = vrot.lane.b32.xlu0 %v9532_v32, %s9921_s30  ;;  %13732 = vst [vmem:[#allocation30_spill] sm:$0xff] %v11213_v15 }
 0x26a   : > { %v1731_v4 = vpop.f32.mrf.mxu3  ;;  %5795 = vrot.lane.b32.xlu1 %v9537_v42, %s9921_s30  ;;  %v9544_v42 = vld [vmem:[%s13696_s2 + $0x18] sm:$0xff] }
 0x26b   : > { %v2146_v54 = vadd.f32 %v2130_v1, %v1731_v4 }
 0x26c   : > { %v1775_v39 = vpop.f32.mrf.mxu1 }
 0x26d   : > { %2162 = vst.msk [vmem:[#allocation4 + $0x18] sm:$0xff] %vm461_vm0, %v2146_v54  ;;  %v2148_v62 = vadd.f32 %v2132_v63, %v1775_v39  ;;  %v2131_v63 = vmul.f32 %v2115_v35, %v11104_v48  ;;  %v9547_v48 = vld [vmem:[%s13696_s2 + $0x30] sm:$0xff] }
 0x26e   : > { %v11231_v1 = vpop.permute.xlu1 %5363 }
 0x26f   : > { %2164 = vst.msk [vmem:[#allocation4 + $0x28] sm:$0xff] %vm461_vm0, %v2148_v62  ;;  %v11234_v4 = vpop.permute.xlu2 %5387 }
 0x270   : > { %13733 = vst [vmem:[#allocation31_spill] sm:$0xff] %v11231_v1  ;;  %v11238_v54 = vpop.permute.xlu0 %5339 }
 0x271   : > { %5822 = vrot.lane.b32.xlu2 %v9530_v50, %s9921_s30  ;;  %6731 = vrot.lane.b32.xlu0 %v9541_v51, %s9921_s30  ;;  %13734 = vst [vmem:[#allocation32_spill] sm:$0xff] %v11234_v4  ;;  %v2120_v50 = vld [vmem:[#allocation4 + $0x48] sm:$0xff] }
 0x272   : > { %v1733_v0 = vpop.f32.mrf.mxu3  ;;  %5856 = vrot.lane.b32.xlu1 %v9531_v27, %s9921_s30  ;;  %13735 = vst [vmem:[#allocation33_spill] sm:$0xff] %v11238_v54 }
 0x273   : > { %v1665_v55 = vpop.f32.mrf.mxu0  ;;  %v2117_v0 = vld [vmem:[#allocation4 + $0x30] sm:$0xff] }
 0x274   : > { %v2143_v3 = vadd.f32 %v2127_v41, %v1665_v55  ;;  %v1777_v14 = vpop.f32.mrf.mxu1  ;;  %v9545_v41 = vld [vmem:[%s13696_s2 + $0x20] sm:$0xff]  ;;  %v2136_v55 = vmul.f32 %v2120_v50, %v11134_v22 }
 0x275   : > { %v2133_v14 = vmul.f32 %v2117_v0, %v11120_v23  ;;  %v9549_v23 = vld [vmem:[%s13696_s2 + $0x40] sm:$0xff] }
 0x276   : > { %2159 = vst.msk [vmem:[#allocation4] sm:$0xff] %vm461_vm0, %v2143_v3 }
 0x278   : > { %v11261_v22 = vpop.permute.xlu0 %5686 }
 0x279   : > { %5863 = vrot.lane.b32.xlu2 %v9539_v29, %s9921_s30  ;;  %6803 = vrot.lane.b32.xlu0 %v9544_v42, %s9921_s30  ;;  %v11255_v29 = vpop.permute.xlu1 %5652  ;;  %13738 = vst [vmem:[#allocation36_spill] sm:$0xff] %v11261_v22 }
 0x27a   : > { %v1709_v18 = vpop.f32.mrf.mxu2  ;;  %5897 = vrot.lane.b32.xlu1 %v9540_v25, %s9921_s30  ;;  %13736 = vst [vmem:[#allocation34_spill] sm:$0xff] %v11255_v29  ;;  %v11258_v25 = vpop.permute.xlu2 %5659 }
 0x27b   : > { %v2145_v24 = vadd.f32 %v2129_v12, %v1709_v18  ;;  %v1819_v10 = vpop.f32.mrf.mxu3  ;;  %v1667_v40 = vpop.f32.mrf.mxu0  ;;  %13737 = vst [vmem:[#allocation35_spill] sm:$0xff] %v11258_v25  ;;  %v9550_v18 = vld [vmem:[%s13696_s2 + $0x48] sm:$0xff] }
 0x27c   : > { %v2150_v60 = vadd.f32 %v2134_v58, %v1819_v10  ;;  %v9548_v58 = vld [vmem:[%s13696_s2 + $0x38] sm:$0xff] }
 0x27d   : > { %2161 = vst.msk [vmem:[#allocation4 + $0x10] sm:$0xff] %vm461_vm0, %v2145_v24  ;;  %v2119_v24 = vld [vmem:[#allocation4 + $0x40] sm:$0xff] }
 0x27e   : > { %2166 = vst.msk [vmem:[#allocation4 + $0x38] sm:$0xff] %vm461_vm0, %v2150_v60  ;;  %v2135_v40 = vmul.f32 %v2119_v24, %v11126_v46 }
 0x281   : > { %6755 = vrot.lane.b32.xlu2 %v9542_v59, %s9921_s30  ;;  %6851 = vrot.lane.b32.xlu0 %v9546_v26, %s9921_s30  ;;  %v11277_v35 = vpop.permute.xlu1 %5693 }
 0x282   : > { %v1711_v39 = vpop.f32.mrf.mxu2  ;;  %6779 = vrot.lane.b32.xlu1 %v9543_v2, %s9921_s30  ;;  %v2124_v2 = vld [vmem:[#allocation4 + $0x68] sm:$0xff]  ;;  %13739 = vst [vmem:[#allocation37_spill] sm:$0xff] %v11277_v35 }
 0x283   : > { %v1821_v62 = vpop.f32.mrf.mxu3  ;;  %v1753_v32 = vpop.f32.mrf.mxu0  ;;  %v2122_v39 = vld [vmem:[#allocation4 + $0x58] sm:$0xff]  ;;  %v2140_v50 = vmul.f32 %v2124_v2, %v11157_v28  ;;  %v9553_v28 = vld [vmem:[%s13696_s2 + $0x60] sm:$0xff]  ;;  %v9555_v2 = vld [vmem:[%s13696_s2 + $0x70] sm:$0xff] }
 0x284   : > { %v2147_v27 = vadd.f32 %v2131_v63, %v1753_v32  ;;  %v2121_v32 = vld [vmem:[#allocation4 + $0x50] sm:$0xff] }
 0x285   : > { %v2137_v46 = vmul.f32 %v2121_v32, %v11145_v13 }
 0x286   : > { %2163 = vst.msk [vmem:[#allocation4 + $0x20] sm:$0xff] %vm461_vm0, %v2147_v27  ;;  %v2138_v27 = vmul.f32 %v2122_v39, %v11140_v36 }
 0x288   : > { %v1863_v3 = vpop.f32.mrf.mxu1 }
 0x289   : > { %v2152_v51 = vadd.f32 %v2136_v55, %v1863_v3  ;;  %6827 = vrot.lane.b32.xlu2 %v9545_v41, %s9921_s30  ;;  %6923 = vrot.lane.b32.xlu0 %v9549_v23, %s9921_s30  ;;  %v9552_v3 = vld [vmem:[%s13696_s2 + $0x58] sm:$0xff] }
 0x28a   : > { %v1797_v52 = vpop.f32.mrf.mxu2  ;;  %6875 = vrot.lane.b32.xlu1 %v9547_v48, %s9921_s30 }
 0x28b   : > { %2168 = vst.msk [vmem:[#allocation4 + $0x48] sm:$0xff] %vm461_vm0, %v2152_v51  ;;  %v2149_v43 = vadd.f32 %v2133_v14, %v1797_v52  ;;  %v1755_v12 = vpop.f32.mrf.mxu0  ;;  %v9551_v14 = vld [vmem:[%s13696_s2 + $0x50] sm:$0xff] }
 0x28c   : > { %v2123_v12 = vld [vmem:[#allocation4 + $0x60] sm:$0xff] }
 0x28d   : > { %2165 = vst.msk [vmem:[#allocation4 + $0x30] sm:$0xff] %vm461_vm0, %v2149_v43 }
 0x290   : > { %v1865_v10 = vpop.f32.mrf.mxu1  ;;  %v1536_v62 = vpop.xlane.xlu0 %1535 }
 0x291   : > { %6899 = vrot.lane.b32.xlu2 %v9548_v58, %s9921_s30  ;;  %6995 = vrot.lane.b32.xlu0 %v9552_v3, %s9921_s30 }
 0x292   : > { %v1799_v60 = vpop.f32.mrf.mxu2  ;;  %6947 = vrot.lane.b32.xlu1 %v9550_v18, %s9921_s30 }
 0x293   : > { %v1530_v42 = vpop.xlane.xlu2 %1529  ;;  %v1841_v59 = vpop.f32.mrf.mxu0  ;;  %v1594_v60 = vperm.slane %v1536_v62, %v10622_v53  ;;  %v2126_v62 = vld [vmem:[#allocation4 + $0x78] sm:$0xff] }
 0x294   : > { %v2151_v63 = vadd.f32 %v2135_v40, %v1841_v59  ;;  %v1592_v23 = vperm.slane %v1530_v42, %v10622_v53  ;;  %v2139_v40 = vmul.f32 %v2123_v12, %v11153_v33  ;;  %v9556_v42 = vld [vmem:[%s13696_s2 + $0x78] sm:$0xff] }
 0x296   : > { %2167 = vst.msk [vmem:[#allocation4 + $0x40] sm:$0xff] %vm461_vm0, %v2151_v63  ;;  %v9554_v63 = vld [vmem:[%s13696_s2 + $0x68] sm:$0xff] }
 0x298   : > { %v1951_v26 = vpop.f32.mrf.mxu1  ;;  %v1548_v58 = vpop.xlane.xlu0 %1547 }
 0x299   : > { %v2156_v41 = vadd.f32 %v2140_v50, %v1951_v26  ;;  %v1907_v0 = vpop.f32.mrf.mxu3  ;;  %6971 = vrot.lane.b32.xlu2 %v9551_v14, %s9921_s30  ;;  %7067 = vrot.lane.b32.xlu0 %v9555_v2, %s9921_s30 }
 0x29a   : > { %v1885_v48 = vpop.f32.mrf.mxu2  ;;  %v2154_v55 = vadd.f32 %v2138_v27, %v1907_v0  ;;  %7019 = vrot.lane.b32.xlu1 %v9553_v28, %s9921_s30 }
 0x29b   : > { %2172 = vst.msk [vmem:[#allocation4 + $0x68] sm:$0xff] %vm461_vm0, %v2156_v41  ;;  %v2153_v36 = vadd.f32 %v2137_v46, %v1885_v48  ;;  %v1843_v13 = vpop.f32.mrf.mxu0  ;;  %v2125_v41 = vld [vmem:[#allocation4 + $0x70] sm:$0xff]  ;;  %v2142_v48 = vmul.f32 %v2126_v62, %v11161_v44 }
 0x29c   : > { %2170 = vst.msk [vmem:[#allocation4 + $0x58] sm:$0xff] %vm461_vm0, %v2154_v55  ;;  %v1539_v51 = vpop.xlane.xlu2 %1538  ;;  %v1533_v52 = vpop.xlane.xlu1 %1532  ;;  %v2141_v3 = vmul.f32 %v2125_v41, %v11165_v11 }
 0x29d   : > { %2169 = vst.msk [vmem:[#allocation4 + $0x50] sm:$0xff] %vm461_vm0, %v2153_v36  ;;  %v1593_v43 = vperm.slane %v1533_v52, %v10622_v53  ;;  %v1595_v26 = vperm.slane %v1539_v51, %v10622_v53 }
 0x29f   : > { %v1608_v24 = vsel %vm1067_vm4, %v1593_v43, %v1592_v23  ;;  %v1524_v23 = vld [vmem:[#allocation3] sm:$0xff] }
 0x2a0   : > { %v1953_v18 = vpop.f32.mrf.mxu1  ;;  %v1609_v32 = vsel %vm1071_vm2, %v1594_v60, %v1608_v24  ;;  %v1557_v14 = vpop.xlane.xlu0 %1556 }
 0x2a1   : > { %v1909_v10 = vpop.f32.mrf.mxu3  ;;  %7043 = vrot.lane.b32.xlu2 %v9554_v63, %s9921_s30  ;;  %v1610_v0 = vsel %vm1075_vm1, %v1595_v26, %v1609_v32  ;;  %v1598_v18 = vperm.slane %v1548_v58, %v10622_v53 }
 0x2a2   : > { %v1887_v59 = vpop.f32.mrf.mxu2  ;;  %7091 = vrot.lane.b32.xlu1 %v9556_v42, %s9921_s30  ;;  %v1526_v10 = vmul.f32 %v10779_v6, %v1524_v23  ;;  %s13178_s30 = scalar_lea.vmem [#allocation5], %s13173_s29 }
 0x2a3   : > { %v1929_v39 = vpop.f32.mrf.mxu0 }
 0x2a4   : > { %v1545_v50 = vpop.xlane.xlu2 %1544  ;;  %v2155_v33 = vadd.f32 %v2139_v40, %v1929_v39  ;;  %v1542_v27 = vpop.xlane.xlu1 %1541 }
 0x2a5   : > { %v1596_v46 = vperm.slane %v1542_v27, %v10622_v53  ;;  %v1597_v28 = vperm.slane %v1545_v50, %v10622_v53 }
 0x2a6   : > { %2171 = vst.msk [vmem:[#allocation4 + $0x60] sm:$0xff] %vm461_vm0, %v2155_v33  ;;  %v1601_v33 = vperm.slane %v1557_v14, %v10622_v53 }
 0x2a7   : > { %v1611_v55 = vsel %vm1339_vm7, %v1596_v46, %v1610_v0 }
 0x2a8   : > { %v1612_v52 = vsel %vm1341_vm8, %v1597_v28, %v1611_v55  ;;  %v1566_v58 = vpop.xlane.xlu0 %1565 }
 0x2a9   : > { %v1995_v36 = vpop.f32.mrf.mxu3  ;;  %v1613_v40 = vsel %vm1343_vm9, %v1598_v18, %v1612_v52 }
 0x2aa   : > { %v1973_v13 = vpop.f32.mrf.mxu2  ;;  %v2158_v51 = vadd.f32 %v2142_v48, %v1995_v36  ;;  %v1604_v48 = vperm.slane %v1566_v58, %v10622_v53 }
 0x2ab   : > { %v2157_v43 = vadd.f32 %v2141_v3, %v1973_v13  ;;  %v1931_v12 = vpop.f32.mrf.mxu0  ;;  %v1525_v3 = vld [vmem:[#allocation3 + $0x8] sm:$0xff] }
 0x2ac   : > { %2174 = vst.msk [vmem:[#allocation4 + $0x78] sm:$0xff] %vm461_vm0, %v2158_v51  ;;  %v1554_v44 = vpop.xlane.xlu2 %1553  ;;  %v1551_v24 = vpop.xlane.xlu1 %1550 }
 0x2ad   : > { %2173 = vst.msk [vmem:[#allocation4 + $0x70] sm:$0xff] %vm461_vm0, %v2157_v43  ;;  %v1599_v11 = vperm.slane %v1551_v24, %v10622_v53  ;;  %v1600_v42 = vperm.slane %v1554_v44, %v10622_v53  ;;  %v1527_v43 = vmul.f32 %v10830_v49, %v1525_v3 }
 0x2af   : > { %v1614_v60 = vsel %vm1345_vm10, %v1599_v11, %v1613_v40  ;;  %v1615_v6 = vsel %vm1067_vm4, %v1601_v33, %v1600_v42  ;;  %v2302_v42 = vpop.f32.mrf.mxu1 }
 0x2b0   : > { %v1624_v59 = vadd.f32 %v1614_v60, %v1526_v10  ;;  %v1575_v55 = vpop.xlane.xlu0 %1574  ;;  %v2525_v3 = vrot.slane %v2302_v42, 4 }
 0x2b1   : > { %v1997_v2 = vpop.f32.mrf.mxu3  ;;  %v1607_v51 = vperm.slane %v1575_v55, %v10622_v53  ;;  %v11357_v55 = vld [vmem:[%s13697_s3 + $0x8] sm:$0xf] }
 0x2b2   : > { %1627 = vst.msk [vmem:[#allocation3] sm:$0xff] %vm444_vm6, %v1624_v59  ;;  %v1975_v63 = vpop.f32.mrf.mxu2 }
 0x2b4   : > { %v1563_v39 = vpop.xlane.xlu2 %1562  ;;  %v1560_v32 = vpop.xlane.xlu1 %1559 }
 0x2b5   : > { %v1602_v50 = vperm.slane %v1560_v32, %v10622_v53  ;;  %v1603_v26 = vperm.slane %v1563_v39, %v10622_v53  ;;  %v2268_v39 = vpop.f32.mrf.mxu0 }
 0x2b7   : > { %v1616_v62 = vsel %vm1071_vm2, %v1602_v50, %v1615_v6 }
 0x2b8   : > { %v1617_v46 = vsel %vm1075_vm1, %v1603_v26, %v1616_v62  ;;  %v2304_v62 = vpop.f32.mrf.mxu1 }
 0x2b9   : > { %v7642_v27 = vld [vmem:[#allocation3] sm:$0xff]  ;;  %v1618_v36 = vsel %vm1339_vm7, %v1604_v48, %v1617_v46 }
 0x2ba   : > { %9686 = vrcp.f32 %v7642_v27  ;;  %v2336_v32 = vpop.f32.mrf.mxu2  ;;  %v2370_v27 = vpop.f32.mrf.mxu3 }
 0x2bc   : > { %v1572_v41 = vpop.xlane.xlu2 %1571  ;;  %v1569_v0 = vpop.xlane.xlu1 %1568 }
 0x2bd   : > { %v1605_v28 = vperm.slane %v1569_v0, %v10622_v53  ;;  %v1606_v14 = vperm.slane %v1572_v41, %v10622_v53  ;;  %v11350_v41 = vpop.f32.mrf.mxu0 }
 0x2bf   : > { %v1619_v52 = vsel %vm1341_vm8, %v1605_v28, %v1618_v36  ;;  %v2526_v36 = vsel %vm832_vm5, %v2370_v27, %v2525_v3 }
 0x2c0   : > { %v9687_v13 = vpop.eup %9686  ;;  %v1620_v12 = vsel %vm1343_vm9, %v1606_v14, %v1619_v52  ;;  %v2511_v14 = vrot.slane %v2336_v32, 4  ;;  %v2523_v52 = vrot.slane %v2370_v27, 4 }
 0x2c1   : > { %v7660_v23 = vperm.slane %v9687_v13, 2  ;;  %v1621_v18 = vsel %vm1345_vm10, %v1607_v51, %v1620_v12  ;;  %v7653_v24 = vperm.slane %v9687_v13, 1  ;;  %v7646_v11 = vperm.slane %v9687_v13, 0 }
 0x2c2   : > { %v1625_v44 = vadd.f32 %v1621_v18, %v1527_v43  ;;  %v7681_v10 = vperm.slane %v9687_v13, 5  ;;  %v7674_v60 = vperm.slane %v9687_v13, 4  ;;  %v7667_v59 = vperm.slane %v9687_v13, 3  ;;  %v11352_v0 = vpop.f32.mrf.mxu2  ;;  %v2372_v28 = vpop.f32.mrf.mxu3 }
 0x2c3   : > { %7665 = vperm.xlu2 %9648, %v7660_v23   ;;  %7658 = vperm.xlu1 %9647, %v7653_v24   ;;  %v7695_v2 = vperm.slane %v9687_v13, 7  ;;  %v7688_v63 = vperm.slane %v9687_v13, 6  ;;  %v11361_v13 = vrot.slane %v11357_v55, 3  ;;  %v2513_v51 = vrot.slane %v2268_v39, 4  ;;  %v11363_v43 = vpop.permute.xlu0 %5727 }
 0x2c4   : > { %1628 = vst.msk [vmem:[#allocation3 + $0x8] sm:$0xff] %vm444_vm6, %v1625_v44  ;;  %7651 = vperm.xlu0 %9649, %v7646_v11   ;;  %v2534_v18 = vperm.slane %v2526_v36, %v10219_v57  ;;  %v2438_v44 = vpop.f32.mrf.mxu1  ;;  %v2512_v24 = vsel %vm832_vm5, %v2511_v14, %v2268_v39 }
 0x2c5   : > { %13740 = vst [vmem:[#allocation38_spill] sm:$0xff] %v11363_v43  ;;  %v2514_v23 = vsel %vm832_vm5, %v2336_v32, %v2513_v51  ;;  %v2752_v11 = vsel %vm1075_vm1, %v11357_v55, %v11361_v13 }
 0x2c6   : > { %v2571_v39 = vrot.slane %v2534_v18, 4 }
 0x2cb   : > { %7686 = vperm.xlu2 %9648, %v7681_v10   ;;  %v7643_v40 = vld [vmem:[#allocation3 + $0x8] sm:$0xff]  ;;  %7679 = vperm.xlu1 %9647, %v7674_v60   ;;  %v2625_v10 = vrot.slane %v11350_v41, 4  ;;  %v2472_v60 = vpop.f32.mrf.mxu2 }
 0x2cc   : > { %9688 = vrcp.f32 %v7643_v40  ;;  %7672 = vperm.xlu0 %9649, %v7667_v59   ;;  %v2404_v40 = vpop.f32.mrf.mxu0  ;;  %v2637_v59 = vrot.slane %v2304_v62, 4 }
 0x2cd   : > { %v2626_v32 = vsel %vm832_vm5, %v11352_v0, %v2625_v10 }
 0x2ce   : > { %v2634_v14 = vperm.slane %v2626_v32, %v10219_v57 }
 0x2d0   : > { %v2685_v32 = vrot.slane %v2634_v14, 4 }
 0x2d2   : > { %v9689_v49 = vpop.eup %9688 }
 0x2d3   : > { %v7702_v58 = vperm.slane %v9689_v49, 0  ;;  %7700 = vperm.xlu1 %9647, %v7695_v2   ;;  %v7716_v50 = vperm.slane %v9689_v49, 2  ;;  %v7709_v33 = vperm.slane %v9689_v49, 1  ;;  %v7723_v6 = vperm.slane %v9689_v49, 3 }
 0x2d4   : > { %7693 = vperm.xlu0 %9649, %v7688_v63   ;;  %v7737_v26 = vperm.slane %v9689_v49, 5  ;;  %v7730_v46 = vperm.slane %v9689_v49, 4  ;;  %v7744_v48 = vperm.slane %v9689_v49, 6  ;;  %v7751_v12 = vperm.slane %v9689_v49, 7 }
 0x2d5   : > { %7707 = vperm.xlu2 %9648, %v7702_v58   ;;  %v2522_v2 = vperm.slane %v2514_v23, %v10219_v57  ;;  %v2524_v49 = vsel %vm832_vm5, %v2523_v52, %v2302_v42  ;;  %v2746_v63 = vsel %vm1067_vm4, %v11357_v55, %v11361_v13  ;;  %v2518_v58 = vperm.slane %v2512_v24, %v10219_v57  ;;  %v2506_v42 = vpop.f32.mrf.mxu3 }
 0x2d6   : > { %v2530_v27 = vperm.slane %v2524_v49, %v10219_v57  ;;  %v2549_v24 = vrot.slane %v2438_v44, 4  ;;  %v2547_v10 = vrot.slane %v2506_v42, 4 }
 0x2d7   : > { %v2573_v3 = vrot.slane %v2522_v2, 4  ;;  %v2561_v51 = vrot.slane %v2518_v58, 4  ;;  %v2572_v52 = vsel %vm832_vm5, %v2571_v39, %v2522_v2 }
 0x2d8   : > { %v2559_v49 = vrot.slane %v2530_v27, 4  ;;  %v11402_v39 = vperm.slane %v2572_v52, %v10261_v31  ;;  %v2548_v52 = vsel %vm832_vm5, %v2547_v10, %v2438_v44 }
 0x2d9   : > { %v2554_v10 = vperm.slane %v2548_v52, %v10219_v57 }
 0x2da   : > { %v2560_v52 = vsel %vm832_vm5, %v2559_v49, %v2518_v58  ;;  %v11464_v58 = vld [vmem:[%s13697_s3 + $0xc] sm:$0xf] }
 0x2db   : > { %7721 = vperm.xlu1 %9647, %v7716_v50   ;;  %v11380_v50 = vrot.slane %v2752_v11, 3  ;;  %v11483_v1 = vrot.slane %v11464_v58, 3 }
 0x2dc   : > { %7714 = vperm.xlu0 %9649, %v7709_v33   ;;  %v2537_v33 = vrot.slane %v2404_v40, 4 }
 0x2dd   : > { %7728 = vperm.xlu2 %9648, %v7723_v6   ;;  %v2535_v6 = vrot.slane %v2472_v60, 4  ;;  %v2775_v23 = vunpack.i.h.s16 %v11380_v50 }
 0x2de   : > { %v2538_v36 = vsel %vm832_vm5, %v2472_v60, %v2537_v33  ;;  %v2562_v33 = vsel %vm832_vm5, %v2530_v27, %v2561_v51  ;;  %v11421_v51 = vpop.permute.xlu2 %5720 }
 0x2df   : > { %v11397_v60 = vperm.slane %v2538_v36, %v10219_v57  ;;  %13743 = vst [vmem:[#allocation41_spill] sm:$0xff] %v11421_v51  ;;  %v2583_v51 = vrot.slane %v2554_v10, 4 }
 0x2e1   : > { %v2597_v27 = vrot.slane %v11397_v60, 4 }
 0x2e3   : > { %7742 = vperm.xlu1 %9647, %v7737_v26   ;;  %v2635_v26 = vrot.slane %v2372_v28, 4 }
 0x2e4   : > { %7735 = vperm.xlu0 %9649, %v7730_v46   ;;  %v2638_v46 = vsel %vm832_vm5, %v2372_v28, %v2637_v59  ;;  %v2536_v28 = vsel %vm832_vm5, %v2535_v6, %v2404_v40  ;;  %v11393_v59 = vpop.permute.xlu0 %5788  ;;  %v2749_v40 = vsel %vm1071_vm2, %v11357_v55, %v11361_v13  ;;  %v11408_v6 = vpop.f32.mrf.mxu1 }
 0x2e5   : > { %7749 = vperm.xlu2 %9648, %v7744_v48   ;;  %v11384_v48 = vrot.slane %v2746_v63, 1  ;;  %v2646_v11 = vperm.slane %v2638_v46, %v10219_v57  ;;  %13741 = vst [vmem:[#allocation39_spill] sm:$0xff] %v11393_v59  ;;  %v2636_v63 = vsel %vm832_vm5, %v2635_v26, %v2304_v62  ;;  %v2542_v26 = vperm.slane %v2536_v28, %v10219_v57  ;;  %v11413_v46 = vpop.permute.xlu1 %5754 }
 0x2e6   : > { %13742 = vst [vmem:[#allocation40_spill] sm:$0xff] %v11413_v46  ;;  %v2550_v59 = vsel %vm832_vm5, %v2506_v42, %v2549_v24  ;;  %v2661_v28 = vrot.slane %v11408_v6, 4 }
 0x2e7   : > { %v2771_v2 = vunpack.i.h.s16 %v11384_v48  ;;  %v2683_v36 = vrot.slane %v2646_v11, 4  ;;  %v2686_v42 = vsel %vm832_vm5, %v2646_v11, %v2685_v32  ;;  %v2585_v24 = vrot.slane %v2542_v26, 4 }
 0x2e9   : > { %v2787_v22 = vpack.i.b16 %v2771_v2, %v2771_v2  ;;  %v2406_v2 = vpop.f32.mrf.mxu0 }
 0x2eb   : > { %v2815_v32 = vperm.slane %v2787_v22, %v10205_v38  ;;  %v2586_v22 = vsel %vm832_vm5, %v2554_v10, %v2585_v24 }
 0x2ec   : > { %7756 = vperm.xlu0 %9649, %v7751_v12   ;;  %v2623_v12 = vrot.slane %v11352_v0, 4  ;;  %v2574_v0 = vsel %vm832_vm5, %v2534_v18, %v2573_v3  ;;  %v2791_v18 = vpack.i.b16 %v2775_v23, %v2775_v23  ;;  %v11416_v3 = vperm.slane %v2636_v63, %v10219_v57  ;;  %v11457_v46 = vpop.permute.xlu0 %5829 }
 0x2ed   : > { %v11431_v23 = vperm.slane %v2574_v0, %v10261_v31  ;;  %v2558_v63 = vperm.slane %v2550_v59, %v10219_v57  ;;  %v11443_v0 = vsel %vm832_vm5, %v2683_v36, %v2634_v14  ;;  %v2649_v14 = vrot.slane %v2406_v2, 4  ;;  %v2508_v36 = vpop.f32.mrf.mxu3  ;;  %13744 = vst [vmem:[#allocation42_spill] sm:$0xff] %v11457_v46 }
 0x2ee   : > { %v2624_v62 = vsel %vm832_vm5, %v2623_v12, %v11350_v41  ;;  %v11426_v41 = vsel %vm1062_vm3, %v11357_v55, %v11361_v13  ;;  %v11428_v12 = vrot.slane %v2749_v40, 2  ;;  %v2831_v55 = vperm.slane %v2791_v18, %v10205_v38 }
 0x2ef   : > { %v11435_v44 = vperm.slane %v2624_v62, %v10219_v57  ;;  %v11446_v40 = vperm.slane %v2562_v33, %v10261_v31  ;;  %v2769_v62 = vunpack.i.h.s16 %v11426_v41  ;;  %v2598_v11 = vsel %vm832_vm5, %v2558_v63, %v2597_v27  ;;  %v2474_v27 = vpop.f32.mrf.mxu2 }
 0x2f0   : > { %v2773_v59 = vunpack.i.h.s16 %v11428_v12  ;;  %v11455_v13 = vperm.slane %v2686_v42, %v10261_v31  ;;  %v2621_v33 = vrot.slane %v11431_v23, 4  ;;  %v2595_v29 = vrot.slane %v2558_v63, 4 }
 0x2f1   : > { %v2887_v43 = vunpack.c.l.bf16 %v2831_v55  ;;  %v11467_v49 = vperm.slane %v2598_v11, %v10261_v31  ;;  %v2613_v42 = vrot.slane %v11446_v40, 4  ;;  %v11471_v18 = vperm.slane %v2560_v52, %v10261_v31  ;;  %v11474_v55 = vpop.permute.xlu1 %5795 }
 0x2f2   : > { %v2785_v46 = vpack.i.b16 %v2769_v62, %v2769_v62  ;;  %v2659_v35 = vrot.slane %v2508_v36, 4  ;;  %v2662_v63 = vsel %vm832_vm5, %v2508_v36, %v2661_v28  ;;  %13745 = vst [vmem:[#allocation43_spill] sm:$0xff] %v11474_v55  ;;  %v2883_v24 = vunpack.c.l.bf16 %v2815_v32  ;;  %v11487_v28 = vpop.permute.xlu2 %5761 }
 0x2f3   : > { %v2789_v10 = vpack.i.b16 %v2773_v59, %v2773_v59  ;;  %v2650_v25 = vsel %vm832_vm5, %v2474_v27, %v2649_v14  ;;  %v11478_v4 = vperm.slane %v2586_v22, %v10261_v31  ;;  %v8998_v11 = vpack.i.b16 %v11380_v50, %v11380_v50  ;;  %13746 = vst [vmem:[#allocation44_spill] sm:$0xff] %v11487_v28 }
 0x2f4   : > { %v2596_v62 = vsel %vm832_vm5, %v2595_v29, %v11397_v60  ;;  %v2647_v52 = vrot.slane %v2474_v27, 4  ;;  %v2903_v36 = vperm.slane %v2887_v43, 0  ;;  %v2584_v32 = vsel %vm832_vm5, %v2583_v51, %v2542_v26 }
 0x2f5   : > { %v11491_v59 = vperm.slane %v2662_v63, %v10219_v57  ;;  %v2622_v14 = vsel %vm832_vm5, %v11467_v49, %v2621_v33  ;;  %v2609_v50 = vrot.slane %v11471_v18, 4  ;;  %v2807_v22 = vperm.slane %v2785_v46, %v10205_v38 }
 0x2f6   : > { %v11498_v55 = vperm.slane %v2650_v25, %v10219_v57  ;;  %v2660_v29 = vsel %vm832_vm5, %v2659_v35, %v11408_v6  ;;  %v2899_v60 = vperm.slane %v2883_v24, 0  ;;  %v2823_v43 = vperm.slane %v2789_v10, %v10205_v38 }
 0x2f7   : > { %v2614_v26 = vsel %vm832_vm5, %v11478_v4, %v2613_v42  ;;  %v2827_v51 = vperm.slane %v8998_v11, %v10205_v38  ;;  %v2762_v33 = vsel %vm1071_vm2, %v11464_v58, %v11483_v1  ;;  %v2759_v25 = vsel %vm1067_vm4, %v11464_v58, %v11483_v1  ;;  %v11520_v42 = vpop.permute.xlu0 %5890 }
 0x2f8   : > { %v2648_v46 = vsel %vm832_vm5, %v2647_v52, %v2406_v2  ;;  %v11513_v27 = vadd.f32 %v2903_v36, %v2622_v14  ;;  %v8997_v35 = vpack.i.b16 %v11428_v12, %v11428_v12  ;;  %v2765_v6 = vsel %vm1075_vm1, %v11464_v58, %v11483_v1  ;;  %13747 = vst [vmem:[#allocation45_spill] sm:$0xff] %v11520_v42 }
 0x2f9   : > { %v11523_v63 = vperm.slane %v2584_v32, %v10261_v31  ;;  %v2881_v24 = vunpack.c.l.bf16 %v2807_v22  ;;  %v2602_v10 = vperm.slane %v2596_v62, %v10261_v31  ;;  %v8996_v2 = vpack.i.b16 %v11384_v48, %v11384_v48  ;;  %v11542_v22 = vpop.permute.xlu1 %5856 }
 0x2fa   : > { %v11528_v11 = vadd.f32 %v2899_v60, %v2614_v26  ;;  %v2885_v52 = vunpack.c.l.bf16 %v2823_v43  ;;  %v11530_v36 = vrot.slane %v2762_v33, 2  ;;  %v11532_v12 = vrot.slane %v2759_v25, 1  ;;  %13748 = vst [vmem:[#allocation46_spill] sm:$0xff] %v11542_v22  ;;  %v11552_v25 = vpop.permute.xlu2 %5822 }
 0x2fb   : > { %v2617_v14 = vrot.slane %v11402_v39, 4  ;;  %v2886_v28 = vunpack.c.l.bf16 %v2827_v51  ;;  %v8995_v32 = vpack.i.b16 %v11426_v41, %v11426_v41  ;;  %v11537_v42 = vrot.slane %v2765_v6, 3  ;;  %13749 = vst [vmem:[#allocation47_spill] sm:$0xff] %v11552_v25 }
 0x2fc   : > { %v11540_v62 = vperm.slane %v2648_v46, %v10219_v57  ;;  %v2952_v48 = vsel %vm461_vm0, %v11513_v27, -inf  ;;  %v2619_v60 = vrot.slane %v11467_v49, 4  ;;  %v2819_v43 = vperm.slane %v8997_v35, %v10205_v38 }
 0x2fd   : > { %v2610_v26 = vsel %vm832_vm5, %v11523_v63, %v2609_v50  ;;  %v2897_v51 = vperm.slane %v2881_v24, 0  ;;  %v2618_v41 = vsel %vm832_vm5, %v2602_v10, %v2617_v14  ;;  %v2811_v33 = vperm.slane %v8996_v2, %v10205_v38 }
 0x2fe   : > { %v2940_v46 = vsel %vm461_vm0, %v11528_v11, -inf  ;;  %v2901_v6 = vperm.slane %v2885_v52, 0  ;;  %v2781_v22 = vunpack.i.h.s16 %v11530_v36  ;;  %v2779_v49 = vunpack.i.h.s16 %v11532_v12 }
 0x2ff   : > { %v2902_v35 = vperm.slane %v2886_v28, 0  ;;  %v2615_v54 = vrot.slane %v2602_v10, 4  ;;  %v2803_v50 = vperm.slane %v8995_v32, %v10205_v38  ;;  %v2783_v24 = vunpack.i.h.s16 %v11537_v42  ;;  %v11573_v15 = vpop.permute.xlu0 %6731 }
 0x300   : > { %v11561_v2 = vperm.slane %v2660_v29, %v10219_v57  ;;  %v2620_v14 = vsel %vm832_vm5, %v2619_v60, %v11431_v23  ;;  %v2884_v25 = vunpack.c.l.bf16 %v2819_v43  ;;  %v2611_v52 = vrot.slane %v11478_v4, 4 }
 0x301   : > { %v2709_v8 = vrot.slane %v11498_v55, 4  ;;  %v2882_v28 = vunpack.c.l.bf16 %v2811_v33  ;;  %v2697_v10 = vrot.slane %v11540_v62, 4  ;;  %v11571_v32 = vadd.f32 %v2901_v6, %v2618_v41 }
 0x302   : > { %v2797_v17 = vpack.i.b16 %v2781_v22, %v2781_v22  ;;  %v2795_v29 = vpack.i.b16 %v2779_v49, %v2779_v49  ;;  %v11575_v7 = vadd.f32 %v2902_v35, %v2620_v14  ;;  %v2616_v4 = vsel %vm832_vm5, %v2615_v54, %v11402_v39 }
 0x303   : > { %v2880_v23 = vunpack.c.l.bf16 %v2803_v50  ;;  %v2799_v60 = vpack.i.b16 %v2783_v24, %v2783_v24  ;;  %v2900_v43 = vperm.slane %v2884_v25, 0  ;;  %v11585_v22 = vsel %vm1062_vm3, %v11464_v58, %v11483_v1  ;;  %v11595_v25 = vpop.permute.xlu1 %5897  ;;  %v11609_v50 = vpop.permute.xlu2 %5863 }
 0x304   : > { %v2898_v33 = vperm.slane %v2882_v28, 0  ;;  %v11591_v54 = vperm.slane %v11443_v0, %v10261_v31  ;;  %v13750_v1 = vrot.slane %v11435_v44, 4  ;;  %v2847_v6 = vperm.slane %v2795_v29, %v10205_v38 }
 0x305   : > { %v2949_v0 = vsel %vm461_vm0, %v11575_v7, -inf  ;;  %v2863_v49 = vperm.slane %v2799_v60, %v10205_v38  ;;  %v2777_v35 = vunpack.i.h.s16 %v11585_v22 }
 0x306   : > { %v2674_v58 = vsel %vm832_vm5, %v11416_v3, %v13750_v1 }
 0x307   : > { %v2682_v29 = vperm.slane %v2674_v58, %v10261_v31 }
 0x30d   : > { %2953 = vmax.xlane.f32.xlu1 %v2952_v48  ;;  %v2707_v48 = vrot.slane %v11491_v59, 4 }
 0x30e   : > { %2941 = vmax.xlane.f32.xlu2 %v2940_v46  ;;  %v11568_v46 = vadd.f32 %v2897_v51, %v2610_v26  ;;  %v2612_v26 = vsel %vm832_vm5, %v2611_v52, %v11446_v40  ;;  %v2607_v51 = vrot.slane %v11523_v63, 4  ;;  %v2946_v40 = vsel %vm461_vm0, %v11571_v32, -inf }
 0x30f   : > { %v2708_v39 = vsel %vm832_vm5, %v2707_v48, %v11498_v55  ;;  %v2855_v63 = vperm.slane %v2797_v17, %v10205_v38  ;;  %v2896_v55 = vperm.slane %v2880_v23, 0  ;;  %v11611_v17 = vadd.f32 %v2900_v43, %v2616_v4 }
 0x310   : > { %v2934_v41 = vsel %vm461_vm0, %v11568_v46, -inf  ;;  %v2608_v24 = vsel %vm832_vm5, %v2607_v51, %v11471_v18  ;;  %v11616_v14 = vperm.slane %v2708_v39, %v10261_v31  ;;  %v2698_v52 = vsel %vm832_vm5, %v11561_v2, %v2697_v10  ;;  %v11639_v39 = vpop.permute.xlu0 %6803 }
 0x311   : > { %v2710_v48 = vsel %vm832_vm5, %v11491_v59, %v2709_v8  ;;  %v11622_v28 = vadd.f32 %v2898_v33, %v2612_v26  ;;  %v9000_v4 = vpack.i.b16 %v11532_v12, %v11532_v12  ;;  %v2729_v23 = vrot.slane %v11591_v54, 4 }
 0x312   : > { %v2893_v60 = vunpack.c.l.bf16 %v2855_v63  ;;  %v2891_v18 = vunpack.c.l.bf16 %v2847_v6  ;;  %v9002_v43 = vpack.i.b16 %v11537_v42, %v11537_v42  ;;  %v11630_v51 = vadd.f32 %v2896_v55, %v2608_v24 }
 0x313   : > { %v2706_v10 = vperm.slane %v2698_v52, %v10261_v31  ;;  %v2793_v8 = vpack.i.b16 %v2777_v35, %v2777_v35  ;;  %v2695_v59 = vrot.slane %v11561_v2, 4  ;;  %v2943_v26 = vsel %vm461_vm0, %v11611_v17, -inf }
 0x314   : > { %v2730_v12 = vsel %vm832_vm5, %v11616_v14, %v2729_v23  ;;  %v2718_v33 = vperm.slane %v2710_v48, %v10261_v31  ;;  %v2937_v42 = vsel %vm461_vm0, %v11622_v28, -inf  ;;  %v2733_v63 = vrot.slane %v11455_v13, 4  ;;  %v11654_v48 = vpop.permute.xlu1 %6779 }
 0x315   : > { %2935 = vmax.xlane.f32.xlu1 %v2934_v41  ;;  %v2895_v41 = vunpack.c.l.bf16 %v2863_v49  ;;  %v2843_v1 = vperm.slane %v9000_v4, %v10205_v38  ;;  %v2909_v58 = vperm.slane %v2893_v60, 0  ;;  %v2907_v2 = vperm.slane %v2891_v18, 0  ;;  %v11660_v18 = vpop.permute.xlu2 %6755 }
 0x316   : > { %2947 = vmax.xlane.f32.xlu0 %v2946_v40  ;;  %2950 = vmax.xlane.f32.xlu2 %v2949_v0  ;;  %v2725_v40 = vrot.slane %v2682_v29, 4  ;;  %v2859_v6 = vperm.slane %v9002_v43, %v10205_v38  ;;  %v13751_v0 = vrot.slane %v11416_v3, 4  ;;  %v2931_v49 = vsel %vm461_vm0, %v11630_v51, -inf }
 0x317   : > { %v2911_v24 = vperm.slane %v2895_v41, 0  ;;  %v2839_v52 = vperm.slane %v2793_v8, %v10205_v38  ;;  %v2734_v4 = vsel %vm832_vm5, %v2718_v33, %v2733_v63  ;;  %v2723_v23 = vrot.slane %v2706_v10, 4 }
 0x318   : > { %v2672_v55 = vsel %vm832_vm5, %v13751_v0, %v11435_v44  ;;  %v2726_v35 = vsel %vm832_vm5, %v2706_v10, %v2725_v40  ;;  %v2890_v60 = vunpack.c.l.bf16 %v2843_v1  ;;  %v2696_v44 = vsel %vm832_vm5, %v2695_v59, %v11540_v62 }
 0x319   : > { %v2678_v3 = vperm.slane %v2672_v55, %v10261_v31  ;;  %v11662_v43 = vadd.f32 %v2909_v58, %v2730_v12  ;;  %v2894_v41 = vunpack.c.l.bf16 %v2859_v6  ;;  %v8999_v8 = vpack.i.b16 %v11585_v22, %v11585_v22 }
 0x31a   : > { %v2731_v40 = vrot.slane %v2718_v33, 4  ;;  %v2889_v10 = vunpack.c.l.bf16 %v2839_v52  ;;  %v9001_v63 = vpack.i.b16 %v11530_v36, %v11530_v36  ;;  %v2702_v1 = vperm.slane %v2696_v44, %v10261_v31  ;;  %v11679_v33 = vpop.permute.xlu0 %6851 }
 0x31b   : > { %v2724_v62 = vsel %vm832_vm5, %v2723_v23, %v2682_v29  ;;  %v2906_v59 = vperm.slane %v2890_v60, 0  ;;  %v2721_v12 = vrot.slane %v2678_v3, 4  ;;  %v2970_v58 = vsel %vm461_vm0, %v11662_v43, -inf }
 0x31c   : > { %v2910_v22 = vperm.slane %v2894_v41, 0  ;;  %v2835_v6 = vperm.slane %v8999_v8, %v10205_v38  ;;  %v2732_v29 = vsel %vm832_vm5, %v2731_v40, %v11455_v13  ;;  %v2905_v0 = vperm.slane %v2889_v10, 0 }
 0x31d   : > { %2944 = vmax.xlane.f32.xlu1 %v2943_v26  ;;  %v11664_v26 = vadd.f32 %v2907_v2, %v2726_v35  ;;  %v2851_v55 = vperm.slane %v9001_v63, %v10205_v38  ;;  %v11687_v35 = vpop.permute.xlu1 %6875  ;;  %v2719_v60 = vrot.slane %v2702_v1, 4  ;;  %v11695_v41 = vpop.permute.xlu2 %6827  ;;  %v2727_v13 = vrot.slane %v11616_v14, 4 }
 0x31e   : > { %2938 = vmax.xlane.f32.xlu0 %v2937_v42  ;;  %2932 = vmax.xlane.f32.xlu2 %v2931_v49  ;;  %v11668_v42 = vadd.f32 %v2911_v24, %v2734_v4  ;;  %v2722_v49 = vsel %vm832_vm5, %v2702_v1, %v2721_v12  ;;  %v11689_v24 = vadd.f32 %v2906_v59, %v2724_v62  ;;  %v2888_v4 = vunpack.c.l.bf16 %v2835_v6 }
 0x31f   : > { %v2964_v2 = vsel %vm461_vm0, %v11664_v26, -inf  ;;  %v11691_v52 = vadd.f32 %v2910_v22, %v2732_v29  ;;  %v11693_v23 = vadd.f32 %v2905_v0, %v2722_v49  ;;  %v2892_v44 = vunpack.c.l.bf16 %v2851_v55 }
 0x320   : > { %v2976_v36 = vsel %vm461_vm0, %v11668_v42, -inf  ;;  %v2961_v8 = vsel %vm461_vm0, %v11689_v24, -inf  ;;  %v2904_v10 = vperm.slane %v2888_v4, 0  ;;  %v2720_v62 = vsel %vm832_vm5, %v2719_v60, %v2678_v3 }
 0x321   : > { %v2973_v40 = vsel %vm461_vm0, %v11691_v52, -inf  ;;  %v2958_v63 = vsel %vm461_vm0, %v11693_v23, -inf  ;;  %v2908_v1 = vperm.slane %v2892_v44, 0  ;;  %v2728_v59 = vsel %vm832_vm5, %v2727_v13, %v11591_v54 }
 0x322   : > { %v11707_v14 = vpop.permute.xlu0 %6923  ;;  %v11709_v12 = vadd.f32 %v2904_v10, %v2720_v62 }
 0x323   : > { %13752 = vst [vmem:[#allocation48_spill] sm:$0xff] %v11707_v14 }
 0x324   : > { %v2955_v6 = vsel %vm461_vm0, %v11709_v12, -inf }
 0x325   : > { %2971 = vmax.xlane.f32.xlu1 %v2970_v58  ;;  %v11711_v58 = vadd.f32 %v2908_v1, %v2728_v59  ;;  %v11715_v22 = vpop.permute.xlu2 %6899 }
 0x326   : > { %2965 = vmax.xlane.f32.xlu0 %v2964_v2  ;;  %2977 = vmax.xlane.f32.xlu2 %v2976_v36  ;;  %v11713_v2 = vpop.permute.xlu1 %6947  ;;  %13754 = vst [vmem:[#allocation50_spill] sm:$0xff] %v11715_v22  ;;  %v2930_v22 = vld [vmem:[#allocation2 + $0x18] sm:$0xff] }
 0x327   : > { %13753 = vst [vmem:[#allocation49_spill] sm:$0xff] %v11713_v2  ;;  %v2967_v3 = vsel %vm461_vm0, %v11711_v58, -inf  ;;  %v2929_v2 = vld [vmem:[#allocation2 + $0x10] sm:$0xff] }
 0x32a   : > { %v11721_v36 = vpop.permute.xlu0 %6995 }
 0x32b   : > { %13755 = vst [vmem:[#allocation51_spill] sm:$0xff] %v11721_v36 }
 0x32d   : > { %2962 = vmax.xlane.f32.xlu1 %v2961_v8  ;;  %v11725_v29 = vpop.permute.xlu2 %6971 }
 0x32e   : > { %2974 = vmax.xlane.f32.xlu0 %v2973_v40  ;;  %2959 = vmax.xlane.f32.xlu2 %v2958_v63  ;;  %v11723_v54 = vpop.permute.xlu1 %7019  ;;  %13757 = vst [vmem:[#allocation53_spill] sm:$0xff] %v11725_v29 }
 0x32f   : > { %13756 = vst [vmem:[#allocation52_spill] sm:$0xff] %v11723_v54 }
 0x332   : > { %v11727_v0 = vpop.permute.xlu0 %7067 }
 0x333   : > { %13758 = vst [vmem:[#allocation54_spill] sm:$0xff] %v11727_v0 }
 0x335   : > { %v11731_v49 = vpop.permute.xlu2 %7043 }
 0x336   : > { %2956 = vmax.xlane.f32.xlu0 %v2955_v6  ;;  %2968 = vmax.xlane.f32.xlu2 %v2967_v3  ;;  %v11729_v55 = vpop.permute.xlu1 %7091  ;;  %13760 = vst [vmem:[#allocation56_spill] sm:$0xff] %v11731_v49 }
 0x337   : > { %13759 = vst [vmem:[#allocation55_spill] sm:$0xff] %v11729_v55 }
 0x33a   : > { %v11733_v4 = vpop.permute.xlu0 %7651 }
 0x33b   : > { %13761 = vst [vmem:[#allocation57_spill] sm:$0xff] %v11733_v4 }
 0x33d   : > { %v11737_v44 = vpop.permute.xlu2 %7665 }
 0x33e   : > { %v11735_v60 = vpop.permute.xlu1 %7658  ;;  %13763 = vst [vmem:[#allocation59_spill] sm:$0xff] %v11737_v44 }
 0x33f   : > { %13762 = vst [vmem:[#allocation58_spill] sm:$0xff] %v11735_v60 }
 0x342   : > { %v11739_v13 = vpop.permute.xlu0 %7672 }
 0x343   : > { %13764 = vst [vmem:[#allocation60_spill] sm:$0xff] %v11739_v13 }
 0x345   : > { %v11743_v40 = vpop.permute.xlu2 %7686 }
 0x346   : > { %v11741_v8 = vpop.permute.xlu1 %7679  ;;  %13766 = vst [vmem:[#allocation62_spill] sm:$0xff] %v11743_v40 }
 0x347   : > { %13765 = vst [vmem:[#allocation61_spill] sm:$0xff] %v11741_v8 }
 0x34a   : > { %v11745_v10 = vpop.permute.xlu0 %7693 }
 0x34b   : > { %13767 = vst [vmem:[#allocation63_spill] sm:$0xff] %v11745_v10 }
 0x34d   : > { %v11747_v63 = vpop.permute.xlu2 %7707 }
 0x34e   : > { %13768 = vst [vmem:[#allocation64_spill] sm:$0xff] %v11747_v63  ;;  %v11749_v62 = vpop.permute.xlu1 %7700 }
 0x34f   : > { %13769 = vst [vmem:[#allocation65_spill] sm:$0xff] %v11749_v62 }
 0x352   : > { %v11751_v1 = vpop.permute.xlu0 %7714 }
 0x353   : > { %13770 = vst [vmem:[#allocation66_spill] sm:$0xff] %v11751_v1 }
 0x355   : > { %v11753_v59 = vpop.permute.xlu2 %7728 }
 0x356   : > { %13771 = vst [vmem:[#allocation67_spill] sm:$0xff] %v11753_v59  ;;  %v11755_v6 = vpop.permute.xlu1 %7721 }
 0x357   : > { %13772 = vst [vmem:[#allocation68_spill] sm:$0xff] %v11755_v6 }
 0x35a   : > { %v11757_v3 = vpop.permute.xlu0 %7735 }
 0x35b   : > { %13773 = vst [vmem:[#allocation69_spill] sm:$0xff] %v11757_v3 }
 0x35d   : > { %v11759_v4 = vpop.permute.xlu2 %7749 }
 0x35e   : > { %13774 = vst [vmem:[#allocation70_spill] sm:$0xff] %v11759_v4  ;;  %v11761_v13 = vpop.permute.xlu1 %7742 }
 0x35f   : > { %13775 = vst [vmem:[#allocation71_spill] sm:$0xff] %v11761_v13 }
 0x362   : > { %v11763_v8 = vpop.permute.xlu0 %7756 }
 0x363   : > { %13776 = vst [vmem:[#allocation72_spill] sm:$0xff] %v11763_v8 }
 0x380   : > { %v2954_v60 = vpop.xlane.xlu1 %2953 }
 0x381   : > { %v2942_v10 = vpop.xlane.xlu2 %2941 }
 0x382   : > { %v2998_v4 = vperm.slane %v2942_v10, %v10622_v53 }
 0x388   : > { %v2936_v40 = vpop.xlane.xlu1 %2935 }
 0x389   : > { %v2948_v63 = vpop.xlane.xlu0 %2947  ;;  %v2951_v44 = vpop.xlane.xlu2 %2950  ;;  %v2996_v1 = vperm.slane %v2936_v40, %v10622_v53 }
 0x38a   : > { %v3000_v54 = vperm.slane %v2948_v63, %v10622_v53  ;;  %v3001_v14 = vperm.slane %v2951_v44, %v10622_v53 }
 0x390   : > { %v2945_v59 = vpop.xlane.xlu1 %2944 }
 0x391   : > { %v2939_v62 = vpop.xlane.xlu0 %2938  ;;  %v2933_v55 = vpop.xlane.xlu2 %2932  ;;  %v2999_v8 = vperm.slane %v2945_v59, %v10622_v53 }
 0x392   : > { %v2995_v6 = vperm.slane %v2933_v55, %v10622_v53  ;;  %v2997_v3 = vperm.slane %v2939_v62, %v10622_v53  ;;  %v3002_v55 = vperm.slane %v2954_v60, %v10622_v53 }
 0x394   : > { %v3011_v13 = vsel %vm1067_vm4, %v2996_v1, %v2995_v6 }
 0x395   : > { %v3012_v49 = vsel %vm1071_vm2, %v2997_v3, %v3011_v13 }
 0x396   : > { %v3013_v36 = vsel %vm1075_vm1, %v2998_v4, %v3012_v49 }
 0x397   : > { %v3014_v40 = vsel %vm1339_vm7, %v2999_v8, %v3013_v36 }
 0x398   : > { %v3015_v62 = vsel %vm1341_vm8, %v3000_v54, %v3014_v40  ;;  %v2972_v63 = vpop.xlane.xlu1 %2971 }
 0x399   : > { %v2966_v10 = vpop.xlane.xlu0 %2965  ;;  %v3016_v1 = vsel %vm1343_vm9, %v3001_v14, %v3015_v62  ;;  %v2978_v6 = vpop.xlane.xlu2 %2977 }
 0x39a   : > { %v3017_v59 = vsel %vm1345_vm10, %v3002_v55, %v3016_v1 }
 0x39b   : > { %v3027_v13 = vmax.f32 %v2929_v2, %v3017_v59 }
 0x39d   : > { %3300 = vst.msk [vmem:[#allocation2 + $0x10] sm:$0xff] %vm444_vm6, %v3027_v13  ;;  %v3049_v49 = vperm.slane %v3027_v13, 2  ;;  %v3042_v4 = vperm.slane %v3027_v13, 1  ;;  %v3035_v44 = vperm.slane %v3027_v13, 0  ;;  %v3070_v8 = vperm.slane %v3027_v13, 5 }
 0x39e   : > { %v3056_v54 = vperm.slane %v3027_v13, 3  ;;  %v3063_v3 = vperm.slane %v3027_v13, 4  ;;  %v3084_v29 = vperm.slane %v3027_v13, 7 }
 0x39f   : > { %3054 = vperm.xlu2 %9648, %v3049_v49   ;;  %3047 = vperm.xlu0 %9649, %v3042_v4   ;;  %v3006_v49 = vperm.slane %v2966_v10, %v10622_v53 }
 0x3a0   : > { %3040 = vperm.xlu1 %9647, %v3035_v44   ;;  %v2963_v40 = vpop.xlane.xlu1 %2962 }
 0x3a1   : > { %v2975_v36 = vpop.xlane.xlu0 %2974  ;;  %v2960_v60 = vpop.xlane.xlu2 %2959  ;;  %v3005_v59 = vperm.slane %v2963_v40, %v10622_v53  ;;  %v3010_v40 = vperm.slane %v2978_v6, %v10622_v53 }
 0x3a2   : > { %v3004_v55 = vperm.slane %v2960_v60, %v10622_v53  ;;  %v3009_v60 = vperm.slane %v2975_v36, %v10622_v53 }
 0x3a7   : > { %3075 = vperm.xlu2 %9648, %v3070_v8   ;;  %3061 = vperm.xlu0 %9649, %v3056_v54   ;;  %v3008_v8 = vperm.slane %v2972_v63, %v10622_v53 }
 0x3a8   : > { %3068 = vperm.xlu1 %9647, %v3063_v3   ;;  %v3077_v3 = vperm.slane %v3027_v13, 6 }
 0x3a9   : > { %v2957_v14 = vpop.xlane.xlu0 %2956  ;;  %v2969_v1 = vpop.xlane.xlu2 %2968 }
 0x3aa   : > { %v3003_v62 = vperm.slane %v2957_v14, %v10622_v53  ;;  %v3007_v0 = vperm.slane %v2969_v1, %v10622_v53 }
 0x3ac   : > { %v3018_v4 = vsel %vm1067_vm4, %v3004_v55, %v3003_v62 }
 0x3ad   : > { %v3019_v44 = vsel %vm1071_vm2, %v3005_v59, %v3018_v4 }
 0x3ae   : > { %v3020_v54 = vsel %vm1075_vm1, %v3006_v49, %v3019_v44  ;;  %v3029_v49 = vsub.f32 %v2929_v2, %v3027_v13 }
 0x3af   : > { %v3021_v14 = vsel %vm1339_vm7, %v3007_v0, %v3020_v54  ;;  %3082 = vperm.xlu0 %9649, %v3077_v3  }
 0x3b0   : > { %v3022_v10 = vsel %vm1341_vm8, %v3008_v8, %v3021_v14  ;;  %3089 = vperm.xlu1 %9647, %v3084_v29   ;;  %v3031_v0 = vmul.f32 1.442695, %v3029_v49 }
 0x3b1   : > { %v3023_v55 = vsel %vm1343_vm9, %v3009_v60, %v3022_v10 }
 0x3b2   : > { %v3024_v62 = vsel %vm1345_vm10, %v3010_v40, %v3023_v55  ;;  %9690 = vpow2.f32 %v3031_v0 }
 0x3b3   : > { %v3028_v63 = vmax.f32 %v2930_v22, %v3024_v62 }
 0x3b5   : > { %3301 = vst.msk [vmem:[#allocation2 + $0x18] sm:$0xff] %vm444_vm6, %v3028_v63  ;;  %v3091_v1 = vperm.slane %v3028_v63, 0  ;;  %v3105_v59 = vperm.slane %v3028_v63, 2  ;;  %v3098_v36 = vperm.slane %v3028_v63, 1  ;;  %v3112_v6 = vperm.slane %v3028_v63, 3 }
 0x3b6   : > { %v3119_v4 = vperm.slane %v3028_v63, 4  ;;  %v3126_v44 = vperm.slane %v3028_v63, 5  ;;  %v3133_v8 = vperm.slane %v3028_v63, 6  ;;  %v3030_v54 = vsub.f32 %v2930_v22, %v3028_v63 }
 0x3b7   : > { %3096 = vperm.xlu2 %9648, %v3091_v1   ;;  %3103 = vperm.xlu0 %9649, %v3098_v36   ;;  %v3140_v3 = vperm.slane %v3028_v63, 7 }
 0x3b8   : > { %3110 = vperm.xlu1 %9647, %v3105_v59   ;;  %v11797_v29 = vpop.eup %9690  ;;  %v3033_v2 = vmul.f32 1.442695, %v3030_v54 }
 0x3b9   : > { %v3716_v60 = vperm.slane %v11797_v29, 2  ;;  %v3702_v13 = vperm.slane %v11797_v29, 0  ;;  %v3709_v14 = vperm.slane %v11797_v29, 1  ;;  %v3737_v40 = vperm.slane %v11797_v29, 5 }
 0x3ba   : > { %9692 = vpow2.f32 %v3033_v2  ;;  %v3723_v22 = vperm.slane %v11797_v29, 3  ;;  %v3730_v55 = vperm.slane %v11797_v29, 4  ;;  %v3744_v63 = vperm.slane %v11797_v29, 6 }
 0x3bb   : > { %v3751_v1 = vperm.slane %v11797_v29, 7 }
 0x3bf   : > { %3117 = vperm.xlu2 %9648, %v3112_v6   ;;  %3124 = vperm.xlu0 %9649, %v3119_v4  }
 0x3c0   : > { %3131 = vperm.xlu1 %9647, %v3126_v44   ;;  %v11803_v10 = vpop.eup %9692 }
 0x3c1   : > { %v3758_v62 = vperm.slane %v11803_v10, 0  ;;  %v3779_v59 = vperm.slane %v11803_v10, 3  ;;  %v3765_v36 = vperm.slane %v11803_v10, 1  ;;  %v3772_v49 = vperm.slane %v11803_v10, 2 }
 0x3c2   : > { %v3800_v0 = vperm.slane %v11803_v10, 6  ;;  %v3786_v6 = vperm.slane %v11803_v10, 4  ;;  %v3793_v4 = vperm.slane %v11803_v10, 5  ;;  %v3807_v44 = vperm.slane %v11803_v10, 7 }
 0x3c7   : > { %3138 = vperm.xlu2 %9648, %v3133_v8   ;;  %3145 = vperm.xlu0 %9649, %v3140_v3  }
 0x3c8   : > { %3721 = vperm.xlu1 %9647, %v3716_v60  }
 0x3cf   : > { %3707 = vperm.xlu2 %9648, %v3702_v13   ;;  %3714 = vperm.xlu0 %9649, %v3709_v14  }
 0x3d0   : > { %3742 = vperm.xlu1 %9647, %v3737_v40  }
 0x3d7   : > { %3728 = vperm.xlu2 %9648, %v3723_v22   ;;  %3735 = vperm.xlu0 %9649, %v3730_v55  }
 0x3d8   : > { %3763 = vperm.xlu1 %9647, %v3758_v62  }
 0x3df   : > { %3749 = vperm.xlu2 %9648, %v3744_v63   ;;  %3756 = vperm.xlu0 %9649, %v3751_v1  }
 0x3e0   : > { %3784 = vperm.xlu1 %9647, %v3779_v59  }
 0x3e7   : > { %3770 = vperm.xlu2 %9648, %v3765_v36   ;;  %3777 = vperm.xlu0 %9649, %v3772_v49  }
 0x3e8   : > { %3805 = vperm.xlu1 %9647, %v3800_v0  }
 0x3ef   : > { %3791 = vperm.xlu2 %9648, %v3786_v6   ;;  %3798 = vperm.xlu0 %9649, %v3793_v4  }
 0x3f7   : > { %3812 = vperm.xlu2 %9648, %v3807_v44  }
 0x3f9   : > { %v3055_v8 = vpop.permute.xlu2 %3054 }
 0x3fa   : > { %v3149_v54 = vsub.f32 %v11622_v28, %v3055_v8 }
 0x3fc   : > { %v3167_v3 = vmul.f32 1.442695, %v3149_v54 }
 0x3fe   : > { %9694 = vpow2.f32 %v3167_v3 }
 0x401   : > { %v3076_v13 = vpop.permute.xlu2 %3075 }
 0x402   : > { %v3152_v14 = vsub.f32 %v11571_v32, %v3076_v13 }
 0x404   : > { %v9695_v60 = vpop.eup %9694  ;;  %v3173_v1 = vmul.f32 1.442695, %v3152_v14 }
 0x405   : > { %v3304_v2 = vpack.c.bf16 %v9695_v60, %v9695_v60 }
 0x407   : > { %9017 = vmatmul.msk.bf16.vlgmr.msra.gmra.mxu2 %vm461_vm0, %v3304_v2 }
 0x408   : > { %3576 = vmatpush.bf16.msra.mxu2 %v10564_v47  ;;  %v3206_v47 = vsel %vm461_vm0, %v9695_v60, 0.0 }
 0x411   : > { %v3048_v40 = vpop.permute.xlu0 %3047  ;;  %v3097_v22 = vpop.permute.xlu2 %3096 }
 0x412   : > { %v3148_v55 = vsub.f32 %v11568_v46, %v3048_v40  ;;  %v3041_v62 = vpop.permute.xlu1 %3040  ;;  %v3155_v36 = vsub.f32 %v11709_v12, %v3097_v22 }
 0x413   : > { %v3147_v63 = vsub.f32 %v11630_v51, %v3041_v62 }
 0x414   : > { %v3165_v28 = vmul.f32 1.442695, %v3148_v55  ;;  %v3179_v4 = vmul.f32 1.442695, %v3155_v36 }
 0x415   : > { %v3163_v59 = vmul.f32 1.442695, %v3147_v63 }
 0x416   : > { %9696 = vpow2.f32 %v3165_v28 }
 0x417   : > { %9698 = vpow2.f32 %v3163_v59 }
 0x418   : > { %9700 = vpow2.f32 %v3173_v1 }
 0x419   : > { %v3062_v49 = vpop.permute.xlu0 %3061  ;;  %3207 = vadd.xlane.f32.xlu0 %v3206_v47  ;;  %v3118_v51 = vpop.permute.xlu2 %3117 }
 0x41a   : > { %v3150_v32 = vsub.f32 %v11528_v11, %v3062_v49  ;;  %v3069_v0 = vpop.permute.xlu1 %3068  ;;  %v3158_v11 = vsub.f32 %v11664_v26, %v3118_v51 }
 0x41b   : > { %v3151_v46 = vsub.f32 %v11611_v17, %v3069_v0 }
 0x41c   : > { %v9697_v6 = vpop.eup %9696  ;;  %v3169_v44 = vmul.f32 1.442695, %v3150_v32  ;;  %v3185_v28 = vmul.f32 1.442695, %v3158_v11 }
 0x41d   : > { %v9699_v8 = vpop.eup %9698  ;;  %v3303_v54 = vpack.c.bf16 %v9697_v6, %v9697_v6  ;;  %v3171_v3 = vmul.f32 1.442695, %v3151_v46  ;;  %v3203_v60 = vsel %vm461_vm0, %v9697_v6, 0.0 }
 0x41e   : > { %v9701_v2 = vpop.eup %9700  ;;  %v3302_v13 = vpack.c.bf16 %v9699_v8, %v9699_v8  ;;  %9702 = vpow2.f32 %v3169_v44  ;;  %v3200_v12 = vsel %vm461_vm0, %v9699_v8, 0.0 }
 0x41f   : > { %9704 = vpow2.f32 %v3171_v3  ;;  %3201 = vadd.xlane.f32.xlu1 %v3200_v12  ;;  %9012 = vmatmul.msk.bf16.vlgmr.msra.gmra.mxu1 %vm461_vm0, %v3303_v54  ;;  %v3215_v14 = vsel %vm461_vm0, %v9701_v2, 0.0  ;;  %v3307_v51 = vpack.c.bf16 %v9701_v2, %v9701_v2  ;;  %v13779_v2 = vld [vmem:[#allocation11_spill] sm:$0xff] }
 0x420   : > { %9706 = vpow2.f32 %v3179_v4  ;;  %9007 = vmatmul.msk.bf16.vlgmr.msra.gmra.mxu0 %vm461_vm0, %v3302_v13  ;;  %3552 = vmatpush.bf16.msra.mxu1 %v10552_v37 }
 0x421   : > { %3528 = vmatpush.bf16.msra.mxu0 %v10558_v45  ;;  %3204 = vadd.xlane.f32.xlu2 %v3203_v60  ;;  %v3083_v17 = vpop.permute.xlu0 %3082  ;;  %v3139_v45 = vpop.permute.xlu2 %3138 }
 0x422   : > { %v3153_v40 = vsub.f32 %v11575_v7, %v3083_v17  ;;  %v3090_v22 = vpop.permute.xlu1 %3089  ;;  %3216 = vadd.xlane.f32.xlu0 %v3215_v14  ;;  %v13777_v7 = vld [vmem:[#allocation9_spill] sm:$0xff]  ;;  %v13780_v17 = vld [vmem:[#allocation12_spill] sm:$0xff] }
 0x423   : > { %v3154_v55 = vsub.f32 %v11513_v27, %v3090_v22  ;;  %v3161_v27 = vsub.f32 %v11691_v52, %v3139_v45 }
 0x424   : > { %v9703_v62 = vpop.eup %9702  ;;  %v3175_v63 = vmul.f32 1.442695, %v3153_v40 }
 0x425   : > { %v9705_v1 = vpop.eup %9704  ;;  %v3305_v59 = vpack.c.bf16 %v9703_v62, %v9703_v62  ;;  %v3177_v37 = vmul.f32 1.442695, %v3154_v55  ;;  %v3209_v26 = vsel %vm461_vm0, %v9703_v62, 0.0  ;;  %v3191_v54 = vmul.f32 1.442695, %v3161_v27 }
 0x426   : > { %v11838_v36 = vpop.eup %9706  ;;  %9708 = vpow2.f32 %v3175_v63  ;;  %v3212_v47 = vsel %vm461_vm0, %v9705_v1, 0.0  ;;  %v3306_v12 = vpack.c.bf16 %v9705_v1, %v9705_v1 }
 0x427   : > { %9710 = vpow2.f32 %v3177_v37  ;;  %3210 = vadd.xlane.f32.xlu1 %v3209_v26  ;;  %9022 = vmatmul.msk.bf16.vlgmr.msra.gmra.mxu3 %vm461_vm0, %v3305_v59  ;;  %v3224_v32 = vsel %vm461_vm0, %v11838_v36, 0.0 }
 0x428   : > { %3600 = vmatpush.bf16.msra.mxu3 %v13777_v7  ;;  %9712 = vpow2.f32 %v3185_v28 }
 0x429   : > { %3213 = vadd.xlane.f32.xlu2 %v3212_v47  ;;  %v3104_v49 = vpop.permute.xlu0 %3103 }
 0x42a   : > { %v3111_v0 = vpop.permute.xlu1 %3110  ;;  %v3156_v46 = vsub.f32 %v11693_v23, %v3104_v49  ;;  %3225 = vadd.xlane.f32.xlu0 %v3224_v32 }
 0x42b   : > { %v3157_v6 = vsub.f32 %v11689_v24, %v3111_v0  ;;  %v13778_v24 = vld [vmem:[#allocation8_spill] sm:$0xff] }
 0x42c   : > { %v9709_v4 = vpop.eup %9708  ;;  %v3181_v44 = vmul.f32 1.442695, %v3156_v46 }
 0x42d   : > { %v9711_v8 = vpop.eup %9710  ;;  %v3308_v3 = vpack.c.bf16 %v9709_v4, %v9709_v4  ;;  %v3183_v13 = vmul.f32 1.442695, %v3157_v6  ;;  %v3218_v52 = vsel %vm461_vm0, %v9709_v4, 0.0  ;;  %v3310_v6 = vpack.c.bf16 %v11838_v36, %v11838_v36 }
 0x42e   : > { %9714 = vpow2.f32 %v3181_v44  ;;  %v3221_v60 = vsel %vm461_vm0, %v9711_v8, 0.0  ;;  %v9713_v11 = vpop.eup %9712  ;;  %v3309_v28 = vpack.c.bf16 %v9711_v8, %v9711_v8  ;;  %v13783_v8 = vld [vmem:[#allocation17_spill] sm:$0xff] }
 0x42f   : > { %9716 = vpow2.f32 %v3183_v13  ;;  %3219 = vadd.xlane.f32.xlu1 %v3218_v52  ;;  %9032 = vmatmul.msk.bf16.vlgmr.msrb.gmra.mxu1 %vm461_vm0, %v3307_v51  ;;  %v3233_v22 = vsel %vm461_vm0, %v9713_v11, 0.0  ;;  %v3313_v52 = vpack.c.bf16 %v9713_v11, %v9713_v11 }
 0x430   : > { %9027 = vmatmul.msk.bf16.vlgmr.msrb.gmra.mxu0 %vm461_vm0, %v3306_v12  ;;  %9037 = vmatmul.msk.bf16.vlgmr.msrb.gmra.mxu2 %vm461_vm0, %v3308_v3  ;;  %9718 = vpow2.f32 %v3191_v54  ;;  %v4029_v54 = vsel %vm461_vm0, %v13783_v8, 0  ;;  %v13784_v3 = vld [vmem:[#allocation18_spill] sm:$0xff] }
 0x431   : > { %3624 = vmatpush.bf16.msrb.mxu0 %v13778_v24  ;;  %3222 = vadd.xlane.f32.xlu2 %v3221_v60  ;;  %v3125_v23 = vpop.permute.xlu0 %3124  ;;  %v3995_v36 = vsel %vm461_vm0, %v13784_v3, 0  ;;  %v13785_v60 = vld [vmem:[#allocation19_spill] sm:$0xff] }
 0x432   : > { %3648 = vmatpush.bf16.msrb.mxu1 %v13779_v2  ;;  %3672 = vmatpush.bf16.msrb.mxu2 %v13780_v17  ;;  %v3132_v14 = vpop.permute.xlu1 %3131  ;;  %v3159_v40 = vsub.f32 %v11711_v58, %v3125_v23  ;;  %v13781_v58 = vld [vmem:[#allocation10_spill] sm:$0xff]  ;;  %v4063_v24 = vsel %vm461_vm0, %v13785_v60, 0  ;;  %v3815_v60 = vld [vmem:[#allocation4 + $0x80] sm:$0xff] }
 0x433   : > { %v3160_v55 = vsub.f32 %v11662_v43, %v3132_v14  ;;  %3234 = vadd.xlane.f32.xlu0 %v3233_v22  ;;  %v13786_v14 = vld [vmem:[#allocation23_spill] sm:$0xff]  ;;  %v13787_v22 = vld [vmem:[#allocation24_spill] sm:$0xff] }
 0x434   : > { %v9715_v62 = vpop.eup %9714  ;;  %v3187_v63 = vmul.f32 1.442695, %v3159_v40  ;;  %v4131_v40 = vsel %vm461_vm0, %v13786_v14, 0  ;;  %v4097_v11 = vsel %vm461_vm0, %v13787_v22, 0 }
 0x435   : > { %v9717_v1 = vpop.eup %9716  ;;  %v3189_v59 = vmul.f32 1.442695, %v3160_v55  ;;  %v3227_v37 = vsel %vm461_vm0, %v9715_v62, 0.0  ;;  %v3311_v0 = vpack.c.bf16 %v9715_v62, %v9715_v62  ;;  %v13788_v55 = vld [vmem:[#allocation25_spill] sm:$0xff] }
 0x436   : > { %9720 = vpow2.f32 %v3187_v63  ;;  %v3230_v26 = vsel %vm461_vm0, %v9717_v1, 0.0  ;;  %v9719_v45 = vpop.eup %9718  ;;  %v3312_v4 = vpack.c.bf16 %v9717_v1, %v9717_v1  ;;  %v4165_v62 = vsel %vm461_vm0, %v13788_v55, 0 }
 0x437   : > { %9722 = vpow2.f32 %v3189_v59  ;;  %3228 = vadd.xlane.f32.xlu1 %v3227_v37  ;;  %9042 = vmatmul.msk.bf16.vlgmr.msrb.gmra.mxu3 %vm461_vm0, %v3309_v28  ;;  %v3242_v7 = vsel %vm461_vm0, %v9719_v45, 0.0  ;;  %v3316_v2 = vpack.c.bf16 %v9719_v45, %v9719_v45  ;;  %v4199_v1 = vsel %vm461_vm0, %v10914_v20, 0  ;;  %v3708_v28 = vpop.permute.xlu2 %3707  ;;  %v13789_v37 = vld [vmem:[#allocation14_spill] sm:$0xff]  ;;  %v13791_v45 = vld [vmem:[#allocation16_spill] sm:$0xff] }
 0x438   : > { %3696 = vmatpush.bf16.msrb.mxu3 %v13781_v58  ;;  %v3831_v22 = vmul.f32 %v3815_v60, %v3708_v28 }
 0x439   : > { %3231 = vadd.xlane.f32.xlu2 %v3230_v26  ;;  %v3146_v43 = vpop.permute.xlu0 %3145  ;;  %v13790_v26 = vld [vmem:[#allocation15_spill] sm:$0xff] }
 0x43a   : > { %v3162_v47 = vsub.f32 %v11668_v42, %v3146_v43  ;;  %v13782_v42 = vld [vmem:[#allocation13_spill] sm:$0xff]  ;;  %v3722_v58 = vpop.permute.xlu1 %3721 }
 0x43b   : > { %3243 = vadd.xlane.f32.xlu0 %v3242_v7  ;;  %v3961_v44 = vsel %vm461_vm0, %v13782_v42, 0  ;;  %v13792_v43 = vld [vmem:[#allocation21_spill] sm:$0xff] }
 0x43c   : > { %v9721_v27 = vpop.eup %9720  ;;  %v3193_v49 = vmul.f32 1.442695, %v3162_v47 }
 0x43d   : > { %v9723_v32 = vpop.eup %9722  ;;  %v3236_v46 = vsel %vm461_vm0, %v9721_v27, 0.0  ;;  %v3314_v17 = vpack.c.bf16 %v9721_v27, %v9721_v27 }
 0x43e   : > { %9724 = vpow2.f32 %v3193_v49  ;;  %v3239_v51 = vsel %vm461_vm0, %v9723_v32, 0.0  ;;  %v3315_v23 = vpack.c.bf16 %v9723_v32, %v9723_v32  ;;  %v13793_v49 = vld [vmem:[#allocation22_spill] sm:$0xff] }
 0x43f   : > { %3237 = vadd.xlane.f32.xlu1 %v3236_v46  ;;  %9052 = vmatmul.msk.bf16.vlgmr.msra.gmra.mxu1 %vm461_vm0, %v3311_v0  ;;  %v11903_v20 = vpop.permute.xlu2 %3728  ;;  %v13796_v32 = vld [vmem:[#allocation26_spill] sm:$0xff] }
 0x440   : > { %9047 = vmatmul.msk.bf16.vlgmr.msra.gmra.mxu0 %vm461_vm0, %v3310_v6  ;;  %9057 = vmatmul.msk.bf16.vlgmr.msra.gmra.mxu2 %vm461_vm0, %v3312_v4 }
 0x441   : > { %3240 = vadd.xlane.f32.xlu2 %v3239_v51  ;;  %3970 = vmatpush.bf16.xpose.msra.mxu0 %v3961_v44  ;;  %v3715_v59 = vpop.permute.xlu0 %3714 }
 0x442   : > { %4004 = vmatpush.bf16.xpose.msra.mxu1 %v3995_v36  ;;  %4038 = vmatpush.bf16.xpose.msra.mxu2 %v4029_v54  ;;  %v11910_v7 = vpop.permute.xlu1 %3742 }
 0x444   : > { %v9725_v13 = vpop.eup %9724 }
 0x445   : > { %v3245_v12 = vsel %vm461_vm0, %v9725_v13, 0.0  ;;  %v3317_v63 = vpack.c.bf16 %v9725_v13, %v9725_v13 }
 0x447   : > { %3246 = vadd.xlane.f32.xlu1 %v3245_v12  ;;  %9062 = vmatmul.msk.bf16.vlgmr.msra.gmra.mxu3 %vm461_vm0, %v3313_v52  ;;  %v11912_v27 = vpop.permute.xlu2 %3749  ;;  %v3816_v12 = vld [vmem:[#allocation4 + $0x88] sm:$0xff] }
 0x448   : > { %4072 = vmatpush.bf16.xpose.msra.mxu3 %v4063_v24 }
 0x449   : > { %v11908_v47 = vpop.permute.xlu0 %3735 }
 0x44f   : > { %9072 = vmatmul.msk.bf16.vlgmr.msrb.gmra.mxu1 %vm461_vm0, %v3315_v23  ;;  %v11929_v0 = vpop.permute.xlu2 %3770 }
 0x450   : > { %9067 = vmatmul.msk.bf16.vlgmr.msrb.gmra.mxu0 %vm461_vm0, %v3314_v17  ;;  %9077 = vmatmul.msk.bf16.vlgmr.msrb.gmra.mxu2 %vm461_vm0, %v3316_v2  ;;  %v3832_v17 = vmul.f32 %v3816_v12, %v3715_v59  ;;  %v3819_v12 = vld [vmem:[#allocation4 + $0xa0] sm:$0xff] }
 0x451   : > { %4106 = vmatpush.bf16.xpose.msrb.mxu0 %v4097_v11  ;;  %4140 = vmatpush.bf16.xpose.msrb.mxu1 %v4131_v40 }
 0x452   : > { %4174 = vmatpush.bf16.xpose.msrb.mxu2 %v4165_v62 }
 0x457   : > { %9082 = vmatmul.msk.bf16.vlgmr.msrb.gmra.mxu3 %vm461_vm0, %v3317_v63 }
 0x458   : > { %4208 = vmatpush.bf16.xpose.msrb.mxu3 %v4199_v1 }
 0x45f   : > { %9100 = vmatmul.msk.bf16.vlgmr.msra.gmra.mxu1 %vm461_vm0, %v13789_v37 }
 0x460   : > { %9091 = vmatmul.msk.bf16.vlgmr.msra.gmra.mxu0 %vm461_vm0, %v13790_v26  ;;  %9109 = vmatmul.msk.bf16.vlgmr.msra.gmra.mxu2 %vm461_vm0, %v13791_v45 }
 0x461   : > { %5040 = vmatpush.bf16.msra.mxu0 %v10860_v5  ;;  %5064 = vmatpush.bf16.msra.mxu1 %v10912_v21  ;;  %v13794_v5 = vld [vmem:[#allocation20_spill] sm:$0xff]  ;;  %v13795_v21 = vld [vmem:[#allocation27_spill] sm:$0xff] }
 0x462   : > { %5088 = vmatpush.bf16.msra.mxu2 %v11163_v61  ;;  %v11925_v61 = vpop.permute.xlu1 %3763 }
 0x467   : > { %9118 = vmatmul.msk.bf16.vlgmr.msra.gmra.mxu3 %vm461_vm0, %v13792_v43 }
 0x468   : > { %5112 = vmatpush.bf16.msra.mxu3 %v11155_v16  ;;  %v11923_v16 = vpop.permute.xlu0 %3756 }
 0x46a   : > { %v11934_v6 = vpop.permute.xlu1 %3784 }
 0x46f   : > { %9136 = vmatmul.msk.bf16.vlgmr.msrb.gmra.mxu1 %vm461_vm0, %v13793_v49 }
 0x470   : > { %9127 = vmatmul.msk.bf16.vlgmr.msrb.gmra.mxu0 %vm461_vm0, %v13794_v5  ;;  %9145 = vmatmul.msk.bf16.vlgmr.msrb.gmra.mxu2 %vm461_vm0, %v13795_v21  ;;  %v11932_v46 = vpop.permute.xlu0 %3777  ;;  %v3196_v5 = vld [vmem:[#allocation3 + $0x10] sm:$0xff] }
 0x471   : > { %5136 = vmatpush.bf16.msrb.mxu0 %v11178_v9  ;;  %5160 = vmatpush.bf16.msrb.mxu1 %v11173_v30  ;;  %v11936_v9 = vpop.permute.xlu2 %3791  ;;  %v3817_v30 = vld [vmem:[#allocation4 + $0x90] sm:$0xff] }
 0x472   : > { %5184 = vmatpush.bf16.msrb.mxu2 %v11176_v34  ;;  %v3833_v34 = vmul.f32 %v3817_v30, %v3722_v58  ;;  %v11940_v51 = vpop.permute.xlu1 %3805 }
 0x477   : > { %9154 = vmatmul.msk.bf16.vlgmr.msrb.gmra.mxu3 %vm461_vm0, %v13796_v32 }
 0x478   : > { %5208 = vmatpush.bf16.msrb.mxu3 %v11195_v56  ;;  %v11938_v4 = vpop.permute.xlu0 %3798 }
 0x479   : > { %v11942_v8 = vpop.permute.xlu2 %3812 }
 0x48a   : > { %v3386_v42 = vpop.f32.mrf.mxu2 }
 0x48b   : > { %v3849_v44 = vadd.f32 %v3833_v34, %v3386_v42 }
 0x48c   : > { %v3208_v54 = vpop.xlane.xlu0 %3207 }
 0x48d   : > { %3865 = vst.msk [vmem:[#allocation4 + $0x90] sm:$0xff] %vm461_vm0, %v3849_v44  ;;  %v3266_v14 = vperm.slane %v3208_v54, %v10622_v53  ;;  %v3818_v54 = vld [vmem:[#allocation4 + $0x98] sm:$0xff] }
 0x492   : > { %v3202_v56 = vpop.xlane.xlu1 %3201  ;;  %v3388_v3 = vpop.f32.mrf.mxu2 }
 0x493   : > { %v3264_v13 = vperm.slane %v3202_v56, %v10622_v53  ;;  %v3198_v56 = vmul.f32 %v11797_v29, %v3196_v5 }
 0x494   : > { %v3205_v36 = vpop.xlane.xlu2 %3204 }
 0x495   : > { %v3265_v52 = vperm.slane %v3205_v36, %v10622_v53  ;;  %v3217_v24 = vpop.xlane.xlu0 %3216  ;;  %v3820_v36 = vld [vmem:[#allocation4 + $0xa8] sm:$0xff] }
 0x496   : > { %v3269_v58 = vperm.slane %v3217_v24, %v10622_v53 }
 0x497   : > { %v3280_v23 = vsel %vm1067_vm4, %v3265_v52, %v3264_v13  ;;  %v3834_v52 = vmul.f32 %v3818_v54, %v11903_v20 }
 0x498   : > { %v3281_v62 = vsel %vm1071_vm2, %v3266_v14, %v3280_v23  ;;  %v3836_v23 = vmul.f32 %v3820_v36, %v11910_v7  ;;  %v3835_v14 = vmul.f32 %v3819_v12, %v11908_v47  ;;  %v3823_v36 = vld [vmem:[#allocation4 + $0xc0] sm:$0xff] }
 0x49a   : > { %v3211_v2 = vpop.xlane.xlu1 %3210 }
 0x49b   : > { %v3267_v40 = vperm.slane %v3211_v2, %v10622_v53 }
 0x49c   : > { %v3214_v11 = vpop.xlane.xlu2 %3213  ;;  %v3362_v55 = vpop.f32.mrf.mxu1 }
 0x49d   : > { %v3268_v63 = vperm.slane %v3214_v11, %v10622_v53  ;;  %v3338_v1 = vpop.f32.mrf.mxu0  ;;  %v3848_v37 = vadd.f32 %v3832_v17, %v3362_v55  ;;  %v3282_v26 = vsel %vm1075_vm1, %v3267_v40, %v3281_v62  ;;  %v3226_v43 = vpop.xlane.xlu0 %3225 }
 0x49e   : > { %v3847_v45 = vadd.f32 %v3831_v22, %v3338_v1  ;;  %v3272_v22 = vperm.slane %v3226_v43, %v10622_v53  ;;  %v3821_v1 = vld [vmem:[#allocation4 + $0xb0] sm:$0xff] }
 0x49f   : > { %3864 = vst.msk [vmem:[#allocation4 + $0x88] sm:$0xff] %vm461_vm0, %v3848_v37  ;;  %v3283_v59 = vsel %vm1339_vm7, %v3268_v63, %v3282_v26  ;;  %v3837_v37 = vmul.f32 %v3821_v1, %v11912_v27 }
 0x4a0   : > { %3863 = vst.msk [vmem:[#allocation4 + $0x80] sm:$0xff] %vm461_vm0, %v3847_v45  ;;  %v3284_v21 = vsel %vm1341_vm8, %v3269_v58, %v3283_v59 }
 0x4a2   : > { %v3220_v28 = vpop.xlane.xlu1 %3219 }
 0x4a3   : > { %v3270_v49 = vperm.slane %v3220_v28, %v10622_v53 }
 0x4a4   : > { %v3223_v32 = vpop.xlane.xlu2 %3222  ;;  %v3364_v30 = vpop.f32.mrf.mxu1 }
 0x4a5   : > { %v3285_v34 = vsel %vm1343_vm9, %v3270_v49, %v3284_v21  ;;  %v3271_v42 = vperm.slane %v3223_v32, %v10622_v53  ;;  %v3340_v44 = vpop.f32.mrf.mxu0  ;;  %v3822_v32 = vld [vmem:[#allocation4 + $0xb8] sm:$0xff] }
 0x4a6   : > { %v3235_v11 = vpop.xlane.xlu0 %3234 }
 0x4a7   : > { %v3286_v3 = vsel %vm1345_vm10, %v3271_v42, %v3285_v34  ;;  %v3275_v58 = vperm.slane %v3235_v11, %v10622_v53 }
 0x4a8   : > { %v3296_v13 = vadd.f32 %v3286_v3, %v3198_v56  ;;  %v3824_v56 = vld [vmem:[#allocation4 + $0xc8] sm:$0xff]  ;;  %v3838_v3 = vmul.f32 %v3822_v32, %v11923_v16  ;;  %v3839_v16 = vmul.f32 %v3823_v36, %v11925_v61  ;;  %v3827_v32 = vld [vmem:[#allocation4 + $0xe0] sm:$0xff] }
 0x4aa   : > { %3298 = vst.msk [vmem:[#allocation3 + $0x10] sm:$0xff] %vm444_vm6, %v3296_v13  ;;  %v3229_v60 = vpop.xlane.xlu1 %3228  ;;  %v3410_v24 = vpop.f32.mrf.mxu3 }
 0x4ab   : > { %v3273_v2 = vperm.slane %v3229_v60, %v10622_v53  ;;  %v3850_v17 = vadd.f32 %v3834_v52, %v3410_v24  ;;  %v3197_v52 = vld [vmem:[#allocation3 + $0x18] sm:$0xff] }
 0x4ac   : > { %v3232_v40 = vpop.xlane.xlu2 %3231  ;;  %v3458_v29 = vpop.f32.mrf.mxu1  ;;  %v3199_v11 = vmul.f32 %v11803_v10, %v3197_v52 }
 0x4ad   : > { %3866 = vst.msk [vmem:[#allocation4 + $0x98] sm:$0xff] %vm461_vm0, %v3850_v17  ;;  %v3434_v20 = vpop.f32.mrf.mxu0  ;;  %v3852_v55 = vadd.f32 %v3836_v23, %v3458_v29  ;;  %v3274_v62 = vperm.slane %v3232_v40, %v10622_v53  ;;  %v3287_v7 = vsel %vm1067_vm4, %v3273_v2, %v3272_v22 }
 0x4ae   : > { %v3851_v63 = vadd.f32 %v3835_v14, %v3434_v20  ;;  %v3244_v44 = vpop.xlane.xlu0 %3243  ;;  %v3840_v14 = vmul.f32 %v3824_v56, %v11929_v0 }
 0x4af   : > { %3868 = vst.msk [vmem:[#allocation4 + $0xa8] sm:$0xff] %vm461_vm0, %v3852_v55  ;;  %v3288_v26 = vsel %vm1071_vm2, %v3274_v62, %v3287_v7  ;;  %v3278_v23 = vperm.slane %v3244_v44, %v10622_v53 }
 0x4b0   : > { %3867 = vst.msk [vmem:[#allocation4 + $0xa0] sm:$0xff] %vm461_vm0, %v3851_v63  ;;  %v3289_v30 = vsel %vm1075_vm1, %v3275_v58, %v3288_v26 }
 0x4b1   : > { %v7790_v47 = vld [vmem:[#allocation3 + $0x10] sm:$0xff] }
 0x4b2   : > { %9726 = vrcp.f32 %v7790_v47  ;;  %v3238_v45 = vpop.xlane.xlu1 %3237  ;;  %v3412_v59 = vpop.f32.mrf.mxu3  ;;  %v3825_v47 = vld [vmem:[#allocation4 + $0xd0] sm:$0xff] }
 0x4b3   : > { %v3276_v28 = vperm.slane %v3238_v45, %v10622_v53  ;;  %v3482_v43 = vpop.f32.mrf.mxu2 }
 0x4b4   : > { %v3853_v49 = vadd.f32 %v3837_v37, %v3482_v43  ;;  %v3241_v5 = vpop.xlane.xlu2 %3240  ;;  %v3460_v21 = vpop.f32.mrf.mxu1  ;;  %v3841_v37 = vmul.f32 %v3825_v47, %v11932_v46 }
 0x4b5   : > { %v3277_v34 = vperm.slane %v3241_v5, %v10622_v53  ;;  %v3436_v42 = vpop.f32.mrf.mxu0  ;;  %v3290_v27 = vsel %vm1339_vm7, %v3276_v28, %v3289_v30  ;;  %v3828_v21 = vld [vmem:[#allocation4 + $0xe8] sm:$0xff] }
 0x4b6   : > { %3869 = vst.msk [vmem:[#allocation4 + $0xb0] sm:$0xff] %vm461_vm0, %v3853_v49  ;;  %v3826_v49 = vld [vmem:[#allocation4 + $0xd8] sm:$0xff] }
 0x4b7   : > { %v3291_v13 = vsel %vm1341_vm8, %v3277_v34, %v3290_v27  ;;  %v3842_v30 = vmul.f32 %v3826_v49, %v11934_v6  ;;  %v3844_v27 = vmul.f32 %v3828_v21, %v11938_v4 }
 0x4b8   : > { %v9727_v54 = vpop.eup %9726  ;;  %v3292_v20 = vsel %vm1343_vm9, %v3278_v23, %v3291_v13 }
 0x4b9   : > { %v7808_v12 = vperm.slane %v9727_v54, 2  ;;  %v7801_v60 = vperm.slane %v9727_v54, 1  ;;  %v7794_v24 = vperm.slane %v9727_v54, 0  ;;  %v7829_v10 = vperm.slane %v9727_v54, 5 }
 0x4ba   : > { %v3247_v2 = vpop.xlane.xlu1 %3246  ;;  %v3506_v17 = vpop.f32.mrf.mxu3  ;;  %v7822_v61 = vperm.slane %v9727_v54, 4  ;;  %v7815_v26 = vperm.slane %v9727_v54, 3  ;;  %v7843_v34 = vperm.slane %v9727_v54, 7  ;;  %v7836_v46 = vperm.slane %v9727_v54, 6 }
 0x4bb   : > { %v3279_v40 = vperm.slane %v3247_v2, %v10622_v53  ;;  %7813 = vperm.xlu0 %9649, %v7808_v12   ;;  %7806 = vperm.xlu2 %9648, %v7801_v60   ;;  %v3484_v29 = vpop.f32.mrf.mxu2  ;;  %v3854_v22 = vadd.f32 %v3838_v3, %v3506_v17  ;;  %v3843_v3 = vmul.f32 %v3827_v32, %v11936_v9 }
 0x4bc   : > { %7799 = vperm.xlu1 %9647, %v7794_v24   ;;  %v3554_v55 = vpop.f32.mrf.mxu1  ;;  %v3829_v24 = vld [vmem:[#allocation4 + $0xf0] sm:$0xff]  ;;  %v3830_v29 = vld [vmem:[#allocation4 + $0xf8] sm:$0xff] }
 0x4bd   : > { %v3293_v62 = vsel %vm1345_vm10, %v3279_v40, %v3292_v20  ;;  %3870 = vst.msk [vmem:[#allocation4 + $0xb8] sm:$0xff] %vm461_vm0, %v3854_v22  ;;  %v3530_v63 = vpop.f32.mrf.mxu0  ;;  %v3856_v0 = vadd.f32 %v3840_v14, %v3554_v55  ;;  %v3845_v23 = vmul.f32 %v3829_v24, %v11940_v51 }
 0x4be   : > { %v3297_v1 = vadd.f32 %v3293_v62, %v3199_v11  ;;  %v3855_v7 = vadd.f32 %v3839_v16, %v3530_v63  ;;  %v3846_v16 = vmul.f32 %v3830_v29, %v11942_v8 }
 0x4bf   : > { %3872 = vst.msk [vmem:[#allocation4 + $0xc8] sm:$0xff] %vm461_vm0, %v3856_v0 }
 0x4c0   : > { %3299 = vst.msk [vmem:[#allocation3 + $0x18] sm:$0xff] %vm444_vm6, %v3297_v1 }
 0x4c1   : > { %3871 = vst.msk [vmem:[#allocation4 + $0xc0] sm:$0xff] %vm461_vm0, %v3855_v7 }
 0x4c2   : > { %v3508_v45 = vpop.f32.mrf.mxu3 }
 0x4c3   : > { %7834 = vperm.xlu0 %9649, %v7829_v10   ;;  %7827 = vperm.xlu2 %9648, %v7822_v61   ;;  %v3578_v59 = vpop.f32.mrf.mxu2 }
 0x4c4   : > { %7820 = vperm.xlu1 %9647, %v7815_v26   ;;  %v3857_v58 = vadd.f32 %v3841_v37, %v3578_v59  ;;  %v3556_v28 = vpop.f32.mrf.mxu1  ;;  %v12011_v59 = vld [vmem:[%s13697_s3 + $0x10] sm:$0xf] }
 0x4c5   : > { %v3532_v43 = vpop.f32.mrf.mxu0 }
 0x4c6   : > { %3873 = vst.msk [vmem:[#allocation4 + $0xd0] sm:$0xff] %vm461_vm0, %v3857_v58  ;;  %v12015_v43 = vrot.slane %v12011_v59, 3 }
 0x4c7   : > { %v7791_v5 = vld [vmem:[#allocation3 + $0x18] sm:$0xff] }
 0x4c8   : > { %9728 = vrcp.f32 %v7791_v5 }
 0x4ca   : > { %v3602_v42 = vpop.f32.mrf.mxu3 }
 0x4cb   : > { %7848 = vperm.xlu2 %9648, %v7843_v34   ;;  %v3580_v44 = vpop.f32.mrf.mxu2  ;;  %v3858_v56 = vadd.f32 %v3842_v30, %v3602_v42  ;;  %v4456_v34 = vsel %vm1075_vm1, %v12011_v59, %v12015_v43 }
 0x4cc   : > { %7841 = vperm.xlu1 %9647, %v7836_v46   ;;  %v3650_v36 = vpop.f32.mrf.mxu1  ;;  %v4453_v46 = vsel %vm1071_vm2, %v12011_v59, %v12015_v43 }
 0x4cd   : > { %3874 = vst.msk [vmem:[#allocation4 + $0xd8] sm:$0xff] %vm461_vm0, %v3858_v56  ;;  %v3626_v13 = vpop.f32.mrf.mxu0  ;;  %v3860_v52 = vadd.f32 %v3844_v27, %v3650_v36 }
 0x4ce   : > { %v9729_v12 = vpop.eup %9728  ;;  %v3859_v60 = vadd.f32 %v3843_v3, %v3626_v13  ;;  %v12028_v3 = vrot.slane %v4456_v34, 3 }
 0x4cf   : > { %3876 = vst.msk [vmem:[#allocation4 + $0xe8] sm:$0xff] %vm461_vm0, %v3860_v52  ;;  %v7850_v6 = vperm.slane %v9729_v12, 0  ;;  %v7864_v54 = vperm.slane %v9729_v12, 2  ;;  %v7857_v4 = vperm.slane %v9729_v12, 1  ;;  %v7871_v22 = vperm.slane %v9729_v12, 3 }
 0x4d0   : > { %3875 = vst.msk [vmem:[#allocation4 + $0xe0] sm:$0xff] %vm461_vm0, %v3859_v60  ;;  %v7885_v11 = vperm.slane %v9729_v12, 5  ;;  %v7878_v20 = vperm.slane %v9729_v12, 4  ;;  %v7892_v1 = vperm.slane %v9729_v12, 6  ;;  %v7899_v7 = vperm.slane %v9729_v12, 7 }
 0x4d1   : > { %7855 = vperm.xlu0 %9649, %v7850_v6   ;;  %v12032_v12 = vrot.slane %v4453_v46, 2 }
 0x4d2   : > { %v3604_v9 = vpop.f32.mrf.mxu3 }
 0x4d3   : > { %7869 = vperm.xlu2 %9648, %v7864_v54   ;;  %v3674_v2 = vpop.f32.mrf.mxu2  ;;  %v4477_v29 = vunpack.i.h.s16 %v12032_v12 }
 0x4d4   : > { %7862 = vperm.xlu1 %9647, %v7857_v4   ;;  %v3861_v17 = vadd.f32 %v3845_v23, %v3674_v2  ;;  %v3652_v14 = vpop.f32.mrf.mxu1  ;;  %v4479_v2 = vunpack.i.h.s16 %v12028_v3 }
 0x4d5   : > { %v3628_v40 = vpop.f32.mrf.mxu0 }
 0x4d6   : > { %3877 = vst.msk [vmem:[#allocation4 + $0xf0] sm:$0xff] %vm461_vm0, %v3861_v17 }
 0x4d9   : > { %7876 = vperm.xlu0 %9649, %v7871_v22  }
 0x4da   : > { %v3698_v55 = vpop.f32.mrf.mxu3 }
 0x4db   : > { %7890 = vperm.xlu2 %9648, %v7885_v11   ;;  %v3676_v62 = vpop.f32.mrf.mxu2  ;;  %v3862_v51 = vadd.f32 %v3846_v16, %v3698_v55  ;;  %v4495_v55 = vpack.i.b16 %v4479_v2, %v4479_v2 }
 0x4dc   : > { %7883 = vperm.xlu1 %9647, %v7878_v20   ;;  %v4006_v63 = vpop.f32.mrf.mxu1 }
 0x4dd   : > { %3878 = vst.msk [vmem:[#allocation4 + $0xf8] sm:$0xff] %vm461_vm0, %v3862_v51  ;;  %v3972_v0 = vpop.f32.mrf.mxu0  ;;  %v4229_v58 = vrot.slane %v4006_v63, 4 }
 0x4de   : > { %v4217_v61 = vrot.slane %v3972_v0, 4 }
 0x4e1   : > { %7897 = vperm.xlu0 %9649, %v7892_v1   ;;  %v4493_v1 = vpack.i.b16 %v4477_v29, %v4477_v29 }
 0x4e2   : > { %v3700_v47 = vpop.f32.mrf.mxu3 }
 0x4e3   : > { %v4040_v10 = vpop.f32.mrf.mxu2  ;;  %v4527_v46 = vperm.slane %v4493_v1, %v10205_v38 }
 0x4e4   : > { %7904 = vperm.xlu1 %9647, %v7899_v7   ;;  %v4008_v8 = vpop.f32.mrf.mxu1  ;;  %v4215_v26 = vrot.slane %v4040_v10, 4  ;;  %v4218_v45 = vsel %vm832_vm5, %v4040_v10, %v4217_v61 }
 0x4e5   : > { %v3974_v37 = vpop.f32.mrf.mxu0  ;;  %v4226_v28 = vperm.slane %v4218_v45, %v10219_v57  ;;  %v4341_v9 = vrot.slane %v4008_v8, 4 }
 0x4e6   : > { %v4216_v49 = vsel %vm832_vm5, %v4215_v26, %v3972_v0  ;;  %v4329_v42 = vrot.slane %v3974_v37, 4 }
 0x4e7   : > { %v4222_v36 = vperm.slane %v4216_v49, %v10219_v57  ;;  %v4277_v13 = vrot.slane %v4226_v28, 4 }
 0x4e9   : > { %v4265_v17 = vrot.slane %v4222_v36, 4 }
 0x4ea   : > { %v4074_v5 = vpop.f32.mrf.mxu3 }
 0x4eb   : > { %v4042_v21 = vpop.f32.mrf.mxu2  ;;  %v4227_v32 = vrot.slane %v4074_v5, 4  ;;  %v4230_v30 = vsel %vm832_vm5, %v4074_v5, %v4229_v58  ;;  %v4535_v58 = vperm.slane %v4495_v55, %v10205_v38 }
 0x4ec   : > { %v4327_v27 = vrot.slane %v4042_v21, 4  ;;  %v4238_v44 = vperm.slane %v4230_v30, %v10219_v57  ;;  %v12026_v56 = vpop.f32.mrf.mxu1  ;;  %v4330_v60 = vsel %vm832_vm5, %v4042_v21, %v4329_v42  ;;  %v4450_v42 = vsel %vm1067_vm4, %v12011_v59, %v12015_v43 }
 0x4ed   : > { %v4228_v52 = vsel %vm832_vm5, %v4227_v32, %v4006_v63  ;;  %v4108_v23 = vpop.f32.mrf.mxu0  ;;  %v12040_v14 = vperm.slane %v4330_v60, %v10219_v57  ;;  %v4253_v45 = vrot.slane %v12026_v56, 4  ;;  %v12089_v2 = vrot.slane %v4450_v42, 1 }
 0x4ee   : > { %v4275_v24 = vrot.slane %v4238_v44, 4  ;;  %v4328_v6 = vsel %vm832_vm5, %v4327_v27, %v3974_v37  ;;  %v4234_v54 = vperm.slane %v4228_v52, %v10219_v57  ;;  %v4278_v4 = vsel %vm832_vm5, %v4238_v44, %v4277_v13 }
 0x4ef   : > { %v12045_v22 = vperm.slane %v4328_v6, %v10219_v57  ;;  %v12048_v16 = vperm.slane %v4278_v4, %v10261_v31  ;;  %v4241_v11 = vrot.slane %v4108_v23, 4  ;;  %v4389_v37 = vrot.slane %v12040_v14, 4 }
 0x4f0   : > { %v4276_v40 = vsel %vm832_vm5, %v4275_v24, %v4226_v28  ;;  %v4263_v62 = vrot.slane %v4234_v54, 4  ;;  %v4266_v26 = vsel %vm832_vm5, %v4234_v54, %v4265_v17  ;;  %v4591_v54 = vunpack.c.l.bf16 %v4535_v58 }
 0x4f1   : > { %v12052_v7 = vperm.slane %v4276_v40, %v10261_v31  ;;  %v4377_v28 = vrot.slane %v12045_v22, 4  ;;  %v4325_v34 = vrot.slane %v12048_v16, 4  ;;  %v12078_v44 = vperm.slane %v4266_v26, %v10261_v31 }
 0x4f2   : > { %v4076_v20 = vpop.f32.mrf.mxu3  ;;  %v4264_v13 = vsel %vm832_vm5, %v4263_v62, %v4222_v36  ;;  %v12094_v36 = vsel %vm1062_vm3, %v12011_v59, %v12015_v43 }
 0x4f3   : > { %v4339_v51 = vrot.slane %v4076_v20, 4  ;;  %v4342_v63 = vsel %vm832_vm5, %v4076_v20, %v4341_v9  ;;  %v4176_v0 = vpop.f32.mrf.mxu2  ;;  %v4473_v20 = vunpack.i.h.s16 %v12094_v36 }
 0x4f4   : > { %v12055_v47 = vperm.slane %v4342_v63, %v10219_v57  ;;  %v4239_v10 = vrot.slane %v4176_v0, 4  ;;  %v4242_v61 = vsel %vm832_vm5, %v4176_v0, %v4241_v11  ;;  %v12066_v32 = vpop.f32.mrf.mxu1  ;;  %v4589_v11 = vunpack.c.l.bf16 %v4527_v46 }
 0x4f5   : > { %v4340_v49 = vsel %vm832_vm5, %v4339_v51, %v4008_v8  ;;  %v4250_v21 = vperm.slane %v4242_v61, %v10219_v57  ;;  %v4321_v8 = vrot.slane %v12052_v7, 4  ;;  %v4110_v24 = vpop.f32.mrf.mxu0  ;;  %v4365_v6 = vrot.slane %v12066_v32, 4 }
 0x4f6   : > { %v4240_v5 = vsel %vm832_vm5, %v4239_v10, %v4108_v23  ;;  %v4390_v30 = vsel %vm832_vm5, %v12055_v47, %v4389_v37  ;;  %v12082_v52 = vperm.slane %v4340_v49, %v10219_v57  ;;  %v4387_v60 = vrot.slane %v12055_v47, 4 }
 0x4f7   : > { %v4246_v27 = vperm.slane %v4240_v5, %v10219_v57  ;;  %v12087_v4 = vperm.slane %v4390_v30, %v10261_v31  ;;  %v4301_v23 = vrot.slane %v4250_v21, 4  ;;  %v4353_v62 = vrot.slane %v4110_v24, 4 }
 0x4f8   : > { %v4475_v63 = vunpack.i.h.s16 %v12089_v2  ;;  %v4607_v47 = vperm.slane %v4591_v54, 0  ;;  %v4489_v59 = vpack.i.b16 %v4473_v20, %v4473_v20  ;;  %v12105_v37 = vperm.slane %v4264_v13, %v10261_v31 }
 0x4f9   : > { %v4289_v55 = vrot.slane %v4246_v27, 4  ;;  %v4605_v58 = vperm.slane %v4589_v11, 0  ;;  %v4388_v11 = vsel %vm832_vm5, %v4387_v60, %v12040_v14  ;;  %v4317_v20 = vrot.slane %v12078_v44, 4 }
 0x4fa   : > { %v4210_v9 = vpop.f32.mrf.mxu3  ;;  %v4491_v49 = vpack.i.b16 %v4475_v63, %v4475_v63  ;;  %v4511_v46 = vperm.slane %v4489_v59, %v10205_v38  ;;  %v4313_v60 = vrot.slane %v12105_v37, 4  ;;  %v12152_v59 = vperm.slane %v4388_v11, %v10261_v31 }
 0x4fb   : > { %v4178_v17 = vpop.f32.mrf.mxu2  ;;  %v4251_v40 = vrot.slane %v4210_v9, 4  ;;  %v4254_v29 = vsel %vm832_vm5, %v4210_v9, %v4253_v45 }
 0x4fc   : > { %v4262_v51 = vperm.slane %v4254_v29, %v10219_v57  ;;  %v4351_v0 = vrot.slane %v4178_v17, 4  ;;  %v4354_v26 = vsel %vm832_vm5, %v4178_v17, %v4353_v62  ;;  %v4585_v29 = vunpack.c.l.bf16 %v4511_v46 }
 0x4fd   : > { %v4252_v1 = vsel %vm832_vm5, %v4251_v40, %v12026_v56  ;;  %v4519_v40 = vperm.slane %v4491_v49, %v10205_v38  ;;  %v9160_v46 = vpack.i.b16 %v12028_v3, %v12028_v3 }
 0x4fe   : > { %v4258_v43 = vperm.slane %v4252_v1, %v10219_v57  ;;  %v4299_v10 = vrot.slane %v4262_v51, 4  ;;  %v4302_v61 = vsel %vm832_vm5, %v4262_v51, %v4301_v23  ;;  %v4352_v42 = vsel %vm832_vm5, %v4351_v0, %v4110_v24 }
 0x4ff   : > { %v12109_v45 = vperm.slane %v4302_v61, %v10261_v31  ;;  %v12128_v24 = vperm.slane %v4354_v26, %v10219_v57  ;;  %v4587_v63 = vunpack.c.l.bf16 %v4519_v40  ;;  %v4601_v0 = vperm.slane %v4585_v29, 0 }
 0x500   : > { %v4287_v5 = vrot.slane %v4258_v43, 4  ;;  %v4300_v56 = vsel %vm832_vm5, %v4299_v10, %v4250_v21  ;;  %v4290_v30 = vsel %vm832_vm5, %v4258_v43, %v4289_v55  ;;  %v4531_v3 = vperm.slane %v9160_v46, %v10205_v38 }
 0x501   : > { %v4326_v13 = vsel %vm832_vm5, %v12109_v45, %v4325_v34  ;;  %v12118_v54 = vperm.slane %v4300_v56, %v10261_v31  ;;  %v4298_v23 = vperm.slane %v4290_v30, %v10261_v31  ;;  %v4603_v10 = vperm.slane %v4587_v63, 0 }
 0x502   : > { %v4212_v9 = vpop.f32.mrf.mxu3  ;;  %v12121_v17 = vadd.f32 %v4607_v47, %v4326_v13  ;;  %v4288_v21 = vsel %vm832_vm5, %v4287_v5, %v4246_v27  ;;  %v12137_v27 = vperm.slane %v4352_v42, %v10219_v57  ;;  %v4413_v26 = vrot.slane %v12128_v24, 4 }
 0x503   : > { %v4322_v34 = vsel %vm832_vm5, %v12118_v54, %v4321_v8  ;;  %v4363_v55 = vrot.slane %v4212_v9, 4  ;;  %v4366_v62 = vsel %vm832_vm5, %v4212_v9, %v4365_v6  ;;  %v12140_v14 = vperm.slane %v4288_v21, %v10261_v31 }
 0x504   : > { %v4656_v51 = vsel %vm461_vm0, %v12121_v17, -inf  ;;  %v4375_v8 = vrot.slane %v12082_v52, 4  ;;  %v4378_v6 = vsel %vm832_vm5, %v12082_v52, %v4377_v28  ;;  %v12148_v1 = vadd.f32 %v4605_v58, %v4322_v34 }
 0x505   : > { %4657 = vmax.xlane.f32.xlu2 %v4656_v51  ;;  %v4318_v47 = vsel %vm832_vm5, %v4298_v23, %v4317_v20  ;;  %v4374_v43 = vperm.slane %v4366_v62, %v10219_v57  ;;  %v4314_v61 = vsel %vm832_vm5, %v12140_v14, %v4313_v60  ;;  %v4364_v49 = vsel %vm832_vm5, %v4363_v55, %v12066_v32 }
 0x506   : > { %v12160_v5 = vadd.f32 %v4601_v0, %v4314_v61  ;;  %v9158_v28 = vpack.i.b16 %v12089_v2, %v12089_v2  ;;  %v4401_v58 = vrot.slane %v12137_v27, 4  ;;  %v12165_v56 = vadd.f32 %v4603_v10, %v4318_v47  ;;  %v12178_v2 = vld [vmem:[%s13697_s3 + $0x14] sm:$0xf] }
 0x507   : > { %v4315_v30 = vrot.slane %v4298_v23, 4  ;;  %v4650_v42 = vsel %vm461_vm0, %v12148_v1, -inf  ;;  %v4323_v32 = vrot.slane %v12109_v45, 4  ;;  %v9159_v9 = vpack.i.b16 %v12032_v12, %v12032_v12 }
 0x508   : > { %v4515_v13 = vperm.slane %v9158_v28, %v10205_v38  ;;  %v12181_v23 = vperm.slane %v4364_v49, %v10219_v57  ;;  %v4411_v40 = vrot.slane %v4374_v43, 4  ;;  %v4319_v21 = vrot.slane %v12118_v54, 4 }
 0x509   : > { %v4414_v29 = vsel %vm832_vm5, %v4374_v43, %v4413_v26  ;;  %v4638_v45 = vsel %vm461_vm0, %v12160_v5, -inf  ;;  %v4523_v11 = vperm.slane %v9159_v9, %v10205_v38  ;;  %v4644_v34 = vsel %vm461_vm0, %v12165_v56, -inf }
 0x50a   : > { %v4586_v12 = vunpack.c.l.bf16 %v4515_v13  ;;  %v4316_v20 = vsel %vm832_vm5, %v4315_v30, %v12078_v44  ;;  %v4590_v55 = vunpack.c.l.bf16 %v4531_v3  ;;  %v12194_v62 = vrot.slane %v12178_v2, 3 }
 0x50b   : > { %4651 = vmax.xlane.f32.xlu0 %v4650_v42  ;;  %v4324_v51 = vsel %vm832_vm5, %v4323_v32, %v12048_v16  ;;  %v4588_v63 = vunpack.c.l.bf16 %v4523_v11  ;;  %v9157_v60 = vpack.i.b16 %v12094_v36, %v12094_v36  ;;  %v4320_v47 = vsel %vm832_vm5, %v4319_v21, %v12052_v7 }
 0x50c   : > { %v4602_v54 = vperm.slane %v4586_v12, 0  ;;  %v4606_v0 = vperm.slane %v4590_v55, 0  ;;  %v4402_v44 = vsel %vm832_vm5, %v12181_v23, %v4401_v58  ;;  %v4463_v43 = vsel %vm1067_vm4, %v12178_v2, %v12194_v62 }
 0x50d   : > { %4639 = vmax.xlane.f32.xlu2 %v4638_v45  ;;  %v4604_v61 = vperm.slane %v4588_v63, 0  ;;  %v4465_v26 = vrot.slane %v4463_v43, 1  ;;  %v4507_v16 = vperm.slane %v9157_v60, %v10205_v38  ;;  %v12213_v36 = vperm.slane %v4378_v6, %v10261_v31 }
 0x50e   : > { %4645 = vmax.xlane.f32.xlu1 %v4644_v34  ;;  %v12207_v10 = vadd.f32 %v4602_v54, %v4316_v20  ;;  %v12210_v49 = vadd.f32 %v4606_v0, %v4324_v51  ;;  %v4311_v7 = vrot.slane %v12140_v14, 4  ;;  %v4466_v28 = vsel %vm1071_vm2, %v12178_v2, %v12194_v62 }
 0x50f   : > { %v12221_v30 = vadd.f32 %v4604_v61, %v4320_v47  ;;  %v4483_v46 = vunpack.i.h.s16 %v4465_v26  ;;  %v4584_v42 = vunpack.c.l.bf16 %v4507_v16  ;;  %v4412_v13 = vsel %vm832_vm5, %v4411_v40, %v12128_v24 }
 0x510   : > { %v4641_v58 = vsel %vm461_vm0, %v12207_v10, -inf  ;;  %v4422_v32 = vperm.slane %v4414_v29, %v10261_v31  ;;  %v4410_v6 = vperm.slane %v4402_v44, %v10261_v31  ;;  %v12227_v14 = vrot.slane %v4466_v28, 2 }
 0x511   : > { %v4647_v9 = vsel %vm461_vm0, %v12221_v30, -inf  ;;  %v4499_v3 = vpack.i.b16 %v4483_v46, %v4483_v46  ;;  %v4600_v21 = vperm.slane %v4584_v42, 0  ;;  %v4469_v45 = vsel %vm1075_vm1, %v12178_v2, %v12194_v62 }
 0x512   : > { %v4653_v12 = vsel %vm461_vm0, %v12210_v49, -inf  ;;  %v4312_v24 = vsel %vm832_vm5, %v4311_v7, %v12105_v37  ;;  %v4485_v40 = vunpack.i.h.s16 %v12227_v14  ;;  %v4471_v29 = vrot.slane %v4469_v45, 3 }
 0x513   : > { %4642 = vmax.xlane.f32.xlu0 %v4641_v58  ;;  %v4429_v11 = vrot.slane %v12213_v36, 4  ;;  %v4551_v34 = vperm.slane %v4499_v3, %v10205_v38  ;;  %v12242_v20 = vperm.slane %v4412_v13, %v10261_v31  ;;  %v9162_v55 = vpack.i.b16 %v4465_v26, %v4465_v26 }
 0x514   : > { %v4399_v54 = vrot.slane %v12181_v23, 4  ;;  %v4501_v51 = vpack.i.b16 %v4485_v40, %v4485_v40  ;;  %v9164_v63 = vpack.i.b16 %v4471_v29, %v4471_v29  ;;  %v4487_v60 = vunpack.i.h.s16 %v4471_v29 }
 0x515   : > { %4648 = vmax.xlane.f32.xlu2 %v4647_v9  ;;  %v4430_v0 = vsel %vm832_vm5, %v4410_v6, %v4429_v11  ;;  %v4595_v37 = vunpack.c.l.bf16 %v4551_v34  ;;  %v12246_v47 = vadd.f32 %v4600_v21, %v4312_v24  ;;  %v4433_v44 = vrot.slane %v12152_v59, 4 }
 0x516   : > { %4654 = vmax.xlane.f32.xlu1 %v4653_v12  ;;  %v4559_v43 = vperm.slane %v4501_v51, %v10205_v38  ;;  %v4563_v61 = vperm.slane %v9164_v63, %v10205_v38  ;;  %v4503_v16 = vpack.i.b16 %v4487_v60, %v4487_v60  ;;  %v4547_v7 = vperm.slane %v9162_v55, %v10205_v38 }
 0x517   : > { %v4611_v26 = vperm.slane %v4595_v37, 0  ;;  %v4434_v23 = vsel %vm832_vm5, %v12242_v20, %v4433_v44  ;;  %v4435_v28 = vrot.slane %v4422_v32, 4  ;;  %v4437_v58 = vrot.slane %v12087_v4, 4 }
 0x518   : > { %v4597_v46 = vunpack.c.l.bf16 %v4559_v43  ;;  %v4598_v42 = vunpack.c.l.bf16 %v4563_v61  ;;  %v4567_v13 = vperm.slane %v4503_v16, %v10205_v38  ;;  %v4427_v9 = vrot.slane %v4410_v6, 4 }
 0x519   : > { %v12256_v3 = vadd.f32 %v4611_v26, %v4430_v0  ;;  %v4635_v21 = vsel %vm461_vm0, %v12246_v47, -inf  ;;  %v4438_v45 = vsel %vm832_vm5, %v4422_v32, %v4437_v58  ;;  %v4400_v12 = vsel %vm832_vm5, %v4399_v54, %v12137_v27 }
 0x51a   : > { %v4613_v24 = vperm.slane %v4597_v46, 0  ;;  %v4599_v40 = vunpack.c.l.bf16 %v4567_v13  ;;  %v4594_v29 = vunpack.c.l.bf16 %v4547_v7  ;;  %v4461_v11 = vsel %vm1062_vm3, %v12178_v2, %v12194_v62 }
 0x51b   : > { %v4668_v6 = vsel %vm461_vm0, %v12256_v3, -inf  ;;  %v4614_v34 = vperm.slane %v4598_v42, 0  ;;  %v4376_v32 = vsel %vm832_vm5, %v4375_v8, %v12045_v22  ;;  %v9161_v55 = vpack.i.b16 %v4461_v11, %v4461_v11 }
 0x51c   : > { %4669 = vmax.xlane.f32.xlu0 %v4668_v6  ;;  %v12272_v27 = vadd.f32 %v4613_v24, %v4434_v23  ;;  %v4436_v54 = vsel %vm832_vm5, %v4435_v28, %v12087_v4  ;;  %v4615_v51 = vperm.slane %v4599_v40, 0  ;;  %v4406_v2 = vperm.slane %v4400_v12, %v10261_v31 }
 0x51d   : > { %v4428_v62 = vsel %vm832_vm5, %v4427_v9, %v12213_v36  ;;  %v4539_v63 = vperm.slane %v9161_v55, %v10205_v38  ;;  %v4481_v60 = vunpack.i.h.s16 %v4461_v11  ;;  %v4610_v8 = vperm.slane %v4594_v29, 0 }
 0x51e   : > { %4636 = vmax.xlane.f32.xlu1 %v4635_v21  ;;  %v4674_v52 = vsel %vm461_vm0, %v12272_v27, -inf  ;;  %v12282_v22 = vadd.f32 %v4615_v51, %v4438_v45  ;;  %v4382_v0 = vperm.slane %v4376_v32, %v10261_v31  ;;  %v12285_v37 = vadd.f32 %v4614_v34, %v4436_v54  ;;  %v7807_v32 = vpop.permute.xlu2 %7806  ;;  %v7775_v54 = vld [vmem:[#allocation4 + $0x88] sm:$0xff] }
 0x51f   : > { %4675 = vmax.xlane.f32.xlu2 %v4674_v52  ;;  %v4592_v4 = vunpack.c.l.bf16 %v4539_v63  ;;  %v4497_v44 = vpack.i.b16 %v4481_v60, %v4481_v60  ;;  %v9163_v43 = vpack.i.b16 %v12227_v14, %v12227_v14  ;;  %v4423_v36 = vrot.slane %v4406_v2, 4 }
 0x520   : > { %v4680_v16 = vsel %vm461_vm0, %v12282_v22, -inf  ;;  %v12292_v7 = vadd.f32 %v4610_v8, %v4428_v62  ;;  %v4425_v26 = vrot.slane %v4382_v0, 4  ;;  %v4677_v28 = vsel %vm461_vm0, %v12285_v37, -inf  ;;  %v7776_v62 = vld [vmem:[#allocation4 + $0x90] sm:$0xff] }
 0x521   : > { %v4543_v61 = vperm.slane %v4497_v44, %v10205_v38  ;;  %v4555_v23 = vperm.slane %v9163_v43, %v10205_v38  ;;  %v4608_v58 = vperm.slane %v4592_v4, 0  ;;  %v4424_v14 = vsel %vm832_vm5, %v4423_v36, %v4382_v0  ;;  %v7779_v0 = vld [vmem:[#allocation4 + $0xa8] sm:$0xff] }
 0x522   : > { %v4426_v42 = vsel %vm832_vm5, %v4406_v2, %v4425_v26  ;;  %v4665_v9 = vsel %vm461_vm0, %v12292_v7, -inf  ;;  %v4431_v24 = vrot.slane %v12242_v20, 4  ;;  %v7907_v2 = vmul.f32 %v7807_v32, %v7775_v54  ;;  %v7781_v26 = vld [vmem:[#allocation4 + $0xb8] sm:$0xff]  ;;  %v7787_v54 = vld [vmem:[#allocation4 + $0xe8] sm:$0xff] }
 0x523   : > { %v4593_v46 = vunpack.c.l.bf16 %v4543_v61  ;;  %v4596_v21 = vunpack.c.l.bf16 %v4555_v23  ;;  %v12301_v45 = vadd.f32 %v4608_v58, %v4424_v14  ;;  %v7774_v61 = vld [vmem:[#allocation4 + $0x80] sm:$0xff]  ;;  %v7777_v14 = vld [vmem:[#allocation4 + $0x98] sm:$0xff] }
 0x524   : > { %4678 = vmax.xlane.f32.xlu0 %v4677_v28  ;;  %v4432_v6 = vsel %vm832_vm5, %v4431_v24, %v12152_v59  ;;  %v7778_v59 = vld [vmem:[#allocation4 + $0xa0] sm:$0xff] }
 0x525   : > { %v4609_v13 = vperm.slane %v4593_v46, 0  ;;  %v4612_v29 = vperm.slane %v4596_v21, 0  ;;  %v4659_v11 = vsel %vm461_vm0, %v12301_v45, -inf  ;;  %v7782_v28 = vld [vmem:[#allocation4 + $0xc0] sm:$0xff]  ;;  %v7784_v21 = vld [vmem:[#allocation4 + $0xd0] sm:$0xff] }
 0x526   : > { %4681 = vmax.xlane.f32.xlu1 %v4680_v16  ;;  %v7828_v51 = vpop.permute.xlu2 %7827 }
 0x527   : > { %4666 = vmax.xlane.f32.xlu2 %v4665_v9  ;;  %v12303_v12 = vadd.f32 %v4609_v13, %v4426_v42  ;;  %v12312_v34 = vadd.f32 %v4612_v29, %v4432_v6  ;;  %v7910_v8 = vmul.f32 %v7828_v51, %v7778_v59  ;;  %v7786_v59 = vld [vmem:[#allocation4 + $0xe0] sm:$0xff] }
 0x529   : > { %v4662_v40 = vsel %vm461_vm0, %v12303_v12, -inf  ;;  %v4671_v55 = vsel %vm461_vm0, %v12312_v34, -inf }
 0x52c   : > { %4660 = vmax.xlane.f32.xlu0 %v4659_v11  ;;  %v7780_v11 = vld [vmem:[#allocation4 + $0xb0] sm:$0xff] }
 0x52d   : > { %v7814_v20 = vpop.permute.xlu0 %7813 }
 0x52e   : > { %4663 = vmax.xlane.f32.xlu1 %v4662_v40  ;;  %v7800_v63 = vpop.permute.xlu1 %7799  ;;  %v7908_v60 = vmul.f32 %v7814_v20, %v7776_v62  ;;  %v7849_v4 = vpop.permute.xlu2 %7848  ;;  %v7785_v40 = vld [vmem:[#allocation4 + $0xd8] sm:$0xff] }
 0x52f   : > { %v7906_v16 = vmul.f32 %v7800_v63, %v7774_v61  ;;  %v7913_v23 = vmul.f32 %v7849_v4, %v7781_v26  ;;  %v7783_v63 = vld [vmem:[#allocation4 + $0xc8] sm:$0xff]  ;;  %v7789_v4 = vld [vmem:[#allocation4 + $0xf8] sm:$0xff] }
 0x535   : > { %v7835_v52 = vpop.permute.xlu0 %7834 }
 0x536   : > { %4672 = vmax.xlane.f32.xlu1 %v4671_v55  ;;  %v7911_v44 = vmul.f32 %v7835_v52, %v7779_v0  ;;  %v7821_v43 = vpop.permute.xlu1 %7820  ;;  %v7870_v46 = vpop.permute.xlu2 %7869 }
 0x537   : > { %v7909_v9 = vmul.f32 %v7821_v43, %v7777_v14  ;;  %v7916_v24 = vmul.f32 %v7870_v46, %v7784_v21 }
 0x53e   : > { %v7842_v42 = vpop.permute.xlu1 %7841  ;;  %v7891_v6 = vpop.permute.xlu2 %7890 }
 0x53f   : > { %8236 = vrot.lane.b32.xlu2 %v7907_v2, %s9922_s10  ;;  %v7912_v32 = vmul.f32 %v7842_v42, %v7780_v11  ;;  %v7919_v51 = vmul.f32 %v7891_v6, %v7787_v54  ;;  %v7788_v2 = vld [vmem:[#allocation4 + $0xf0] sm:$0xff] }
 0x540   : > { %8238 = vrot.lane.b32.xlu0 %v7908_v60, %s9922_s10 }
 0x543   : > { %v7856_v36 = vpop.permute.xlu0 %7855 }
 0x544   : > { %v7914_v58 = vmul.f32 %v7856_v36, %v7782_v28 }
 0x546   : > { %v7863_v55 = vpop.permute.xlu1 %7862 }
 0x547   : > { %8242 = vrot.lane.b32.xlu2 %v7910_v8, %s9922_s10  ;;  %v7915_v60 = vmul.f32 %v7863_v55, %v7783_v63 }
 0x548   : > { %8244 = vrot.lane.b32.xlu0 %v7911_v44, %s9922_s10 }
 0x54b   : > { %v7877_v13 = vpop.permute.xlu0 %7876 }
 0x54c   : > { %v7917_v29 = vmul.f32 %v7877_v13, %v7785_v40 }
 0x54e   : > { %v7884_v52 = vpop.permute.xlu1 %7883 }
 0x54f   : > { %8234 = vrot.lane.b32.xlu1 %v7906_v16, %s9922_s10  ;;  %8248 = vrot.lane.b32.xlu2 %v7913_v23, %s9922_s10  ;;  %v7918_v8 = vmul.f32 %v7884_v52, %v7786_v59 }
 0x550   : > { %8250 = vrot.lane.b32.xlu0 %v7914_v58, %s9922_s10 }
 0x553   : > { %v7898_v20 = vpop.permute.xlu0 %7897 }
 0x554   : > { %v7920_v62 = vmul.f32 %v7898_v20, %v7788_v2  ;;  %v4633_v20 = vld [vmem:[#allocation2 + $0x20] sm:$0xff] }
 0x556   : > { %v7905_v0 = vpop.permute.xlu1 %7904 }
 0x557   : > { %8240 = vrot.lane.b32.xlu1 %v7909_v9, %s9922_s10  ;;  %8254 = vrot.lane.b32.xlu2 %v7916_v24, %s9922_s10  ;;  %v7921_v44 = vmul.f32 %v7905_v0, %v7789_v4 }
 0x558   : > { %8256 = vrot.lane.b32.xlu0 %v7917_v29, %s9922_s10 }
 0x55f   : > { %8246 = vrot.lane.b32.xlu1 %v7912_v32, %s9922_s10  ;;  %8260 = vrot.lane.b32.xlu2 %v7919_v51, %s9922_s10 }
 0x560   : > { %8262 = vrot.lane.b32.xlu0 %v7920_v62, %s9922_s10 }
 0x567   : > { %8252 = vrot.lane.b32.xlu1 %v7915_v60, %s9922_s10 }
 0x56f   : > { %8258 = vrot.lane.b32.xlu1 %v7918_v8, %s9922_s10 }
 0x577   : > { %8264 = vrot.lane.b32.xlu1 %v7921_v44, %s9922_s10 }
 0x578   : > { %v4658_v43 = vpop.xlane.xlu2 %4657 }
 0x579   : > { %v4706_v55 = vperm.slane %v4658_v43, %v10622_v53 }
 0x57e   : > { %v4652_v36 = vpop.xlane.xlu0 %4651 }
 0x57f   : > { %v4704_v29 = vperm.slane %v4652_v36, %v10622_v53 }
 0x580   : > { %v4640_v16 = vpop.xlane.xlu2 %4639 }
 0x581   : > { %v4646_v61 = vpop.xlane.xlu1 %4645  ;;  %v4700_v46 = vperm.slane %v4640_v16, %v10622_v53 }
 0x582   : > { %v4702_v9 = vperm.slane %v4646_v61, %v10622_v53 }
 0x586   : > { %v4643_v26 = vpop.xlane.xlu0 %4642 }
 0x587   : > { %v4701_v13 = vperm.slane %v4643_v26, %v10622_v53 }
 0x588   : > { %v4649_v28 = vpop.xlane.xlu2 %4648 }
 0x589   : > { %v4655_v23 = vpop.xlane.xlu1 %4654  ;;  %v4703_v24 = vperm.slane %v4649_v28, %v10622_v53 }
 0x58a   : > { %v4705_v6 = vperm.slane %v4655_v23, %v10622_v53 }
 0x58f   : > { %v4670_v14 = vpop.xlane.xlu0 %4669 }
 0x591   : > { %v4637_v58 = vpop.xlane.xlu1 %4636 }
 0x592   : > { %v4699_v42 = vperm.slane %v4637_v58, %v10622_v53  ;;  %v4676_v2 = vpop.xlane.xlu2 %4675 }
 0x594   : > { %v4715_v21 = vsel %vm1067_vm4, %v4700_v46, %v4699_v42  ;;  %v4710_v42 = vperm.slane %v4670_v14, %v10622_v53 }
 0x595   : > { %v4716_v40 = vsel %vm1071_vm2, %v4701_v13, %v4715_v21  ;;  %v4712_v21 = vperm.slane %v4676_v2, %v10622_v53 }
 0x596   : > { %v4717_v11 = vsel %vm1075_vm1, %v4702_v9, %v4716_v40 }
 0x597   : > { %v4718_v32 = vsel %vm1339_vm7, %v4703_v24, %v4717_v11  ;;  %v4679_v60 = vpop.xlane.xlu0 %4678 }
 0x598   : > { %v4719_v54 = vsel %vm1341_vm8, %v4704_v29, %v4718_v32  ;;  %v4713_v40 = vperm.slane %v4679_v60, %v10622_v53 }
 0x599   : > { %v4720_v51 = vsel %vm1343_vm9, %v4705_v6, %v4719_v54  ;;  %v4682_v62 = vpop.xlane.xlu1 %4681  ;;  %v4634_v6 = vld [vmem:[#allocation2 + $0x28] sm:$0xff] }
 0x59a   : > { %v4721_v63 = vsel %vm1345_vm10, %v4706_v55, %v4720_v51  ;;  %v4667_v36 = vpop.xlane.xlu2 %4666  ;;  %v4714_v11 = vperm.slane %v4682_v62, %v10622_v53 }
 0x59b   : > { %v4731_v52 = vmax.f32 %v4633_v20, %v4721_v63  ;;  %v4709_v28 = vperm.slane %v4667_v36, %v10622_v53 }
 0x59d   : > { %5004 = vst.msk [vmem:[#allocation2 + $0x20] sm:$0xff] %vm444_vm6, %v4731_v52  ;;  %v4753_v59 = vperm.slane %v4731_v52, 2  ;;  %v4746_v8 = vperm.slane %v4731_v52, 1  ;;  %v4739_v0 = vperm.slane %v4731_v52, 0  ;;  %v4781_v26 = vperm.slane %v4731_v52, 6 }
 0x59e   : > { %v4767_v23 = vperm.slane %v4731_v52, 4  ;;  %v4760_v58 = vperm.slane %v4731_v52, 3  ;;  %v4788_v55 = vperm.slane %v4731_v52, 7  ;;  %v4774_v14 = vperm.slane %v4731_v52, 5 }
 0x59f   : > { %4758 = vperm.xlu1 %9647, %v4753_v59   ;;  %4751 = vperm.xlu0 %9649, %v4746_v8   ;;  %v4661_v44 = vpop.xlane.xlu0 %4660  ;;  %v4733_v60 = vsub.f32 %v4633_v20, %v4731_v52 }
 0x5a0   : > { %4744 = vperm.xlu2 %9648, %v4739_v0   ;;  %v4707_v61 = vperm.slane %v4661_v44, %v10622_v53 }
 0x5a1   : > { %v4664_v4 = vpop.xlane.xlu1 %4663  ;;  %v4735_v62 = vmul.f32 1.442695, %v4733_v60 }
 0x5a2   : > { %v4708_v43 = vperm.slane %v4664_v4, %v10622_v53  ;;  %v12367_v52 = vpop.permute.xlu2 %8236 }
 0x5a3   : > { %9730 = vpow2.f32 %v4735_v62 }
 0x5a4   : > { %v4722_v16 = vsel %vm1067_vm4, %v4708_v43, %v4707_v61 }
 0x5a5   : > { %v4723_v46 = vsel %vm1071_vm2, %v4709_v28, %v4722_v16 }
 0x5a6   : > { %v4724_v24 = vsel %vm1075_vm1, %v4710_v42, %v4723_v46 }
 0x5a7   : > { %4786 = vperm.xlu1 %9647, %v4781_v26   ;;  %4772 = vperm.xlu0 %9649, %v4767_v23  }
 0x5a8   : > { %4765 = vperm.xlu2 %9648, %v4760_v58  }
 0x5a9   : > { %v4673_v13 = vpop.xlane.xlu1 %4672  ;;  %v12364_v43 = vpop.eup %9730 }
 0x5aa   : > { %v4711_v9 = vperm.slane %v4673_v13, %v10622_v53  ;;  %v5406_v61 = vperm.slane %v12364_v43, 0  ;;  %v5413_v16 = vperm.slane %v12364_v43, 1  ;;  %v5427_v23 = vperm.slane %v12364_v43, 3  ;;  %v12373_v42 = vpop.permute.xlu2 %8242 }
 0x5ab   : > { %v5420_v28 = vperm.slane %v12364_v43, 2  ;;  %v5434_v46 = vperm.slane %v12364_v43, 4  ;;  %v5448_v13 = vperm.slane %v12364_v43, 6 }
 0x5ac   : > { %v4725_v29 = vsel %vm1339_vm7, %v4711_v9, %v4724_v24  ;;  %v5441_v9 = vperm.slane %v12364_v43, 5 }
 0x5ad   : > { %v4726_v32 = vsel %vm1341_vm8, %v4712_v21, %v4725_v29 }
 0x5ae   : > { %v4727_v54 = vsel %vm1343_vm9, %v4713_v40, %v4726_v32  ;;  %v5455_v40 = vperm.slane %v12364_v43, 7 }
 0x5af   : > { %v4728_v51 = vsel %vm1345_vm10, %v4714_v11, %v4727_v54  ;;  %4793 = vperm.xlu0 %9649, %v4788_v55  }
 0x5b0   : > { %v4732_v63 = vmax.f32 %v4634_v6, %v4728_v51  ;;  %4779 = vperm.xlu2 %9648, %v4774_v14  }
 0x5b2   : > { %5005 = vst.msk [vmem:[#allocation2 + $0x28] sm:$0xff] %vm444_vm6, %v4732_v63  ;;  %v4802_v2 = vperm.slane %v4732_v63, 1  ;;  %v4809_v59 = vperm.slane %v4732_v63, 2  ;;  %v4795_v8 = vperm.slane %v4732_v63, 0  ;;  %v4823_v0 = vperm.slane %v4732_v63, 4  ;;  %v12383_v11 = vpop.permute.xlu2 %8248  ;;  %v12386_v32 = vpop.permute.xlu0 %8238 }
 0x5b3   : > { %v4830_v4 = vperm.slane %v4732_v63, 5  ;;  %v4816_v44 = vperm.slane %v4732_v63, 3  ;;  %v4844_v36 = vperm.slane %v4732_v63, 7  ;;  %v4837_v20 = vperm.slane %v4732_v63, 6 }
 0x5b4   : > { %4807 = vperm.xlu1 %9647, %v4802_v2   ;;  %v4734_v26 = vsub.f32 %v4634_v6, %v4732_v63 }
 0x5b6   : > { %v4737_v58 = vmul.f32 1.442695, %v4734_v26 }
 0x5b7   : > { %4814 = vperm.xlu0 %9649, %v4809_v59  }
 0x5b8   : > { %4800 = vperm.xlu2 %9648, %v4795_v8   ;;  %9732 = vpow2.f32 %v4737_v58 }
 0x5ba   : > { %v12393_v63 = vpop.permute.xlu2 %8254  ;;  %v12396_v60 = vpop.permute.xlu0 %8244 }
 0x5bc   : > { %4828 = vperm.xlu1 %9647, %v4823_v0  }
 0x5be   : > { %v12379_v24 = vpop.eup %9732 }
 0x5bf   : > { %4835 = vperm.xlu0 %9649, %v4830_v4   ;;  %v5469_v29 = vperm.slane %v12379_v24, 1  ;;  %v5462_v6 = vperm.slane %v12379_v24, 0  ;;  %v5476_v54 = vperm.slane %v12379_v24, 2  ;;  %v5490_v14 = vperm.slane %v12379_v24, 4 }
 0x5c0   : > { %4821 = vperm.xlu2 %9648, %v4816_v44   ;;  %v5483_v51 = vperm.slane %v12379_v24, 3  ;;  %v5497_v2 = vperm.slane %v12379_v24, 5  ;;  %v5511_v8 = vperm.slane %v12379_v24, 7  ;;  %v5504_v62 = vperm.slane %v12379_v24, 6 }
 0x5c1   : > { %v12377_v21 = vpop.permute.xlu1 %8234 }
 0x5c2   : > { %v12402_v0 = vpop.permute.xlu2 %8260  ;;  %v12404_v4 = vpop.permute.xlu0 %8250 }
 0x5c4   : > { %4849 = vperm.xlu1 %9647, %v4844_v36  }
 0x5c7   : > { %5411 = vperm.xlu0 %9649, %v5406_v61  }
 0x5c8   : > { %4842 = vperm.xlu2 %9648, %v4837_v20  }
 0x5c9   : > { %v12388_v55 = vpop.permute.xlu1 %8240 }
 0x5cc   : > { %5418 = vperm.xlu1 %9647, %v5413_v16   ;;  %v12409_v16 = vpop.permute.xlu0 %8256 }
 0x5cf   : > { %5432 = vperm.xlu0 %9649, %v5427_v23  }
 0x5d0   : > { %5425 = vperm.xlu2 %9648, %v5420_v28  }
 0x5d1   : > { %v12398_v59 = vpop.permute.xlu1 %8246 }
 0x5d4   : > { %5439 = vperm.xlu1 %9647, %v5434_v46  }
 0x5d7   : > { %5453 = vperm.xlu0 %9649, %v5448_v13  }
 0x5d8   : > { %5446 = vperm.xlu2 %9648, %v5441_v9   ;;  %v12415_v9 = vpop.permute.xlu0 %8262 }
 0x5d9   : > { %v12406_v44 = vpop.permute.xlu1 %8252 }
 0x5dc   : > { %5460 = vperm.xlu1 %9647, %v5455_v40  }
 0x5df   : > { %5474 = vperm.xlu0 %9649, %v5469_v29  }
 0x5e0   : > { %5467 = vperm.xlu2 %9648, %v5462_v6  }
 0x5e1   : > { %v12411_v26 = vpop.permute.xlu1 %8258 }
 0x5e4   : > { %5481 = vperm.xlu1 %9647, %v5476_v54   ;;  %v13798_v54 = vld [vmem:[#allocation28_spill] sm:$0xff] }
 0x5e7   : > { %5495 = vperm.xlu0 %9649, %v5490_v14  }
 0x5e8   : > { %5488 = vperm.xlu2 %9648, %v5483_v51  }
 0x5e9   : > { %v12417_v40 = vpop.permute.xlu1 %8264 }
 0x5ea   : > { %13797 = vst [vmem:[#allocation9_spill] sm:$0xff] %v12417_v40 }
 0x5ec   : > { %5502 = vperm.xlu1 %9647, %v5497_v2  }
 0x5ef   : > { %5516 = vperm.xlu0 %9649, %v5511_v8  }
 0x5f0   : > { %5509 = vperm.xlu2 %9648, %v5504_v62  }
 0x5fa   : > { %v4745_v36 = vpop.permute.xlu2 %4744 }
 0x5fb   : > { %v4851_v61 = vsub.f32 %v12246_v47, %v4745_v36 }
 0x5fd   : > { %v4867_v20 = vmul.f32 1.442695, %v4851_v61 }
 0x5ff   : > { %9734 = vpow2.f32 %v4867_v20 }
 0x602   : > { %v4766_v23 = vpop.permute.xlu2 %4765 }
 0x603   : > { %v4854_v28 = vsub.f32 %v12165_v56, %v4766_v23 }
 0x605   : > { %v9735_v58 = vpop.eup %9734  ;;  %v4873_v46 = vmul.f32 1.442695, %v4854_v28 }
 0x606   : > { %v5006_v13 = vpack.c.bf16 %v9735_v58, %v9735_v58  ;;  %v4904_v20 = vsel %vm461_vm0, %v9735_v58, 0.0 }
 0x607   : > { %9736 = vpow2.f32 %v4873_v46 }
 0x608   : > { %9169 = vmatmul.msk.bf16.vlgmr.msra.gmra.mxu0 %vm461_vm0, %v5006_v13 }
 0x609   : > { %5232 = vmatpush.bf16.msra.mxu0 %v11188_v19 }
 0x60a   : > { %v4780_v47 = vpop.permute.xlu2 %4779 }
 0x60b   : > { %v4856_v8 = vsub.f32 %v12148_v1, %v4780_v47 }
 0x60d   : > { %v9737_v29 = vpop.eup %9736  ;;  %v4877_v19 = vmul.f32 1.442695, %v4856_v8 }
 0x60e   : > { %v5009_v6 = vpack.c.bf16 %v9737_v29, %v9737_v29 }
 0x610   : > { %9184 = vmatmul.msk.bf16.vlgmr.msra.gmra.mxu3 %vm461_vm0, %v5009_v6 }
 0x611   : > { %5304 = vmatpush.bf16.msra.mxu3 %v13798_v54  ;;  %v4759_v56 = vpop.permute.xlu1 %4758  ;;  %v4752_v14 = vpop.permute.xlu0 %4751 }
 0x612   : > { %v4853_v51 = vsub.f32 %v12207_v10, %v4759_v56  ;;  %v4852_v2 = vsub.f32 %v12160_v5, %v4752_v14  ;;  %v4801_v61 = vpop.permute.xlu2 %4800 }
 0x613   : > { %v4859_v5 = vsub.f32 %v12301_v45, %v4801_v61  ;;  %v4913_v45 = vsel %vm461_vm0, %v9737_v29, 0.0 }
 0x614   : > { %v4871_v62 = vmul.f32 1.442695, %v4853_v51  ;;  %v4869_v36 = vmul.f32 1.442695, %v4852_v2  ;;  %v13800_v2 = vld [vmem:[#allocation7_spill] sm:$0xff] }
 0x616   : > { %9738 = vpow2.f32 %v4871_v62 }
 0x617   : > { %9740 = vpow2.f32 %v4869_v36 }
 0x618   : > { %9742 = vpow2.f32 %v4877_v19 }
 0x619   : > { %v4787_v23 = vpop.permute.xlu1 %4786  ;;  %v4773_v28 = vpop.permute.xlu0 %4772  ;;  %4905 = vadd.xlane.f32.xlu0 %v4904_v20 }
 0x61a   : > { %v4857_v46 = vsub.f32 %v12210_v49, %v4787_v23  ;;  %v4855_v13 = vsub.f32 %v12221_v30, %v4773_v28  ;;  %v4822_v51 = vpop.permute.xlu2 %4821  ;;  %v4883_v49 = vmul.f32 1.442695, %v4859_v5  ;;  %v13799_v30 = vld [vmem:[#allocation30_spill] sm:$0xff] }
 0x61b   : > { %v4862_v19 = vsub.f32 %v12256_v3, %v4822_v51 }
 0x61c   : > { %v9739_v10 = vpop.eup %9738  ;;  %v4879_v1 = vmul.f32 1.442695, %v4857_v46  ;;  %v4875_v47 = vmul.f32 1.442695, %v4855_v13 }
 0x61d   : > { %v9741_v6 = vpop.eup %9740  ;;  %v5008_v54 = vpack.c.bf16 %v9739_v10, %v9739_v10  ;;  %v4910_v56 = vsel %vm461_vm0, %v9739_v10, 0.0  ;;  %v4889_v5 = vmul.f32 1.442695, %v4862_v19  ;;  %v13802_v19 = vld [vmem:[#allocation33_spill] sm:$0xff] }
 0x61e   : > { %v5007_v14 = vpack.c.bf16 %v9741_v6, %v9741_v6  ;;  %9744 = vpow2.f32 %v4879_v1  ;;  %4911 = vadd.xlane.f32.xlu1 %v4910_v56  ;;  %v4907_v58 = vsel %vm461_vm0, %v9741_v6, 0.0  ;;  %v9743_v62 = vpop.eup %9742 }
 0x61f   : > { %9746 = vpow2.f32 %v4875_v47  ;;  %4908 = vadd.xlane.f32.xlu2 %v4907_v58  ;;  %9179 = vmatmul.msk.bf16.vlgmr.msra.gmra.mxu2 %vm461_vm0, %v5008_v54  ;;  %v4919_v28 = vsel %vm461_vm0, %v9743_v62, 0.0  ;;  %v13801_v47 = vld [vmem:[#allocation29_spill] sm:$0xff] }
 0x620   : > { %9174 = vmatmul.msk.bf16.vlgmr.msra.gmra.mxu1 %vm461_vm0, %v5007_v14  ;;  %5280 = vmatpush.bf16.msra.mxu2 %v13799_v30  ;;  %9748 = vpow2.f32 %v4883_v49 }
 0x621   : > { %5256 = vmatpush.bf16.msra.mxu1 %v13800_v2  ;;  %v4794_v8 = vpop.permute.xlu0 %4793  ;;  %4914 = vadd.xlane.f32.xlu0 %v4913_v45  ;;  %v5011_v2 = vpack.c.bf16 %v9743_v62, %v9743_v62 }
 0x622   : > { %v4858_v36 = vsub.f32 %v12121_v17, %v4794_v8  ;;  %v4843_v1 = vpop.permute.xlu2 %4842 }
 0x624   : > { %v9745_v61 = vpop.eup %9744  ;;  %v4881_v20 = vmul.f32 1.442695, %v4858_v36 }
 0x625   : > { %v9747_v23 = vpop.eup %9746  ;;  %v4922_v17 = vsel %vm461_vm0, %v9745_v61, 0.0  ;;  %v5012_v51 = vpack.c.bf16 %v9745_v61, %v9745_v61 }
 0x626   : > { %v5010_v46 = vpack.c.bf16 %v9747_v23, %v9747_v23  ;;  %9750 = vpow2.f32 %v4881_v20  ;;  %v4808_v13 = vpop.permute.xlu1 %4807  ;;  %v4916_v29 = vsel %vm461_vm0, %v9747_v23, 0.0  ;;  %4920 = vadd.xlane.f32.xlu1 %v4919_v28  ;;  %v9749_v54 = vpop.eup %9748  ;;  %v13803_v20 = vld [vmem:[#allocation31_spill] sm:$0xff]  ;;  %v13804_v28 = vld [vmem:[#allocation32_spill] sm:$0xff] }
 0x627   : > { %v4860_v10 = vsub.f32 %v12303_v12, %v4808_v13  ;;  %4917 = vadd.xlane.f32.xlu2 %v4916_v29  ;;  %v4865_v12 = vsub.f32 %v12285_v37, %v4843_v1  ;;  %v4928_v45 = vsel %vm461_vm0, %v9749_v54, 0.0 }
 0x628   : > { %9189 = vmatmul.msk.bf16.vlgmr.msrb.gmra.mxu0 %vm461_vm0, %v5010_v46 }
 0x629   : > { %v4885_v3 = vmul.f32 1.442695, %v4860_v10  ;;  %5328 = vmatpush.bf16.msrb.mxu0 %v13801_v47  ;;  %v4815_v6 = vpop.permute.xlu0 %4814  ;;  %4923 = vadd.xlane.f32.xlu0 %v4922_v17  ;;  %v5014_v17 = vpack.c.bf16 %v9749_v54, %v9749_v54  ;;  %v13805_v47 = vld [vmem:[#allocation35_spill] sm:$0xff] }
 0x62a   : > { %v4861_v56 = vsub.f32 %v12292_v7, %v4815_v6  ;;  %v4895_v7 = vmul.f32 1.442695, %v4865_v12 }
 0x62b   : > { %9752 = vpow2.f32 %v4885_v3 }
 0x62c   : > { %v9751_v14 = vpop.eup %9750  ;;  %9754 = vpow2.f32 %v4889_v5  ;;  %v4887_v58 = vmul.f32 1.442695, %v4861_v56 }
 0x62d   : > { %v5013_v49 = vpack.c.bf16 %v9751_v14, %v9751_v14  ;;  %v4925_v30 = vsel %vm461_vm0, %v9751_v14, 0.0 }
 0x62e   : > { %9756 = vpow2.f32 %v4887_v58  ;;  %v4829_v8 = vpop.permute.xlu1 %4828  ;;  %4929 = vadd.xlane.f32.xlu1 %v4928_v45  ;;  %v13806_v45 = vld [vmem:[#allocation37_spill] sm:$0xff] }
 0x62f   : > { %v4863_v36 = vsub.f32 %v12312_v34, %v4829_v8  ;;  %4926 = vadd.xlane.f32.xlu2 %v4925_v30  ;;  %9199 = vmatmul.msk.bf16.vlgmr.msrb.gmra.mxu2 %vm461_vm0, %v5012_v51  ;;  %v13807_v8 = vld [vmem:[#allocation38_spill] sm:$0xff] }
 0x630   : > { %9194 = vmatmul.msk.bf16.vlgmr.msrb.gmra.mxu1 %vm461_vm0, %v5011_v2  ;;  %9204 = vmatmul.msk.bf16.vlgmr.msrb.gmra.mxu3 %vm461_vm0, %v5013_v49  ;;  %v5699_v2 = vsel %vm461_vm0, %v13806_v45, 0  ;;  %v5519_v45 = vld [vmem:[#allocation4 + $0x100] sm:$0xff] }
 0x631   : > { %v9753_v37 = vpop.eup %9752  ;;  %v4891_v61 = vmul.f32 1.442695, %v4863_v36  ;;  %5352 = vmatpush.bf16.msrb.mxu1 %v13802_v19  ;;  %5376 = vmatpush.bf16.msrb.mxu2 %v13803_v20  ;;  %v4836_v62 = vpop.permute.xlu0 %4835  ;;  %v5733_v36 = vsel %vm461_vm0, %v13807_v8, 0 }
 0x632   : > { %v9755_v23 = vpop.eup %9754  ;;  %5400 = vmatpush.bf16.msrb.mxu3 %v13804_v28  ;;  %v4864_v34 = vsub.f32 %v12272_v27, %v4836_v62  ;;  %v4931_v46 = vsel %vm461_vm0, %v9753_v37, 0.0  ;;  %v5665_v27 = vsel %vm461_vm0, %v13805_v47, 0  ;;  %v5015_v30 = vpack.c.bf16 %v9753_v37, %v9753_v37  ;;  %v13809_v62 = vld [vmem:[#allocation43_spill] sm:$0xff]  ;;  %v13813_v47 = vld [vmem:[#allocation36_spill] sm:$0xff] }
 0x633   : > { %9758 = vpow2.f32 %v4891_v61  ;;  %4932 = vadd.xlane.f32.xlu0 %v4931_v46  ;;  %v4937_v5 = vsel %vm461_vm0, %v9755_v23, 0.0  ;;  %v5017_v49 = vpack.c.bf16 %v9755_v23, %v9755_v23  ;;  %v13808_v61 = vld [vmem:[#allocation44_spill] sm:$0xff]  ;;  %v5801_v23 = vsel %vm461_vm0, %v13809_v62, 0 }
 0x634   : > { %v9757_v13 = vpop.eup %9756  ;;  %9760 = vpow2.f32 %v4895_v7  ;;  %v4893_v29 = vmul.f32 1.442695, %v4864_v34  ;;  %v5767_v19 = vsel %vm461_vm0, %v13808_v61, 0 }
 0x635   : > { %v4934_v10 = vsel %vm461_vm0, %v9757_v13, 0.0  ;;  %v5016_v58 = vpack.c.bf16 %v9757_v13, %v9757_v13  ;;  %v5869_v13 = vsel %vm461_vm0, %v11609_v50, 0 }
 0x636   : > { %9762 = vpow2.f32 %v4893_v29  ;;  %v4850_v1 = vpop.permute.xlu1 %4849  ;;  %4938 = vadd.xlane.f32.xlu1 %v4937_v5  ;;  %v13810_v29 = vld [vmem:[#allocation42_spill] sm:$0xff]  ;;  %v5903_v5 = vsel %vm461_vm0, %v11595_v25, 0 }
 0x637   : > { %v4866_v3 = vsub.f32 %v12282_v22, %v4850_v1  ;;  %4935 = vadd.xlane.f32.xlu2 %v4934_v10  ;;  %v5835_v10 = vsel %vm461_vm0, %v13810_v29, 0  ;;  %v13811_v1 = vld [vmem:[#allocation34_spill] sm:$0xff] }
 0x638   : > { %9209 = vmatmul.msk.bf16.vlgmr.msra.gmra.mxu0 %vm461_vm0, %v5014_v17 }
 0x639   : > { %v9759_v6 = vpop.eup %9758  ;;  %v4897_v56 = vmul.f32 1.442695, %v4866_v3  ;;  %5674 = vmatpush.bf16.xpose.msra.mxu0 %v5665_v27  ;;  %v5412_v17 = vpop.permute.xlu0 %5411  ;;  %v13812_v3 = vld [vmem:[#allocation41_spill] sm:$0xff]  ;;  %v13814_v27 = vld [vmem:[#allocation40_spill] sm:$0xff] }
 0x63a   : > { %v9761_v14 = vpop.eup %9760  ;;  %v4940_v12 = vsel %vm461_vm0, %v9759_v6, 0.0  ;;  %v5018_v20 = vpack.c.bf16 %v9759_v6, %v9759_v6  ;;  %v5426_v6 = vpop.permute.xlu2 %5425 }
 0x63b   : > { %9764 = vpow2.f32 %v4897_v56  ;;  %4941 = vadd.xlane.f32.xlu0 %v4940_v12  ;;  %v4946_v22 = vsel %vm461_vm0, %v9761_v14, 0.0  ;;  %v5020_v28 = vpack.c.bf16 %v9761_v14, %v9761_v14 }
 0x63c   : > { %v9763_v54 = vpop.eup %9762 }
 0x63d   : > { %v4943_v51 = vsel %vm461_vm0, %v9763_v54, 0.0  ;;  %v5019_v34 = vpack.c.bf16 %v9763_v54, %v9763_v54  ;;  %v13816_v54 = vld [vmem:[#allocation46_spill] sm:$0xff] }
 0x63e   : > { %4947 = vadd.xlane.f32.xlu1 %v4946_v22  ;;  %v5419_v25 = vpop.permute.xlu1 %5418 }
 0x63f   : > { %4944 = vadd.xlane.f32.xlu2 %v4943_v51  ;;  %9219 = vmatmul.msk.bf16.vlgmr.msra.gmra.mxu2 %vm461_vm0, %v5016_v58 }
 0x640   : > { %9214 = vmatmul.msk.bf16.vlgmr.msra.gmra.mxu1 %vm461_vm0, %v5015_v30  ;;  %9224 = vmatmul.msk.bf16.vlgmr.msra.gmra.mxu3 %vm461_vm0, %v5017_v49 }
 0x641   : > { %v9765_v7 = vpop.eup %9764  ;;  %5708 = vmatpush.bf16.xpose.msra.mxu1 %v5699_v2  ;;  %5742 = vmatpush.bf16.xpose.msra.mxu2 %v5733_v36  ;;  %v5433_v50 = vpop.permute.xlu0 %5432  ;;  %v5535_v2 = vmul.f32 %v5519_v45, %v5412_v17  ;;  %v5520_v17 = vld [vmem:[#allocation4 + $0x108] sm:$0xff] }
 0x642   : > { %5776 = vmatpush.bf16.xpose.msra.mxu3 %v5767_v19  ;;  %v4949_v37 = vsel %vm461_vm0, %v9765_v7, 0.0  ;;  %v5021_v46 = vpack.c.bf16 %v9765_v7, %v9765_v7  ;;  %v12505_v12 = vpop.permute.xlu2 %5446 }
 0x643   : > { %4950 = vadd.xlane.f32.xlu0 %v4949_v37  ;;  %v5522_v37 = vld [vmem:[#allocation4 + $0x118] sm:$0xff] }
 0x644   : > { %v5538_v62 = vmul.f32 %v5522_v37, %v5433_v50  ;;  %v5523_v37 = vld [vmem:[#allocation4 + $0x120] sm:$0xff] }
 0x646   : > { %v5440_v14 = vpop.permute.xlu1 %5439 }
 0x648   : > { %9229 = vmatmul.msk.bf16.vlgmr.msrb.gmra.mxu0 %vm461_vm0, %v5018_v20 }
 0x649   : > { %5810 = vmatpush.bf16.xpose.msrb.mxu0 %v5801_v23  ;;  %v12500_v56 = vpop.permute.xlu0 %5453 }
 0x64a   : > { %v12520_v51 = vpop.permute.xlu2 %5467 }
 0x64f   : > { %9239 = vmatmul.msk.bf16.vlgmr.msrb.gmra.mxu2 %vm461_vm0, %v5020_v28 }
 0x650   : > { %9234 = vmatmul.msk.bf16.vlgmr.msrb.gmra.mxu1 %vm461_vm0, %v5019_v34  ;;  %9244 = vmatmul.msk.bf16.vlgmr.msrb.gmra.mxu3 %vm461_vm0, %v5021_v46 }
 0x651   : > { %5844 = vmatpush.bf16.xpose.msrb.mxu1 %v5835_v10  ;;  %5878 = vmatpush.bf16.xpose.msrb.mxu2 %v5869_v13  ;;  %v12509_v58 = vpop.permute.xlu0 %5474 }
 0x652   : > { %5912 = vmatpush.bf16.xpose.msrb.mxu3 %v5903_v5  ;;  %v12526_v30 = vpop.permute.xlu2 %5488 }
 0x658   : > { %9253 = vmatmul.msk.bf16.vlgmr.msra.gmra.mxu0 %vm461_vm0, %v13811_v1 }
 0x659   : > { %6744 = vmatpush.bf16.msra.mxu0 %v11573_v15  ;;  %v13815_v15 = vld [vmem:[#allocation39_spill] sm:$0xff]  ;;  %v12522_v22 = vpop.permute.xlu0 %5495 }
 0x65a   : > { %v12533_v7 = vpop.permute.xlu2 %5509 }
 0x65f   : > { %9271 = vmatmul.msk.bf16.vlgmr.msra.gmra.mxu2 %vm461_vm0, %v13812_v3 }
 0x660   : > { %9262 = vmatmul.msk.bf16.vlgmr.msra.gmra.mxu1 %vm461_vm0, %v13813_v47  ;;  %9280 = vmatmul.msk.bf16.vlgmr.msra.gmra.mxu3 %vm461_vm0, %v13814_v27 }
 0x661   : > { %6768 = vmatpush.bf16.msra.mxu1 %v11660_v18  ;;  %6792 = vmatpush.bf16.msra.mxu2 %v11654_v48  ;;  %v13817_v18 = vld [vmem:[#allocation47_spill] sm:$0xff]  ;;  %v13818_v48 = vld [vmem:[#allocation45_spill] sm:$0xff]  ;;  %v12528_v8 = vpop.permute.xlu0 %5516 }
 0x662   : > { %6816 = vmatpush.bf16.msra.mxu3 %v11639_v39  ;;  %v13819_v39 = vld [vmem:[#allocation50_spill] sm:$0xff] }
 0x668   : > { %9289 = vmatmul.msk.bf16.vlgmr.msrb.gmra.mxu0 %vm461_vm0, %v13815_v15 }
 0x669   : > { %6840 = vmatpush.bf16.msrb.mxu0 %v11695_v41  ;;  %v12518_v41 = vpop.permute.xlu1 %5460 }
 0x66f   : > { %9307 = vmatmul.msk.bf16.vlgmr.msrb.gmra.mxu2 %vm461_vm0, %v13816_v54  ;;  %v5536_v54 = vmul.f32 %v5520_v17, %v5419_v25  ;;  %v4900_v25 = vld [vmem:[#allocation3 + $0x20] sm:$0xff] }
 0x670   : > { %9298 = vmatmul.msk.bf16.vlgmr.msrb.gmra.mxu1 %vm461_vm0, %v13817_v18  ;;  %9316 = vmatmul.msk.bf16.vlgmr.msrb.gmra.mxu3 %vm461_vm0, %v13818_v48 }
 0x671   : > { %6864 = vmatpush.bf16.msrb.mxu1 %v11679_v33  ;;  %6888 = vmatpush.bf16.msrb.mxu2 %v11687_v35  ;;  %v12524_v49 = vpop.permute.xlu1 %5481 }
 0x672   : > { %6912 = vmatpush.bf16.msrb.mxu3 %v13819_v39 }
 0x679   : > { %v12531_v35 = vpop.permute.xlu1 %5502 }
 0x685   : > { %v5042_v36 = vpop.f32.mrf.mxu0 }
 0x686   : > { %v5551_v33 = vadd.f32 %v5535_v2, %v5042_v36  ;;  %v5521_v2 = vld [vmem:[#allocation4 + $0x110] sm:$0xff] }
 0x688   : > { %5567 = vst.msk [vmem:[#allocation4 + $0x100] sm:$0xff] %vm461_vm0, %v5551_v33 }
 0x68c   : > { %v4906_v61 = vpop.xlane.xlu0 %4905 }
 0x68d   : > { %v5044_v19 = vpop.f32.mrf.mxu0  ;;  %v4968_v29 = vperm.slane %v4906_v61, %v10622_v53 }
 0x68e   : > { %v5537_v19 = vmul.f32 %v5521_v2, %v5426_v6  ;;  %v5525_v2 = vld [vmem:[#allocation4 + $0x130] sm:$0xff] }
 0x691   : > { %v4912_v20 = vpop.xlane.xlu1 %4911 }
 0x692   : > { %v4909_v23 = vpop.xlane.xlu2 %4908  ;;  %v4970_v10 = vperm.slane %v4912_v20, %v10622_v53 }
 0x693   : > { %v4969_v28 = vperm.slane %v4909_v23, %v10622_v53  ;;  %v5114_v34 = vpop.f32.mrf.mxu3 }
 0x694   : > { %v5554_v46 = vadd.f32 %v5538_v62, %v5114_v34  ;;  %v4915_v13 = vpop.xlane.xlu0 %4914 }
 0x695   : > { %v4984_v5 = vsel %vm1067_vm4, %v4969_v28, %v4968_v29  ;;  %v4971_v1 = vperm.slane %v4915_v13, %v10622_v53  ;;  %v5539_v13 = vmul.f32 %v5523_v37, %v5440_v14 }
 0x696   : > { %5570 = vst.msk [vmem:[#allocation4 + $0x118] sm:$0xff] %vm461_vm0, %v5554_v46  ;;  %v4985_v50 = vsel %vm1071_vm2, %v4970_v10, %v4984_v5  ;;  %v4902_v10 = vmul.f32 %v12364_v43, %v4900_v25 }
 0x697   : > { %v4986_v18 = vsel %vm1075_vm1, %v4971_v1, %v4985_v50 }
 0x699   : > { %v4921_v3 = vpop.xlane.xlu1 %4920 }
 0x69a   : > { %v4918_v47 = vpop.xlane.xlu2 %4917  ;;  %v4973_v48 = vperm.slane %v4921_v3, %v10622_v53 }
 0x69b   : > { %v4972_v27 = vperm.slane %v4918_v47, %v10622_v53  ;;  %v5116_v15 = vpop.f32.mrf.mxu3  ;;  %v5524_v47 = vld [vmem:[#allocation4 + $0x128] sm:$0xff] }
 0x69c   : > { %v4924_v45 = vpop.xlane.xlu0 %4923  ;;  %v5540_v43 = vmul.f32 %v5524_v47, %v12505_v12 }
 0x69d   : > { %v5066_v39 = vpop.f32.mrf.mxu1  ;;  %v4987_v36 = vsel %vm1339_vm7, %v4972_v27, %v4986_v18  ;;  %v4974_v61 = vperm.slane %v4924_v45, %v10622_v53 }
 0x69e   : > { %v5552_v33 = vadd.f32 %v5536_v54, %v5066_v39  ;;  %v4988_v20 = vsel %vm1341_vm8, %v4973_v48, %v4987_v36 }
 0x69f   : > { %v4989_v29 = vsel %vm1343_vm9, %v4974_v61, %v4988_v20  ;;  %v5526_v61 = vld [vmem:[#allocation4 + $0x138] sm:$0xff] }
 0x6a0   : > { %5568 = vst.msk [vmem:[#allocation4 + $0x108] sm:$0xff] %vm461_vm0, %v5552_v33 }
 0x6a1   : > { %v4930_v62 = vpop.xlane.xlu1 %4929 }
 0x6a2   : > { %v4927_v23 = vpop.xlane.xlu2 %4926  ;;  %v5090_v28 = vpop.f32.mrf.mxu2  ;;  %v4976_v48 = vperm.slane %v4930_v62, %v10622_v53  ;;  %v5541_v62 = vmul.f32 %v5525_v2, %v12500_v56  ;;  %v5528_v2 = vld [vmem:[#allocation4 + $0x148] sm:$0xff] }
 0x6a3   : > { %v4975_v34 = vperm.slane %v4927_v23, %v10622_v53  ;;  %v5553_v46 = vadd.f32 %v5537_v19, %v5090_v28  ;;  %v5527_v23 = vld [vmem:[#allocation4 + $0x140] sm:$0xff] }
 0x6a5   : > { %v4990_v5 = vsel %vm1345_vm10, %v4975_v34, %v4989_v29  ;;  %5569 = vst.msk [vmem:[#allocation4 + $0x110] sm:$0xff] %vm461_vm0, %v5553_v46  ;;  %v5068_v6 = vpop.f32.mrf.mxu1  ;;  %v5138_v17 = vpop.f32.mrf.mxu0  ;;  %v5542_v34 = vmul.f32 %v5526_v61, %v12518_v41 }
 0x6a6   : > { %v5000_v1 = vadd.f32 %v4990_v5, %v4902_v10  ;;  %v5555_v3 = vadd.f32 %v5539_v13, %v5138_v17  ;;  %v4933_v50 = vpop.xlane.xlu0 %4932  ;;  %v5543_v17 = vmul.f32 %v5527_v23, %v12520_v51 }
 0x6a7   : > { %v4977_v54 = vperm.slane %v4933_v50, %v10622_v53 }
 0x6a8   : > { %5002 = vst.msk [vmem:[#allocation3 + $0x20] sm:$0xff] %vm444_vm6, %v5000_v1 }
 0x6a9   : > { %5571 = vst.msk [vmem:[#allocation4 + $0x120] sm:$0xff] %vm461_vm0, %v5555_v3  ;;  %v4939_v27 = vpop.xlane.xlu1 %4938  ;;  %v4991_v37 = vsel %vm1067_vm4, %v4977_v54, %v4976_v48 }
 0x6aa   : > { %v4936_v14 = vpop.xlane.xlu2 %4935  ;;  %v5092_v15 = vpop.f32.mrf.mxu2  ;;  %v4979_v20 = vperm.slane %v4939_v27, %v10622_v53  ;;  %v4901_v27 = vld [vmem:[#allocation3 + $0x28] sm:$0xff] }
 0x6ab   : > { %v4978_v18 = vperm.slane %v4936_v14, %v10622_v53 }
 0x6ad   : > { %v5140_v39 = vpop.f32.mrf.mxu0  ;;  %v5162_v45 = vpop.f32.mrf.mxu1  ;;  %v4992_v25 = vsel %vm1071_vm2, %v4978_v18, %v4991_v37  ;;  %v5544_v37 = vmul.f32 %v5528_v2, %v12509_v58 }
 0x6ae   : > { %v5556_v36 = vadd.f32 %v5540_v43, %v5162_v45  ;;  %v4942_v33 = vpop.xlane.xlu0 %4941  ;;  %v4993_v29 = vsel %vm1075_vm1, %v4979_v20, %v4992_v25  ;;  %v4903_v39 = vmul.f32 %v12379_v24, %v4901_v27  ;;  %v5530_v24 = vld [vmem:[#allocation4 + $0x158] sm:$0xff] }
 0x6af   : > { %v7938_v19 = vld [vmem:[#allocation3 + $0x20] sm:$0xff]  ;;  %v4980_v12 = vperm.slane %v4942_v33, %v10622_v53 }
 0x6b0   : > { %9766 = vrcp.f32 %v7938_v19  ;;  %5572 = vst.msk [vmem:[#allocation4 + $0x128] sm:$0xff] %vm461_vm0, %v5556_v36 }
 0x6b1   : > { %v4948_v28 = vpop.xlane.xlu1 %4947  ;;  %v4994_v1 = vsel %vm1339_vm7, %v4980_v12, %v4993_v29  ;;  %v5529_v12 = vld [vmem:[#allocation4 + $0x150] sm:$0xff]  ;;  %v5546_v29 = vmul.f32 %v5530_v24, %v12526_v30 }
 0x6b2   : > { %v4945_v46 = vpop.xlane.xlu2 %4944  ;;  %v5186_v13 = vpop.f32.mrf.mxu2  ;;  %v4982_v3 = vperm.slane %v4948_v28, %v10622_v53 }
 0x6b3   : > { %v4981_v10 = vperm.slane %v4945_v46, %v10622_v53  ;;  %v5557_v5 = vadd.f32 %v5541_v62, %v5186_v13  ;;  %v5210_v6 = vpop.f32.mrf.mxu3  ;;  %v5545_v46 = vmul.f32 %v5529_v12, %v12524_v49  ;;  %v5531_v13 = vld [vmem:[#allocation4 + $0x160] sm:$0xff] }
 0x6b4   : > { %v5558_v50 = vadd.f32 %v5542_v34, %v5210_v6 }
 0x6b5   : > { %v4995_v56 = vsel %vm1341_vm8, %v4981_v10, %v4994_v1  ;;  %5573 = vst.msk [vmem:[#allocation4 + $0x130] sm:$0xff] %vm461_vm0, %v5557_v5  ;;  %v5164_v41 = vpop.f32.mrf.mxu1  ;;  %v5234_v47 = vpop.f32.mrf.mxu0 }
 0x6b6   : > { %v9767_v14 = vpop.eup %9766  ;;  %5574 = vst.msk [vmem:[#allocation4 + $0x138] sm:$0xff] %vm461_vm0, %v5558_v50  ;;  %v5559_v15 = vadd.f32 %v5543_v17, %v5234_v47  ;;  %v4951_v54 = vpop.xlane.xlu0 %4950  ;;  %v4996_v45 = vsel %vm1343_vm9, %v4982_v3, %v4995_v56  ;;  %v5547_v17 = vmul.f32 %v5531_v13, %v12522_v22  ;;  %v5532_v41 = vld [vmem:[#allocation4 + $0x168] sm:$0xff]  ;;  %v12598_v13 = vld [vmem:[%s13697_s3 + $0x18] sm:$0xf] }
 0x6b7   : > { %v4983_v43 = vperm.slane %v4951_v54, %v10622_v53  ;;  %v7956_v51 = vperm.slane %v9767_v14, 2  ;;  %v7949_v18 = vperm.slane %v9767_v14, 1  ;;  %v7942_v48 = vperm.slane %v9767_v14, 0 }
 0x6b8   : > { %5575 = vst.msk [vmem:[#allocation4 + $0x140] sm:$0xff] %vm461_vm0, %v5559_v15  ;;  %v7977_v62 = vperm.slane %v9767_v14, 5  ;;  %v7970_v28 = vperm.slane %v9767_v14, 4  ;;  %v7963_v34 = vperm.slane %v9767_v14, 3  ;;  %v7991_v56 = vperm.slane %v9767_v14, 7 }
 0x6b9   : > { %v4997_v36 = vsel %vm1345_vm10, %v4983_v43, %v4996_v45  ;;  %7961 = vperm.xlu1 %9647, %v7956_v51   ;;  %7954 = vperm.xlu0 %9649, %v7949_v18   ;;  %v7984_v30 = vperm.slane %v9767_v14, 6  ;;  %v5548_v54 = vmul.f32 %v5532_v41, %v12531_v35  ;;  %v5533_v18 = vld [vmem:[#allocation4 + $0x170] sm:$0xff] }
 0x6ba   : > { %v5001_v33 = vadd.f32 %v4997_v36, %v4903_v39  ;;  %7947 = vperm.xlu2 %9648, %v7942_v48   ;;  %v5188_v61 = vpop.f32.mrf.mxu2  ;;  %v5534_v39 = vld [vmem:[#allocation4 + $0x178] sm:$0xff]  ;;  %v5549_v14 = vmul.f32 %v5533_v18, %v12533_v7 }
 0x6bb   : > { %v5212_v19 = vpop.f32.mrf.mxu3  ;;  %v5550_v36 = vmul.f32 %v5534_v39, %v12528_v8 }
 0x6bc   : > { %5003 = vst.msk [vmem:[#allocation3 + $0x28] sm:$0xff] %vm444_vm6, %v5001_v33 }
 0x6bd   : > { %v5236_v20 = vpop.f32.mrf.mxu0  ;;  %v5258_v25 = vpop.f32.mrf.mxu1 }
 0x6be   : > { %v5560_v23 = vadd.f32 %v5544_v37, %v5258_v25 }
 0x6c0   : > { %5576 = vst.msk [vmem:[#allocation4 + $0x148] sm:$0xff] %vm461_vm0, %v5560_v23 }
 0x6c1   : > { %7982 = vperm.xlu1 %9647, %v7977_v62   ;;  %7975 = vperm.xlu0 %9649, %v7970_v28  }
 0x6c2   : > { %7968 = vperm.xlu2 %9648, %v7963_v34   ;;  %v5282_v58 = vpop.f32.mrf.mxu2 }
 0x6c3   : > { %v7939_v10 = vld [vmem:[#allocation3 + $0x28] sm:$0xff]  ;;  %v5561_v5 = vadd.f32 %v5545_v46, %v5282_v58  ;;  %v5306_v6 = vpop.f32.mrf.mxu3 }
 0x6c4   : > { %9768 = vrcp.f32 %v7939_v10  ;;  %v5562_v1 = vadd.f32 %v5546_v29, %v5306_v6  ;;  %v12601_v10 = vrot.slane %v12598_v13, 3 }
 0x6c5   : > { %5577 = vst.msk [vmem:[#allocation4 + $0x150] sm:$0xff] %vm461_vm0, %v5561_v5  ;;  %v5260_v3 = vpop.f32.mrf.mxu1  ;;  %v5330_v50 = vpop.f32.mrf.mxu0 }
 0x6c6   : > { %5578 = vst.msk [vmem:[#allocation4 + $0x158] sm:$0xff] %vm461_vm0, %v5562_v1  ;;  %v5563_v49 = vadd.f32 %v5547_v17, %v5330_v50 }
 0x6c8   : > { %5579 = vst.msk [vmem:[#allocation4 + $0x160] sm:$0xff] %vm461_vm0, %v5563_v49  ;;  %v6160_v49 = vsel %vm1075_vm1, %v12598_v13, %v12601_v10 }
 0x6c9   : > { %7996 = vperm.xlu0 %9649, %v7991_v56  }
 0x6ca   : > { %v9769_v47 = vpop.eup %9768  ;;  %7989 = vperm.xlu2 %9648, %v7984_v30   ;;  %v5284_v27 = vpop.f32.mrf.mxu2 }
 0x6cb   : > { %v5308_v15 = vpop.f32.mrf.mxu3  ;;  %v7998_v22 = vperm.slane %v9769_v47, 0  ;;  %v8012_v45 = vperm.slane %v9769_v47, 2  ;;  %v8005_v2 = vperm.slane %v9769_v47, 1  ;;  %v8019_v35 = vperm.slane %v9769_v47, 3 }
 0x6cc   : > { %v8033_v12 = vperm.slane %v9769_v47, 5  ;;  %v8026_v23 = vperm.slane %v9769_v47, 4  ;;  %v8040_v8 = vperm.slane %v9769_v47, 6  ;;  %v8047_v34 = vperm.slane %v9769_v47, 7 }
 0x6cd   : > { %v5332_v43 = vpop.f32.mrf.mxu0  ;;  %v5354_v51 = vpop.f32.mrf.mxu1  ;;  %8003 = vperm.xlu1 %9647, %v7998_v22   ;;  %v12611_v27 = vrot.slane %v6160_v49, 3  ;;  %v6157_v15 = vsel %vm1071_vm2, %v12598_v13, %v12601_v10 }
 0x6ce   : > { %v5564_v48 = vadd.f32 %v5548_v54, %v5354_v51 }
 0x6cf   : > { %v6183_v18 = vunpack.i.h.s16 %v12611_v27 }
 0x6d0   : > { %5580 = vst.msk [vmem:[#allocation4 + $0x168] sm:$0xff] %vm461_vm0, %v5564_v48  ;;  %v12621_v48 = vrot.slane %v6157_v15, 2 }
 0x6d1   : > { %8017 = vperm.xlu0 %9649, %v8012_v45  }
 0x6d2   : > { %8010 = vperm.xlu2 %9648, %v8005_v2   ;;  %v5378_v33 = vpop.f32.mrf.mxu2 }
 0x6d3   : > { %v5565_v61 = vadd.f32 %v5549_v14, %v5378_v33  ;;  %v5402_v19 = vpop.f32.mrf.mxu3  ;;  %v6199_v14 = vpack.i.b16 %v6183_v18, %v6183_v18 }
 0x6d4   : > { %v5566_v37 = vadd.f32 %v5550_v36, %v5402_v19  ;;  %v6181_v19 = vunpack.i.h.s16 %v12621_v48 }
 0x6d5   : > { %5581 = vst.msk [vmem:[#allocation4 + $0x170] sm:$0xff] %vm461_vm0, %v5565_v61  ;;  %v5356_v20 = vpop.f32.mrf.mxu1  ;;  %v5676_v25 = vpop.f32.mrf.mxu0  ;;  %8024 = vperm.xlu1 %9647, %v8019_v35   ;;  %v6154_v35 = vsel %vm1067_vm4, %v12598_v13, %v12601_v10 }
 0x6d6   : > { %5582 = vst.msk [vmem:[#allocation4 + $0x178] sm:$0xff] %vm461_vm0, %v5566_v37  ;;  %v5921_v46 = vrot.slane %v5676_v25, 4 }
 0x6d9   : > { %8038 = vperm.xlu0 %9649, %v8033_v12  }
 0x6da   : > { %8031 = vperm.xlu2 %9648, %v8026_v23   ;;  %v5380_v7 = vpop.f32.mrf.mxu2  ;;  %v6239_v23 = vperm.slane %v6199_v14, %v10205_v38 }
 0x6db   : > { %v5404_v24 = vpop.f32.mrf.mxu3 }
 0x6dd   : > { %v5678_v62 = vpop.f32.mrf.mxu0  ;;  %v5710_v28 = vpop.f32.mrf.mxu1  ;;  %8045 = vperm.xlu1 %9647, %v8040_v8  }
 0x6de   : > { %v5933_v29 = vrot.slane %v5710_v28, 4  ;;  %v6033_v39 = vrot.slane %v5678_v62, 4 }
 0x6e2   : > { %8052 = vperm.xlu2 %9648, %v8047_v34   ;;  %v5744_v58 = vpop.f32.mrf.mxu2 }
 0x6e3   : > { %v5919_v5 = vrot.slane %v5744_v58, 4  ;;  %v5922_v6 = vsel %vm832_vm5, %v5744_v58, %v5921_v46  ;;  %v5778_v17 = vpop.f32.mrf.mxu3  ;;  %v12644_v58 = vrot.slane %v6154_v35, 1 }
 0x6e4   : > { %v5930_v1 = vperm.slane %v5922_v6, %v10219_v57  ;;  %v5931_v3 = vrot.slane %v5778_v17, 4  ;;  %v5934_v50 = vsel %vm832_vm5, %v5778_v17, %v5933_v29 }
 0x6e5   : > { %v5920_v56 = vsel %vm832_vm5, %v5919_v5, %v5676_v25  ;;  %v5942_v30 = vperm.slane %v5934_v50, %v10219_v57  ;;  %v5712_v41 = vpop.f32.mrf.mxu1  ;;  %v5812_v47 = vpop.f32.mrf.mxu0 }
 0x6e6   : > { %v5981_v22 = vrot.slane %v5930_v1, 4  ;;  %v12617_v54 = vperm.slane %v5920_v56, %v10219_v57  ;;  %v5932_v43 = vsel %vm832_vm5, %v5931_v3, %v5710_v28  ;;  %v6045_v33 = vrot.slane %v5712_v41, 4 }
 0x6e7   : > { %v5979_v51 = vrot.slane %v5942_v30, 4  ;;  %v12626_v36 = vperm.slane %v5932_v43, %v10219_v57  ;;  %v6197_v3 = vpack.i.b16 %v6181_v19, %v6181_v19  ;;  %v5945_v49 = vrot.slane %v5812_v47, 4 }
 0x6e8   : > { %v5982_v2 = vsel %vm832_vm5, %v5942_v30, %v5981_v22  ;;  %v5969_v37 = vrot.slane %v12617_v54, 4 }
 0x6e9   : > { %v5980_v45 = vsel %vm832_vm5, %v5979_v51, %v5930_v1  ;;  %v12639_v24 = vperm.slane %v5982_v2, %v10261_v31  ;;  %v12650_v1 = vunpack.c.l.bf16 %v6239_v23  ;;  %v5967_v50 = vrot.slane %v12626_v36, 4 }
 0x6ea   : > { %v5746_v61 = vpop.f32.mrf.mxu2  ;;  %v12636_v7 = vperm.slane %v5980_v45, %v10261_v31  ;;  %v6179_v51 = vunpack.i.h.s16 %v12644_v58  ;;  %v6231_v14 = vperm.slane %v6197_v3, %v10205_v38 }
 0x6eb   : > { %v6031_v20 = vrot.slane %v5746_v61, 4  ;;  %v6034_v25 = vsel %vm832_vm5, %v5746_v61, %v6033_v39  ;;  %v5780_v12 = vpop.f32.mrf.mxu3  ;;  %v6029_v30 = vrot.slane %v12639_v24, 4  ;;  %v6311_v2 = vperm.slane %v12650_v1, 0 }
 0x6ec   : > { %v6043_v8 = vrot.slane %v5780_v12, 4  ;;  %v6046_v28 = vsel %vm832_vm5, %v5780_v12, %v6045_v33  ;;  %v6042_v46 = vperm.slane %v6034_v25, %v10219_v57  ;;  %v6195_v35 = vpack.i.b16 %v6179_v51, %v6179_v51 }
 0x6ed   : > { %v6032_v34 = vsel %vm832_vm5, %v6031_v20, %v5678_v62  ;;  %v5846_v29 = vpop.f32.mrf.mxu1  ;;  %v6054_v6 = vperm.slane %v6046_v28, %v10219_v57  ;;  %v12648_v17 = vpop.f32.mrf.mxu0  ;;  %v5970_v62 = vsel %vm832_vm5, %v12626_v36, %v5969_v37 }
 0x6ee   : > { %v6044_v5 = vsel %vm832_vm5, %v6043_v8, %v5712_v41  ;;  %v12656_v56 = vperm.slane %v6032_v34, %v10219_v57  ;;  %v6025_v41 = vrot.slane %v12636_v7, 4  ;;  %v6093_v15 = vrot.slane %v6042_v46, 4 }
 0x6ef   : > { %v12661_v22 = vperm.slane %v6044_v5, %v10219_v57  ;;  %v6057_v43 = vrot.slane %v12648_v17, 4  ;;  %v6091_v18 = vrot.slane %v6054_v6, 4  ;;  %v5957_v39 = vrot.slane %v5846_v29, 4 }
 0x6f0   : > { %v12669_v19 = vperm.slane %v5970_v62, %v10261_v31  ;;  %v6081_v37 = vrot.slane %v12656_v56, 4  ;;  %v12675_v23 = vsel %vm832_vm5, %v6054_v6, %v6093_v15  ;;  %v6223_v5 = vperm.slane %v6195_v35, %v10205_v38 }
 0x6f1   : > { %v6092_v1 = vsel %vm832_vm5, %v6091_v18, %v6042_v46 }
 0x6f2   : > { %v5880_v45 = vpop.f32.mrf.mxu2  ;;  %v6021_v6 = vrot.slane %v12669_v19, 4 }
 0x6f3   : > { %v5943_v36 = vrot.slane %v5880_v45, 4  ;;  %v5946_v33 = vsel %vm832_vm5, %v5880_v45, %v5945_v49  ;;  %v5914_v61 = vpop.f32.mrf.mxu3  ;;  %v6293_v45 = vunpack.c.l.bf16 %v6231_v14 }
 0x6f4   : > { %v5954_v20 = vperm.slane %v5946_v33, %v10219_v57  ;;  %v5955_v25 = vrot.slane %v5914_v61, 4  ;;  %v5958_v12 = vsel %vm832_vm5, %v5914_v61, %v5957_v39  ;;  %v5968_v33 = vsel %vm832_vm5, %v5967_v50, %v12617_v54 }
 0x6f5   : > { %v5944_v8 = vsel %vm832_vm5, %v5943_v36, %v5812_v47  ;;  %v5966_v28 = vperm.slane %v5958_v12, %v10219_v57  ;;  %v5848_v34 = vpop.f32.mrf.mxu1  ;;  %v6291_v61 = vunpack.c.l.bf16 %v6223_v5  ;;  %v9320_v54 = vpack.i.b16 %v12644_v58, %v12644_v58 }
 0x6f6   : > { %v5950_v3 = vperm.slane %v5944_v8, %v10219_v57  ;;  %v6005_v49 = vrot.slane %v5954_v20, 4  ;;  %v5956_v62 = vsel %vm832_vm5, %v5955_v25, %v5846_v29  ;;  %v6069_v36 = vrot.slane %v5848_v34, 4 }
 0x6f7   : > { %v5962_v51 = vperm.slane %v5956_v62, %v10219_v57  ;;  %v6003_v39 = vrot.slane %v5966_v28, 4  ;;  %v12695_v29 = vsel %vm1062_vm3, %v12598_v13, %v12601_v10 }
 0x6f8   : > { %v5993_v15 = vrot.slane %v5950_v3, 4  ;;  %v6006_v47 = vsel %vm832_vm5, %v5966_v28, %v6005_v49  ;;  %v6177_v62 = vunpack.i.h.s16 %v12695_v29 }
 0x6f9   : > { %v6004_v46 = vsel %vm832_vm5, %v6003_v39, %v5954_v20  ;;  %v12690_v18 = vperm.slane %v6006_v47, %v10261_v31  ;;  %v5991_v14 = vrot.slane %v5962_v51, 4  ;;  %v12717_v39 = vperm.slane %v5968_v33, %v10261_v31 }
 0x6fa   : > { %v5882_v35 = vpop.f32.mrf.mxu2  ;;  %v12698_v25 = vperm.slane %v6004_v46, %v10261_v31  ;;  %v5994_v12 = vsel %vm832_vm5, %v5962_v51, %v5993_v15  ;;  %v6307_v46 = vperm.slane %v6291_v61, 0 }
 0x6fb   : > { %v6055_v50 = vrot.slane %v5882_v35, 4  ;;  %v6058_v20 = vsel %vm832_vm5, %v5882_v35, %v6057_v43  ;;  %v5916_v8 = vpop.f32.mrf.mxu3  ;;  %v6030_v28 = vsel %vm832_vm5, %v12690_v18, %v6029_v30  ;;  %v6002_v13 = vperm.slane %v5994_v12, %v10261_v31 }
 0x6fc   : > { %v12708_v10 = vperm.slane %v6058_v20, %v10219_v57  ;;  %v6067_v5 = vrot.slane %v5916_v8, 4  ;;  %v6070_v49 = vsel %vm832_vm5, %v5916_v8, %v6069_v36  ;;  %v12714_v51 = vadd.f32 %v6311_v2, %v6030_v28 }
 0x6fd   : > { %v6056_v58 = vsel %vm832_vm5, %v6055_v50, %v12648_v17  ;;  %v6309_v43 = vperm.slane %v6293_v45, 0  ;;  %v6078_v15 = vperm.slane %v6070_v49, %v10219_v57  ;;  %v6026_v47 = vsel %vm832_vm5, %v12698_v25, %v6025_v41 }
 0x6fe   : > { %v6068_v30 = vsel %vm832_vm5, %v6067_v5, %v5848_v34  ;;  %v6082_v36 = vsel %vm832_vm5, %v12661_v22, %v6081_v37  ;;  %v12726_v35 = vperm.slane %v6056_v58, %v10219_v57  ;;  %v6022_v17 = vsel %vm832_vm5, %v6002_v13, %v6021_v6  ;;  %v12757_v58 = vld [vmem:[%s13697_s3 + $0x1c] sm:$0xf] }
 0x6ff   : > { %v6219_v2 = vperm.slane %v9320_v54, %v10205_v38  ;;  %v12731_v45 = vperm.slane %v6092_v1, %v10261_v31  ;;  %v6117_v34 = vrot.slane %v12708_v10, 4  ;;  %v5992_v33 = vsel %vm832_vm5, %v5991_v14, %v5950_v3 }
 0x700   : > { %v6193_v12 = vpack.i.b16 %v6177_v62, %v6177_v62  ;;  %v12736_v41 = vperm.slane %v6068_v30, %v10219_v57  ;;  %v6360_v37 = vsel %vm461_vm0, %v12714_v51, -inf  ;;  %v12740_v61 = vadd.f32 %v6309_v43, %v6026_v47 }
 0x701   : > { %v6017_v6 = vrot.slane %v12717_v39, 4  ;;  %v6115_v50 = vrot.slane %v6078_v15, 4  ;;  %v12743_v54 = vadd.f32 %v6307_v46, %v6022_v17  ;;  %v5998_v1 = vperm.slane %v5992_v33, %v10261_v31 }
 0x702   : > { %v6215_v20 = vperm.slane %v6193_v12, %v10205_v38  ;;  %v6105_v3 = vrot.slane %v12726_v35, 4  ;;  %v6019_v14 = vrot.slane %v6002_v13, 4  ;;  %v6290_v57 = vunpack.c.l.bf16 %v6219_v2 }
 0x703   : > { %6361 = vmax.xlane.f32.xlu0 %v6360_v37  ;;  %v9322_v8 = vpack.i.b16 %v12611_v27, %v12611_v27  ;;  %v6118_v28 = vsel %vm832_vm5, %v6078_v15, %v6117_v34  ;;  %v6027_v49 = vrot.slane %v12690_v18, 4  ;;  %v9321_v62 = vpack.i.b16 %v12621_v48, %v12621_v48 }
 0x704   : > { %v6289_v5 = vunpack.c.l.bf16 %v6215_v20  ;;  %v6103_v43 = vrot.slane %v12736_v41, 4  ;;  %v6354_v13 = vsel %vm461_vm0, %v12740_v61, -inf  ;;  %v6018_v27 = vsel %vm832_vm5, %v5998_v1, %v6017_v6 }
 0x705   : > { %v6235_v30 = vperm.slane %v9322_v8, %v10205_v38  ;;  %v6348_v18 = vsel %vm461_vm0, %v12743_v54, -inf  ;;  %v6306_v47 = vperm.slane %v6290_v57, 0  ;;  %v6227_v48 = vperm.slane %v9321_v62, %v10205_v38 }
 0x706   : > { %v6305_v15 = vperm.slane %v6289_v5, 0  ;;  %v6020_v46 = vsel %vm832_vm5, %v6019_v14, %v12669_v19  ;;  %v6023_v2 = vrot.slane %v12698_v25, 4  ;;  %v12771_v34 = vrot.slane %v12757_v58, 3 }
 0x707   : > { %6355 = vmax.xlane.f32.xlu1 %v6354_v13  ;;  %v6294_v17 = vunpack.c.l.bf16 %v6235_v30  ;;  %v6028_v12 = vsel %vm832_vm5, %v6027_v49, %v12639_v24  ;;  %v6292_v37 = vunpack.c.l.bf16 %v6227_v48  ;;  %v6106_v6 = vsel %vm832_vm5, %v12736_v41, %v6105_v3 }
 0x708   : > { %v12773_v33 = vadd.f32 %v6305_v15, %v6018_v27  ;;  %v12780_v57 = vperm.slane %v6082_v36, %v10261_v31  ;;  %v6167_v19 = vsel %vm1067_vm4, %v12757_v58, %v12771_v34  ;;  %v9319_v25 = vpack.i.b16 %v12695_v29, %v12695_v29 }
 0x709   : > { %v6310_v20 = vperm.slane %v6294_v17, 0  ;;  %v12789_v8 = vadd.f32 %v6306_v47, %v6020_v46  ;;  %v6308_v24 = vperm.slane %v6292_v37, 0  ;;  %v6169_v5 = vrot.slane %v6167_v19, 1 }
 0x70a   : > { %v6342_v14 = vsel %vm461_vm0, %v12773_v33, -inf  ;;  %v6024_v36 = vsel %vm832_vm5, %v6023_v2, %v12636_v7  ;;  %v12794_v3 = vperm.slane %v6106_v6, %v10261_v31  ;;  %v6015_v49 = vrot.slane %v5998_v1, 4 }
 0x70b   : > { %6349 = vmax.xlane.f32.xlu2 %v6348_v18  ;;  %6343 = vmax.xlane.f32.xlu0 %v6342_v14  ;;  %v6211_v62 = vperm.slane %v9319_v25, %v10205_v38  ;;  %v6116_v29 = vsel %vm832_vm5, %v6115_v50, %v12708_v10  ;;  %v12799_v13 = vadd.f32 %v6310_v20, %v6028_v12  ;;  %v6187_v27 = vunpack.i.h.s16 %v6169_v5 }
 0x70c   : > { %v6170_v30 = vsel %vm1071_vm2, %v12757_v58, %v12771_v34  ;;  %v6126_v18 = vperm.slane %v6118_v28, %v10261_v31  ;;  %v6133_v7 = vrot.slane %v12780_v57, 4  ;;  %v6345_v1 = vsel %vm461_vm0, %v12789_v8, -inf }
 0x70d   : > { %v6288_v15 = vunpack.c.l.bf16 %v6211_v62  ;;  %v12806_v47 = vrot.slane %v6170_v30, 2  ;;  %v12810_v48 = vadd.f32 %v6308_v24, %v6024_v36  ;;  %v6203_v10 = vpack.i.b16 %v6187_v27, %v6187_v27 }
 0x70e   : > { %v6173_v50 = vsel %vm1075_vm1, %v12757_v58, %v12771_v34  ;;  %v6134_v46 = vsel %vm832_vm5, %v12794_v3, %v6133_v7  ;;  %v6016_v28 = vsel %vm832_vm5, %v6015_v49, %v12717_v39  ;;  %v6357_v12 = vsel %vm461_vm0, %v12799_v13, -inf }
 0x70f   : > { %6346 = vmax.xlane.f32.xlu1 %v6345_v1  ;;  %v6189_v17 = vunpack.i.h.s16 %v12806_v47  ;;  %v6175_v2 = vrot.slane %v6173_v50, 3  ;;  %v6255_v37 = vperm.slane %v6203_v10, %v10205_v38  ;;  %v12824_v6 = vperm.slane %v6116_v29, %v10261_v31 }
 0x710   : > { %v9324_v20 = vpack.i.b16 %v6169_v5, %v6169_v5  ;;  %v6304_v19 = vperm.slane %v6288_v15, 0  ;;  %v6351_v36 = vsel %vm461_vm0, %v12810_v48, -inf  ;;  %v6139_v49 = vrot.slane %v6126_v18, 4 }
 0x711   : > { %v6205_v25 = vpack.i.b16 %v6189_v17, %v6189_v17  ;;  %v9326_v14 = vpack.i.b16 %v6175_v2, %v6175_v2  ;;  %v6191_v24 = vunpack.i.h.s16 %v6175_v2  ;;  %v6299_v39 = vunpack.c.l.bf16 %v6255_v37 }
 0x712   : > { %v6251_v62 = vperm.slane %v9324_v20, %v10205_v38  ;;  %v6079_v5 = vrot.slane %v12661_v22, 4  ;;  %v6102_v7 = vperm.slane %v12675_v23, %v10261_v31  ;;  %v6137_v1 = vrot.slane %v12731_v45, 4 }
 0x713   : > { %6358 = vmax.xlane.f32.xlu2 %v6357_v12  ;;  %6352 = vmax.xlane.f32.xlu0 %v6351_v36  ;;  %v6263_v27 = vperm.slane %v6205_v25, %v10205_v38  ;;  %v6267_v30 = vperm.slane %v9326_v14, %v10205_v38  ;;  %v6207_v29 = vpack.i.b16 %v6191_v24, %v6191_v24  ;;  %v6315_v15 = vperm.slane %v6299_v39, 0 }
 0x714   : > { %v12835_v10 = vadd.f32 %v6304_v19, %v6016_v28  ;;  %v6138_v37 = vsel %vm832_vm5, %v12824_v6, %v6137_v1  ;;  %v6140_v20 = vsel %vm832_vm5, %v6139_v49, %v6102_v7  ;;  %v6104_v22 = vsel %vm832_vm5, %v6103_v43, %v12726_v35 }
 0x715   : > { %v6301_v50 = vunpack.c.l.bf16 %v6263_v27  ;;  %v6302_v17 = vunpack.c.l.bf16 %v6267_v30  ;;  %v6271_v2 = vperm.slane %v6207_v29, %v10205_v38  ;;  %v12838_v12 = vadd.f32 %v6315_v15, %v6134_v46 }
 0x716   : > { %v6298_v28 = vunpack.c.l.bf16 %v6251_v62  ;;  %v6165_v19 = vsel %vm1062_vm3, %v12757_v58, %v12771_v34  ;;  %v6131_v24 = vrot.slane %v12794_v3, 4  ;;  %v6339_v41 = vsel %vm461_vm0, %v12835_v10, -inf }
 0x717   : > { %v6317_v23 = vperm.slane %v6301_v50, 0  ;;  %v6303_v25 = vunpack.c.l.bf16 %v6271_v2  ;;  %v6372_v46 = vsel %vm461_vm0, %v12838_v12, -inf  ;;  %v6318_v14 = vperm.slane %v6302_v17, 0 }
 0x718   : > { %v9323_v36 = vpack.i.b16 %v6165_v19, %v6165_v19  ;;  %6373 = vmax.xlane.f32.xlu1 %v6372_v46  ;;  %v6141_v35 = vrot.slane %v6102_v7, 4  ;;  %v6110_v43 = vperm.slane %v6104_v22, %v10261_v31  ;;  %v6080_v58 = vsel %vm832_vm5, %v6079_v5, %v12656_v56 }
 0x719   : > { %v12855_v39 = vadd.f32 %v6317_v23, %v6138_v37  ;;  %v6319_v49 = vperm.slane %v6303_v25, 0  ;;  %v6185_v62 = vunpack.i.h.s16 %v6165_v19  ;;  %v6314_v30 = vperm.slane %v6298_v28, 0 }
 0x71a   : > { %v6243_v34 = vperm.slane %v9323_v36, %v10205_v38  ;;  %v6142_v27 = vsel %vm832_vm5, %v6126_v18, %v6141_v35  ;;  %v12864_v29 = vadd.f32 %v6318_v14, %v6140_v20  ;;  %v6132_v7 = vsel %vm832_vm5, %v6131_v24, %v12780_v57 }
 0x71b   : > { %6340 = vmax.xlane.f32.xlu2 %v6339_v41  ;;  %v6378_v3 = vsel %vm461_vm0, %v12855_v39, -inf  ;;  %v6201_v1 = vpack.i.b16 %v6185_v62, %v6185_v62  ;;  %v6086_v56 = vperm.slane %v6080_v58, %v10261_v31  ;;  %v6127_v5 = vrot.slane %v6110_v43, 4 }
 0x71c   : > { %6379 = vmax.xlane.f32.xlu0 %v6378_v3  ;;  %v6296_v15 = vunpack.c.l.bf16 %v6243_v34  ;;  %v12869_v50 = vadd.f32 %v6319_v49, %v6142_v27  ;;  %v9325_v2 = vpack.i.b16 %v12806_v47, %v12806_v47  ;;  %v12874_v18 = vadd.f32 %v6314_v30, %v6132_v7  ;;  %v7926_v30 = vld [vmem:[#allocation4 + $0x120] sm:$0xff]  ;;  %v7948_v7 = vpop.permute.xlu2 %7947 }
 0x71d   : > { %v6247_v17 = vperm.slane %v6201_v1, %v10205_v38  ;;  %v6381_v37 = vsel %vm461_vm0, %v12864_v29, -inf  ;;  %v6128_v57 = vsel %vm832_vm5, %v6127_v5, %v6086_v56  ;;  %v6129_v23 = vrot.slane %v6086_v56, 4  ;;  %v7924_v1 = vld [vmem:[#allocation4 + $0x110] sm:$0xff] }
 0x71e   : > { %v6312_v20 = vperm.slane %v6296_v15, 0  ;;  %v6384_v31 = vsel %vm461_vm0, %v12869_v50, -inf  ;;  %v6259_v28 = vperm.slane %v9325_v2, %v10205_v38  ;;  %v6369_v47 = vsel %vm461_vm0, %v12874_v18, -inf }
 0x71f   : > { %v6297_v22 = vunpack.c.l.bf16 %v6247_v17  ;;  %v6130_v19 = vsel %vm832_vm5, %v6110_v43, %v6129_v23  ;;  %v6135_v36 = vrot.slane %v12824_v6, 4  ;;  %v7923_v6 = vld [vmem:[#allocation4 + $0x108] sm:$0xff]  ;;  %v7929_v17 = vld [vmem:[#allocation4 + $0x138] sm:$0xff] }
 0x720   : > { %6382 = vmax.xlane.f32.xlu1 %v6381_v37  ;;  %v12885_v46 = vadd.f32 %v6312_v20, %v6128_v57  ;;  %v6300_v24 = vunpack.c.l.bf16 %v6259_v28  ;;  %v7927_v37 = vld [vmem:[#allocation4 + $0x128] sm:$0xff]  ;;  %v7922_v20 = vld [vmem:[#allocation4 + $0x100] sm:$0xff]  ;;  %v7932_v28 = vld [vmem:[#allocation4 + $0x150] sm:$0xff] }
 0x721   : > { %v6313_v25 = vperm.slane %v6297_v22, 0  ;;  %v6136_v43 = vsel %vm832_vm5, %v6135_v36, %v12731_v45  ;;  %v8054_v23 = vmul.f32 %v7948_v7, %v7922_v20  ;;  %v7931_v7 = vld [vmem:[#allocation4 + $0x148] sm:$0xff]  ;;  %vm8492_vm5 = vcmask 519168  }
 0x722   : > { %v6363_v41 = vsel %vm461_vm0, %v12885_v46, -inf  ;;  %v6316_v35 = vperm.slane %v6300_v24, 0  ;;  %v7925_v24 = vld [vmem:[#allocation4 + $0x118] sm:$0xff] }
 0x723   : > { %6385 = vmax.xlane.f32.xlu2 %v6384_v31  ;;  %v12887_v14 = vadd.f32 %v6313_v25, %v6130_v19  ;;  %v7930_v19 = vld [vmem:[#allocation4 + $0x140] sm:$0xff] }
 0x724   : > { %6370 = vmax.xlane.f32.xlu0 %v6369_v47  ;;  %v12896_v58 = vadd.f32 %v6316_v35, %v6136_v43  ;;  %v7969_v22 = vpop.permute.xlu2 %7968  ;;  %v7935_v43 = vld [vmem:[#allocation4 + $0x168] sm:$0xff] }
 0x725   : > { %v6366_v38 = vsel %vm461_vm0, %v12887_v14, -inf }
 0x726   : > { %v6375_v34 = vsel %vm461_vm0, %v12896_v58, -inf }
 0x728   : > { %6364 = vmax.xlane.f32.xlu1 %v6363_v41  ;;  %v8057_v41 = vmul.f32 %v7969_v22, %v7925_v24 }
 0x72b   : > { %6367 = vmax.xlane.f32.xlu2 %v6366_v38  ;;  %v7955_v49 = vpop.permute.xlu0 %7954  ;;  %v7962_v27 = vpop.permute.xlu1 %7961 }
 0x72c   : > { %v8055_v3 = vmul.f32 %v7955_v49, %v7923_v6  ;;  %v8056_v5 = vmul.f32 %v7962_v27, %v7924_v1  ;;  %v7990_v38 = vpop.permute.xlu2 %7989  ;;  %v7933_v6 = vld [vmem:[#allocation4 + $0x158] sm:$0xff] }
 0x733   : > { %6376 = vmax.xlane.f32.xlu2 %v6375_v34  ;;  %v7976_v62 = vpop.permute.xlu0 %7975  ;;  %v7983_v45 = vpop.permute.xlu1 %7982 }
 0x734   : > { %v8058_v15 = vmul.f32 %v7976_v62, %v7926_v30  ;;  %v8059_v57 = vmul.f32 %v7983_v45, %v7927_v37  ;;  %v7928_v62 = vld [vmem:[#allocation4 + $0x130] sm:$0xff]  ;;  %v8011_v30 = vpop.permute.xlu2 %8010 }
 0x735   : > { %v8060_v27 = vmul.f32 %v7990_v38, %v7928_v62 }
 0x738   : > { %8300 = vrot.lane.b32.xlu0 %v8055_v3, %s9923_s16 }
 0x73b   : > { %v7997_v56 = vpop.permute.xlu0 %7996 }
 0x73c   : > { %v8061_v2 = vmul.f32 %v7997_v56, %v7929_v17  ;;  %v8032_v1 = vpop.permute.xlu2 %8031  ;;  %v7934_v56 = vld [vmem:[#allocation4 + $0x160] sm:$0xff] }
 0x73f   : > { %v8004_v25 = vpop.permute.xlu1 %8003 }
 0x740   : > { %8306 = vrot.lane.b32.xlu0 %v8058_v15, %s9923_s16  ;;  %v8062_v36 = vmul.f32 %v8004_v25, %v7930_v19  ;;  %v8063_v15 = vmul.f32 %v8011_v30, %v7931_v7 }
 0x741   : > { %8302 = vrot.lane.b32.xlu1 %v8056_v5, %s9923_s16  ;;  %v8066_v5 = vmul.f32 %v8032_v1, %v7934_v56 }
 0x743   : > { %v8018_v31 = vpop.permute.xlu0 %8017 }
 0x744   : > { %v8064_v47 = vmul.f32 %v8018_v31, %v7932_v28  ;;  %v12916_v17 = vpop.permute.xlu2 %8052 }
 0x747   : > { %v8025_v49 = vpop.permute.xlu1 %8024 }
 0x748   : > { %8312 = vrot.lane.b32.xlu0 %v8061_v2, %s9923_s16  ;;  %v8065_v3 = vmul.f32 %v8025_v49, %v7933_v6 }
 0x749   : > { %8308 = vrot.lane.b32.xlu1 %v8059_v57, %s9923_s16 }
 0x74b   : > { %8298 = vrot.lane.b32.xlu2 %v8054_v23, %s9923_s16  ;;  %v8039_v35 = vpop.permute.xlu0 %8038 }
 0x74c   : > { %v8067_v34 = vmul.f32 %v8039_v35, %v7935_v43 }
 0x74f   : > { %v12914_v45 = vpop.permute.xlu1 %8045 }
 0x750   : > { %8318 = vrot.lane.b32.xlu0 %v8064_v47, %s9923_s16 }
 0x751   : > { %8314 = vrot.lane.b32.xlu1 %v8062_v36, %s9923_s16 }
 0x753   : > { %8304 = vrot.lane.b32.xlu2 %v8057_v41, %s9923_s16 }
 0x758   : > { %8324 = vrot.lane.b32.xlu0 %v8067_v34, %s9923_s16 }
 0x759   : > { %8320 = vrot.lane.b32.xlu1 %v8065_v3, %s9923_s16 }
 0x75b   : > { %8310 = vrot.lane.b32.xlu2 %v8060_v27, %s9923_s16  ;;  %v6337_v27 = vld [vmem:[#allocation2 + $0x30] sm:$0xff] }
 0x763   : > { %8316 = vrot.lane.b32.xlu2 %v8063_v15, %s9923_s16 }
 0x76b   : > { %8322 = vrot.lane.b32.xlu2 %v8066_v5, %s9923_s16 }
 0x776   : > { %v6362_v2 = vpop.xlane.xlu0 %6361 }
 0x777   : > { %v6410_v3 = vperm.slane %v6362_v2, %v10622_v53 }
 0x77a   : > { %v6356_v37 = vpop.xlane.xlu1 %6355 }
 0x77b   : > { %v6408_v49 = vperm.slane %v6356_v37, %v10622_v53 }
 0x77e   : > { %v6350_v20 = vpop.xlane.xlu2 %6349  ;;  %v6344_v22 = vpop.xlane.xlu0 %6343 }
 0x77f   : > { %v6404_v47 = vperm.slane %v6344_v22, %v10622_v53  ;;  %v6406_v36 = vperm.slane %v6350_v20, %v10622_v53 }
 0x782   : > { %v6347_v57 = vpop.xlane.xlu1 %6346 }
 0x783   : > { %v6405_v24 = vperm.slane %v6347_v57, %v10622_v53 }
 0x786   : > { %v6359_v23 = vpop.xlane.xlu2 %6358  ;;  %v6353_v31 = vpop.xlane.xlu0 %6352 }
 0x787   : > { %v6407_v38 = vperm.slane %v6353_v31, %v10622_v53  ;;  %v6409_v34 = vperm.slane %v6359_v23, %v10622_v53 }
 0x78b   : > { %v6374_v25 = vpop.xlane.xlu1 %6373 }
 0x78e   : > { %v6341_v28 = vpop.xlane.xlu2 %6340 }
 0x78f   : > { %v6403_v19 = vperm.slane %v6341_v28, %v10622_v53  ;;  %v6380_v15 = vpop.xlane.xlu0 %6379 }
 0x791   : > { %v6419_v41 = vsel %vm1067_vm4, %v6404_v47, %v6403_v19 }
 0x792   : > { %v6420_v35 = vsel %vm1071_vm2, %v6405_v24, %v6419_v41 }
 0x793   : > { %v6421_v43 = vsel %vm1075_vm1, %v6406_v36, %v6420_v35  ;;  %v6383_v62 = vpop.xlane.xlu1 %6382  ;;  %v6414_v35 = vperm.slane %v6374_v25, %v10622_v53 }
 0x794   : > { %v6422_v6 = vsel %vm1339_vm7, %v6407_v38, %v6421_v43 }
 0x795   : > { %v6423_v30 = vsel %vm1341_vm8, %v6408_v49, %v6422_v6 }
 0x796   : > { %v6424_v7 = vsel %vm1343_vm9, %v6409_v34, %v6423_v30  ;;  %v6386_v1 = vpop.xlane.xlu2 %6385  ;;  %v6416_v34 = vperm.slane %v6380_v15, %v10622_v53 }
 0x797   : > { %v6425_v56 = vsel %vm1345_vm10, %v6410_v3, %v6424_v7  ;;  %v6371_v31 = vpop.xlane.xlu0 %6370  ;;  %v6417_v3 = vperm.slane %v6383_v62, %v10622_v53  ;;  %v6418_v7 = vperm.slane %v6386_v1, %v10622_v53 }
 0x798   : > { %v6435_v5 = vmax.f32 %v6337_v27, %v6425_v56  ;;  %v6413_v36 = vperm.slane %v6371_v31, %v10622_v53  ;;  %v6338_v56 = vld [vmem:[#allocation2 + $0x38] sm:$0xff] }
 0x79a   : > { %6708 = vst.msk [vmem:[#allocation2 + $0x30] sm:$0xff] %vm444_vm6, %v6435_v5  ;;  %v6457_v37 = vperm.slane %v6435_v5, 2  ;;  %v6450_v20 = vperm.slane %v6435_v5, 1  ;;  %v6443_v22 = vperm.slane %v6435_v5, 0  ;;  %v6485_v19 = vperm.slane %v6435_v5, 6 }
 0x79b   : > { %v6365_v57 = vpop.xlane.xlu1 %6364  ;;  %v6471_v24 = vperm.slane %v6435_v5, 4  ;;  %v6464_v41 = vperm.slane %v6435_v5, 3  ;;  %v6478_v25 = vperm.slane %v6435_v5, 5  ;;  %v6437_v62 = vsub.f32 %v6337_v27, %v6435_v5 }
 0x79c   : > { %6462 = vperm.xlu2 %9648, %v6457_v37   ;;  %6455 = vperm.xlu1 %9647, %v6450_v20   ;;  %v6411_v28 = vperm.slane %v6365_v57, %v10622_v53  ;;  %v6492_v20 = vperm.slane %v6435_v5, 7 }
 0x79d   : > { %6448 = vperm.xlu0 %9649, %v6443_v22   ;;  %v6439_v1 = vmul.f32 1.442695, %v6437_v62 }
 0x79e   : > { %v6368_v2 = vpop.xlane.xlu2 %6367 }
 0x79f   : > { %v6412_v23 = vperm.slane %v6368_v2, %v10622_v53  ;;  %9770 = vpow2.f32 %v6439_v1 }
 0x7a1   : > { %v6426_v47 = vsel %vm1067_vm4, %v6412_v23, %v6411_v28 }
 0x7a2   : > { %v6427_v38 = vsel %vm1071_vm2, %v6413_v36, %v6426_v47 }
 0x7a3   : > { %v6428_v6 = vsel %vm1075_vm1, %v6414_v35, %v6427_v38 }
 0x7a4   : > { %6490 = vperm.xlu2 %9648, %v6485_v19   ;;  %6476 = vperm.xlu1 %9647, %v6471_v24  }
 0x7a5   : > { %6469 = vperm.xlu0 %9649, %v6464_v41   ;;  %v12950_v24 = vpop.eup %9770 }
 0x7a6   : > { %v6377_v49 = vpop.xlane.xlu2 %6376  ;;  %v7124_v27 = vperm.slane %v12950_v24, 2 }
 0x7a7   : > { %v6415_v43 = vperm.slane %v6377_v49, %v10622_v53  ;;  %v7110_v49 = vperm.slane %v12950_v24, 0 }
 0x7a9   : > { %v6429_v30 = vsel %vm1339_vm7, %v6415_v43, %v6428_v6  ;;  %v7145_v43 = vperm.slane %v12950_v24, 5 }
 0x7aa   : > { %v6430_v37 = vsel %vm1341_vm8, %v6416_v34, %v6429_v30  ;;  %v7117_v34 = vperm.slane %v12950_v24, 1 }
 0x7ab   : > { %v6431_v22 = vsel %vm1343_vm9, %v6417_v3, %v6430_v37  ;;  %v7131_v3 = vperm.slane %v12950_v24, 3  ;;  %v7152_v37 = vperm.slane %v12950_v24, 6 }
 0x7ac   : > { %v6432_v57 = vsel %vm1345_vm10, %v6418_v7, %v6431_v22  ;;  %6497 = vperm.xlu1 %9647, %v6492_v20  }
 0x7ad   : > { %v6436_v2 = vmax.f32 %v6338_v56, %v6432_v57  ;;  %6483 = vperm.xlu0 %9649, %v6478_v25   ;;  %v7159_v25 = vperm.slane %v12950_v24, 7  ;;  %v12970_v57 = vpop.permute.xlu0 %8300 }
 0x7ae   : > { %v12953_v35 = vpop.permute.xlu2 %8298 }
 0x7af   : > { %6709 = vst.msk [vmem:[#allocation2 + $0x38] sm:$0xff] %vm444_vm6, %v6436_v2  ;;  %v6506_v15 = vperm.slane %v6436_v2, 1  ;;  %v6513_v23 = vperm.slane %v6436_v2, 2  ;;  %v6499_v31 = vperm.slane %v6436_v2, 0  ;;  %v6527_v28 = vperm.slane %v6436_v2, 4 }
 0x7b0   : > { %v6534_v47 = vperm.slane %v6436_v2, 5  ;;  %v6520_v19 = vperm.slane %v6436_v2, 3  ;;  %v6548_v36 = vperm.slane %v6436_v2, 7  ;;  %v6438_v41 = vsub.f32 %v6338_v56, %v6436_v2 }
 0x7b1   : > { %6511 = vperm.xlu2 %9648, %v6506_v15   ;;  %v6541_v5 = vperm.slane %v6436_v2, 6  ;;  %v7138_v56 = vperm.slane %v12950_v24, 4 }
 0x7b2   : > { %v6441_v38 = vmul.f32 1.442695, %v6438_v41 }
 0x7b3   : > { %v12978_v1 = vpop.permute.xlu1 %8302 }
 0x7b4   : > { %6518 = vperm.xlu1 %9647, %v6513_v23   ;;  %9772 = vpow2.f32 %v6441_v38 }
 0x7b5   : > { %6504 = vperm.xlu0 %9649, %v6499_v31  }
 0x7b6   : > { %v12961_v30 = vpop.permute.xlu2 %8304 }
 0x7b9   : > { %6532 = vperm.xlu2 %9648, %v6527_v28   ;;  %v12980_v28 = vpop.permute.xlu0 %8306 }
 0x7ba   : > { %v12958_v6 = vpop.eup %9772 }
 0x7bb   : > { %v7166_v7 = vperm.slane %v12958_v6, 0  ;;  %v7187_v22 = vperm.slane %v12958_v6, 3  ;;  %v7173_v2 = vperm.slane %v12958_v6, 1  ;;  %v7208_v15 = vperm.slane %v12958_v6, 6  ;;  %v12986_v41 = vpop.permute.xlu1 %8308 }
 0x7bc   : > { %6539 = vperm.xlu1 %9647, %v6534_v47   ;;  %v7180_v62 = vperm.slane %v12958_v6, 2  ;;  %v7194_v31 = vperm.slane %v12958_v6, 4  ;;  %v7201_v47 = vperm.slane %v12958_v6, 5 }
 0x7bd   : > { %6525 = vperm.xlu0 %9649, %v6520_v19  }
 0x7be   : > { %v12966_v20 = vpop.permute.xlu2 %8310 }
 0x7c1   : > { %6553 = vperm.xlu2 %9648, %v6548_v36   ;;  %v7215_v36 = vperm.slane %v12958_v6, 7 }
 0x7c4   : > { %7129 = vperm.xlu1 %9647, %v7124_v27   ;;  %v12988_v27 = vpop.permute.xlu0 %8312 }
 0x7c5   : > { %6546 = vperm.xlu0 %9649, %v6541_v5  }
 0x7c6   : > { %v12975_v23 = vpop.permute.xlu2 %8316 }
 0x7c7   : > { %13820 = vst [vmem:[#allocation8_spill] sm:$0xff] %v12975_v23 }
 0x7c9   : > { %7115 = vperm.xlu2 %9648, %v7110_v49  }
 0x7cc   : > { %7150 = vperm.xlu1 %9647, %v7145_v43   ;;  %v12991_v43 = vpop.permute.xlu1 %8314 }
 0x7cd   : > { %7122 = vperm.xlu0 %9649, %v7117_v34   ;;  %v12993_v34 = vpop.permute.xlu0 %8318 }
 0x7ce   : > { %v12983_v19 = vpop.permute.xlu2 %8322  ;;  %13822 = vst [vmem:[#allocation12_spill] sm:$0xff] %v12993_v34 }
 0x7cf   : > { %13821 = vst [vmem:[#allocation11_spill] sm:$0xff] %v12983_v19 }
 0x7d1   : > { %7136 = vperm.xlu2 %9648, %v7131_v3  }
 0x7d4   : > { %7171 = vperm.xlu1 %9647, %v7166_v7  }
 0x7d5   : > { %7143 = vperm.xlu0 %9649, %v7138_v56  }
 0x7d9   : > { %7157 = vperm.xlu2 %9648, %v7152_v37  }
 0x7dc   : > { %7192 = vperm.xlu1 %9647, %v7187_v22  }
 0x7dd   : > { %7164 = vperm.xlu0 %9649, %v7159_v25   ;;  %v13823_v25 = vld [vmem:[#allocation53_spill] sm:$0xff] }
 0x7e1   : > { %7178 = vperm.xlu2 %9648, %v7173_v2   ;;  %v12998_v2 = vpop.permute.xlu1 %8320 }
 0x7e4   : > { %7213 = vperm.xlu1 %9647, %v7208_v15   ;;  %v13000_v15 = vpop.permute.xlu0 %8324 }
 0x7e5   : > { %7185 = vperm.xlu0 %9649, %v7180_v62   ;;  %13824 = vst [vmem:[#allocation10_spill] sm:$0xff] %v13000_v15 }
 0x7e9   : > { %7199 = vperm.xlu2 %9648, %v7194_v31  }
 0x7ed   : > { %7206 = vperm.xlu0 %9649, %v7201_v47  }
 0x7f1   : > { %7220 = vperm.xlu2 %9648, %v7215_v36  }
 0x7f6   : > { %v6463_v5 = vpop.permute.xlu2 %6462 }
 0x7f7   : > { %v6557_v38 = vsub.f32 %v12789_v8, %v6463_v5 }
 0x7f9   : > { %v6575_v49 = vmul.f32 1.442695, %v6557_v38 }
 0x7fb   : > { %9774 = vpow2.f32 %v6575_v49  ;;  %v13825_v49 = vld [vmem:[#allocation54_spill] sm:$0xff] }
 0x7fe   : > { %v6491_v3 = vpop.permute.xlu2 %6490 }
 0x7ff   : > { %v6561_v56 = vsub.f32 %v12799_v13, %v6491_v3 }
 0x801   : > { %v9775_v7 = vpop.eup %9774  ;;  %v6583_v22 = vmul.f32 1.442695, %v6561_v56 }
 0x802   : > { %v6712_v37 = vpack.c.bf16 %v9775_v7, %v9775_v7 }
 0x803   : > { %9776 = vpow2.f32 %v6583_v22 }
 0x804   : > { %9341 = vmatmul.msk.bf16.vlgmr.msra.gmra.mxu2 %vm461_vm0, %v6712_v37 }
 0x805   : > { %6984 = vmatpush.bf16.msra.mxu2 %v13823_v25 }
 0x809   : > { %v13002_v62 = vpop.eup %9776 }
 0x80a   : > { %v6716_v5 = vpack.c.bf16 %v13002_v62, %v13002_v62 }
 0x80e   : > { %v6456_v8 = vpop.permute.xlu1 %6455 }
 0x80f   : > { %v6556_v31 = vsub.f32 %v12773_v33, %v6456_v8  ;;  %v6449_v47 = vpop.permute.xlu0 %6448 }
 0x810   : > { %v6555_v36 = vsub.f32 %v12835_v10, %v6449_v47  ;;  %v6614_v10 = vsel %vm461_vm0, %v9775_v7, 0.0 }
 0x811   : > { %v6573_v13 = vmul.f32 1.442695, %v6556_v31 }
 0x812   : > { %v6571_v38 = vmul.f32 1.442695, %v6555_v36 }
 0x813   : > { %9778 = vpow2.f32 %v6573_v13  ;;  %v6512_v13 = vpop.permute.xlu2 %6511 }
 0x814   : > { %9780 = vpow2.f32 %v6571_v38  ;;  %9361 = vmatmul.msk.bf16.vlgmr.msrb.gmra.mxu2 %vm461_vm0, %v6716_v5 }
 0x815   : > { %7080 = vmatpush.bf16.msrb.mxu2 %v13825_v49 }
 0x816   : > { %v6477_v3 = vpop.permute.xlu1 %6476 }
 0x817   : > { %v6559_v56 = vsub.f32 %v12810_v48, %v6477_v3  ;;  %v6470_v37 = vpop.permute.xlu0 %6469  ;;  %v13827_v48 = vld [vmem:[#allocation48_spill] sm:$0xff] }
 0x818   : > { %v6558_v33 = vsub.f32 %v12743_v54, %v6470_v37  ;;  %v13826_v54 = vld [vmem:[#allocation49_spill] sm:$0xff] }
 0x819   : > { %v9779_v22 = vpop.eup %9778  ;;  %v6579_v25 = vmul.f32 1.442695, %v6559_v56 }
 0x81a   : > { %v9781_v8 = vpop.eup %9780  ;;  %v6711_v31 = vpack.c.bf16 %v9779_v22, %v9779_v22  ;;  %v6577_v47 = vmul.f32 1.442695, %v6558_v33  ;;  %6615 = vadd.xlane.f32.xlu2 %v6614_v10  ;;  %v6611_v36 = vsel %vm461_vm0, %v9779_v22, 0.0 }
 0x81b   : > { %v6710_v5 = vpack.c.bf16 %v9781_v8, %v9781_v8  ;;  %9782 = vpow2.f32 %v6579_v25  ;;  %6612 = vadd.xlane.f32.xlu0 %v6611_v36  ;;  %v6608_v38 = vsel %vm461_vm0, %v9781_v8, 0.0  ;;  %v6564_v25 = vsub.f32 %v12887_v14, %v6512_v13  ;;  %v6533_v36 = vpop.permute.xlu2 %6532 }
 0x81c   : > { %9784 = vpow2.f32 %v6577_v47  ;;  %6609 = vadd.xlane.f32.xlu1 %v6608_v38  ;;  %9336 = vmatmul.msk.bf16.vlgmr.msra.gmra.mxu1 %vm461_vm0, %v6711_v31 }
 0x81d   : > { %9331 = vmatmul.msk.bf16.vlgmr.msra.gmra.mxu0 %vm461_vm0, %v6710_v5  ;;  %6960 = vmatpush.bf16.msra.mxu1 %v13826_v54 }
 0x81e   : > { %6936 = vmatpush.bf16.msra.mxu0 %v13827_v48  ;;  %v6498_v7 = vpop.permute.xlu1 %6497  ;;  %v6567_v48 = vsub.f32 %v12896_v58, %v6533_v36  ;;  %v13829_v58 = vld [vmem:[#allocation52_spill] sm:$0xff] }
 0x81f   : > { %v6562_v49 = vsub.f32 %v12714_v51, %v6498_v7  ;;  %v6484_v3 = vpop.permute.xlu0 %6483  ;;  %v6589_v51 = vmul.f32 1.442695, %v6564_v25 }
 0x820   : > { %v6560_v56 = vsub.f32 %v12740_v61, %v6484_v3  ;;  %v13828_v61 = vld [vmem:[#allocation51_spill] sm:$0xff] }
 0x821   : > { %v9783_v37 = vpop.eup %9782  ;;  %v6585_v33 = vmul.f32 1.442695, %v6562_v49 }
 0x822   : > { %v9785_v22 = vpop.eup %9784  ;;  %v6581_v10 = vmul.f32 1.442695, %v6560_v56  ;;  %v6620_v8 = vsel %vm461_vm0, %v9783_v37, 0.0 }
 0x823   : > { %v6713_v31 = vpack.c.bf16 %v9785_v22, %v9785_v22  ;;  %9786 = vpow2.f32 %v6585_v33  ;;  %6621 = vadd.xlane.f32.xlu0 %v6620_v8  ;;  %v6617_v47 = vsel %vm461_vm0, %v9785_v22, 0.0  ;;  %v6626_v33 = vsel %vm461_vm0, %v13002_v62, 0.0  ;;  %v6554_v62 = vpop.permute.xlu2 %6553 }
 0x824   : > { %9788 = vpow2.f32 %v6581_v10  ;;  %6618 = vadd.xlane.f32.xlu1 %v6617_v47  ;;  %v6714_v22 = vpack.c.bf16 %v9783_v37, %v9783_v37  ;;  %v13830_v10 = vld [vmem:[#allocation56_spill] sm:$0xff] }
 0x825   : > { %9346 = vmatmul.msk.bf16.vlgmr.msra.gmra.mxu3 %vm461_vm0, %v6713_v31  ;;  %9790 = vpow2.f32 %v6589_v51 }
 0x826   : > { %7008 = vmatpush.bf16.msra.mxu3 %v13828_v61  ;;  %v6519_v5 = vpop.permute.xlu1 %6518 }
 0x827   : > { %v6565_v38 = vsub.f32 %v12874_v18, %v6519_v5  ;;  %v6505_v14 = vpop.permute.xlu0 %6504 }
 0x828   : > { %v6563_v13 = vsub.f32 %v12885_v46, %v6505_v14  ;;  %v6595_v46 = vmul.f32 1.442695, %v6567_v48 }
 0x829   : > { %v9787_v54 = vpop.eup %9786  ;;  %v6591_v7 = vmul.f32 1.442695, %v6565_v38  ;;  %v6570_v38 = vsub.f32 %v12869_v50, %v6554_v62  ;;  %v13831_v50 = vld [vmem:[#allocation55_spill] sm:$0xff] }
 0x82a   : > { %v9789_v49 = vpop.eup %9788  ;;  %v6587_v3 = vmul.f32 1.442695, %v6563_v13  ;;  %v6629_v56 = vsel %vm461_vm0, %v9787_v54, 0.0 }
 0x82b   : > { %v6715_v25 = vpack.c.bf16 %v9789_v49, %v9789_v49  ;;  %9792 = vpow2.f32 %v6591_v7  ;;  %6630 = vadd.xlane.f32.xlu0 %v6629_v56  ;;  %v6623_v18 = vsel %vm461_vm0, %v9789_v49, 0.0  ;;  %v9791_v47 = vpop.eup %9790  ;;  %v6717_v7 = vpack.c.bf16 %v9787_v54, %v9787_v54 }
 0x82c   : > { %9794 = vpow2.f32 %v6587_v3  ;;  %6624 = vadd.xlane.f32.xlu2 %v6623_v18  ;;  %6627 = vadd.xlane.f32.xlu1 %v6626_v33 }
 0x82d   : > { %9351 = vmatmul.msk.bf16.vlgmr.msrb.gmra.mxu0 %vm461_vm0, %v6714_v22  ;;  %9356 = vmatmul.msk.bf16.vlgmr.msrb.gmra.mxu1 %vm461_vm0, %v6715_v25  ;;  %9796 = vpow2.f32 %v6595_v46  ;;  %v6719_v46 = vpack.c.bf16 %v9791_v47, %v9791_v47 }
 0x82e   : > { %7032 = vmatpush.bf16.msrb.mxu0 %v13829_v58  ;;  %7056 = vmatpush.bf16.msrb.mxu1 %v13830_v10  ;;  %v6540_v8 = vpop.permute.xlu1 %6539 }
 0x82f   : > { %v6568_v37 = vsub.f32 %v12855_v39, %v6540_v8  ;;  %v6526_v31 = vpop.permute.xlu0 %6525  ;;  %v6635_v39 = vsel %vm461_vm0, %v9791_v47, 0.0 }
 0x830   : > { %v6566_v36 = vsub.f32 %v12838_v12, %v6526_v31  ;;  %v6601_v12 = vmul.f32 1.442695, %v6570_v38  ;;  %v7116_v38 = vpop.permute.xlu2 %7115 }
 0x831   : > { %v9793_v51 = vpop.eup %9792  ;;  %v6597_v61 = vmul.f32 1.442695, %v6568_v37 }
 0x832   : > { %v9795_v5 = vpop.eup %9794  ;;  %v6720_v14 = vpack.c.bf16 %v9793_v51, %v9793_v51  ;;  %v6593_v13 = vmul.f32 1.442695, %v6566_v36  ;;  %v6638_v48 = vsel %vm461_vm0, %v9793_v51, 0.0 }
 0x833   : > { %9798 = vpow2.f32 %v6597_v61  ;;  %6639 = vadd.xlane.f32.xlu0 %v6638_v48  ;;  %v6632_v49 = vsel %vm461_vm0, %v9795_v5, 0.0  ;;  %v9797_v3 = vpop.eup %9796  ;;  %v6718_v58 = vpack.c.bf16 %v9795_v5, %v9795_v5 }
 0x834   : > { %9800 = vpow2.f32 %v6593_v13  ;;  %6633 = vadd.xlane.f32.xlu2 %v6632_v49  ;;  %6636 = vadd.xlane.f32.xlu1 %v6635_v39  ;;  %v6644_v8 = vsel %vm461_vm0, %v9797_v3, 0.0  ;;  %v6722_v51 = vpack.c.bf16 %v9797_v3, %v9797_v3 }
 0x835   : > { %9366 = vmatmul.msk.bf16.vlgmr.msrb.gmra.mxu3 %vm461_vm0, %v6717_v7  ;;  %9381 = vmatmul.msk.bf16.vlgmr.msra.gmra.mxu2 %vm461_vm0, %v6720_v14  ;;  %9802 = vpow2.f32 %v6601_v12 }
 0x836   : > { %7104 = vmatpush.bf16.msrb.mxu3 %v13831_v50  ;;  %v7130_v13 = vpop.permute.xlu1 %7129 }
 0x837   : > { %v6547_v56 = vpop.permute.xlu0 %6546 }
 0x838   : > { %v6569_v54 = vsub.f32 %v12864_v29, %v6547_v56  ;;  %v13059_v48 = vpop.permute.xlu2 %7136 }
 0x839   : > { %v9799_v33 = vpop.eup %9798 }
 0x83a   : > { %v9801_v22 = vpop.eup %9800  ;;  %v6599_v25 = vmul.f32 1.442695, %v6569_v54  ;;  %v6647_v18 = vsel %vm461_vm0, %v9799_v33, 0.0  ;;  %v6723_v61 = vpack.c.bf16 %v9799_v33, %v9799_v33  ;;  %v7225_v33 = vld [vmem:[#allocation4 + $0x190] sm:$0xff] }
 0x83b   : > { %6648 = vadd.xlane.f32.xlu0 %v6647_v18  ;;  %v6641_v10 = vsel %vm461_vm0, %v9801_v22, 0.0  ;;  %v9803_v29 = vpop.eup %9802  ;;  %v6721_v37 = vpack.c.bf16 %v9801_v22, %v9801_v22 }
 0x83c   : > { %9804 = vpow2.f32 %v6599_v25  ;;  %6642 = vadd.xlane.f32.xlu2 %v6641_v10  ;;  %6645 = vadd.xlane.f32.xlu1 %v6644_v8  ;;  %v6653_v47 = vsel %vm461_vm0, %v9803_v29, 0.0  ;;  %v6725_v5 = vpack.c.bf16 %v9803_v29, %v9803_v29  ;;  %v7241_v25 = vmul.f32 %v7225_v33, %v7130_v13 }
 0x83d   : > { %9371 = vmatmul.msk.bf16.vlgmr.msra.gmra.mxu0 %vm461_vm0, %v6718_v58  ;;  %9376 = vmatmul.msk.bf16.vlgmr.msra.gmra.mxu1 %vm461_vm0, %v6719_v46 }
 0x83e   : > { %v13063_v49 = vpop.permute.xlu1 %7150 }
 0x83f   : > { %v7123_v14 = vpop.permute.xlu0 %7122 }
 0x840   : > { %v7158_v39 = vpop.permute.xlu2 %7157 }
 0x842   : > { %v9805_v62 = vpop.eup %9804 }
 0x843   : > { %v6724_v31 = vpack.c.bf16 %v9805_v62, %v9805_v62  ;;  %v6650_v36 = vsel %vm461_vm0, %v9805_v62, 0.0 }
 0x844   : > { %6651 = vadd.xlane.f32.xlu2 %v6650_v36  ;;  %6654 = vadd.xlane.f32.xlu1 %v6653_v47  ;;  %v7224_v36 = vld [vmem:[#allocation4 + $0x188] sm:$0xff]  ;;  %v7223_v47 = vld [vmem:[#allocation4 + $0x180] sm:$0xff] }
 0x845   : > { %9386 = vmatmul.msk.bf16.vlgmr.msra.gmra.mxu3 %vm461_vm0, %v6721_v37  ;;  %9401 = vmatmul.msk.bf16.vlgmr.msrb.gmra.mxu2 %vm461_vm0, %v6724_v31  ;;  %v7229_v31 = vld [vmem:[#allocation4 + $0x1b0] sm:$0xff] }
 0x846   : > { %v13067_v50 = vpop.permute.xlu1 %7171 }
 0x847   : > { %v13061_v7 = vpop.permute.xlu0 %7143 }
 0x848   : > { %v13069_v3 = vpop.permute.xlu2 %7178 }
 0x84d   : > { %9391 = vmatmul.msk.bf16.vlgmr.msrb.gmra.mxu0 %vm461_vm0, %v6722_v51  ;;  %9396 = vmatmul.msk.bf16.vlgmr.msrb.gmra.mxu1 %vm461_vm0, %v6723_v61  ;;  %v7245_v51 = vmul.f32 %v7229_v31, %v7158_v39 }
 0x84e   : > { %v13073_v54 = vpop.permute.xlu1 %7192 }
 0x84f   : > { %v13065_v12 = vpop.permute.xlu0 %7164 }
 0x850   : > { %v13075_v22 = vpop.permute.xlu2 %7199 }
 0x855   : > { %9406 = vmatmul.msk.bf16.vlgmr.msrb.gmra.mxu3 %vm461_vm0, %v6725_v5 }
 0x856   : > { %v13079_v46 = vpop.permute.xlu1 %7213 }
 0x857   : > { %v13071_v56 = vpop.permute.xlu0 %7185 }
 0x858   : > { %v13082_v8 = vpop.permute.xlu2 %7220 }
 0x85f   : > { %v13077_v18 = vpop.permute.xlu0 %7206 }
 0x887   : > { %v6794_v58 = vpop.f32.mrf.mxu2 }
 0x888   : > { %v7257_v10 = vadd.f32 %v7241_v25, %v6794_v58  ;;  %v7240_v25 = vmul.f32 %v7224_v36, %v7123_v14 }
 0x88a   : > { %7273 = vst.msk [vmem:[#allocation4 + $0x190] sm:$0xff] %vm461_vm0, %v7257_v10  ;;  %v7239_v10 = vmul.f32 %v7223_v47, %v7116_v38 }
 0x88d   : > { %v6616_v61 = vpop.xlane.xlu2 %6615 }
 0x88e   : > { %v6613_v29 = vpop.xlane.xlu0 %6612  ;;  %v6674_v31 = vperm.slane %v6616_v61, %v10622_v53 }
 0x88f   : > { %v6610_v62 = vpop.xlane.xlu1 %6609  ;;  %v6796_v37 = vpop.f32.mrf.mxu2  ;;  %v6673_v5 = vperm.slane %v6613_v29, %v10622_v53 }
 0x890   : > { %v6672_v13 = vperm.slane %v6610_v62, %v10622_v53 }
 0x892   : > { %v6688_v23 = vsel %vm1067_vm4, %v6673_v5, %v6672_v13 }
 0x893   : > { %v6689_v14 = vsel %vm1071_vm2, %v6674_v31, %v6688_v23  ;;  %v7228_v31 = vld [vmem:[#allocation4 + $0x1a8] sm:$0xff] }
 0x896   : > { %v6622_v33 = vpop.xlane.xlu0 %6621 }
 0x897   : > { %v6619_v40 = vpop.xlane.xlu1 %6618  ;;  %v6890_v19 = vpop.f32.mrf.mxu2  ;;  %v6676_v62 = vperm.slane %v6622_v33, %v10622_v53 }
 0x898   : > { %v7261_v58 = vadd.f32 %v7245_v51, %v6890_v19  ;;  %v6675_v37 = vperm.slane %v6619_v40, %v10622_v53  ;;  %v6604_v51 = vld [vmem:[#allocation3 + $0x30] sm:$0xff] }
 0x899   : > { %v6770_v15 = vpop.f32.mrf.mxu1 }
 0x89a   : > { %7277 = vst.msk [vmem:[#allocation4 + $0x1b0] sm:$0xff] %vm461_vm0, %v7261_v58  ;;  %v6746_v34 = vpop.f32.mrf.mxu0  ;;  %v7256_v39 = vadd.f32 %v7240_v25, %v6770_v15  ;;  %v6690_v19 = vsel %vm1075_vm1, %v6675_v37, %v6689_v14  ;;  %v6606_v25 = vmul.f32 %v12950_v24, %v6604_v51 }
 0x89b   : > { %v7255_v29 = vadd.f32 %v7239_v10, %v6746_v34  ;;  %v6691_v34 = vsel %vm1339_vm7, %v6676_v62, %v6690_v19  ;;  %v7226_v10 = vld [vmem:[#allocation4 + $0x198] sm:$0xff] }
 0x89c   : > { %7272 = vst.msk [vmem:[#allocation4 + $0x188] sm:$0xff] %vm461_vm0, %v7256_v39  ;;  %v7242_v14 = vmul.f32 %v7226_v10, %v13059_v48 }
 0x89d   : > { %7271 = vst.msk [vmem:[#allocation4 + $0x180] sm:$0xff] %vm461_vm0, %v7255_v29  ;;  %v7227_v29 = vld [vmem:[#allocation4 + $0x1a0] sm:$0xff] }
 0x89e   : > { %v6631_v38 = vpop.xlane.xlu0 %6630 }
 0x89f   : > { %v6628_v36 = vpop.xlane.xlu1 %6627  ;;  %v6625_v40 = vpop.xlane.xlu2 %6624  ;;  %v6679_v13 = vperm.slane %v6631_v38, %v10622_v53 }
 0x8a0   : > { %v6678_v47 = vperm.slane %v6628_v36, %v10622_v53  ;;  %v6677_v15 = vperm.slane %v6625_v40, %v10622_v53  ;;  %v6892_v61 = vpop.f32.mrf.mxu2  ;;  %v7244_v36 = vmul.f32 %v7228_v31, %v13063_v49  ;;  %v7243_v40 = vmul.f32 %v7227_v29, %v13061_v7 }
 0x8a1   : > { %v6772_v5 = vpop.f32.mrf.mxu1 }
 0x8a2   : > { %v6692_v23 = vsel %vm1341_vm8, %v6677_v15, %v6691_v34  ;;  %v6748_v33 = vpop.f32.mrf.mxu0 }
 0x8a3   : > { %v6693_v58 = vsel %vm1343_vm9, %v6678_v47, %v6692_v23 }
 0x8a4   : > { %v6694_v37 = vsel %vm1345_vm10, %v6679_v13, %v6693_v58 }
 0x8a5   : > { %v6704_v39 = vadd.f32 %v6694_v37, %v6606_v25 }
 0x8a6   : > { %v6640_v24 = vpop.xlane.xlu0 %6639 }
 0x8a7   : > { %6706 = vst.msk [vmem:[#allocation3 + $0x30] sm:$0xff] %vm444_vm6, %v6704_v39  ;;  %v6637_v62 = vpop.xlane.xlu1 %6636  ;;  %v6634_v19 = vpop.xlane.xlu2 %6633  ;;  %v6682_v23 = vperm.slane %v6640_v24, %v10622_v53 }
 0x8a8   : > { %v6818_v38 = vpop.f32.mrf.mxu3  ;;  %v6681_v61 = vperm.slane %v6637_v62, %v10622_v53  ;;  %v6680_v34 = vperm.slane %v6634_v19, %v10622_v53  ;;  %v7233_v62 = vld [vmem:[#allocation4 + $0x1d0] sm:$0xff] }
 0x8a9   : > { %v7258_v51 = vadd.f32 %v7242_v14, %v6818_v38  ;;  %v7230_v14 = vld [vmem:[#allocation4 + $0x1b8] sm:$0xff] }
 0x8aa   : > { %v6842_v47 = vpop.f32.mrf.mxu0  ;;  %v6866_v15 = vpop.f32.mrf.mxu1  ;;  %v6695_v7 = vsel %vm1067_vm4, %v6681_v61, %v6680_v34  ;;  %v7246_v61 = vmul.f32 %v7230_v14, %v13065_v12  ;;  %v7249_v34 = vmul.f32 %v7233_v62, %v13071_v56 }
 0x8ab   : > { %7274 = vst.msk [vmem:[#allocation4 + $0x198] sm:$0xff] %vm461_vm0, %v7258_v51  ;;  %v7259_v48 = vadd.f32 %v7243_v40, %v6842_v47  ;;  %v7260_v5 = vadd.f32 %v7244_v36, %v6866_v15  ;;  %v6696_v37 = vsel %vm1071_vm2, %v6682_v23, %v6695_v7  ;;  %v7232_v36 = vld [vmem:[#allocation4 + $0x1c8] sm:$0xff]  ;;  %v7231_v40 = vld [vmem:[#allocation4 + $0x1c0] sm:$0xff] }
 0x8ac   : > { %v7248_v7 = vmul.f32 %v7232_v36, %v13069_v3 }
 0x8ad   : > { %7275 = vst.msk [vmem:[#allocation4 + $0x1a0] sm:$0xff] %vm461_vm0, %v7259_v48 }
 0x8ae   : > { %v8086_v13 = vld [vmem:[#allocation3 + $0x30] sm:$0xff]  ;;  %7276 = vst.msk [vmem:[#allocation4 + $0x1a8] sm:$0xff] %vm461_vm0, %v7260_v5  ;;  %v6649_v19 = vpop.xlane.xlu0 %6648 }
 0x8af   : > { %9806 = vrcp.f32 %v8086_v13  ;;  %v6646_v49 = vpop.xlane.xlu1 %6645  ;;  %v6643_v33 = vpop.xlane.xlu2 %6642  ;;  %v6685_v48 = vperm.slane %v6649_v19, %v10622_v53  ;;  %v6605_v13 = vld [vmem:[#allocation3 + $0x38] sm:$0xff] }
 0x8b0   : > { %v6683_v25 = vperm.slane %v6643_v33, %v10622_v53  ;;  %v6820_v58 = vpop.f32.mrf.mxu3  ;;  %v6684_v10 = vperm.slane %v6646_v49, %v10622_v53 }
 0x8b2   : > { %v6844_v39 = vpop.f32.mrf.mxu0  ;;  %v6868_v31 = vpop.f32.mrf.mxu1  ;;  %v6697_v29 = vsel %vm1075_vm1, %v6683_v25, %v6696_v37  ;;  %vm8443_vm1 = vcmask 392192  }
 0x8b3   : > { %v6698_v24 = vsel %vm1339_vm7, %v6684_v10, %v6697_v29  ;;  %v7247_v10 = vmul.f32 %v7231_v40, %v13067_v50  ;;  %v6607_v39 = vmul.f32 %v12958_v6, %v6605_v13 }
 0x8b4   : > { %v6699_v12 = vsel %vm1341_vm8, %v6685_v48, %v6698_v24  ;;  %v7235_v48 = vld [vmem:[#allocation4 + $0x1e0] sm:$0xff] }
 0x8b5   : > { %v13118_v38 = vpop.eup %9806 }
 0x8b6   : > { %v8104_v51 = vperm.slane %v13118_v38, 2  ;;  %v8097_v47 = vperm.slane %v13118_v38, 1  ;;  %v8090_v15 = vperm.slane %v13118_v38, 0  ;;  %v8125_v50 = vperm.slane %v13118_v38, 5 }
 0x8b7   : > { %v6655_v5 = vpop.xlane.xlu1 %6654  ;;  %v6652_v23 = vpop.xlane.xlu2 %6651  ;;  %v8118_v6 = vperm.slane %v13118_v38, 4  ;;  %v8111_v36 = vperm.slane %v13118_v38, 3  ;;  %v8139_v13 = vperm.slane %v13118_v38, 7 }
 0x8b8   : > { %v6687_v49 = vperm.slane %v6655_v5, %v10622_v53  ;;  %v6686_v33 = vperm.slane %v6652_v23, %v10622_v53  ;;  %v6914_v25 = vpop.f32.mrf.mxu3  ;;  %v6986_v58 = vpop.f32.mrf.mxu2  ;;  %8109 = vperm.xlu2 %9648, %v8104_v51   ;;  %8102 = vperm.xlu1 %9647, %v8097_v47   ;;  %v7236_v5 = vld [vmem:[#allocation4 + $0x1e8] sm:$0xff] }
 0x8b9   : > { %v7262_v56 = vadd.f32 %v7246_v61, %v6914_v25  ;;  %v7265_v37 = vadd.f32 %v7249_v34, %v6986_v58  ;;  %8095 = vperm.xlu0 %9649, %v8090_v15   ;;  %v7234_v15 = vld [vmem:[#allocation4 + $0x1d8] sm:$0xff]  ;;  %v7237_v61 = vld [vmem:[#allocation4 + $0x1f0] sm:$0xff]  ;;  %v7251_v58 = vmul.f32 %v7235_v48, %v13075_v22 }
 0x8ba   : > { %v6700_v31 = vsel %vm1343_vm9, %v6686_v33, %v6699_v12  ;;  %v6938_v3 = vpop.f32.mrf.mxu0  ;;  %v6962_v29 = vpop.f32.mrf.mxu1  ;;  %v7250_v23 = vmul.f32 %v7234_v15, %v13073_v54  ;;  %v7937_v48 = vld [vmem:[#allocation4 + $0x178] sm:$0xff] }
 0x8bb   : > { %v6701_v14 = vsel %vm1345_vm10, %v6687_v49, %v6700_v31  ;;  %7278 = vst.msk [vmem:[#allocation4 + $0x1b8] sm:$0xff] %vm461_vm0, %v7262_v56  ;;  %v7263_v53 = vadd.f32 %v7247_v10, %v6938_v3  ;;  %v7264_v62 = vadd.f32 %v7248_v7, %v6962_v29  ;;  %v7253_v7 = vmul.f32 %v7237_v61, %v13079_v46 }
 0x8bc   : > { %v6705_v19 = vadd.f32 %v6701_v14, %v6607_v39  ;;  %7281 = vst.msk [vmem:[#allocation4 + $0x1d0] sm:$0xff] %vm461_vm0, %v7265_v37  ;;  %v8132_v49 = vperm.slane %v13118_v38, 6  ;;  %v7252_v10 = vmul.f32 %v7236_v5, %v13077_v18  ;;  %v8072_v5 = vld [vmem:[#allocation4 + $0x190] sm:$0xff] }
 0x8bd   : > { %7279 = vst.msk [vmem:[#allocation4 + $0x1c0] sm:$0xff] %vm461_vm0, %v7263_v53 }
 0x8be   : > { %6707 = vst.msk [vmem:[#allocation3 + $0x38] sm:$0xff] %vm444_vm6, %v6705_v19 }
 0x8bf   : > { %7280 = vst.msk [vmem:[#allocation4 + $0x1c8] sm:$0xff] %vm461_vm0, %v7264_v62  ;;  %v7238_v62 = vld [vmem:[#allocation4 + $0x1f8] sm:$0xff] }
 0x8c0   : > { %v6916_v40 = vpop.f32.mrf.mxu3  ;;  %v6988_v24 = vpop.f32.mrf.mxu2  ;;  %8130 = vperm.xlu2 %9648, %v8125_v50   ;;  %8123 = vperm.xlu1 %9647, %v8118_v6   ;;  %v7254_v6 = vmul.f32 %v7238_v62, %v13082_v8  ;;  %v8069_v8 = vmul.f32 %v12916_v17, %v7937_v48  ;;  %v8070_v17 = vld [vmem:[#allocation4 + $0x180] sm:$0xff] }
 0x8c1   : > { %8116 = vperm.xlu0 %9649, %v8111_v36  }
 0x8c2   : > { %v6940_v51 = vpop.f32.mrf.mxu0  ;;  %v6964_v47 = vpop.f32.mrf.mxu1 }
 0x8c3   : > { %v7936_v51 = vld [vmem:[#allocation4 + $0x170] sm:$0xff] }
 0x8c4   : > { %v8068_v15 = vmul.f32 %v12914_v45, %v7936_v51 }
 0x8c5   : > { %v8087_v34 = vld [vmem:[#allocation3 + $0x38] sm:$0xff] }
 0x8c6   : > { %9808 = vrcp.f32 %v8087_v34 }
 0x8c8   : > { %v7010_v33 = vpop.f32.mrf.mxu3  ;;  %v7082_v25 = vpop.f32.mrf.mxu2  ;;  %8144 = vperm.xlu1 %9647, %v8139_v13  }
 0x8c9   : > { %v7266_v12 = vadd.f32 %v7250_v23, %v7010_v33  ;;  %v7269_v56 = vadd.f32 %v7253_v7, %v7082_v25  ;;  %8137 = vperm.xlu0 %9649, %v8132_v49   ;;  %v8075_v7 = vld [vmem:[#allocation4 + $0x1a8] sm:$0xff]  ;;  %v8078_v33 = vld [vmem:[#allocation4 + $0x1c0] sm:$0xff] }
 0x8ca   : > { %v7034_v37 = vpop.f32.mrf.mxu0  ;;  %v7058_v39 = vpop.f32.mrf.mxu1 }
 0x8cb   : > { %7282 = vst.msk [vmem:[#allocation4 + $0x1d8] sm:$0xff] %vm461_vm0, %v7266_v12  ;;  %v7267_v31 = vadd.f32 %v7251_v58, %v7034_v37  ;;  %v7268_v54 = vadd.f32 %v7252_v10, %v7058_v39  ;;  %v8071_v10 = vld [vmem:[#allocation4 + $0x188] sm:$0xff] }
 0x8cc   : > { %v9809_v3 = vpop.eup %9808  ;;  %7285 = vst.msk [vmem:[#allocation4 + $0x1f0] sm:$0xff] %vm461_vm0, %v7269_v56 }
 0x8cd   : > { %7283 = vst.msk [vmem:[#allocation4 + $0x1e0] sm:$0xff] %vm461_vm0, %v7267_v31  ;;  %v8146_v46 = vperm.slane %v9809_v3, 0  ;;  %v8160_v38 = vperm.slane %v9809_v3, 2  ;;  %v8153_v29 = vperm.slane %v9809_v3, 1  ;;  %v8167_v19 = vperm.slane %v9809_v3, 3 }
 0x8ce   : > { %7284 = vst.msk [vmem:[#allocation4 + $0x1e8] sm:$0xff] %vm461_vm0, %v7268_v54  ;;  %v8181_v50 = vperm.slane %v9809_v3, 5  ;;  %v8174_v36 = vperm.slane %v9809_v3, 4  ;;  %v8188_v47 = vperm.slane %v9809_v3, 6  ;;  %v8195_v61 = vperm.slane %v9809_v3, 7 }
 0x8cf   : > { %8151 = vperm.xlu2 %9648, %v8146_v46   ;;  %v8074_v46 = vld [vmem:[#allocation4 + $0x1a0] sm:$0xff] }
 0x8d0   : > { %v7012_v22 = vpop.f32.mrf.mxu3  ;;  %v7084_v18 = vpop.f32.mrf.mxu2  ;;  %8165 = vperm.xlu1 %9647, %v8160_v38  }
 0x8d1   : > { %8158 = vperm.xlu0 %9649, %v8153_v29   ;;  %v8073_v22 = vld [vmem:[#allocation4 + $0x198] sm:$0xff] }
 0x8d2   : > { %v7036_v14 = vpop.f32.mrf.mxu0  ;;  %v7060_v53 = vpop.f32.mrf.mxu1  ;;  %v8081_v31 = vld [vmem:[#allocation4 + $0x1d8] sm:$0xff] }
 0x8d3   : > { %v8084_v53 = vld [vmem:[#allocation4 + $0x1f0] sm:$0xff] }
 0x8d7   : > { %8172 = vperm.xlu2 %9648, %v8167_v19  }
 0x8d8   : > { %v7106_v40 = vpop.f32.mrf.mxu3  ;;  %8186 = vperm.xlu1 %9647, %v8181_v50   ;;  %v8077_v50 = vld [vmem:[#allocation4 + $0x1b8] sm:$0xff] }
 0x8d9   : > { %v7270_v24 = vadd.f32 %v7254_v6, %v7106_v40  ;;  %8179 = vperm.xlu0 %9649, %v8174_v36   ;;  %v8076_v40 = vld [vmem:[#allocation4 + $0x1b0] sm:$0xff] }
 0x8db   : > { %7286 = vst.msk [vmem:[#allocation4 + $0x1f8] sm:$0xff] %vm461_vm0, %v7270_v24 }
 0x8df   : > { %8193 = vperm.xlu2 %9648, %v8188_v47   ;;  %v8080_v47 = vld [vmem:[#allocation4 + $0x1d0] sm:$0xff] }
 0x8e0   : > { %v7108_v34 = vpop.f32.mrf.mxu3  ;;  %8326 = vrot.lane.b32.xlu1 %v8068_v15, %s9923_s16 }
 0x8e1   : > { %8200 = vperm.xlu0 %9649, %v8195_v61   ;;  %v8079_v34 = vld [vmem:[#allocation4 + $0x1c8] sm:$0xff] }
 0x8e7   : > { %8328 = vrot.lane.b32.xlu2 %v8069_v8, %s9923_s16 }
 0x912   : > { %v8110_v13 = vpop.permute.xlu2 %8109 }
 0x913   : > { %v8204_v23 = vmul.f32 %v8110_v13, %v8072_v5  ;;  %v8083_v5 = vld [vmem:[#allocation4 + $0x1e8] sm:$0xff] }
 0x915   : > { %8366 = vrot.lane.b32.xlu2 %v8204_v23, %s9924_s17 }
 0x91a   : > { %v8131_v49 = vpop.permute.xlu2 %8130 }
 0x91b   : > { %v8207_v45 = vmul.f32 %v8131_v49, %v8075_v7  ;;  %v8082_v7 = vld [vmem:[#allocation4 + $0x1e0] sm:$0xff] }
 0x91d   : > { %8372 = vrot.lane.b32.xlu2 %v8207_v45, %s9924_s17 }
 0x929   : > { %v8152_v25 = vpop.permute.xlu2 %8151 }
 0x92a   : > { %v8210_v58 = vmul.f32 %v8152_v25, %v8078_v33  ;;  %v8103_v12 = vpop.permute.xlu1 %8102  ;;  %v13181_v33 = vld [vmem:[%s13178_s30 + $0x8] sm:$0xff]  }
 0x92b   : > { %v8203_v56 = vmul.f32 %v8103_v12, %v8071_v10  ;;  %v8096_v37 = vpop.permute.xlu0 %8095  ;;  %v9563_v25 = vunpack.c.l.bf16 %v13181_v33  ;;  %v8085_v10 = vld [vmem:[#allocation4 + $0x1f8] sm:$0xff] }
 0x92c   : > { %v8202_v39 = vmul.f32 %v8096_v37, %v8070_v17  ;;  %8378 = vrot.lane.b32.xlu2 %v8210_v58, %s9924_s17  ;;  %v13186_v17 = vld [vmem:[%s13178_s30 + $0x10] sm:$0xff]  }
 0x92d   : > { %8364 = vrot.lane.b32.xlu1 %v8203_v56, %s9924_s17  ;;  %v9409_v58 = vmul.f32 -1.442695, %v9563_v25  ;;  %v9568_v37 = vunpack.c.h.bf16 %v13186_v17 }
 0x92e   : > { %8362 = vrot.lane.b32.xlu0 %v8202_v39, %s9924_s17 }
 0x92f   : > { %9810 = vpow2.f32 %v9409_v58 }
 0x931   : > { %v8173_v54 = vpop.permute.xlu2 %8172 }
 0x932   : > { %v8213_v3 = vmul.f32 %v8173_v54, %v8081_v31  ;;  %v8124_v38 = vpop.permute.xlu1 %8123  ;;  %v9412_v31 = vmul.f32 -1.442695, %v9568_v37 }
 0x933   : > { %v8206_v29 = vmul.f32 %v8124_v38, %v8074_v46  ;;  %v8117_v18 = vpop.permute.xlu0 %8116 }
 0x934   : > { %v8205_v14 = vmul.f32 %v8117_v18, %v8073_v22  ;;  %8384 = vrot.lane.b32.xlu2 %v8213_v3, %s9924_s17  ;;  %9812 = vpow2.f32 %v9412_v31 }
 0x935   : > { %8370 = vrot.lane.b32.xlu1 %v8206_v29, %s9924_s17  ;;  %v9811_v39 = vpop.eup %9810 }
 0x936   : > { %8368 = vrot.lane.b32.xlu0 %v8205_v14, %s9924_s17  ;;  %v7372_v54 = vadd.f32 1.0, %v9811_v39  ;;  %v13190_v14 = vld [vmem:[%s13178_s30 + $0x20] sm:$0xff]  }
 0x938   : > { %9814 = vrcp.f32 %v7372_v54  ;;  %vm7421_vm11 = vweird.f32 %v7372_v54  ;;  %v7427_v18 = vand.u32 2147483648, %v7372_v54 }
 0x939   : > { %v8194_v62 = vpop.permute.xlu2 %8193 }
 0x93a   : > { %v8216_v19 = vmul.f32 %v8194_v62, %v8084_v53  ;;  %v8145_v6 = vpop.permute.xlu1 %8144  ;;  %v9813_v3 = vpop.eup %9812  ;;  %v7425_v62 = vand.u32 2147483647, %v7372_v54 }
 0x93b   : > { %v8209_v36 = vmul.f32 %v8145_v6, %v8077_v50  ;;  %v8138_v24 = vpop.permute.xlu0 %8137  ;;  %v7375_v38 = vadd.f32 1.0, %v9813_v3  ;;  %v7631_v3 = vld [vmem:[#allocation4 + $0x28] sm:$0xff] }
 0x93c   : > { %v8208_v51 = vmul.f32 %v8138_v24, %v8076_v40  ;;  %8390 = vrot.lane.b32.xlu2 %v8216_v19, %s9924_s17  ;;  %v9575_v19 = vunpack.c.l.bf16 %v13190_v14  ;;  %v7628_v40 = vld [vmem:[#allocation4 + $0x10] sm:$0xff]  ;;  %vm7426_vm14 = vcmp.eq.f32.partialorder %v7425_v62, 8.507059e+37 }
 0x93d   : > { %8376 = vrot.lane.b32.xlu1 %v8209_v36, %s9924_s17  ;;  %9816 = vrcp.f32 %v7375_v38  ;;  %vm7466_vm2 = vweird.f32 %v7375_v38  ;;  %v7470_v25 = vand.u32 2147483647, %v7375_v38 }
 0x93e   : > { %8374 = vrot.lane.b32.xlu0 %v8208_v51, %s9924_s17  ;;  %v9815_v46 = vpop.eup %9814  ;;  %v9415_v36 = vmul.f32 -1.442695, %v9575_v19  ;;  %v7428_v51 = vor.u32 1.1754944e-38, %v7427_v18  ;;  %v13229_v19 = vld [vmem:[%s13178_s30 + $0x38] sm:$0xff]  }
 0x93f   : > { %v7417_v29 = vmul.f32 %v9815_v46, %v7372_v54  ;;  %vm7422_vm12 = vweird.f32 %v9815_v46  ;;  %vm7471_vm6 = vcmp.eq.f32.partialorder %v7470_v25, 8.507059e+37 }
 0x940   : > { %vm13195_vm13 = vmor %vm7421_vm11, %vm7422_vm12  ;;  %9818 = vpow2.f32 %v9415_v36  ;;  %v9587_v36 = vunpack.c.l.bf16 %v13229_v19 }
 0x941   : > { %v7418_v22 = vsub.f32 1.0, %v7417_v29  ;;  %v13192_v53 = vpop.permute.xlu2 %8328 }
 0x942   : > { %v8166_v15 = vpop.permute.xlu1 %8165 }
 0x943   : > { %v8212_v61 = vmul.f32 %v8166_v15, %v8080_v47  ;;  %v8159_v48 = vpop.permute.xlu0 %8158  ;;  %v7419_v50 = vmul.f32 %v9815_v46, %v7418_v22  ;;  %v9817_v47 = vpop.eup %9816  ;;  %v13834_v15 = vld [vmem:[#allocation59_spill] sm:$0xff] }
 0x944   : > { %v8211_v8 = vmul.f32 %v8159_v48, %v8079_v34  ;;  %v7462_v48 = vmul.f32 %v9817_v47, %v7375_v38  ;;  %vm7467_vm3 = vweird.f32 %v9817_v47 }
 0x945   : > { %8382 = vrot.lane.b32.xlu1 %v8212_v61, %s9924_s17  ;;  %v7420_v24 = vadd.f32 %v9815_v46, %v7419_v50  ;;  %v7760_v61 = vmul.f32 %v13834_v15, %v7628_v40  ;;  %vm13211_vm4 = vmor %vm7466_vm2, %vm7467_vm3 }
 0x946   : > { %8380 = vrot.lane.b32.xlu0 %v8211_v8, %s9924_s17 }
 0x947   : > { %v7424_v34 = vsel %vm13195_vm13, %v9815_v46, %v7420_v24  ;;  %v8412_v8 = vsel %vm461_vm0, %v7760_v61, %v12386_v32  ;;  %v9819_v32 = vpop.eup %9818 }
 0x94a   : > { %v8187_v13 = vpop.permute.xlu1 %8186 }
 0x94b   : > { %v8215_v23 = vmul.f32 %v8187_v13, %v8083_v5  ;;  %v8180_v49 = vpop.permute.xlu0 %8179  ;;  %v7429_v5 = vsel %vm7426_vm14, %v7428_v51, %v7424_v34  ;;  %v7463_v13 = vsub.f32 1.0, %v7462_v48  ;;  %v7627_v48 = vld [vmem:[#allocation4 + $0x8] sm:$0xff] }
 0x94c   : > { %v8214_v45 = vmul.f32 %v8180_v49, %v8082_v7  ;;  %v13205_v7 = vld [vmem:[%s13178_s30 + $0x28] sm:$0xff]   ;;  %v8429_v49 = vsel %vm8426_vm15, %v8412_v8, %v12978_v1  ;;  %v13215_v1 = vadd.f32 1.0, %v9819_v32  ;;  %v7629_v8 = vld [vmem:[#allocation4 + $0x18] sm:$0xff] }
 0x94d   : > { %8388 = vrot.lane.b32.xlu1 %v8215_v23, %s9924_s17  ;;  %v7472_v23 = vand.u32 2147483648, %v7375_v38  ;;  %v9580_v58 = vunpack.c.h.bf16 %v13205_v7  ;;  %v13837_v38 = vld [vmem:[#allocation62_spill] sm:$0xff] }
 0x94e   : > { %8386 = vrot.lane.b32.xlu0 %v8214_v45, %s9924_s17  ;;  %v7763_v29 = vmul.f32 %v13837_v38, %v7631_v3  ;;  %vm7511_vm7 = vweird.f32 %v13215_v1  ;;  %v7515_v32 = vand.u32 2147483647, %v13215_v1  ;;  %v7633_v38 = vld [vmem:[#allocation4 + $0x38] sm:$0xff] }
 0x94f   : > { %v9418_v39 = vmul.f32 -1.442695, %v9580_v58  ;;  %v7473_v54 = vor.u32 1.1754944e-38, %v7472_v23  ;;  %v13838_v23 = vld [vmem:[#allocation64_spill] sm:$0xff]  ;;  %v7626_v58 = vld [vmem:[#allocation4] sm:$0xff] }
 0x950   : > { %v8415_v18 = vsel %vm461_vm0, %v7763_v29, %v12396_v60  ;;  %vm7516_vm10 = vcmp.eq.f32.partialorder %v7515_v32, 8.507059e+37  ;;  %v7638_v32 = vld [vmem:[#allocation4 + $0x60] sm:$0xff] }
 0x951   : > { %9820 = vpow2.f32 %v9418_v39  ;;  %v8432_v50 = vsel %vm8426_vm15, %v8415_v18, %v12986_v41  ;;  %v7634_v41 = vld [vmem:[#allocation4 + $0x40] sm:$0xff]  ;;  %v13843_v18 = vld [vmem:[#allocation60_spill] sm:$0xff] }
 0x952   : > { %9822 = vrcp.f32 %v13215_v1  ;;  %v13841_v39 = vld [vmem:[#allocation67_spill] sm:$0xff] }
 0x953   : > { %v8201_v12 = vpop.permute.xlu0 %8200 }
 0x954   : > { %v8217_v56 = vmul.f32 %v8201_v12, %v8085_v10  ;;  %v7464_v12 = vmul.f32 %v9817_v47, %v7463_v13  ;;  %v7517_v13 = vand.u32 2147483648, %v13215_v1 }
 0x956   : > { %8392 = vrot.lane.b32.xlu0 %v8217_v56, %s9924_s17  ;;  %v7465_v31 = vadd.f32 %v9817_v47, %v7464_v12  ;;  %v7630_v12 = vld [vmem:[#allocation4 + $0x20] sm:$0xff] }
 0x957   : > { %v9821_v24 = vpop.eup %9820 }
 0x958   : > { %v7469_v22 = vsel %vm13211_vm4, %v9817_v47, %v7465_v31  ;;  %v9421_v47 = vmul.f32 -1.442695, %v9587_v36  ;;  %v9823_v15 = vpop.eup %9822  ;;  %v13235_v61 = vadd.f32 1.0, %v9821_v24  ;;  %v13845_v36 = vld [vmem:[#allocation65_spill] sm:$0xff] }
 0x959   : > { %v7474_v62 = vsel %vm7471_vm6, %v7473_v54, %v7469_v22  ;;  %v7507_v60 = vmul.f32 %v9823_v15, %v13215_v1  ;;  %vm7512_vm8 = vweird.f32 %v9823_v15  ;;  %v13842_v54 = vld [vmem:[#allocation61_spill] sm:$0xff]  ;;  %v9558_v22 = vld [vmem:[%s13178_s30] sm:$0xff]  }
 0x95a   : > { %9824 = vpow2.f32 %v9421_v47  ;;  %v7762_v3 = vmul.f32 %v13842_v54, %v7630_v12  ;;  %v7632_v24 = vld [vmem:[#allocation4 + $0x30] sm:$0xff]  ;;  %vm13258_vm9 = vmor %vm7511_vm7, %vm7512_vm8  ;;  %v13850_v12 = vld [vmem:[#allocation66_spill] sm:$0xff]  ;;  %vm7556_vm11 = vweird.f32 %v13235_v61  ;;  %v7560_v47 = vand.u32 2147483647, %v13235_v61 }
 0x95b   : > { %9826 = vrcp.f32 %v13235_v61 }
 0x95c   : > { %vm7561_vm14 = vcmp.eq.f32.partialorder %v7560_v47, 8.507059e+37 }
 0x96f   : > { %v8367_v45 = vpop.permute.xlu2 %8366 }
 0x970   : > { %v8446_v10 = vsel %vm8443_vm1, %v8429_v49, %v8367_v45  ;;  %v7766_v49 = vmul.f32 %v13838_v23, %v7634_v41  ;;  %v13839_v45 = vld [vmem:[#allocation58_spill] sm:$0xff]  ;;  %v7635_v23 = vld [vmem:[#allocation4 + $0x48] sm:$0xff] }
 0x971   : > { %v8462_v56 = vmul.f32 %v8446_v10, %v7429_v5  ;;  %v7508_v5 = vsub.f32 1.0, %v7507_v60  ;;  %v7759_v25 = vmul.f32 %v13839_v45, %v7627_v48  ;;  %v7637_v10 = vld [vmem:[#allocation4 + $0x58] sm:$0xff]  ;;  %v9825_v60 = vpop.eup %9824  ;;  %v13848_v48 = vld [vmem:[#allocation63_spill] sm:$0xff] }
 0x972   : > { %v13248_v31 = vmul.f32 %v13841_v39, %v7637_v10  ;;  %v13263_v41 = vmul.f32 %v13848_v48, %v7632_v24  ;;  %v9827_v10 = vpop.eup %9826  ;;  %v7639_v39 = vld [vmem:[#allocation4 + $0x68] sm:$0xff]  ;;  %v13269_v1 = vadd.f32 1.0, %v9825_v60  ;;  %v8414_v48 = vsel %vm461_vm0, %v7762_v3, %v12373_v42 }
 0x973   : > { %v8478_v46 = vpack.c.bf16 %v8462_v56, %v8462_v56  ;;  %v13840_v56 = vld [vmem:[#allocation57_spill] sm:$0xff]  ;;  %v7509_v29 = vmul.f32 %v9823_v15, %v7508_v5  ;;  %v13849_v5 = vld [vmem:[#allocation68_spill] sm:$0xff]  ;;  %vm7557_vm12 = vweird.f32 %v9827_v10  ;;  %v9567_v42 = vunpack.c.l.bf16 %v13186_v17 }
 0x974   : > { %v7758_v37 = vmul.f32 %v13840_v56, %v7626_v58  ;;  %v7518_v58 = vor.u32 1.1754944e-38, %v7517_v13  ;;  %v13267_v56 = vmul.f32 %v13850_v12, %v7635_v23  ;;  %v7552_v13 = vmul.f32 %v9827_v10, %v13235_v61  ;;  %vm13304_vm13 = vmor %vm7556_vm11, %vm7557_vm12 }
 0x975   : > { %8495 = vst.msk [vmem:[%s13222_s18 + $0x8] sm:$0xf] %vm8492_vm5, %v8478_v46  ;;  %v7640_v46 = vld [vmem:[#allocation4 + $0x70] sm:$0xff]  ;;  %v7510_v45 = vadd.f32 %v9823_v15, %v7509_v29  ;;  %v7562_v29 = vand.u32 2147483648, %v13235_v61  ;;  %9828 = vrcp.f32 %v13269_v1  ;;  %v9411_v61 = vmul.f32 -1.442695, %v9567_v42 }
 0x976   : > { %v7553_v24 = vsub.f32 1.0, %v7552_v13  ;;  %v8410_v3 = vsel %vm461_vm0, %v7758_v37, %v12377_v21  ;;  %vm7601_vm2 = vweird.f32 %v13269_v1 }
 0x977   : > { %v8373_v6 = vpop.permute.xlu2 %8372 }
 0x978   : > { %v8449_v40 = vsel %vm8443_vm1, %v8432_v50, %v8373_v6  ;;  %v13844_v50 = vld [vmem:[#allocation70_spill] sm:$0xff]  ;;  %v7554_v23 = vmul.f32 %v9827_v10, %v7553_v24 }
 0x979   : > { %v8465_v51 = vmul.f32 %v8449_v40, %v7474_v62  ;;  %v7761_v62 = vmul.f32 %v13843_v18, %v7629_v8  ;;  %v7772_v6 = vmul.f32 %v13844_v50, %v7640_v46  ;;  %v7765_v40 = vmul.f32 %v13845_v36, %v7633_v38  ;;  %v13851_v46 = vld [vmem:[#allocation71_spill] sm:$0xff] }
 0x97a   : > { %v13272_v38 = vmul.f32 %v13851_v46, %v7639_v39  ;;  %v8418_v18 = vsel %vm461_vm0, %v7766_v49, %v12404_v4  ;;  %v7514_v50 = vsel %vm13258_vm9, %v9823_v15, %v7510_v45  ;;  %v8411_v4 = vsel %vm461_vm0, %v7759_v25, %v12367_v52 }
 0x97b   : > { %v8481_v34 = vpack.c.bf16 %v8465_v51, %v8465_v51  ;;  %v7636_v51 = vld [vmem:[#allocation4 + $0x50] sm:$0xff]  ;;  %v7519_v36 = vsel %vm7516_vm10, %v7518_v58, %v7514_v50  ;;  %v8435_v15 = vsel %vm8426_vm15, %v8418_v18, %v12991_v43  ;;  %v9829_v58 = vpop.eup %9828  ;;  %v8421_v39 = vsel %vm461_vm0, %v13248_v31, %v12409_v16 }
 0x97c   : > { %v7768_v8 = vmul.f32 %v13849_v5, %v7636_v51  ;;  %v9559_v51 = vunpack.c.l.bf16 %v9558_v22  ;;  %v8424_v17 = vsel %vm461_vm0, %v7772_v6, %v12415_v9  ;;  %v7597_v37 = vmul.f32 %v9829_v58, %v13269_v1 }
 0x97d   : > { %8498 = vst.msk [vmem:[%s13222_s18 + $0x14] sm:$0xf] %vm8492_vm5, %v8481_v34  ;;  %v9560_v34 = vunpack.c.h.bf16 %v9558_v22  ;;  %v13295_v22 = vsel %vm461_vm0, %v7765_v40, %v12383_v11  ;;  %v7555_v11 = vadd.f32 %v9827_v10, %v7554_v23  ;;  %v7563_v40 = vor.u32 1.1754944e-38, %v7562_v29 }
 0x97e   : > { %v9407_v45 = vmul.f32 -1.442695, %v9559_v51  ;;  %v13299_v52 = vsel %vm461_vm0, %v7768_v8, %v12393_v63  ;;  %v8413_v63 = vsel %vm461_vm0, %v7761_v62, %v12388_v55  ;;  %v9564_v62 = vunpack.c.h.bf16 %v13181_v33  ;;  %v8327_v51 = vpop.permute.xlu1 %8326 }
 0x97f   : > { %v9408_v54 = vmul.f32 -1.442695, %v9560_v34  ;;  %v13852_v34 = vld [vmem:[#allocation69_spill] sm:$0xff]  ;;  %v7559_v21 = vsel %vm13304_vm13, %v9827_v10, %v7555_v11  ;;  %v7598_v16 = vsub.f32 1.0, %v7597_v37  ;;  %vm7602_vm3 = vweird.f32 %v9829_v58 }
 0x980   : > { %v13283_v60 = vmul.f32 %v13852_v34, %v7638_v32  ;;  %v7607_v9 = vand.u32 2147483648, %v13269_v1  ;;  %v13330_v31 = vsel %vm8426_vm15, %v8411_v4, %v12970_v57  ;;  %v8438_v6 = vsel %vm8426_vm15, %v8421_v39, %v12998_v2  ;;  %v9591_v32 = vld [vmem:[%s13178_s30 + $0x18] sm:$0xff]   ;;  %vm13349_vm4 = vmor %vm7601_vm2, %vm7602_vm3 }
 0x981   : > { %9830 = vpow2.f32 %v9408_v54  ;;  %v7564_v54 = vsel %vm7561_vm14, %v7563_v40, %v7559_v21  ;;  %v7605_v46 = vand.u32 2147483647, %v13269_v1  ;;  %v13338_v33 = vsel %vm8426_vm15, %v8410_v3, %v12953_v35 }
 0x982   : > { %9832 = vpow2.f32 %v9407_v45  ;;  %v7599_v13 = vmul.f32 %v9829_v58, %v7598_v16  ;;  %v9410_v29 = vmul.f32 -1.442695, %v9564_v62  ;;  %v13344_v57 = vsel %vm8426_vm15, %v8414_v48, %v12980_v28 }
 0x983   : > { %9834 = vpow2.f32 %v9411_v61  ;;  %v7608_v4 = vor.u32 1.1754944e-38, %v7607_v9  ;;  %vm7606_vm6 = vcmp.eq.f32.partialorder %v7605_v46, 8.507059e+37  ;;  %v13360_v1 = vsel %vm8426_vm15, %v8413_v63, %v12961_v30 }
 0x984   : > { %v7600_v34 = vadd.f32 %v9829_v58, %v7599_v13  ;;  %v9571_v42 = vunpack.c.l.bf16 %v9591_v32 }
 0x986   : > { %v8379_v49 = vpop.permute.xlu2 %8378  ;;  %v7604_v48 = vsel %vm13349_vm4, %v9829_v58, %v7600_v34  ;;  %v9413_v39 = vmul.f32 -1.442695, %v9571_v42 }
 0x987   : > { %v8452_v5 = vsel %vm8443_vm1, %v8435_v15, %v8379_v49  ;;  %v9831_v12 = vpop.eup %9830  ;;  %v9572_v15 = vunpack.c.h.bf16 %v9591_v32  ;;  %v7609_v30 = vsel %vm7606_vm6, %v7608_v4, %v7604_v48  ;;  %v9579_v32 = vunpack.c.l.bf16 %v13205_v7 }
 0x988   : > { %v8468_v25 = vmul.f32 %v8452_v5, %v7519_v36  ;;  %v13324_v55 = vadd.f32 1.0, %v9831_v12  ;;  %v9833_v18 = vpop.eup %9832 }
 0x989   : > { %v13354_v24 = vadd.f32 1.0, %v9833_v18  ;;  %v9835_v28 = vpop.eup %9834  ;;  %v9414_v23 = vmul.f32 -1.442695, %v9572_v15  ;;  %v9417_v42 = vmul.f32 -1.442695, %v9579_v32 }
 0x98a   : > { %v8484_v8 = vpack.c.bf16 %v8468_v25, %v8468_v25  ;;  %9836 = vrcp.f32 %v13324_v55  ;;  %v7410_v35 = vand.u32 2147483647, %v13324_v55  ;;  %v7412_v47 = vand.u32 2147483648, %v13324_v55 }
 0x98b   : > { %9838 = vpow2.f32 %v9410_v29  ;;  %v13364_v5 = vadd.f32 1.0, %v9835_v28  ;;  %v8441_v25 = vsel %vm8426_vm15, %v8424_v17, %v8327_v51  ;;  %vm7406_vm7 = vweird.f32 %v13324_v55 }
 0x98c   : > { %8501 = vst.msk [vmem:[%s13222_s18 + $0x20] sm:$0xf] %vm8492_vm5, %v8484_v8  ;;  %9840 = vrcp.f32 %v13354_v24  ;;  %vm13370_vm8 = vcmp.eq.f32.partialorder %v7410_v35, 8.507059e+37  ;;  %v7395_v11 = vand.u32 2147483647, %v13354_v24  ;;  %v7413_v58 = vor.u32 1.1754944e-38, %v7412_v47 }
 0x98d   : > { %9842 = vrcp.f32 %v13364_v5  ;;  %vm7391_vm9 = vweird.f32 %v13354_v24  ;;  %v7397_v63 = vand.u32 2147483648, %v13354_v24  ;;  %v7455_v37 = vand.u32 2147483647, %v13364_v5 }
 0x98e   : > { %v8385_v10 = vpop.permute.xlu2 %8384  ;;  %9844 = vpow2.f32 %v9414_v23  ;;  %v7457_v62 = vand.u32 2147483648, %v13364_v5  ;;  %vm13385_vm11 = vcmp.eq.f32.partialorder %v7395_v11, 8.507059e+37  ;;  %vm7451_vm13 = vweird.f32 %v13364_v5 }
 0x98f   : > { %v8455_v50 = vsel %vm8443_vm1, %v8438_v6, %v8385_v10  ;;  %9846 = vpow2.f32 %v9413_v39  ;;  %v7398_v18 = vor.u32 1.1754944e-38, %v7397_v63  ;;  %vm13401_vm2 = vcmp.eq.f32.partialorder %v7455_v37, 8.507059e+37 }
 0x990   : > { %v8471_v2 = vmul.f32 %v8455_v50, %v7564_v54  ;;  %v9837_v45 = vpop.eup %9836  ;;  %v7458_v35 = vor.u32 1.1754944e-38, %v7457_v62  ;;  %v9576_v47 = vunpack.c.h.bf16 %v13190_v14 }
 0x991   : > { %v7402_v3 = vmul.f32 %v9837_v45, %v13324_v55  ;;  %v9839_v8 = vpop.eup %9838  ;;  %vm7407_vm10 = vweird.f32 %v9837_v45 }
 0x992   : > { %v8487_v49 = vpack.c.bf16 %v8471_v2, %v8471_v2  ;;  %v9841_v17 = vpop.eup %9840  ;;  %v13382_v54 = vadd.f32 1.0, %v9839_v8  ;;  %vm13391_vm12 = vmor %vm7406_vm7, %vm7407_vm10  ;;  %v8423_v8 = vsel %vm461_vm0, %v13272_v38, %v12402_v0  ;;  %v8416_v0 = vsel %vm461_vm0, %v13263_v41, %v12398_v59 }
 0x993   : > { %v7403_v12 = vsub.f32 1.0, %v7402_v3  ;;  %v7387_v9 = vmul.f32 %v9841_v17, %v13354_v24  ;;  %v9843_v50 = vpop.eup %9842  ;;  %vm7392_vm14 = vweird.f32 %v9841_v17  ;;  %v8419_v41 = vsel %vm461_vm0, %v13267_v56, %v12406_v44 }
 0x994   : > { %8504 = vst.msk [vmem:[%s13222_s18 + $0x2c] sm:$0xf] %vm8492_vm5, %v8487_v49  ;;  %9848 = vrcp.f32 %v13382_v54  ;;  %v9845_v2 = vpop.eup %9844  ;;  %v7447_v55 = vmul.f32 %v9843_v50, %v13364_v5  ;;  %vm7436_vm3 = vweird.f32 %v13382_v54  ;;  %v7440_v4 = vand.u32 2147483647, %v13382_v54  ;;  %vm13415_vm4 = vmor %vm7391_vm9, %vm7392_vm14 }
 0x995   : > { %v7404_v16 = vmul.f32 %v9837_v45, %v7403_v12  ;;  %v7388_v29 = vsub.f32 1.0, %v7387_v9  ;;  %v13409_v15 = vadd.f32 1.0, %v9845_v2  ;;  %vm7452_vm6 = vweird.f32 %v9843_v50  ;;  %v9847_v48 = vpop.eup %9846  ;;  %v9594_v9 = vld [vmem:[%s13178_s30 + $0x30] sm:$0xff]  }
 0x996   : > { %v8391_v40 = vpop.permute.xlu2 %8390  ;;  %v7448_v49 = vsub.f32 1.0, %v7447_v55  ;;  %vm13434_vm7 = vmor %vm7451_vm13, %vm7452_vm6  ;;  %vm13444_vm9 = vcmp.eq.f32.partialorder %v7440_v4, 8.507059e+37 }
 0x997   : > { %v8458_v61 = vsel %vm8443_vm1, %v8441_v25, %v8391_v40  ;;  %v7405_v13 = vadd.f32 %v9837_v45, %v7404_v16  ;;  %v7389_v34 = vmul.f32 %v9841_v17, %v7388_v29  ;;  %v7442_v25 = vand.u32 2147483648, %v13382_v54 }
 0x998   : > { %v8474_v21 = vmul.f32 %v8458_v61, %v7609_v30  ;;  %9850 = vrcp.f32 %v13409_v15  ;;  %v7449_v3 = vmul.f32 %v9843_v50, %v7448_v49  ;;  %v7500_v11 = vand.u32 2147483647, %v13409_v15 }
 0x999   : > { %v7409_v51 = vsel %vm13391_vm12, %v9837_v45, %v7405_v13  ;;  %v7390_v45 = vadd.f32 %v9841_v17, %v7389_v34  ;;  %v13425_v40 = vadd.f32 1.0, %v9847_v48  ;;  %v7502_v39 = vand.u32 2147483648, %v13409_v15 }
 0x99a   : > { %v8490_v10 = vpack.c.bf16 %v8474_v21, %v8474_v21  ;;  %v7414_v7 = vsel %vm13370_vm8, %v7413_v58, %v7409_v51  ;;  %v9849_v43 = vpop.eup %9848  ;;  %v7450_v12 = vadd.f32 %v9843_v50, %v7449_v3  ;;  %v7443_v16 = vor.u32 1.1754944e-38, %v7442_v25 }
 0x99b   : > { %v7394_v14 = vsel %vm13415_vm4, %v9841_v17, %v7390_v45  ;;  %v9416_v17 = vmul.f32 -1.442695, %v9576_v47  ;;  %vm7437_vm8 = vweird.f32 %v9849_v43  ;;  %9852 = vrcp.f32 %v13425_v40 }
 0x99c   : > { %8507 = vst.msk [vmem:[%s13222_s18 + $0x38] sm:$0xf] %vm8492_vm5, %v8490_v10  ;;  %v7399_v61 = vsel %vm13385_vm11, %v7398_v18, %v7394_v14  ;;  %v7454_v5 = vsel %vm13434_vm7, %v9843_v50, %v7450_v12  ;;  %vm7496_vm10 = vweird.f32 %v13409_v15  ;;  %vm13453_vm11 = vcmp.eq.f32.partialorder %v7500_v11, 8.507059e+37  ;;  %vm13461_vm12 = vmor %vm7436_vm3, %vm7437_vm8 }
 0x99d   : > { %v7459_v50 = vsel %vm13401_vm2, %v7458_v35, %v7454_v5  ;;  %v7503_v32 = vor.u32 1.1754944e-38, %v7502_v39  ;;  %9854 = vpow2.f32 %v9417_v42  ;;  %vm7481_vm13 = vweird.f32 %v13425_v40 }
 0x99e   : > { %v9851_v6 = vpop.eup %9850  ;;  %9856 = vpow2.f32 %v9416_v17  ;;  %v9584_v51 = vunpack.c.h.bf16 %v9594_v9  ;;  %v9583_v34 = vunpack.c.l.bf16 %v9594_v9  ;;  %v9588_v11 = vunpack.c.h.bf16 %v13229_v19 }
 0x99f   : > { %v8365_v23 = vpop.permute.xlu1 %8364  ;;  %v7492_v29 = vmul.f32 %v9851_v6, %v13409_v15  ;;  %vm7497_vm14 = vweird.f32 %v9851_v6 }
 0x9a0   : > { %v8445_v24 = vsel %vm8443_vm1, %v13330_v31, %v8365_v23  ;;  %v8363_v30 = vpop.permute.xlu0 %8362  ;;  %v7432_v31 = vmul.f32 %v9849_v43, %v13382_v54  ;;  %v9420_v49 = vmul.f32 -1.442695, %v9584_v51  ;;  %v9419_v45 = vmul.f32 -1.442695, %v9583_v34  ;;  %vm13480_vm2 = vmor %vm7496_vm10, %vm7497_vm14 }
 0x9a1   : > { %v8461_v58 = vmul.f32 %v8445_v24, %v7414_v7  ;;  %v8444_v63 = vsel %vm8443_vm1, %v13338_v33, %v8363_v30  ;;  %v7493_v35 = vsub.f32 1.0, %v7492_v29  ;;  %v9853_v47 = vpop.eup %9852 }
 0x9a2   : > { %v8460_v37 = vmul.f32 %v8444_v63, %v7399_v61  ;;  %v7433_v33 = vsub.f32 1.0, %v7432_v31  ;;  %vm7482_vm3 = vweird.f32 %v9853_v47  ;;  %9858 = vpow2.f32 %v9420_v49 }
 0x9a3   : > { %v8477_v21 = vpack.c.bf16 %v8461_v58, %v8461_v58  ;;  %v7494_v23 = vmul.f32 %v9851_v6, %v7493_v35  ;;  %v9855_v30 = vpop.eup %9854  ;;  %9860 = vpow2.f32 %v9419_v45  ;;  %v8434_v31 = vsel %vm8426_vm15, %v13295_v22, %v12988_v27  ;;  %vm13513_vm4 = vmor %vm7481_vm13, %vm7482_vm3  ;;  %v13882_v35 = vld [vmem:[#allocation11_spill] sm:$0xff] }
 0x9a4   : > { %v8476_v10 = vpack.c.bf16 %v8460_v37, %v8460_v37  ;;  %v7434_v46 = vmul.f32 %v9849_v43, %v7433_v33  ;;  %v9857_v58 = vpop.eup %9856  ;;  %v13489_v63 = vadd.f32 1.0, %v9855_v30  ;;  %v8433_v33 = vsel %vm8426_vm15, %v8416_v0, %v12966_v20 }
 0x9a5   : > { %8494 = vst.msk [vmem:[%s13222_s18 + $0x4] sm:$0xf] %vm8492_vm5, %v8477_v21  ;;  %v7495_v3 = vadd.f32 %v9851_v6, %v7494_v23  ;;  %v13499_v19 = vadd.f32 1.0, %v9857_v58  ;;  %v9422_v21 = vmul.f32 -1.442695, %v9588_v11 }
 0x9a6   : > { %8493 = vst.msk [vmem:[%s13222_s18] sm:$0xf] %vm8492_vm5, %v8476_v10  ;;  %v7435_v55 = vadd.f32 %v9849_v43, %v7434_v46  ;;  %9862 = vrcp.f32 %v13489_v63  ;;  %v7547_v29 = vand.u32 2147483648, %v13489_v63  ;;  %vm7541_vm7 = vweird.f32 %v13489_v63 }
 0x9a7   : > { %v8371_v2 = vpop.permute.xlu1 %8370  ;;  %v7499_v61 = vsel %vm13480_vm2, %v9851_v6, %v7495_v3  ;;  %9864 = vrcp.f32 %v13499_v19  ;;  %vm7526_vm10 = vweird.f32 %v13499_v19 }
 0x9a8   : > { %v8448_v36 = vsel %vm8443_vm1, %v13344_v57, %v8371_v2  ;;  %v8369_v54 = vpop.permute.xlu0 %8368  ;;  %v7439_v7 = vsel %vm13461_vm12, %v9849_v43, %v7435_v55  ;;  %v7485_v57 = vand.u32 2147483647, %v13425_v40  ;;  %v7487_v43 = vand.u32 2147483648, %v13425_v40  ;;  %v9859_v59 = vpop.eup %9858  ;;  %v13881_v55 = vld [vmem:[#allocation10_spill] sm:$0xff] }
 0x9a9   : > { %v8464_v4 = vmul.f32 %v8448_v36, %v7459_v50  ;;  %v8447_v28 = vsel %vm8443_vm1, %v13360_v1, %v8369_v54  ;;  %v7444_v48 = vsel %vm13444_vm9, %v7443_v16, %v7439_v7  ;;  %v7477_v1 = vmul.f32 %v9853_v47, %v13425_v40  ;;  %v13879_v16 = vld [vmem:[#allocation12_spill] sm:$0xff]  ;;  %v9861_v20 = vpop.eup %9860 }
 0x9aa   : > { %v8463_v42 = vmul.f32 %v8447_v28, %v7444_v48  ;;  %v7504_v39 = vsel %vm13453_vm11, %v7503_v32, %v7499_v61  ;;  %v7488_v37 = vor.u32 1.1754944e-38, %v7487_v43  ;;  %vm7486_vm6 = vcmp.eq.f32.partialorder %v7485_v57, 8.507059e+37  ;;  %v13880_v50 = vld [vmem:[#allocation8_spill] sm:$0xff] }
 0x9ab   : > { %v8480_v25 = vpack.c.bf16 %v8464_v4, %v8464_v4  ;;  %v7478_v15 = vsub.f32 1.0, %v7477_v1  ;;  %v8422_v40 = vsel %vm461_vm0, %v13283_v60, %v12411_v26  ;;  %v8437_v9 = vsel %vm8426_vm15, %v13299_v52, %v13879_v16 }
 0x9ac   : > { %v8479_v14 = vpack.c.bf16 %v8463_v42, %v8463_v42  ;;  %v13532_v18 = vadd.f32 1.0, %v9859_v59  ;;  %9866 = vpow2.f32 %v9422_v21  ;;  %v8436_v44 = vsel %vm8426_vm15, %v8419_v41, %v13880_v50  ;;  %v9863_v13 = vpop.eup %9862 }
 0x9ad   : > { %8497 = vst.msk [vmem:[%s13222_s18 + $0x10] sm:$0xf] %vm8492_vm5, %v8480_v25  ;;  %v7479_v17 = vmul.f32 %v9853_v47, %v7478_v15  ;;  %v7545_v26 = vand.u32 2147483647, %v13489_v63  ;;  %v13537_v60 = vadd.f32 1.0, %v9861_v20  ;;  %v9865_v2 = vpop.eup %9864  ;;  %v13546_v51 = vsel %vm8426_vm15, %v8423_v8, %v13881_v55  ;;  %v7641_v55 = vld [vmem:[#allocation4 + $0x78] sm:$0xff] }
 0x9ae   : > { %8496 = vst.msk [vmem:[%s13222_s18 + $0xc] sm:$0xf] %vm8492_vm5, %v8479_v14  ;;  %v7530_v32 = vand.u32 2147483647, %v13499_v19  ;;  %9868 = vrcp.f32 %v13532_v18  ;;  %v7537_v36 = vmul.f32 %v9863_v13, %v13489_v63  ;;  %v7532_v54 = vand.u32 2147483648, %v13499_v19 }
 0x9af   : > { %v8377_v12 = vpop.permute.xlu1 %8376  ;;  %v7480_v62 = vadd.f32 %v9853_v47, %v7479_v17  ;;  %9870 = vrcp.f32 %v13537_v60  ;;  %v13553_v34 = vsel %vm8426_vm15, %v8422_v40, %v13882_v35  ;;  %v7522_v28 = vmul.f32 %v9865_v2, %v13499_v19  ;;  %v13899_v35 = vld [vmem:[#allocation72_spill] sm:$0xff] }
 0x9b0   : > { %v8451_v27 = vsel %vm8443_vm1, %v8434_v31, %v8377_v12  ;;  %v8375_v38 = vpop.permute.xlu0 %8374  ;;  %v7538_v49 = vsub.f32 1.0, %v7537_v36  ;;  %vm7542_vm8 = vweird.f32 %v9863_v13  ;;  %vm13557_vm9 = vcmp.eq.f32.partialorder %v7545_v26, 8.507059e+37  ;;  %v8544_v31 = vld [vmem:[%s13222_s18 + $0x14] sm:$0xf] (%p9990_p6) }
 0x9b1   : > { %v8467_v5 = vmul.f32 %v8451_v27, %v7504_v39  ;;  %v8450_v6 = vsel %vm8443_vm1, %v8433_v33, %v8375_v38  ;;  %v7484_v46 = vsel %vm13513_vm4, %v9853_v47, %v7480_v62  ;;  %v7548_v57 = vor.u32 1.1754944e-38, %v7547_v29  ;;  %vm13574_vm14 = vmor %vm7541_vm7, %vm7542_vm8  ;;  %v13900_v47 = vld [vmem:[#allocation9_spill] sm:$0xff]  ;;  %8545 = vst [vmem:[%s8517_s24 + $0x28] sm:$0xf] (%p9990_p6), %v8544_v31 }
 0x9b2   : > { %v7489_v56 = vsel %vm7486_vm6, %v7488_v37, %v7484_v46  ;;  %v9867_v23 = vpop.eup %9866  ;;  %v7523_v45 = vsub.f32 1.0, %v7522_v28  ;;  %vm7527_vm11 = vweird.f32 %v9865_v2  ;;  %vm13564_vm12 = vcmp.eq.f32.partialorder %v7530_v32, 8.507059e+37 }
 0x9b3   : > { %v8483_v10 = vpack.c.bf16 %v8467_v5, %v8467_v5  ;;  %v8466_v52 = vmul.f32 %v8450_v6, %v7489_v56  ;;  %v7539_v42 = vmul.f32 %v9863_v13, %v7538_v49  ;;  %v7533_v24 = vor.u32 1.1754944e-38, %v7532_v54  ;;  %vm13583_vm2 = vmor %vm7526_vm10, %vm7527_vm11 }
 0x9b4   : > { %vm7586_vm13 = vweird.f32 %v13532_v18  ;;  %v13569_v1 = vadd.f32 1.0, %v9867_v23  ;;  %v9869_v43 = vpop.eup %9868  ;;  %v7524_v11 = vmul.f32 %v9865_v2, %v7523_v45  ;;  %v7590_v58 = vand.u32 2147483647, %v13532_v18 }
 0x9b5   : > { %8500 = vst.msk [vmem:[%s13222_s18 + $0x1c] sm:$0xf] %vm8492_vm5, %v8483_v10  ;;  %v8482_v4 = vpack.c.bf16 %v8466_v52, %v8466_v52  ;;  %v7592_v14 = vand.u32 2147483648, %v13532_v18  ;;  %v9871_v15 = vpop.eup %9870  ;;  %v7540_v8 = vadd.f32 %v9863_v13, %v7539_v42  ;;  %v7582_v63 = vmul.f32 %v9869_v43, %v13532_v18 }
 0x9b6   : > { %vm7571_vm3 = vweird.f32 %v13537_v60  ;;  %9872 = vrcp.f32 %v13569_v1  ;;  %v7525_v61 = vadd.f32 %v9865_v2, %v7524_v11  ;;  %v7567_v39 = vmul.f32 %v9871_v15, %v13537_v60 }
 0x9b7   : > { %v8383_v7 = vpop.permute.xlu1 %8382  ;;  %8499 = vst.msk [vmem:[%s13222_s18 + $0x18] sm:$0xf] %vm8492_vm5, %v8482_v4  ;;  %v7575_v17 = vand.u32 2147483647, %v13537_v60  ;;  %v7544_v19 = vsel %vm13574_vm14, %v9863_v13, %v7540_v8  ;;  %v7583_v21 = vsub.f32 1.0, %v7582_v63  ;;  %vm7587_vm4 = vweird.f32 %v9869_v43 }
 0x9b8   : > { %v8381_v48 = vpop.permute.xlu0 %8380  ;;  %v8454_v3 = vsel %vm8443_vm1, %v8437_v9, %v8383_v7  ;;  %v7577_v0 = vand.u32 2147483648, %v13537_v60  ;;  %v7549_v27 = vsel %vm13557_vm9, %v7548_v57, %v7544_v19  ;;  %v7529_v38 = vsel %vm13583_vm2, %v9865_v2, %v7525_v61  ;;  %vm13608_vm8 = vmor %vm7586_vm13, %vm7587_vm4  ;;  %v8542_v8 = vld [vmem:[%s13222_s18 + $0x10] sm:$0xf] (%p9990_p6)  ;;  %v8556_v19 = vld [vmem:[%s13222_s18 + $0x2c] sm:$0xf] (%p9990_p6) }
 0x9b9   : > { %v8453_v12 = vsel %vm8443_vm1, %v8436_v44, %v8381_v48  ;;  %v7568_v22 = vsub.f32 1.0, %v7567_v39  ;;  %vm7572_vm6 = vweird.f32 %v9871_v15  ;;  %v8470_v37 = vmul.f32 %v8454_v3, %v7549_v27  ;;  %8543 = vst [vmem:[%s8517_s24 + $0x20] sm:$0xf] (%p9990_p6), %v8542_v8  ;;  %v8562_v27 = vld [vmem:[%s13222_s18 + $0x38] sm:$0xf] (%p9990_p6) }
 0x9ba   : > { %v7534_v33 = vsel %vm13564_vm12, %v7533_v24, %v7529_v38  ;;  %v7584_v62 = vmul.f32 %v9869_v43, %v7583_v21  ;;  %vm13602_vm7 = vcmp.eq.f32.partialorder %v7590_v58, 8.507059e+37  ;;  %v7593_v9 = vor.u32 1.1754944e-38, %v7592_v14  ;;  %vm13619_vm10 = vmor %vm7571_vm3, %vm7572_vm6  ;;  %v8538_v14 = vld [vmem:[%s13222_s18 + $0x8] sm:$0xf] (%p9990_p6)  ;;  %8557 = vst [vmem:[%s8517_s24 + $0x58] sm:$0xf] (%p9990_p6), %v8556_v19 }
 0x9bb   : > { %v8469_v40 = vmul.f32 %v8453_v12, %v7534_v33  ;;  %v7569_v6 = vmul.f32 %v9871_v15, %v7568_v22  ;;  %vm13612_vm9 = vcmp.eq.f32.partialorder %v7575_v17, 8.507059e+37  ;;  %v8486_v46 = vpack.c.bf16 %v8470_v37, %v8470_v37  ;;  %8539 = vst [vmem:[%s8517_s24 + $0x10] sm:$0xf] (%p9990_p6), %v8538_v14  ;;  %v8550_v12 = vld [vmem:[%s13222_s18 + $0x20] sm:$0xf] (%p9990_p6) }
 0x9bc   : > { %v9873_v10 = vpop.eup %9872  ;;  %v7585_v50 = vadd.f32 %v9869_v43, %v7584_v62  ;;  %v7578_v18 = vor.u32 1.1754944e-38, %v7577_v0  ;;  %vm7616_vm11 = vweird.f32 %v13569_v1  ;;  %v7620_v32 = vand.u32 2147483647, %v13569_v1  ;;  %v8548_v61 = vld [vmem:[%s13222_s18 + $0x1c] sm:$0xf] (%p9990_p6) }
 0x9bd   : > { %v8485_v56 = vpack.c.bf16 %v8469_v40, %v8469_v40  ;;  %v7570_v13 = vadd.f32 %v9871_v15, %v7569_v6  ;;  %v7612_v52 = vmul.f32 %v9873_v10, %v13569_v1  ;;  %8503 = vst.msk [vmem:[%s13222_s18 + $0x28] sm:$0xf] %vm8492_vm5, %v8486_v46  ;;  %v7622_v2 = vand.u32 2147483648, %v13569_v1  ;;  %v8536_v1 = vld [vmem:[%s13222_s18 + $0x4] sm:$0xf] (%p9990_p6) }
 0x9be   : > { %v7589_v29 = vsel %vm13608_vm8, %v9869_v43, %v7585_v50  ;;  %vm7617_vm12 = vweird.f32 %v9873_v10  ;;  %v7773_v4 = vmul.f32 %v13899_v35, %v7641_v55  ;;  %vm7621_vm14 = vcmp.eq.f32.partialorder %v7620_v32, 8.507059e+37  ;;  %8537 = vst [vmem:[%s8517_s24 + $0x8] sm:$0xf] (%p9990_p6), %v8536_v1  ;;  %v8546_v63 = vld [vmem:[%s13222_s18 + $0x18] sm:$0xf] (%p9990_p6) }
 0x9bf   : > { %v8389_v5 = vpop.permute.xlu1 %8388  ;;  %8502 = vst.msk [vmem:[%s13222_s18 + $0x24] sm:$0xf] %vm8492_vm5, %v8485_v56  ;;  %v7574_v36 = vsel %vm13619_vm10, %v9871_v15, %v7570_v13  ;;  %v7613_v54 = vsub.f32 1.0, %v7612_v52  ;;  %vm7618_vm13 = vmor %vm7616_vm11, %vm7617_vm12  ;;  %v7623_v45 = vor.u32 1.1754944e-38, %v7622_v2  ;;  %v8540_v15 = vld [vmem:[%s13222_s18 + $0xc] sm:$0xf] (%p9990_p6) }
 0x9c0   : > { %v8387_v41 = vpop.permute.xlu0 %8386  ;;  %v8457_v26 = vsel %vm8443_vm1, %v13546_v51, %v8389_v5  ;;  %v7594_v51 = vsel %vm13602_vm7, %v7593_v9, %v7589_v29  ;;  %v7579_v7 = vsel %vm13612_vm9, %v7578_v18, %v7574_v36  ;;  %v8425_v48 = vsel %vm461_vm0, %v7773_v4, %v13900_v47  ;;  %8541 = vst [vmem:[%s8517_s24 + $0x18] sm:$0xf] (%p9990_p6), %v8540_v15 }
 0x9c1   : > { %v8456_v60 = vsel %vm8443_vm1, %v13553_v34, %v8387_v41  ;;  %v8473_v34 = vmul.f32 %v8457_v26, %v7594_v51  ;;  %v7614_v49 = vmul.f32 %v9873_v10, %v7613_v54  ;;  %v8442_v25 = vsel %vm8426_vm15, %v8425_v48, %v13192_v53  ;;  %v8534_v53 = vld [vmem:[%s13222_s18] sm:$0xf] (%p9990_p6)  ;;  %8547 = vst [vmem:[%s8517_s24 + $0x30] sm:$0xf] (%p9990_p6), %v8546_v63 }
 0x9c2   : > { %v8472_v28 = vmul.f32 %v8456_v60, %v7579_v7  ;;  %8535 = vst [vmem:[%s8517_s24] sm:$0xf] (%p9990_p6), %v8534_v53 }
 0x9c3   : > { %v8489_v23 = vpack.c.bf16 %v8473_v34, %v8473_v34  ;;  %v7615_v24 = vadd.f32 %v9873_v10, %v7614_v49  ;;  %8549 = vst [vmem:[%s8517_s24 + $0x38] sm:$0xf] (%p9990_p6), %v8548_v61 }
 0x9c4   : > { %v8488_v42 = vpack.c.bf16 %v8472_v28, %v8472_v28  ;;  %v8554_v17 = vld [vmem:[%s13222_s18 + $0x28] sm:$0xf] (%p9990_p6)  ;;  %8551 = vst [vmem:[%s8517_s24 + $0x40] sm:$0xf] (%p9990_p6), %v8550_v12 }
 0x9c5   : > { %8506 = vst.msk [vmem:[%s13222_s18 + $0x34] sm:$0xf] %vm8492_vm5, %v8489_v23  ;;  %v7619_v30 = vsel %vm7618_vm13, %v9873_v10, %v7615_v24 }
 0x9c6   : > { %8505 = vst.msk [vmem:[%s13222_s18 + $0x30] sm:$0xf] %vm8492_vm5, %v8488_v42  ;;  %v7624_v3 = vsel %vm7621_vm14, %v7623_v45, %v7619_v30  ;;  %v8552_v39 = vld [vmem:[%s13222_s18 + $0x24] sm:$0xf] (%p9990_p6) }
 0x9c7   : > { %8553 = vst [vmem:[%s8517_s24 + $0x48] sm:$0xf] (%p9990_p6), %v8552_v39 }
 0x9c8   : > { %v8393_v57 = vpop.permute.xlu0 %8392  ;;  %8555 = vst [vmem:[%s8517_s24 + $0x50] sm:$0xf] (%p9990_p6), %v8554_v17 }
 0x9c9   : > { %v8459_v43 = vsel %vm8443_vm1, %v8442_v25, %v8393_v57  ;;  %8563 = vst [vmem:[%s8517_s24 + $0x70] sm:$0xf] (%p9990_p6), %v8562_v27 }
 0x9ca   : > { %v8475_v11 = vmul.f32 %v8459_v43, %v7624_v3  ;;  %8515 = sbr.rel (!%p9990_p6) target bundleno = 2519 (0x9d7), region = 93 }
 0x9cc   : > { %v8491_v58 = vpack.c.bf16 %v8475_v11, %v8475_v11  ;;  %v8560_v0 = vld [vmem:[%s13222_s18 + $0x34] sm:$0xf] (%p9990_p6) }
 0x9cd   : > { %v8558_v21 = vld [vmem:[%s13222_s18 + $0x30] sm:$0xf] (%p9990_p6)  ;;  %8561 = vst [vmem:[%s8517_s24 + $0x68] sm:$0xf] (%p9990_p6), %v8560_v0 }
 0x9ce   : > { %8508 = vst.msk [vmem:[%s13222_s18 + $0x3c] sm:$0xf] %vm8492_vm5, %v8491_v58 }
 0x9cf   : > { %8559 = vst [vmem:[%s8517_s24 + $0x60] sm:$0xf] %v8558_v21 }
 0x9d5   : > { %v8564_v38 = vld [vmem:[%s13222_s18 + $0x3c] sm:$0xf] }
 0x9d6   : > { %8565 = vst [vmem:[%s8517_s24 + $0x78] sm:$0xf] %v8564_v38 }
 0x9d7 PF: > { %s15_s22 = sadd.s32 1, %s9912_s22   ;;  %s13901_s18 = smov %s9900_s19 }
 0x9d8   : > { %p12_p12 = scmp.ge.s32.totalorder %s15_s22, 4   ;;  %s13902_s19 = smov %s9995_s28 }
 0x9d9   : > { %s13903_s20 = smov %s9908_s21  ;;  %s13904_s21 = smov %s13906_s23 }
 0x9da   :  { %14 = sbr.rel (!%p12_p12) target bundleno = 3 (0x3), region = 189 }

</bundles_post_ra>
